<compile_context>
chip_gen: v7x
topology: tpu7x:2x2x1
jax: 0.10.0
libtpu: 0.0.40
codegen_flags: <defaults>
</compile_context>

<pallas_src>
import jax
import jax.numpy as jnp
from jax.experimental import pallas as pl
from jax.experimental.pallas import tpu as pltpu

HIDDEN = 128            # nn.LSTM hidden_size
NUM_LAYERS = 3          # nn.LSTM num_layers
LINEAR1 = 16            # linear1 out_features
OUTPUT_DIMENSION = 4    # linear2 out_features (module-level global in the spec)
TB = 8                  # batch rows per grid step (sublane-friendly)


def _sigmoid(x):
    # Explicit formulation: exp goes to the EUP, the rest is cheap VPU work.
    return 1.0 / (1.0 + jnp.exp(-x))


def _lstm_cell(gates, c_prev):
    """gates: (TB, 4H) pre-activations in PyTorch order (i, f, g, o)."""
    H = HIDDEN
    i = _sigmoid(gates[:, 0 * H:1 * H])
    f = _sigmoid(gates[:, 1 * H:2 * H])
    g = jnp.tanh(gates[:, 2 * H:3 * H])
    o = _sigmoid(gates[:, 3 * H:4 * H])
    c = f * c_prev + i * g
    h = o * jnp.tanh(c)
    return h, c


def _lstm_head_kernel(x_ref,
                      wih0_ref, whh0_ref, bg0_ref,
                      wih1_ref, whh1_ref, bg1_ref,
                      wih2_ref, whh2_ref, bg2_ref,
                      w1_ref, b1_ref, w2_ref, b2_ref,
                      out_ref):
    # x_ref  : (T, TB, D) time-major block for TB batch rows
    # wihL   : (Din, 4H)  input->gates weight (pre-transposed)
    # whhL   : (H, 4H)    hidden->gates weight (pre-transposed)
    # bgL    : (1, 4H)    combined bias (b_ih + b_hh)
    # w1/b1  : (H, 16) / (1, 16)      head linear1 (pre-transposed)
    # w2/b2  : (16, OUT) / (1, OUT)   head linear2 (pre-transposed)
    # out_ref: (TB, OUT)
    T = x_ref.shape[0]
    TBk = x_ref.shape[1]
    H = HIDDEN

    # Hoist weight loads out of the time loop (read once from VMEM).
    wih0, whh0, bg0 = wih0_ref[...], whh0_ref[...], bg0_ref[...]
    wih1, whh1, bg1 = wih1_ref[...], whh1_ref[...], bg1_ref[...]
    wih2, whh2, bg2 = wih2_ref[...], whh2_ref[...], bg2_ref[...]

    zeros = jnp.zeros((TBk, H), jnp.float32)
    h0, c0 = zeros, zeros
    h1, c1 = zeros, zeros
    h2, c2 = zeros, zeros

    # Static unroll over the sequence; all three stacked layers advance
    # together per timestep.  Dropout between layers is identity at inference.
    for t in range(T):
        xt = x_ref[t].astype(jnp.float32)          # (TB, D), tile-aligned view

        g0 = (jnp.dot(xt, wih0, preferred_element_type=jnp.float32) + bg0 +
              jnp.dot(h0, whh0, preferred_element_type=jnp.float32))
        h0, c0 = _lstm_cell(g0, c0)

        g1 = (jnp.dot(h0, wih1, preferred_element_type=jnp.float32) + bg1 +
              jnp.dot(h1, whh1, preferred_element_type=jnp.float32))
        h1, c1 = _lstm_cell(g1, c1)

        g2 = (jnp.dot(h1, wih2, preferred_element_type=jnp.float32) + bg2 +
              jnp.dot(h2, whh2, preferred_element_type=jnp.float32))
        h2, c2 = _lstm_cell(g2, c2)

    # Head on the last-timestep hidden state of the top layer.
    z = jnp.dot(h2, w1_ref[...], preferred_element_type=jnp.float32) + b1_ref[...]
    z = jnp.where(z >= 0, z, 0.01 * z)             # LeakyReLU (slope 0.01)
    y = jnp.dot(z, w2_ref[...], preferred_element_type=jnp.float32) + b2_ref[...]
    out_ref[...] = y.astype(out_ref.dtype)


def lstm_forward(x, params, tgt=None, predict_days=0):
    """x: (B, T, D) f32, batch_first like the PyTorch module.
    Returns (B, OUTPUT_DIMENSION), or (B, 1, OUTPUT_DIMENSION) if predict_days>0.
    `tgt` is accepted for signature parity with the PyTorch forward; unused."""
    del tgt
    B, T, D = x.shape
    H = HIDDEN

    # Pad the batch up to a sublane multiple so every block is (8, ...) dense.
    B_pad = ((B + TB - 1) // TB) * TB
    if B_pad != B:
        x = jnp.pad(x, ((0, B_pad - B), (0, 0), (0, 0)))
    x_tm = jnp.transpose(x, (1, 0, 2))             # (T, B_pad, D), time-major

    ins = [x_tm]
    in_specs = [pl.BlockSpec((T, TB, D), lambda b: (0, b, 0))]
    for l in range(NUM_LAYERS):
        din = D if l == 0 else H
        ins += [
            params[f"w_ih_{l}"].T,                                   # (din, 4H)
            params[f"w_hh_{l}"].T,                                   # (H, 4H)
            (params[f"b_ih_{l}"] + params[f"b_hh_{l}"]).reshape(1, 4 * H),
        ]
        in_specs += [
            pl.BlockSpec((din, 4 * H), lambda b: (0, 0)),
            pl.BlockSpec((H, 4 * H), lambda b: (0, 0)),
            pl.BlockSpec((1, 4 * H), lambda b: (0, 0)),
        ]
    ins += [
        params["w1"].T,                            # (H, 16)
        params["b1"].reshape(1, LINEAR1),
        params["w2"].T,                            # (16, OUT)
        params["b2"].reshape(1, OUTPUT_DIMENSION),
    ]
    in_specs += [
        pl.BlockSpec((H, LINEAR1), lambda b: (0, 0)),
        pl.BlockSpec((1, LINEAR1), lambda b: (0, 0)),
        pl.BlockSpec((LINEAR1, OUTPUT_DIMENSION), lambda b: (0, 0)),
        pl.BlockSpec((1, OUTPUT_DIMENSION), lambda b: (0, 0)),
    ]

    out = pl.pallas_call(
        _lstm_head_kernel,
        out_shape=jax.ShapeDtypeStruct((B_pad, OUTPUT_DIMENSION), x.dtype),
        grid_spec=pltpu.PrefetchScalarGridSpec(
            num_scalar_prefetch=0,
            grid=(B_pad // TB,),
            in_specs=in_specs,
            out_specs=pl.BlockSpec((TB, OUTPUT_DIMENSION), lambda b: (b, 0)),
        ),
        compiler_params=pltpu.CompilerParams(
            dimension_semantics=("parallel",)),
    )(*ins)

    out = out[:B]
    if predict_days > 0:
        out = out[:, None, :]
    return out


def lstm_reference(x, params):
    """Pure-JAX reference mirroring the PyTorch module (eval mode)."""
    B, T, D = x.shape
    H = HIDDEN
    seq = x
    for l in range(NUM_LAYERS):
        wih, whh = params[f"w_ih_{l}"], params[f"w_hh_{l}"]
        b = params[f"b_ih_{l}"] + params[f"b_hh_{l}"]
        h = jnp.zeros((B, H), jnp.float32)
        c = jnp.zeros((B, H), jnp.float32)
        outs = []
        for t in range(T):
            gates = seq[:, t, :] @ wih.T + h @ whh.T + b
            h, c = _lstm_cell(gates, c)
            outs.append(h)
        seq = jnp.stack(outs, axis=1)
        # TODO(synk): nn.LSTM dropout=0.5 between layers is training-only;
        # eval/inference forward applies no dropout, so nothing to emulate.
    last = seq[:, -1, :]
    z = last @ params["w1"].T + params["b1"]
    z = jnp.where(z >= 0, z, 0.01 * z)
    return z @ params["w2"].T + params["b2"]


if __name__ == "__main__":
    B, T, D = 2, 8, 32                       # batch=2, seq=8, dimension=32
    key = jax.random.PRNGKey(0)
    keys = iter(jax.random.split(key, 17))

    params = {}
    lstm_bound = 1.0 / (HIDDEN ** 0.5)
    for l in range(NUM_LAYERS):
        din = D if l == 0 else HIDDEN
        params[f"w_ih_{l}"] = jax.random.uniform(
            next(keys), (4 * HIDDEN, din), jnp.float32, -lstm_bound, lstm_bound)
        params[f"w_hh_{l}"] = jax.random.uniform(
            next(keys), (4 * HIDDEN, HIDDEN), jnp.float32, -lstm_bound, lstm_bound)
        params[f"b_ih_{l}"] = jax.random.uniform(
            next(keys), (4 * HIDDEN,), jnp.float32, -lstm_bound, lstm_bound)
        params[f"b_hh_{l}"] = jax.random.uniform(
            next(keys), (4 * HIDDEN,), jnp.float32, -lstm_bound, lstm_bound)
    l1_bound = 1.0 / (HIDDEN ** 0.5)
    params["w1"] = jax.random.uniform(
        next(keys), (LINEAR1, HIDDEN), jnp.float32, -l1_bound, l1_bound)
    params["b1"] = jax.random.uniform(
        next(keys), (LINEAR1,), jnp.float32, -l1_bound, l1_bound)
    l2_bound = 1.0 / (LINEAR1 ** 0.5)
    params["w2"] = jax.random.uniform(
        next(keys), (OUTPUT_DIMENSION, LINEAR1), jnp.float32, -l2_bound, l2_bound)
    params["b2"] = jax.random.uniform(
        next(keys), (OUTPUT_DIMENSION,), jnp.float32, -l2_bound, l2_bound)

    x = jax.random.normal(next(keys), (B, T, D), jnp.float32)

    out = lstm_forward(x, params, tgt=None, predict_days=0)
    jax.block_until_ready(out)

    ref = lstm_reference(x, params)
    assert out.shape == (B, OUTPUT_DIMENSION), out.shape
    max_err = float(jnp.max(jnp.abs(out - ref)))
    # Tolerance leaves headroom for possible differences in MXU f32 pass
    # strategy between Mosaic's matmul lowering and XLA's reference dots.
    assert jnp.allclose(out, ref, atol=2e-2, rtol=2e-2), f"max err {max_err}"
    print("KERNEL_OK")
</pallas_src>

<mosaic_0001>
module attributes {stable_mosaic.version = 11 : i64} {
  func.func @_lstm_head_kernel(%arg0: i32, %arg1: memref<8x8x32xf32, #tpu.memory_space<vmem>>, %arg2: memref<32x512xf32, #tpu.memory_space<vmem>>, %arg3: memref<128x512xf32, #tpu.memory_space<vmem>>, %arg4: memref<1x512xf32, #tpu.memory_space<vmem>>, %arg5: memref<128x512xf32, #tpu.memory_space<vmem>>, %arg6: memref<128x512xf32, #tpu.memory_space<vmem>>, %arg7: memref<1x512xf32, #tpu.memory_space<vmem>>, %arg8: memref<128x512xf32, #tpu.memory_space<vmem>>, %arg9: memref<128x512xf32, #tpu.memory_space<vmem>>, %arg10: memref<1x512xf32, #tpu.memory_space<vmem>>, %arg11: memref<128x16xf32, #tpu.memory_space<vmem>>, %arg12: memref<1x16xf32, #tpu.memory_space<vmem>>, %arg13: memref<16x4xf32, #tpu.memory_space<vmem>>, %arg14: memref<1x4xf32, #tpu.memory_space<vmem>>, %arg15: memref<8x4xf32, #tpu.memory_space<vmem>>) attributes {dimension_semantics = [#tpu.dimension_semantics<parallel>], iteration_bounds = array<i64: 1>, scalar_prefetch = 0 : i64, scratch_operands = 0 : i64, tpu.core_type = #tpu.core_type<tc>, window_params = [{transform_indices = @transform_0, window_bounds = array<i64: 8, 8, 32>}, {pipeline_mode = #tpu.pipeline_mode<synchronous>, transform_indices = @transform_1, window_bounds = array<i64: 32, 512>}, {pipeline_mode = #tpu.pipeline_mode<synchronous>, transform_indices = @transform_2, window_bounds = array<i64: 128, 512>}, {pipeline_mode = #tpu.pipeline_mode<synchronous>, transform_indices = @transform_3, window_bounds = array<i64: 1, 512>}, {pipeline_mode = #tpu.pipeline_mode<synchronous>, transform_indices = @transform_4, window_bounds = array<i64: 128, 512>}, {pipeline_mode = #tpu.pipeline_mode<synchronous>, transform_indices = @transform_5, window_bounds = array<i64: 128, 512>}, {pipeline_mode = #tpu.pipeline_mode<synchronous>, transform_indices = @transform_6, window_bounds = array<i64: 1, 512>}, {pipeline_mode = #tpu.pipeline_mode<synchronous>, transform_indices = @transform_7, window_bounds = array<i64: 128, 512>}, {pipeline_mode = #tpu.pipeline_mode<synchronous>, transform_indices = @transform_8, window_bounds = array<i64: 128, 512>}, {pipeline_mode = #tpu.pipeline_mode<synchronous>, transform_indices = @transform_9, window_bounds = array<i64: 1, 512>}, {pipeline_mode = #tpu.pipeline_mode<synchronous>, transform_indices = @transform_10, window_bounds = array<i64: 128, 16>}, {pipeline_mode = #tpu.pipeline_mode<synchronous>, transform_indices = @transform_11, window_bounds = array<i64: 1, 16>}, {pipeline_mode = #tpu.pipeline_mode<synchronous>, transform_indices = @transform_12, window_bounds = array<i64: 16, 4>}, {pipeline_mode = #tpu.pipeline_mode<synchronous>, transform_indices = @transform_13, window_bounds = array<i64: 1, 4>}, {transform_indices = @transform_14, window_bounds = array<i64: 8, 4>}]} {
    %c0 = arith.constant 0 : index
    %c0_0 = arith.constant 0 : index
    %0 = vector.load %arg2[%c0, %c0_0] : memref<32x512xf32, #tpu.memory_space<vmem>>, vector<32x512xf32>
    %c0_1 = arith.constant 0 : index
    %c0_2 = arith.constant 0 : index
    %1 = vector.load %arg3[%c0_1, %c0_2] : memref<128x512xf32, #tpu.memory_space<vmem>>, vector<128x512xf32>
    %c0_3 = arith.constant 0 : index
    %c0_4 = arith.constant 0 : index
    %2 = vector.load %arg4[%c0_3, %c0_4] : memref<1x512xf32, #tpu.memory_space<vmem>>, vector<1x512xf32>
    %c0_5 = arith.constant 0 : index
    %c0_6 = arith.constant 0 : index
    %3 = vector.load %arg5[%c0_5, %c0_6] : memref<128x512xf32, #tpu.memory_space<vmem>>, vector<128x512xf32>
    %c0_7 = arith.constant 0 : index
    %c0_8 = arith.constant 0 : index
    %4 = vector.load %arg6[%c0_7, %c0_8] : memref<128x512xf32, #tpu.memory_space<vmem>>, vector<128x512xf32>
    %c0_9 = arith.constant 0 : index
    %c0_10 = arith.constant 0 : index
    %5 = vector.load %arg7[%c0_9, %c0_10] : memref<1x512xf32, #tpu.memory_space<vmem>>, vector<1x512xf32>
    %c0_11 = arith.constant 0 : index
    %c0_12 = arith.constant 0 : index
    %6 = vector.load %arg8[%c0_11, %c0_12] : memref<128x512xf32, #tpu.memory_space<vmem>>, vector<128x512xf32>
    %c0_13 = arith.constant 0 : index
    %c0_14 = arith.constant 0 : index
    %7 = vector.load %arg9[%c0_13, %c0_14] : memref<128x512xf32, #tpu.memory_space<vmem>>, vector<128x512xf32>
    %c0_15 = arith.constant 0 : index
    %c0_16 = arith.constant 0 : index
    %8 = vector.load %arg10[%c0_15, %c0_16] : memref<1x512xf32, #tpu.memory_space<vmem>>, vector<1x512xf32>
    %cst = arith.constant 0.000000e+00 : f32
    %9 = vector.broadcast %cst : f32 to vector<8x128xf32>
    %c0_17 = arith.constant 0 : index
    %c0_18 = arith.constant 0 : index
    %c0_19 = arith.constant 0 : index
    %10 = vector.load %arg1[%c0_17, %c0_18, %c0_19] : memref<8x8x32xf32, #tpu.memory_space<vmem>>, vector<1x8x32xf32>
    %11 = vector.shape_cast %10 : vector<1x8x32xf32> to vector<8x32xf32>
    %cst_20 = arith.constant dense<0.000000e+00> : vector<8x512xf32>
    %12 = tpu.matmul %11, %0, %cst_20 {dimension_numbers = #tpu.dot_dimension_numbers<[1], [0], [0], [1], [0, 0, 1, 1], [], []>} : vector<8x32xf32>, vector<32x512xf32>, vector<8x512xf32> -> vector<8x512xf32>
    %13 = vector.broadcast %2 : vector<1x512xf32> to vector<8x512xf32>
    %14 = arith.addf %12, %13 : vector<8x512xf32>
    %cst_21 = arith.constant dense<0.000000e+00> : vector<8x512xf32>
    %15 = tpu.matmul %9, %1, %cst_21 {dimension_numbers = #tpu.dot_dimension_numbers<[1], [0], [0], [1], [0, 0, 1, 1], [], []>} : vector<8x128xf32>, vector<128x512xf32>, vector<8x512xf32> -> vector<8x512xf32>
    %16 = arith.addf %14, %15 : vector<8x512xf32>
    %17 = vector.extract_strided_slice %16 {offsets = [0, 0], sizes = [8, 128], strides = [1, 1]} : vector<8x512xf32> to vector<8x128xf32>
    %cst_22 = arith.constant 0.000000e+00 : f32
    %18 = vector.broadcast %cst_22 : f32 to vector<8x128xf32>
    %19 = arith.subf %18, %17 : vector<8x128xf32>
    %20 = math.exp %19 : vector<8x128xf32>
    %cst_23 = arith.constant 1.000000e+00 : f32
    %21 = vector.broadcast %cst_23 : f32 to vector<8x128xf32>
    %22 = arith.addf %21, %20 : vector<8x128xf32>
    %cst_24 = arith.constant 1.000000e+00 : f32
    %23 = vector.broadcast %cst_24 : f32 to vector<8x128xf32>
    %24 = arith.divf %23, %22 : vector<8x128xf32>
    %25 = vector.extract_strided_slice %16 {offsets = [0, 128], sizes = [8, 128], strides = [1, 1]} : vector<8x512xf32> to vector<8x128xf32>
    %cst_25 = arith.constant 0.000000e+00 : f32
    %26 = vector.broadcast %cst_25 : f32 to vector<8x128xf32>
    %27 = arith.subf %26, %25 : vector<8x128xf32>
    %28 = math.exp %27 : vector<8x128xf32>
    %cst_26 = arith.constant 1.000000e+00 : f32
    %29 = vector.broadcast %cst_26 : f32 to vector<8x128xf32>
    %30 = arith.addf %29, %28 : vector<8x128xf32>
    %cst_27 = arith.constant 1.000000e+00 : f32
    %31 = vector.broadcast %cst_27 : f32 to vector<8x128xf32>
    %32 = arith.divf %31, %30 : vector<8x128xf32>
    %33 = vector.extract_strided_slice %16 {offsets = [0, 256], sizes = [8, 128], strides = [1, 1]} : vector<8x512xf32> to vector<8x128xf32>
    %34 = math.tanh %33 : vector<8x128xf32>
    %35 = vector.extract_strided_slice %16 {offsets = [0, 384], sizes = [8, 128], strides = [1, 1]} : vector<8x512xf32> to vector<8x128xf32>
    %cst_28 = arith.constant 0.000000e+00 : f32
    %36 = vector.broadcast %cst_28 : f32 to vector<8x128xf32>
    %37 = arith.subf %36, %35 : vector<8x128xf32>
    %38 = math.exp %37 : vector<8x128xf32>
    %cst_29 = arith.constant 1.000000e+00 : f32
    %39 = vector.broadcast %cst_29 : f32 to vector<8x128xf32>
    %40 = arith.addf %39, %38 : vector<8x128xf32>
    %cst_30 = arith.constant 1.000000e+00 : f32
    %41 = vector.broadcast %cst_30 : f32 to vector<8x128xf32>
    %42 = arith.divf %41, %40 : vector<8x128xf32>
    %43 = arith.mulf %32, %9 : vector<8x128xf32>
    %44 = arith.mulf %24, %34 : vector<8x128xf32>
    %45 = arith.addf %43, %44 : vector<8x128xf32>
    %46 = math.tanh %45 : vector<8x128xf32>
    %47 = arith.mulf %42, %46 : vector<8x128xf32>
    %cst_31 = arith.constant dense<0.000000e+00> : vector<8x512xf32>
    %48 = tpu.matmul %47, %3, %cst_31 {dimension_numbers = #tpu.dot_dimension_numbers<[1], [0], [0], [1], [0, 0, 1, 1], [], []>} : vector<8x128xf32>, vector<128x512xf32>, vector<8x512xf32> -> vector<8x512xf32>
    %49 = vector.broadcast %5 : vector<1x512xf32> to vector<8x512xf32>
    %50 = arith.addf %48, %49 : vector<8x512xf32>
    %cst_32 = arith.constant dense<0.000000e+00> : vector<8x512xf32>
    %51 = tpu.matmul %9, %4, %cst_32 {dimension_numbers = #tpu.dot_dimension_numbers<[1], [0], [0], [1], [0, 0, 1, 1], [], []>} : vector<8x128xf32>, vector<128x512xf32>, vector<8x512xf32> -> vector<8x512xf32>
    %52 = arith.addf %50, %51 : vector<8x512xf32>
    %53 = vector.extract_strided_slice %52 {offsets = [0, 0], sizes = [8, 128], strides = [1, 1]} : vector<8x512xf32> to vector<8x128xf32>
    %cst_33 = arith.constant 0.000000e+00 : f32
    %54 = vector.broadcast %cst_33 : f32 to vector<8x128xf32>
    %55 = arith.subf %54, %53 : vector<8x128xf32>
    %56 = math.exp %55 : vector<8x128xf32>
    %cst_34 = arith.constant 1.000000e+00 : f32
    %57 = vector.broadcast %cst_34 : f32 to vector<8x128xf32>
    %58 = arith.addf %57, %56 : vector<8x128xf32>
    %cst_35 = arith.constant 1.000000e+00 : f32
    %59 = vector.broadcast %cst_35 : f32 to vector<8x128xf32>
    %60 = arith.divf %59, %58 : vector<8x128xf32>
    %61 = vector.extract_strided_slice %52 {offsets = [0, 128], sizes = [8, 128], strides = [1, 1]} : vector<8x512xf32> to vector<8x128xf32>
    %cst_36 = arith.constant 0.000000e+00 : f32
    %62 = vector.broadcast %cst_36 : f32 to vector<8x128xf32>
    %63 = arith.subf %62, %61 : vector<8x128xf32>
    %64 = math.exp %63 : vector<8x128xf32>
    %cst_37 = arith.constant 1.000000e+00 : f32
    %65 = vector.broadcast %cst_37 : f32 to vector<8x128xf32>
    %66 = arith.addf %65, %64 : vector<8x128xf32>
    %cst_38 = arith.constant 1.000000e+00 : f32
    %67 = vector.broadcast %cst_38 : f32 to vector<8x128xf32>
    %68 = arith.divf %67, %66 : vector<8x128xf32>
    %69 = vector.extract_strided_slice %52 {offsets = [0, 256], sizes = [8, 128], strides = [1, 1]} : vector<8x512xf32> to vector<8x128xf32>
    %70 = math.tanh %69 : vector<8x128xf32>
    %71 = vector.extract_strided_slice %52 {offsets = [0, 384], sizes = [8, 128], strides = [1, 1]} : vector<8x512xf32> to vector<8x128xf32>
    %cst_39 = arith.constant 0.000000e+00 : f32
    %72 = vector.broadcast %cst_39 : f32 to vector<8x128xf32>
    %73 = arith.subf %72, %71 : vector<8x128xf32>
    %74 = math.exp %73 : vector<8x128xf32>
    %cst_40 = arith.constant 1.000000e+00 : f32
    %75 = vector.broadcast %cst_40 : f32 to vector<8x128xf32>
    %76 = arith.addf %75, %74 : vector<8x128xf32>
    %cst_41 = arith.constant 1.000000e+00 : f32
    %77 = vector.broadcast %cst_41 : f32 to vector<8x128xf32>
    %78 = arith.divf %77, %76 : vector<8x128xf32>
    %79 = arith.mulf %68, %9 : vector<8x128xf32>
    %80 = arith.mulf %60, %70 : vector<8x128xf32>
    %81 = arith.addf %79, %80 : vector<8x128xf32>
    %82 = math.tanh %81 : vector<8x128xf32>
    %83 = arith.mulf %78, %82 : vector<8x128xf32>
    %cst_42 = arith.constant dense<0.000000e+00> : vector<8x512xf32>
    %84 = tpu.matmul %83, %6, %cst_42 {dimension_numbers = #tpu.dot_dimension_numbers<[1], [0], [0], [1], [0, 0, 1, 1], [], []>} : vector<8x128xf32>, vector<128x512xf32>, vector<8x512xf32> -> vector<8x512xf32>
    %85 = vector.broadcast %8 : vector<1x512xf32> to vector<8x512xf32>
    %86 = arith.addf %84, %85 : vector<8x512xf32>
    %cst_43 = arith.constant dense<0.000000e+00> : vector<8x512xf32>
    %87 = tpu.matmul %9, %7, %cst_43 {dimension_numbers = #tpu.dot_dimension_numbers<[1], [0], [0], [1], [0, 0, 1, 1], [], []>} : vector<8x128xf32>, vector<128x512xf32>, vector<8x512xf32> -> vector<8x512xf32>
    %88 = arith.addf %86, %87 : vector<8x512xf32>
    %89 = vector.extract_strided_slice %88 {offsets = [0, 0], sizes = [8, 128], strides = [1, 1]} : vector<8x512xf32> to vector<8x128xf32>
    %cst_44 = arith.constant 0.000000e+00 : f32
    %90 = vector.broadcast %cst_44 : f32 to vector<8x128xf32>
    %91 = arith.subf %90, %89 : vector<8x128xf32>
    %92 = math.exp %91 : vector<8x128xf32>
    %cst_45 = arith.constant 1.000000e+00 : f32
    %93 = vector.broadcast %cst_45 : f32 to vector<8x128xf32>
    %94 = arith.addf %93, %92 : vector<8x128xf32>
    %cst_46 = arith.constant 1.000000e+00 : f32
    %95 = vector.broadcast %cst_46 : f32 to vector<8x128xf32>
    %96 = arith.divf %95, %94 : vector<8x128xf32>
    %97 = vector.extract_strided_slice %88 {offsets = [0, 128], sizes = [8, 128], strides = [1, 1]} : vector<8x512xf32> to vector<8x128xf32>
    %cst_47 = arith.constant 0.000000e+00 : f32
    %98 = vector.broadcast %cst_47 : f32 to vector<8x128xf32>
    %99 = arith.subf %98, %97 : vector<8x128xf32>
    %100 = math.exp %99 : vector<8x128xf32>
    %cst_48 = arith.constant 1.000000e+00 : f32
    %101 = vector.broadcast %cst_48 : f32 to vector<8x128xf32>
    %102 = arith.addf %101, %100 : vector<8x128xf32>
    %cst_49 = arith.constant 1.000000e+00 : f32
    %103 = vector.broadcast %cst_49 : f32 to vector<8x128xf32>
    %104 = arith.divf %103, %102 : vector<8x128xf32>
    %105 = vector.extract_strided_slice %88 {offsets = [0, 256], sizes = [8, 128], strides = [1, 1]} : vector<8x512xf32> to vector<8x128xf32>
    %106 = math.tanh %105 : vector<8x128xf32>
    %107 = vector.extract_strided_slice %88 {offsets = [0, 384], sizes = [8, 128], strides = [1, 1]} : vector<8x512xf32> to vector<8x128xf32>
    %cst_50 = arith.constant 0.000000e+00 : f32
    %108 = vector.broadcast %cst_50 : f32 to vector<8x128xf32>
    %109 = arith.subf %108, %107 : vector<8x128xf32>
    %110 = math.exp %109 : vector<8x128xf32>
    %cst_51 = arith.constant 1.000000e+00 : f32
    %111 = vector.broadcast %cst_51 : f32 to vector<8x128xf32>
    %112 = arith.addf %111, %110 : vector<8x128xf32>
    %cst_52 = arith.constant 1.000000e+00 : f32
    %113 = vector.broadcast %cst_52 : f32 to vector<8x128xf32>
    %114 = arith.divf %113, %112 : vector<8x128xf32>
    %115 = arith.mulf %104, %9 : vector<8x128xf32>
    %116 = arith.mulf %96, %106 : vector<8x128xf32>
    %117 = arith.addf %115, %116 : vector<8x128xf32>
    %118 = math.tanh %117 : vector<8x128xf32>
    %119 = arith.mulf %114, %118 : vector<8x128xf32>
    %c1 = arith.constant 1 : index
    %c0_53 = arith.constant 0 : index
    %c0_54 = arith.constant 0 : index
    %120 = vector.load %arg1[%c1, %c0_53, %c0_54] : memref<8x8x32xf32, #tpu.memory_space<vmem>>, vector<1x8x32xf32>
    %121 = vector.shape_cast %120 : vector<1x8x32xf32> to vector<8x32xf32>
    %cst_55 = arith.constant dense<0.000000e+00> : vector<8x512xf32>
    %122 = tpu.matmul %121, %0, %cst_55 {dimension_numbers = #tpu.dot_dimension_numbers<[1], [0], [0], [1], [0, 0, 1, 1], [], []>} : vector<8x32xf32>, vector<32x512xf32>, vector<8x512xf32> -> vector<8x512xf32>
    %123 = vector.broadcast %2 : vector<1x512xf32> to vector<8x512xf32>
    %124 = arith.addf %122, %123 : vector<8x512xf32>
    %cst_56 = arith.constant dense<0.000000e+00> : vector<8x512xf32>
    %125 = tpu.matmul %47, %1, %cst_56 {dimension_numbers = #tpu.dot_dimension_numbers<[1], [0], [0], [1], [0, 0, 1, 1], [], []>} : vector<8x128xf32>, vector<128x512xf32>, vector<8x512xf32> -> vector<8x512xf32>
    %126 = arith.addf %124, %125 : vector<8x512xf32>
    %127 = vector.extract_strided_slice %126 {offsets = [0, 0], sizes = [8, 128], strides = [1, 1]} : vector<8x512xf32> to vector<8x128xf32>
    %cst_57 = arith.constant 0.000000e+00 : f32
    %128 = vector.broadcast %cst_57 : f32 to vector<8x128xf32>
    %129 = arith.subf %128, %127 : vector<8x128xf32>
    %130 = math.exp %129 : vector<8x128xf32>
    %cst_58 = arith.constant 1.000000e+00 : f32
    %131 = vector.broadcast %cst_58 : f32 to vector<8x128xf32>
    %132 = arith.addf %131, %130 : vector<8x128xf32>
    %cst_59 = arith.constant 1.000000e+00 : f32
    %133 = vector.broadcast %cst_59 : f32 to vector<8x128xf32>
    %134 = arith.divf %133, %132 : vector<8x128xf32>
    %135 = vector.extract_strided_slice %126 {offsets = [0, 128], sizes = [8, 128], strides = [1, 1]} : vector<8x512xf32> to vector<8x128xf32>
    %cst_60 = arith.constant 0.000000e+00 : f32
    %136 = vector.broadcast %cst_60 : f32 to vector<8x128xf32>
    %137 = arith.subf %136, %135 : vector<8x128xf32>
    %138 = math.exp %137 : vector<8x128xf32>
    %cst_61 = arith.constant 1.000000e+00 : f32
    %139 = vector.broadcast %cst_61 : f32 to vector<8x128xf32>
    %140 = arith.addf %139, %138 : vector<8x128xf32>
    %cst_62 = arith.constant 1.000000e+00 : f32
    %141 = vector.broadcast %cst_62 : f32 to vector<8x128xf32>
    %142 = arith.divf %141, %140 : vector<8x128xf32>
    %143 = vector.extract_strided_slice %126 {offsets = [0, 256], sizes = [8, 128], strides = [1, 1]} : vector<8x512xf32> to vector<8x128xf32>
    %144 = math.tanh %143 : vector<8x128xf32>
    %145 = vector.extract_strided_slice %126 {offsets = [0, 384], sizes = [8, 128], strides = [1, 1]} : vector<8x512xf32> to vector<8x128xf32>
    %cst_63 = arith.constant 0.000000e+00 : f32
    %146 = vector.broadcast %cst_63 : f32 to vector<8x128xf32>
    %147 = arith.subf %146, %145 : vector<8x128xf32>
    %148 = math.exp %147 : vector<8x128xf32>
    %cst_64 = arith.constant 1.000000e+00 : f32
    %149 = vector.broadcast %cst_64 : f32 to vector<8x128xf32>
    %150 = arith.addf %149, %148 : vector<8x128xf32>
    %cst_65 = arith.constant 1.000000e+00 : f32
    %151 = vector.broadcast %cst_65 : f32 to vector<8x128xf32>
    %152 = arith.divf %151, %150 : vector<8x128xf32>
    %153 = arith.mulf %142, %45 : vector<8x128xf32>
    %154 = arith.mulf %134, %144 : vector<8x128xf32>
    %155 = arith.addf %153, %154 : vector<8x128xf32>
    %156 = math.tanh %155 : vector<8x128xf32>
    %157 = arith.mulf %152, %156 : vector<8x128xf32>
    %cst_66 = arith.constant dense<0.000000e+00> : vector<8x512xf32>
    %158 = tpu.matmul %157, %3, %cst_66 {dimension_numbers = #tpu.dot_dimension_numbers<[1], [0], [0], [1], [0, 0, 1, 1], [], []>} : vector<8x128xf32>, vector<128x512xf32>, vector<8x512xf32> -> vector<8x512xf32>
    %159 = vector.broadcast %5 : vector<1x512xf32> to vector<8x512xf32>
    %160 = arith.addf %158, %159 : vector<8x512xf32>
    %cst_67 = arith.constant dense<0.000000e+00> : vector<8x512xf32>
    %161 = tpu.matmul %83, %4, %cst_67 {dimension_numbers = #tpu.dot_dimension_numbers<[1], [0], [0], [1], [0, 0, 1, 1], [], []>} : vector<8x128xf32>, vector<128x512xf32>, vector<8x512xf32> -> vector<8x512xf32>
    %162 = arith.addf %160, %161 : vector<8x512xf32>
    %163 = vector.extract_strided_slice %162 {offsets = [0, 0], sizes = [8, 128], strides = [1, 1]} : vector<8x512xf32> to vector<8x128xf32>
    %cst_68 = arith.constant 0.000000e+00 : f32
    %164 = vector.broadcast %cst_68 : f32 to vector<8x128xf32>
    %165 = arith.subf %164, %163 : vector<8x128xf32>
    %166 = math.exp %165 : vector<8x128xf32>
    %cst_69 = arith.constant 1.000000e+00 : f32
    %167 = vector.broadcast %cst_69 : f32 to vector<8x128xf32>
    %168 = arith.addf %167, %166 : vector<8x128xf32>
    %cst_70 = arith.constant 1.000000e+00 : f32
    %169 = vector.broadcast %cst_70 : f32 to vector<8x128xf32>
    %170 = arith.divf %169, %168 : vector<8x128xf32>
    %171 = vector.extract_strided_slice %162 {offsets = [0, 128], sizes = [8, 128], strides = [1, 1]} : vector<8x512xf32> to vector<8x128xf32>
    %cst_71 = arith.constant 0.000000e+00 : f32
    %172 = vector.broadcast %cst_71 : f32 to vector<8x128xf32>
    %173 = arith.subf %172, %171 : vector<8x128xf32>
    %174 = math.exp %173 : vector<8x128xf32>
    %cst_72 = arith.constant 1.000000e+00 : f32
    %175 = vector.broadcast %cst_72 : f32 to vector<8x128xf32>
    %176 = arith.addf %175, %174 : vector<8x128xf32>
    %cst_73 = arith.constant 1.000000e+00 : f32
    %177 = vector.broadcast %cst_73 : f32 to vector<8x128xf32>
    %178 = arith.divf %177, %176 : vector<8x128xf32>
    %179 = vector.extract_strided_slice %162 {offsets = [0, 256], sizes = [8, 128], strides = [1, 1]} : vector<8x512xf32> to vector<8x128xf32>
    %180 = math.tanh %179 : vector<8x128xf32>
    %181 = vector.extract_strided_slice %162 {offsets = [0, 384], sizes = [8, 128], strides = [1, 1]} : vector<8x512xf32> to vector<8x128xf32>
    %cst_74 = arith.constant 0.000000e+00 : f32
    %182 = vector.broadcast %cst_74 : f32 to vector<8x128xf32>
    %183 = arith.subf %182, %181 : vector<8x128xf32>
    %184 = math.exp %183 : vector<8x128xf32>
    %cst_75 = arith.constant 1.000000e+00 : f32
    %185 = vector.broadcast %cst_75 : f32 to vector<8x128xf32>
    %186 = arith.addf %185, %184 : vector<8x128xf32>
    %cst_76 = arith.constant 1.000000e+00 : f32
    %187 = vector.broadcast %cst_76 : f32 to vector<8x128xf32>
    %188 = arith.divf %187, %186 : vector<8x128xf32>
    %189 = arith.mulf %178, %81 : vector<8x128xf32>
    %190 = arith.mulf %170, %180 : vector<8x128xf32>
    %191 = arith.addf %189, %190 : vector<8x128xf32>
    %192 = math.tanh %191 : vector<8x128xf32>
    %193 = arith.mulf %188, %192 : vector<8x128xf32>
    %cst_77 = arith.constant dense<0.000000e+00> : vector<8x512xf32>
    %194 = tpu.matmul %193, %6, %cst_77 {dimension_numbers = #tpu.dot_dimension_numbers<[1], [0], [0], [1], [0, 0, 1, 1], [], []>} : vector<8x128xf32>, vector<128x512xf32>, vector<8x512xf32> -> vector<8x512xf32>
    %195 = vector.broadcast %8 : vector<1x512xf32> to vector<8x512xf32>
    %196 = arith.addf %194, %195 : vector<8x512xf32>
    %cst_78 = arith.constant dense<0.000000e+00> : vector<8x512xf32>
    %197 = tpu.matmul %119, %7, %cst_78 {dimension_numbers = #tpu.dot_dimension_numbers<[1], [0], [0], [1], [0, 0, 1, 1], [], []>} : vector<8x128xf32>, vector<128x512xf32>, vector<8x512xf32> -> vector<8x512xf32>
    %198 = arith.addf %196, %197 : vector<8x512xf32>
    %199 = vector.extract_strided_slice %198 {offsets = [0, 0], sizes = [8, 128], strides = [1, 1]} : vector<8x512xf32> to vector<8x128xf32>
    %cst_79 = arith.constant 0.000000e+00 : f32
    %200 = vector.broadcast %cst_79 : f32 to vector<8x128xf32>
    %201 = arith.subf %200, %199 : vector<8x128xf32>
    %202 = math.exp %201 : vector<8x128xf32>
    %cst_80 = arith.constant 1.000000e+00 : f32
    %203 = vector.broadcast %cst_80 : f32 to vector<8x128xf32>
    %204 = arith.addf %203, %202 : vector<8x128xf32>
    %cst_81 = arith.constant 1.000000e+00 : f32
    %205 = vector.broadcast %cst_81 : f32 to vector<8x128xf32>
    %206 = arith.divf %205, %204 : vector<8x128xf32>
    %207 = vector.extract_strided_slice %198 {offsets = [0, 128], sizes = [8, 128], strides = [1, 1]} : vector<8x512xf32> to vector<8x128xf32>
    %cst_82 = arith.constant 0.000000e+00 : f32
    %208 = vector.broadcast %cst_82 : f32 to vector<8x128xf32>
    %209 = arith.subf %208, %207 : vector<8x128xf32>
    %210 = math.exp %209 : vector<8x128xf32>
    %cst_83 = arith.constant 1.000000e+00 : f32
    %211 = vector.broadcast %cst_83 : f32 to vector<8x128xf32>
    %212 = arith.addf %211, %210 : vector<8x128xf32>
    %cst_84 = arith.constant 1.000000e+00 : f32
    %213 = vector.broadcast %cst_84 : f32 to vector<8x128xf32>
    %214 = arith.divf %213, %212 : vector<8x128xf32>
    %215 = vector.extract_strided_slice %198 {offsets = [0, 256], sizes = [8, 128], strides = [1, 1]} : vector<8x512xf32> to vector<8x128xf32>
    %216 = math.tanh %215 : vector<8x128xf32>
    %217 = vector.extract_strided_slice %198 {offsets = [0, 384], sizes = [8, 128], strides = [1, 1]} : vector<8x512xf32> to vector<8x128xf32>
    %cst_85 = arith.constant 0.000000e+00 : f32
    %218 = vector.broadcast %cst_85 : f32 to vector<8x128xf32>
    %219 = arith.subf %218, %217 : vector<8x128xf32>
    %220 = math.exp %219 : vector<8x128xf32>
    %cst_86 = arith.constant 1.000000e+00 : f32
    %221 = vector.broadcast %cst_86 : f32 to vector<8x128xf32>
    %222 = arith.addf %221, %220 : vector<8x128xf32>
    %cst_87 = arith.constant 1.000000e+00 : f32
    %223 = vector.broadcast %cst_87 : f32 to vector<8x128xf32>
    %224 = arith.divf %223, %222 : vector<8x128xf32>
    %225 = arith.mulf %214, %117 : vector<8x128xf32>
    %226 = arith.mulf %206, %216 : vector<8x128xf32>
    %227 = arith.addf %225, %226 : vector<8x128xf32>
    %228 = math.tanh %227 : vector<8x128xf32>
    %229 = arith.mulf %224, %228 : vector<8x128xf32>
    %c2 = arith.constant 2 : index
    %c0_88 = arith.constant 0 : index
    %c0_89 = arith.constant 0 : index
    %230 = vector.load %arg1[%c2, %c0_88, %c0_89] : memref<8x8x32xf32, #tpu.memory_space<vmem>>, vector<1x8x32xf32>
    %231 = vector.shape_cast %230 : vector<1x8x32xf32> to vector<8x32xf32>
    %cst_90 = arith.constant dense<0.000000e+00> : vector<8x512xf32>
    %232 = tpu.matmul %231, %0, %cst_90 {dimension_numbers = #tpu.dot_dimension_numbers<[1], [0], [0], [1], [0, 0, 1, 1], [], []>} : vector<8x32xf32>, vector<32x512xf32>, vector<8x512xf32> -> vector<8x512xf32>
    %233 = vector.broadcast %2 : vector<1x512xf32> to vector<8x512xf32>
    %234 = arith.addf %232, %233 : vector<8x512xf32>
    %cst_91 = arith.constant dense<0.000000e+00> : vector<8x512xf32>
    %235 = tpu.matmul %157, %1, %cst_91 {dimension_numbers = #tpu.dot_dimension_numbers<[1], [0], [0], [1], [0, 0, 1, 1], [], []>} : vector<8x128xf32>, vector<128x512xf32>, vector<8x512xf32> -> vector<8x512xf32>
    %236 = arith.addf %234, %235 : vector<8x512xf32>
    %237 = vector.extract_strided_slice %236 {offsets = [0, 0], sizes = [8, 128], strides = [1, 1]} : vector<8x512xf32> to vector<8x128xf32>
    %cst_92 = arith.constant 0.000000e+00 : f32
    %238 = vector.broadcast %cst_92 : f32 to vector<8x128xf32>
    %239 = arith.subf %238, %237 : vector<8x128xf32>
    %240 = math.exp %239 : vector<8x128xf32>
    %cst_93 = arith.constant 1.000000e+00 : f32
    %241 = vector.broadcast %cst_93 : f32 to vector<8x128xf32>
    %242 = arith.addf %241, %240 : vector<8x128xf32>
    %cst_94 = arith.constant 1.000000e+00 : f32
    %243 = vector.broadcast %cst_94 : f32 to vector<8x128xf32>
    %244 = arith.divf %243, %242 : vector<8x128xf32>
    %245 = vector.extract_strided_slice %236 {offsets = [0, 128], sizes = [8, 128], strides = [1, 1]} : vector<8x512xf32> to vector<8x128xf32>
    %cst_95 = arith.constant 0.000000e+00 : f32
    %246 = vector.broadcast %cst_95 : f32 to vector<8x128xf32>
    %247 = arith.subf %246, %245 : vector<8x128xf32>
    %248 = math.exp %247 : vector<8x128xf32>
    %cst_96 = arith.constant 1.000000e+00 : f32
    %249 = vector.broadcast %cst_96 : f32 to vector<8x128xf32>
    %250 = arith.addf %249, %248 : vector<8x128xf32>
    %cst_97 = arith.constant 1.000000e+00 : f32
    %251 = vector.broadcast %cst_97 : f32 to vector<8x128xf32>
    %252 = arith.divf %251, %250 : vector<8x128xf32>
    %253 = vector.extract_strided_slice %236 {offsets = [0, 256], sizes = [8, 128], strides = [1, 1]} : vector<8x512xf32> to vector<8x128xf32>
    %254 = math.tanh %253 : vector<8x128xf32>
    %255 = vector.extract_strided_slice %236 {offsets = [0, 384], sizes = [8, 128], strides = [1, 1]} : vector<8x512xf32> to vector<8x128xf32>
    %cst_98 = arith.constant 0.000000e+00 : f32
    %256 = vector.broadcast %cst_98 : f32 to vector<8x128xf32>
    %257 = arith.subf %256, %255 : vector<8x128xf32>
    %258 = math.exp %257 : vector<8x128xf32>
    %cst_99 = arith.constant 1.000000e+00 : f32
    %259 = vector.broadcast %cst_99 : f32 to vector<8x128xf32>
    %260 = arith.addf %259, %258 : vector<8x128xf32>
    %cst_100 = arith.constant 1.000000e+00 : f32
    %261 = vector.broadcast %cst_100 : f32 to vector<8x128xf32>
    %262 = arith.divf %261, %260 : vector<8x128xf32>
    %263 = arith.mulf %252, %155 : vector<8x128xf32>
    %264 = arith.mulf %244, %254 : vector<8x128xf32>
    %265 = arith.addf %263, %264 : vector<8x128xf32>
    %266 = math.tanh %265 : vector<8x128xf32>
    %267 = arith.mulf %262, %266 : vector<8x128xf32>
    %cst_101 = arith.constant dense<0.000000e+00> : vector<8x512xf32>
    %268 = tpu.matmul %267, %3, %cst_101 {dimension_numbers = #tpu.dot_dimension_numbers<[1], [0], [0], [1], [0, 0, 1, 1], [], []>} : vector<8x128xf32>, vector<128x512xf32>, vector<8x512xf32> -> vector<8x512xf32>
    %269 = vector.broadcast %5 : vector<1x512xf32> to vector<8x512xf32>
    %270 = arith.addf %268, %269 : vector<8x512xf32>
    %cst_102 = arith.constant dense<0.000000e+00> : vector<8x512xf32>
    %271 = tpu.matmul %193, %4, %cst_102 {dimension_numbers = #tpu.dot_dimension_numbers<[1], [0], [0], [1], [0, 0, 1, 1], [], []>} : vector<8x128xf32>, vector<128x512xf32>, vector<8x512xf32> -> vector<8x512xf32>
    %272 = arith.addf %270, %271 : vector<8x512xf32>
    %273 = vector.extract_strided_slice %272 {offsets = [0, 0], sizes = [8, 128], strides = [1, 1]} : vector<8x512xf32> to vector<8x128xf32>
    %cst_103 = arith.constant 0.000000e+00 : f32
    %274 = vector.broadcast %cst_103 : f32 to vector<8x128xf32>
    %275 = arith.subf %274, %273 : vector<8x128xf32>
    %276 = math.exp %275 : vector<8x128xf32>
    %cst_104 = arith.constant 1.000000e+00 : f32
    %277 = vector.broadcast %cst_104 : f32 to vector<8x128xf32>
    %278 = arith.addf %277, %276 : vector<8x128xf32>
    %cst_105 = arith.constant 1.000000e+00 : f32
    %279 = vector.broadcast %cst_105 : f32 to vector<8x128xf32>
    %280 = arith.divf %279, %278 : vector<8x128xf32>
    %281 = vector.extract_strided_slice %272 {offsets = [0, 128], sizes = [8, 128], strides = [1, 1]} : vector<8x512xf32> to vector<8x128xf32>
    %cst_106 = arith.constant 0.000000e+00 : f32
    %282 = vector.broadcast %cst_106 : f32 to vector<8x128xf32>
    %283 = arith.subf %282, %281 : vector<8x128xf32>
    %284 = math.exp %283 : vector<8x128xf32>
    %cst_107 = arith.constant 1.000000e+00 : f32
    %285 = vector.broadcast %cst_107 : f32 to vector<8x128xf32>
    %286 = arith.addf %285, %284 : vector<8x128xf32>
    %cst_108 = arith.constant 1.000000e+00 : f32
    %287 = vector.broadcast %cst_108 : f32 to vector<8x128xf32>
    %288 = arith.divf %287, %286 : vector<8x128xf32>
    %289 = vector.extract_strided_slice %272 {offsets = [0, 256], sizes = [8, 128], strides = [1, 1]} : vector<8x512xf32> to vector<8x128xf32>
    %290 = math.tanh %289 : vector<8x128xf32>
    %291 = vector.extract_strided_slice %272 {offsets = [0, 384], sizes = [8, 128], strides = [1, 1]} : vector<8x512xf32> to vector<8x128xf32>
    %cst_109 = arith.constant 0.000000e+00 : f32
    %292 = vector.broadcast %cst_109 : f32 to vector<8x128xf32>
    %293 = arith.subf %292, %291 : vector<8x128xf32>
    %294 = math.exp %293 : vector<8x128xf32>
    %cst_110 = arith.constant 1.000000e+00 : f32
    %295 = vector.broadcast %cst_110 : f32 to vector<8x128xf32>
    %296 = arith.addf %295, %294 : vector<8x128xf32>
    %cst_111 = arith.constant 1.000000e+00 : f32
    %297 = vector.broadcast %cst_111 : f32 to vector<8x128xf32>
    %298 = arith.divf %297, %296 : vector<8x128xf32>
    %299 = arith.mulf %288, %191 : vector<8x128xf32>
    %300 = arith.mulf %280, %290 : vector<8x128xf32>
    %301 = arith.addf %299, %300 : vector<8x128xf32>
    %302 = math.tanh %301 : vector<8x128xf32>
    %303 = arith.mulf %298, %302 : vector<8x128xf32>
    %cst_112 = arith.constant dense<0.000000e+00> : vector<8x512xf32>
    %304 = tpu.matmul %303, %6, %cst_112 {dimension_numbers = #tpu.dot_dimension_numbers<[1], [0], [0], [1], [0, 0, 1, 1], [], []>} : vector<8x128xf32>, vector<128x512xf32>, vector<8x512xf32> -> vector<8x512xf32>
    %305 = vector.broadcast %8 : vector<1x512xf32> to vector<8x512xf32>
    %306 = arith.addf %304, %305 : vector<8x512xf32>
    %cst_113 = arith.constant dense<0.000000e+00> : vector<8x512xf32>
    %307 = tpu.matmul %229, %7, %cst_113 {dimension_numbers = #tpu.dot_dimension_numbers<[1], [0], [0], [1], [0, 0, 1, 1], [], []>} : vector<8x128xf32>, vector<128x512xf32>, vector<8x512xf32> -> vector<8x512xf32>
    %308 = arith.addf %306, %307 : vector<8x512xf32>
    %309 = vector.extract_strided_slice %308 {offsets = [0, 0], sizes = [8, 128], strides = [1, 1]} : vector<8x512xf32> to vector<8x128xf32>
    %cst_114 = arith.constant 0.000000e+00 : f32
    %310 = vector.broadcast %cst_114 : f32 to vector<8x128xf32>
    %311 = arith.subf %310, %309 : vector<8x128xf32>
    %312 = math.exp %311 : vector<8x128xf32>
    %cst_115 = arith.constant 1.000000e+00 : f32
    %313 = vector.broadcast %cst_115 : f32 to vector<8x128xf32>
    %314 = arith.addf %313, %312 : vector<8x128xf32>
    %cst_116 = arith.constant 1.000000e+00 : f32
    %315 = vector.broadcast %cst_116 : f32 to vector<8x128xf32>
    %316 = arith.divf %315, %314 : vector<8x128xf32>
    %317 = vector.extract_strided_slice %308 {offsets = [0, 128], sizes = [8, 128], strides = [1, 1]} : vector<8x512xf32> to vector<8x128xf32>
    %cst_117 = arith.constant 0.000000e+00 : f32
    %318 = vector.broadcast %cst_117 : f32 to vector<8x128xf32>
    %319 = arith.subf %318, %317 : vector<8x128xf32>
    %320 = math.exp %319 : vector<8x128xf32>
    %cst_118 = arith.constant 1.000000e+00 : f32
    %321 = vector.broadcast %cst_118 : f32 to vector<8x128xf32>
    %322 = arith.addf %321, %320 : vector<8x128xf32>
    %cst_119 = arith.constant 1.000000e+00 : f32
    %323 = vector.broadcast %cst_119 : f32 to vector<8x128xf32>
    %324 = arith.divf %323, %322 : vector<8x128xf32>
    %325 = vector.extract_strided_slice %308 {offsets = [0, 256], sizes = [8, 128], strides = [1, 1]} : vector<8x512xf32> to vector<8x128xf32>
    %326 = math.tanh %325 : vector<8x128xf32>
    %327 = vector.extract_strided_slice %308 {offsets = [0, 384], sizes = [8, 128], strides = [1, 1]} : vector<8x512xf32> to vector<8x128xf32>
    %cst_120 = arith.constant 0.000000e+00 : f32
    %328 = vector.broadcast %cst_120 : f32 to vector<8x128xf32>
    %329 = arith.subf %328, %327 : vector<8x128xf32>
    %330 = math.exp %329 : vector<8x128xf32>
    %cst_121 = arith.constant 1.000000e+00 : f32
    %331 = vector.broadcast %cst_121 : f32 to vector<8x128xf32>
    %332 = arith.addf %331, %330 : vector<8x128xf32>
    %cst_122 = arith.constant 1.000000e+00 : f32
    %333 = vector.broadcast %cst_122 : f32 to vector<8x128xf32>
    %334 = arith.divf %333, %332 : vector<8x128xf32>
    %335 = arith.mulf %324, %227 : vector<8x128xf32>
    %336 = arith.mulf %316, %326 : vector<8x128xf32>
    %337 = arith.addf %335, %336 : vector<8x128xf32>
    %338 = math.tanh %337 : vector<8x128xf32>
    %339 = arith.mulf %334, %338 : vector<8x128xf32>
    %c3 = arith.constant 3 : index
    %c0_123 = arith.constant 0 : index
    %c0_124 = arith.constant 0 : index
    %340 = vector.load %arg1[%c3, %c0_123, %c0_124] : memref<8x8x32xf32, #tpu.memory_space<vmem>>, vector<1x8x32xf32>
    %341 = vector.shape_cast %340 : vector<1x8x32xf32> to vector<8x32xf32>
    %cst_125 = arith.constant dense<0.000000e+00> : vector<8x512xf32>
    %342 = tpu.matmul %341, %0, %cst_125 {dimension_numbers = #tpu.dot_dimension_numbers<[1], [0], [0], [1], [0, 0, 1, 1], [], []>} : vector<8x32xf32>, vector<32x512xf32>, vector<8x512xf32> -> vector<8x512xf32>
    %343 = vector.broadcast %2 : vector<1x512xf32> to vector<8x512xf32>
    %344 = arith.addf %342, %343 : vector<8x512xf32>
    %cst_126 = arith.constant dense<0.000000e+00> : vector<8x512xf32>
    %345 = tpu.matmul %267, %1, %cst_126 {dimension_numbers = #tpu.dot_dimension_numbers<[1], [0], [0], [1], [0, 0, 1, 1], [], []>} : vector<8x128xf32>, vector<128x512xf32>, vector<8x512xf32> -> vector<8x512xf32>
    %346 = arith.addf %344, %345 : vector<8x512xf32>
    %347 = vector.extract_strided_slice %346 {offsets = [0, 0], sizes = [8, 128], strides = [1, 1]} : vector<8x512xf32> to vector<8x128xf32>
    %cst_127 = arith.constant 0.000000e+00 : f32
    %348 = vector.broadcast %cst_127 : f32 to vector<8x128xf32>
    %349 = arith.subf %348, %347 : vector<8x128xf32>
    %350 = math.exp %349 : vector<8x128xf32>
    %cst_128 = arith.constant 1.000000e+00 : f32
    %351 = vector.broadcast %cst_128 : f32 to vector<8x128xf32>
    %352 = arith.addf %351, %350 : vector<8x128xf32>
    %cst_129 = arith.constant 1.000000e+00 : f32
    %353 = vector.broadcast %cst_129 : f32 to vector<8x128xf32>
    %354 = arith.divf %353, %352 : vector<8x128xf32>
    %355 = vector.extract_strided_slice %346 {offsets = [0, 128], sizes = [8, 128], strides = [1, 1]} : vector<8x512xf32> to vector<8x128xf32>
    %cst_130 = arith.constant 0.000000e+00 : f32
    %356 = vector.broadcast %cst_130 : f32 to vector<8x128xf32>
    %357 = arith.subf %356, %355 : vector<8x128xf32>
    %358 = math.exp %357 : vector<8x128xf32>
    %cst_131 = arith.constant 1.000000e+00 : f32
    %359 = vector.broadcast %cst_131 : f32 to vector<8x128xf32>
    %360 = arith.addf %359, %358 : vector<8x128xf32>
    %cst_132 = arith.constant 1.000000e+00 : f32
    %361 = vector.broadcast %cst_132 : f32 to vector<8x128xf32>
    %362 = arith.divf %361, %360 : vector<8x128xf32>
    %363 = vector.extract_strided_slice %346 {offsets = [0, 256], sizes = [8, 128], strides = [1, 1]} : vector<8x512xf32> to vector<8x128xf32>
    %364 = math.tanh %363 : vector<8x128xf32>
    %365 = vector.extract_strided_slice %346 {offsets = [0, 384], sizes = [8, 128], strides = [1, 1]} : vector<8x512xf32> to vector<8x128xf32>
    %cst_133 = arith.constant 0.000000e+00 : f32
    %366 = vector.broadcast %cst_133 : f32 to vector<8x128xf32>
    %367 = arith.subf %366, %365 : vector<8x128xf32>
    %368 = math.exp %367 : vector<8x128xf32>
    %cst_134 = arith.constant 1.000000e+00 : f32
    %369 = vector.broadcast %cst_134 : f32 to vector<8x128xf32>
    %370 = arith.addf %369, %368 : vector<8x128xf32>
    %cst_135 = arith.constant 1.000000e+00 : f32
    %371 = vector.broadcast %cst_135 : f32 to vector<8x128xf32>
    %372 = arith.divf %371, %370 : vector<8x128xf32>
    %373 = arith.mulf %362, %265 : vector<8x128xf32>
    %374 = arith.mulf %354, %364 : vector<8x128xf32>
    %375 = arith.addf %373, %374 : vector<8x128xf32>
    %376 = math.tanh %375 : vector<8x128xf32>
    %377 = arith.mulf %372, %376 : vector<8x128xf32>
    %cst_136 = arith.constant dense<0.000000e+00> : vector<8x512xf32>
    %378 = tpu.matmul %377, %3, %cst_136 {dimension_numbers = #tpu.dot_dimension_numbers<[1], [0], [0], [1], [0, 0, 1, 1], [], []>} : vector<8x128xf32>, vector<128x512xf32>, vector<8x512xf32> -> vector<8x512xf32>
    %379 = vector.broadcast %5 : vector<1x512xf32> to vector<8x512xf32>
    %380 = arith.addf %378, %379 : vector<8x512xf32>
    %cst_137 = arith.constant dense<0.000000e+00> : vector<8x512xf32>
    %381 = tpu.matmul %303, %4, %cst_137 {dimension_numbers = #tpu.dot_dimension_numbers<[1], [0], [0], [1], [0, 0, 1, 1], [], []>} : vector<8x128xf32>, vector<128x512xf32>, vector<8x512xf32> -> vector<8x512xf32>
    %382 = arith.addf %380, %381 : vector<8x512xf32>
    %383 = vector.extract_strided_slice %382 {offsets = [0, 0], sizes = [8, 128], strides = [1, 1]} : vector<8x512xf32> to vector<8x128xf32>
    %cst_138 = arith.constant 0.000000e+00 : f32
    %384 = vector.broadcast %cst_138 : f32 to vector<8x128xf32>
    %385 = arith.subf %384, %383 : vector<8x128xf32>
    %386 = math.exp %385 : vector<8x128xf32>
    %cst_139 = arith.constant 1.000000e+00 : f32
    %387 = vector.broadcast %cst_139 : f32 to vector<8x128xf32>
    %388 = arith.addf %387, %386 : vector<8x128xf32>
    %cst_140 = arith.constant 1.000000e+00 : f32
    %389 = vector.broadcast %cst_140 : f32 to vector<8x128xf32>
    %390 = arith.divf %389, %388 : vector<8x128xf32>
    %391 = vector.extract_strided_slice %382 {offsets = [0, 128], sizes = [8, 128], strides = [1, 1]} : vector<8x512xf32> to vector<8x128xf32>
    %cst_141 = arith.constant 0.000000e+00 : f32
    %392 = vector.broadcast %cst_141 : f32 to vector<8x128xf32>
    %393 = arith.subf %392, %391 : vector<8x128xf32>
    %394 = math.exp %393 : vector<8x128xf32>
    %cst_142 = arith.constant 1.000000e+00 : f32
    %395 = vector.broadcast %cst_142 : f32 to vector<8x128xf32>
    %396 = arith.addf %395, %394 : vector<8x128xf32>
    %cst_143 = arith.constant 1.000000e+00 : f32
    %397 = vector.broadcast %cst_143 : f32 to vector<8x128xf32>
    %398 = arith.divf %397, %396 : vector<8x128xf32>
    %399 = vector.extract_strided_slice %382 {offsets = [0, 256], sizes = [8, 128], strides = [1, 1]} : vector<8x512xf32> to vector<8x128xf32>
    %400 = math.tanh %399 : vector<8x128xf32>
    %401 = vector.extract_strided_slice %382 {offsets = [0, 384], sizes = [8, 128], strides = [1, 1]} : vector<8x512xf32> to vector<8x128xf32>
    %cst_144 = arith.constant 0.000000e+00 : f32
    %402 = vector.broadcast %cst_144 : f32 to vector<8x128xf32>
    %403 = arith.subf %402, %401 : vector<8x128xf32>
    %404 = math.exp %403 : vector<8x128xf32>
    %cst_145 = arith.constant 1.000000e+00 : f32
    %405 = vector.broadcast %cst_145 : f32 to vector<8x128xf32>
    %406 = arith.addf %405, %404 : vector<8x128xf32>
    %cst_146 = arith.constant 1.000000e+00 : f32
    %407 = vector.broadcast %cst_146 : f32 to vector<8x128xf32>
    %408 = arith.divf %407, %406 : vector<8x128xf32>
    %409 = arith.mulf %398, %301 : vector<8x128xf32>
    %410 = arith.mulf %390, %400 : vector<8x128xf32>
    %411 = arith.addf %409, %410 : vector<8x128xf32>
    %412 = math.tanh %411 : vector<8x128xf32>
    %413 = arith.mulf %408, %412 : vector<8x128xf32>
    %cst_147 = arith.constant dense<0.000000e+00> : vector<8x512xf32>
    %414 = tpu.matmul %413, %6, %cst_147 {dimension_numbers = #tpu.dot_dimension_numbers<[1], [0], [0], [1], [0, 0, 1, 1], [], []>} : vector<8x128xf32>, vector<128x512xf32>, vector<8x512xf32> -> vector<8x512xf32>
    %415 = vector.broadcast %8 : vector<1x512xf32> to vector<8x512xf32>
    %416 = arith.addf %414, %415 : vector<8x512xf32>
    %cst_148 = arith.constant dense<0.000000e+00> : vector<8x512xf32>
    %417 = tpu.matmul %339, %7, %cst_148 {dimension_numbers = #tpu.dot_dimension_numbers<[1], [0], [0], [1], [0, 0, 1, 1], [], []>} : vector<8x128xf32>, vector<128x512xf32>, vector<8x512xf32> -> vector<8x512xf32>
    %418 = arith.addf %416, %417 : vector<8x512xf32>
    %419 = vector.extract_strided_slice %418 {offsets = [0, 0], sizes = [8, 128], strides = [1, 1]} : vector<8x512xf32> to vector<8x128xf32>
    %cst_149 = arith.constant 0.000000e+00 : f32
    %420 = vector.broadcast %cst_149 : f32 to vector<8x128xf32>
    %421 = arith.subf %420, %419 : vector<8x128xf32>
    %422 = math.exp %421 : vector<8x128xf32>
    %cst_150 = arith.constant 1.000000e+00 : f32
    %423 = vector.broadcast %cst_150 : f32 to vector<8x128xf32>
    %424 = arith.addf %423, %422 : vector<8x128xf32>
    %cst_151 = arith.constant 1.000000e+00 : f32
    %425 = vector.broadcast %cst_151 : f32 to vector<8x128xf32>
    %426 = arith.divf %425, %424 : vector<8x128xf32>
    %427 = vector.extract_strided_slice %418 {offsets = [0, 128], sizes = [8, 128], strides = [1, 1]} : vector<8x512xf32> to vector<8x128xf32>
    %cst_152 = arith.constant 0.000000e+00 : f32
    %428 = vector.broadcast %cst_152 : f32 to vector<8x128xf32>
    %429 = arith.subf %428, %427 : vector<8x128xf32>
    %430 = math.exp %429 : vector<8x128xf32>
    %cst_153 = arith.constant 1.000000e+00 : f32
    %431 = vector.broadcast %cst_153 : f32 to vector<8x128xf32>
    %432 = arith.addf %431, %430 : vector<8x128xf32>
    %cst_154 = arith.constant 1.000000e+00 : f32
    %433 = vector.broadcast %cst_154 : f32 to vector<8x128xf32>
    %434 = arith.divf %433, %432 : vector<8x128xf32>
    %435 = vector.extract_strided_slice %418 {offsets = [0, 256], sizes = [8, 128], strides = [1, 1]} : vector<8x512xf32> to vector<8x128xf32>
    %436 = math.tanh %435 : vector<8x128xf32>
    %437 = vector.extract_strided_slice %418 {offsets = [0, 384], sizes = [8, 128], strides = [1, 1]} : vector<8x512xf32> to vector<8x128xf32>
    %cst_155 = arith.constant 0.000000e+00 : f32
    %438 = vector.broadcast %cst_155 : f32 to vector<8x128xf32>
    %439 = arith.subf %438, %437 : vector<8x128xf32>
    %440 = math.exp %439 : vector<8x128xf32>
    %cst_156 = arith.constant 1.000000e+00 : f32
    %441 = vector.broadcast %cst_156 : f32 to vector<8x128xf32>
    %442 = arith.addf %441, %440 : vector<8x128xf32>
    %cst_157 = arith.constant 1.000000e+00 : f32
    %443 = vector.broadcast %cst_157 : f32 to vector<8x128xf32>
    %444 = arith.divf %443, %442 : vector<8x128xf32>
    %445 = arith.mulf %434, %337 : vector<8x128xf32>
    %446 = arith.mulf %426, %436 : vector<8x128xf32>
    %447 = arith.addf %445, %446 : vector<8x128xf32>
    %448 = math.tanh %447 : vector<8x128xf32>
    %449 = arith.mulf %444, %448 : vector<8x128xf32>
    %c4 = arith.constant 4 : index
    %c0_158 = arith.constant 0 : index
    %c0_159 = arith.constant 0 : index
    %450 = vector.load %arg1[%c4, %c0_158, %c0_159] : memref<8x8x32xf32, #tpu.memory_space<vmem>>, vector<1x8x32xf32>
    %451 = vector.shape_cast %450 : vector<1x8x32xf32> to vector<8x32xf32>
    %cst_160 = arith.constant dense<0.000000e+00> : vector<8x512xf32>
    %452 = tpu.matmul %451, %0, %cst_160 {dimension_numbers = #tpu.dot_dimension_numbers<[1], [0], [0], [1], [0, 0, 1, 1], [], []>} : vector<8x32xf32>, vector<32x512xf32>, vector<8x512xf32> -> vector<8x512xf32>
    %453 = vector.broadcast %2 : vector<1x512xf32> to vector<8x512xf32>
    %454 = arith.addf %452, %453 : vector<8x512xf32>
    %cst_161 = arith.constant dense<0.000000e+00> : vector<8x512xf32>
    %455 = tpu.matmul %377, %1, %cst_161 {dimension_numbers = #tpu.dot_dimension_numbers<[1], [0], [0], [1], [0, 0, 1, 1], [], []>} : vector<8x128xf32>, vector<128x512xf32>, vector<8x512xf32> -> vector<8x512xf32>
    %456 = arith.addf %454, %455 : vector<8x512xf32>
    %457 = vector.extract_strided_slice %456 {offsets = [0, 0], sizes = [8, 128], strides = [1, 1]} : vector<8x512xf32> to vector<8x128xf32>
    %cst_162 = arith.constant 0.000000e+00 : f32
    %458 = vector.broadcast %cst_162 : f32 to vector<8x128xf32>
    %459 = arith.subf %458, %457 : vector<8x128xf32>
    %460 = math.exp %459 : vector<8x128xf32>
    %cst_163 = arith.constant 1.000000e+00 : f32
    %461 = vector.broadcast %cst_163 : f32 to vector<8x128xf32>
    %462 = arith.addf %461, %460 : vector<8x128xf32>
    %cst_164 = arith.constant 1.000000e+00 : f32
    %463 = vector.broadcast %cst_164 : f32 to vector<8x128xf32>
    %464 = arith.divf %463, %462 : vector<8x128xf32>
    %465 = vector.extract_strided_slice %456 {offsets = [0, 128], sizes = [8, 128], strides = [1, 1]} : vector<8x512xf32> to vector<8x128xf32>
    %cst_165 = arith.constant 0.000000e+00 : f32
    %466 = vector.broadcast %cst_165 : f32 to vector<8x128xf32>
    %467 = arith.subf %466, %465 : vector<8x128xf32>
    %468 = math.exp %467 : vector<8x128xf32>
    %cst_166 = arith.constant 1.000000e+00 : f32
    %469 = vector.broadcast %cst_166 : f32 to vector<8x128xf32>
    %470 = arith.addf %469, %468 : vector<8x128xf32>
    %cst_167 = arith.constant 1.000000e+00 : f32
    %471 = vector.broadcast %cst_167 : f32 to vector<8x128xf32>
    %472 = arith.divf %471, %470 : vector<8x128xf32>
    %473 = vector.extract_strided_slice %456 {offsets = [0, 256], sizes = [8, 128], strides = [1, 1]} : vector<8x512xf32> to vector<8x128xf32>
    %474 = math.tanh %473 : vector<8x128xf32>
    %475 = vector.extract_strided_slice %456 {offsets = [0, 384], sizes = [8, 128], strides = [1, 1]} : vector<8x512xf32> to vector<8x128xf32>
    %cst_168 = arith.constant 0.000000e+00 : f32
    %476 = vector.broadcast %cst_168 : f32 to vector<8x128xf32>
    %477 = arith.subf %476, %475 : vector<8x128xf32>
    %478 = math.exp %477 : vector<8x128xf32>
    %cst_169 = arith.constant 1.000000e+00 : f32
    %479 = vector.broadcast %cst_169 : f32 to vector<8x128xf32>
    %480 = arith.addf %479, %478 : vector<8x128xf32>
    %cst_170 = arith.constant 1.000000e+00 : f32
    %481 = vector.broadcast %cst_170 : f32 to vector<8x128xf32>
    %482 = arith.divf %481, %480 : vector<8x128xf32>
    %483 = arith.mulf %472, %375 : vector<8x128xf32>
    %484 = arith.mulf %464, %474 : vector<8x128xf32>
    %485 = arith.addf %483, %484 : vector<8x128xf32>
    %486 = math.tanh %485 : vector<8x128xf32>
    %487 = arith.mulf %482, %486 : vector<8x128xf32>
    %cst_171 = arith.constant dense<0.000000e+00> : vector<8x512xf32>
    %488 = tpu.matmul %487, %3, %cst_171 {dimension_numbers = #tpu.dot_dimension_numbers<[1], [0], [0], [1], [0, 0, 1, 1], [], []>} : vector<8x128xf32>, vector<128x512xf32>, vector<8x512xf32> -> vector<8x512xf32>
    %489 = vector.broadcast %5 : vector<1x512xf32> to vector<8x512xf32>
    %490 = arith.addf %488, %489 : vector<8x512xf32>
    %cst_172 = arith.constant dense<0.000000e+00> : vector<8x512xf32>
    %491 = tpu.matmul %413, %4, %cst_172 {dimension_numbers = #tpu.dot_dimension_numbers<[1], [0], [0], [1], [0, 0, 1, 1], [], []>} : vector<8x128xf32>, vector<128x512xf32>, vector<8x512xf32> -> vector<8x512xf32>
    %492 = arith.addf %490, %491 : vector<8x512xf32>
    %493 = vector.extract_strided_slice %492 {offsets = [0, 0], sizes = [8, 128], strides = [1, 1]} : vector<8x512xf32> to vector<8x128xf32>
    %cst_173 = arith.constant 0.000000e+00 : f32
    %494 = vector.broadcast %cst_173 : f32 to vector<8x128xf32>
    %495 = arith.subf %494, %493 : vector<8x128xf32>
    %496 = math.exp %495 : vector<8x128xf32>
    %cst_174 = arith.constant 1.000000e+00 : f32
    %497 = vector.broadcast %cst_174 : f32 to vector<8x128xf32>
    %498 = arith.addf %497, %496 : vector<8x128xf32>
    %cst_175 = arith.constant 1.000000e+00 : f32
    %499 = vector.broadcast %cst_175 : f32 to vector<8x128xf32>
    %500 = arith.divf %499, %498 : vector<8x128xf32>
    %501 = vector.extract_strided_slice %492 {offsets = [0, 128], sizes = [8, 128], strides = [1, 1]} : vector<8x512xf32> to vector<8x128xf32>
    %cst_176 = arith.constant 0.000000e+00 : f32
    %502 = vector.broadcast %cst_176 : f32 to vector<8x128xf32>
    %503 = arith.subf %502, %501 : vector<8x128xf32>
    %504 = math.exp %503 : vector<8x128xf32>
    %cst_177 = arith.constant 1.000000e+00 : f32
    %505 = vector.broadcast %cst_177 : f32 to vector<8x128xf32>
    %506 = arith.addf %505, %504 : vector<8x128xf32>
    %cst_178 = arith.constant 1.000000e+00 : f32
    %507 = vector.broadcast %cst_178 : f32 to vector<8x128xf32>
    %508 = arith.divf %507, %506 : vector<8x128xf32>
    %509 = vector.extract_strided_slice %492 {offsets = [0, 256], sizes = [8, 128], strides = [1, 1]} : vector<8x512xf32> to vector<8x128xf32>
    %510 = math.tanh %509 : vector<8x128xf32>
    %511 = vector.extract_strided_slice %492 {offsets = [0, 384], sizes = [8, 128], strides = [1, 1]} : vector<8x512xf32> to vector<8x128xf32>
    %cst_179 = arith.constant 0.000000e+00 : f32
    %512 = vector.broadcast %cst_179 : f32 to vector<8x128xf32>
    %513 = arith.subf %512, %511 : vector<8x128xf32>
    %514 = math.exp %513 : vector<8x128xf32>
    %cst_180 = arith.constant 1.000000e+00 : f32
    %515 = vector.broadcast %cst_180 : f32 to vector<8x128xf32>
    %516 = arith.addf %515, %514 : vector<8x128xf32>
    %cst_181 = arith.constant 1.000000e+00 : f32
    %517 = vector.broadcast %cst_181 : f32 to vector<8x128xf32>
    %518 = arith.divf %517, %516 : vector<8x128xf32>
    %519 = arith.mulf %508, %411 : vector<8x128xf32>
    %520 = arith.mulf %500, %510 : vector<8x128xf32>
    %521 = arith.addf %519, %520 : vector<8x128xf32>
    %522 = math.tanh %521 : vector<8x128xf32>
    %523 = arith.mulf %518, %522 : vector<8x128xf32>
    %cst_182 = arith.constant dense<0.000000e+00> : vector<8x512xf32>
    %524 = tpu.matmul %523, %6, %cst_182 {dimension_numbers = #tpu.dot_dimension_numbers<[1], [0], [0], [1], [0, 0, 1, 1], [], []>} : vector<8x128xf32>, vector<128x512xf32>, vector<8x512xf32> -> vector<8x512xf32>
    %525 = vector.broadcast %8 : vector<1x512xf32> to vector<8x512xf32>
    %526 = arith.addf %524, %525 : vector<8x512xf32>
    %cst_183 = arith.constant dense<0.000000e+00> : vector<8x512xf32>
    %527 = tpu.matmul %449, %7, %cst_183 {dimension_numbers = #tpu.dot_dimension_numbers<[1], [0], [0], [1], [0, 0, 1, 1], [], []>} : vector<8x128xf32>, vector<128x512xf32>, vector<8x512xf32> -> vector<8x512xf32>
    %528 = arith.addf %526, %527 : vector<8x512xf32>
    %529 = vector.extract_strided_slice %528 {offsets = [0, 0], sizes = [8, 128], strides = [1, 1]} : vector<8x512xf32> to vector<8x128xf32>
    %cst_184 = arith.constant 0.000000e+00 : f32
    %530 = vector.broadcast %cst_184 : f32 to vector<8x128xf32>
    %531 = arith.subf %530, %529 : vector<8x128xf32>
    %532 = math.exp %531 : vector<8x128xf32>
    %cst_185 = arith.constant 1.000000e+00 : f32
    %533 = vector.broadcast %cst_185 : f32 to vector<8x128xf32>
    %534 = arith.addf %533, %532 : vector<8x128xf32>
    %cst_186 = arith.constant 1.000000e+00 : f32
    %535 = vector.broadcast %cst_186 : f32 to vector<8x128xf32>
    %536 = arith.divf %535, %534 : vector<8x128xf32>
    %537 = vector.extract_strided_slice %528 {offsets = [0, 128], sizes = [8, 128], strides = [1, 1]} : vector<8x512xf32> to vector<8x128xf32>
    %cst_187 = arith.constant 0.000000e+00 : f32
    %538 = vector.broadcast %cst_187 : f32 to vector<8x128xf32>
    %539 = arith.subf %538, %537 : vector<8x128xf32>
    %540 = math.exp %539 : vector<8x128xf32>
    %cst_188 = arith.constant 1.000000e+00 : f32
    %541 = vector.broadcast %cst_188 : f32 to vector<8x128xf32>
    %542 = arith.addf %541, %540 : vector<8x128xf32>
    %cst_189 = arith.constant 1.000000e+00 : f32
    %543 = vector.broadcast %cst_189 : f32 to vector<8x128xf32>
    %544 = arith.divf %543, %542 : vector<8x128xf32>
    %545 = vector.extract_strided_slice %528 {offsets = [0, 256], sizes = [8, 128], strides = [1, 1]} : vector<8x512xf32> to vector<8x128xf32>
    %546 = math.tanh %545 : vector<8x128xf32>
    %547 = vector.extract_strided_slice %528 {offsets = [0, 384], sizes = [8, 128], strides = [1, 1]} : vector<8x512xf32> to vector<8x128xf32>
    %cst_190 = arith.constant 0.000000e+00 : f32
    %548 = vector.broadcast %cst_190 : f32 to vector<8x128xf32>
    %549 = arith.subf %548, %547 : vector<8x128xf32>
    %550 = math.exp %549 : vector<8x128xf32>
    %cst_191 = arith.constant 1.000000e+00 : f32
    %551 = vector.broadcast %cst_191 : f32 to vector<8x128xf32>
    %552 = arith.addf %551, %550 : vector<8x128xf32>
    %cst_192 = arith.constant 1.000000e+00 : f32
    %553 = vector.broadcast %cst_192 : f32 to vector<8x128xf32>
    %554 = arith.divf %553, %552 : vector<8x128xf32>
    %555 = arith.mulf %544, %447 : vector<8x128xf32>
    %556 = arith.mulf %536, %546 : vector<8x128xf32>
    %557 = arith.addf %555, %556 : vector<8x128xf32>
    %558 = math.tanh %557 : vector<8x128xf32>
    %559 = arith.mulf %554, %558 : vector<8x128xf32>
    %c5 = arith.constant 5 : index
    %c0_193 = arith.constant 0 : index
    %c0_194 = arith.constant 0 : index
    %560 = vector.load %arg1[%c5, %c0_193, %c0_194] : memref<8x8x32xf32, #tpu.memory_space<vmem>>, vector<1x8x32xf32>
    %561 = vector.shape_cast %560 : vector<1x8x32xf32> to vector<8x32xf32>
    %cst_195 = arith.constant dense<0.000000e+00> : vector<8x512xf32>
    %562 = tpu.matmul %561, %0, %cst_195 {dimension_numbers = #tpu.dot_dimension_numbers<[1], [0], [0], [1], [0, 0, 1, 1], [], []>} : vector<8x32xf32>, vector<32x512xf32>, vector<8x512xf32> -> vector<8x512xf32>
    %563 = vector.broadcast %2 : vector<1x512xf32> to vector<8x512xf32>
    %564 = arith.addf %562, %563 : vector<8x512xf32>
    %cst_196 = arith.constant dense<0.000000e+00> : vector<8x512xf32>
    %565 = tpu.matmul %487, %1, %cst_196 {dimension_numbers = #tpu.dot_dimension_numbers<[1], [0], [0], [1], [0, 0, 1, 1], [], []>} : vector<8x128xf32>, vector<128x512xf32>, vector<8x512xf32> -> vector<8x512xf32>
    %566 = arith.addf %564, %565 : vector<8x512xf32>
    %567 = vector.extract_strided_slice %566 {offsets = [0, 0], sizes = [8, 128], strides = [1, 1]} : vector<8x512xf32> to vector<8x128xf32>
    %cst_197 = arith.constant 0.000000e+00 : f32
    %568 = vector.broadcast %cst_197 : f32 to vector<8x128xf32>
    %569 = arith.subf %568, %567 : vector<8x128xf32>
    %570 = math.exp %569 : vector<8x128xf32>
    %cst_198 = arith.constant 1.000000e+00 : f32
    %571 = vector.broadcast %cst_198 : f32 to vector<8x128xf32>
    %572 = arith.addf %571, %570 : vector<8x128xf32>
    %cst_199 = arith.constant 1.000000e+00 : f32
    %573 = vector.broadcast %cst_199 : f32 to vector<8x128xf32>
    %574 = arith.divf %573, %572 : vector<8x128xf32>
    %575 = vector.extract_strided_slice %566 {offsets = [0, 128], sizes = [8, 128], strides = [1, 1]} : vector<8x512xf32> to vector<8x128xf32>
    %cst_200 = arith.constant 0.000000e+00 : f32
    %576 = vector.broadcast %cst_200 : f32 to vector<8x128xf32>
    %577 = arith.subf %576, %575 : vector<8x128xf32>
    %578 = math.exp %577 : vector<8x128xf32>
    %cst_201 = arith.constant 1.000000e+00 : f32
    %579 = vector.broadcast %cst_201 : f32 to vector<8x128xf32>
    %580 = arith.addf %579, %578 : vector<8x128xf32>
    %cst_202 = arith.constant 1.000000e+00 : f32
    %581 = vector.broadcast %cst_202 : f32 to vector<8x128xf32>
    %582 = arith.divf %581, %580 : vector<8x128xf32>
    %583 = vector.extract_strided_slice %566 {offsets = [0, 256], sizes = [8, 128], strides = [1, 1]} : vector<8x512xf32> to vector<8x128xf32>
    %584 = math.tanh %583 : vector<8x128xf32>
    %585 = vector.extract_strided_slice %566 {offsets = [0, 384], sizes = [8, 128], strides = [1, 1]} : vector<8x512xf32> to vector<8x128xf32>
    %cst_203 = arith.constant 0.000000e+00 : f32
    %586 = vector.broadcast %cst_203 : f32 to vector<8x128xf32>
    %587 = arith.subf %586, %585 : vector<8x128xf32>
    %588 = math.exp %587 : vector<8x128xf32>
    %cst_204 = arith.constant 1.000000e+00 : f32
    %589 = vector.broadcast %cst_204 : f32 to vector<8x128xf32>
    %590 = arith.addf %589, %588 : vector<8x128xf32>
    %cst_205 = arith.constant 1.000000e+00 : f32
    %591 = vector.broadcast %cst_205 : f32 to vector<8x128xf32>
    %592 = arith.divf %591, %590 : vector<8x128xf32>
    %593 = arith.mulf %582, %485 : vector<8x128xf32>
    %594 = arith.mulf %574, %584 : vector<8x128xf32>
    %595 = arith.addf %593, %594 : vector<8x128xf32>
    %596 = math.tanh %595 : vector<8x128xf32>
    %597 = arith.mulf %592, %596 : vector<8x128xf32>
    %cst_206 = arith.constant dense<0.000000e+00> : vector<8x512xf32>
    %598 = tpu.matmul %597, %3, %cst_206 {dimension_numbers = #tpu.dot_dimension_numbers<[1], [0], [0], [1], [0, 0, 1, 1], [], []>} : vector<8x128xf32>, vector<128x512xf32>, vector<8x512xf32> -> vector<8x512xf32>
    %599 = vector.broadcast %5 : vector<1x512xf32> to vector<8x512xf32>
    %600 = arith.addf %598, %599 : vector<8x512xf32>
    %cst_207 = arith.constant dense<0.000000e+00> : vector<8x512xf32>
    %601 = tpu.matmul %523, %4, %cst_207 {dimension_numbers = #tpu.dot_dimension_numbers<[1], [0], [0], [1], [0, 0, 1, 1], [], []>} : vector<8x128xf32>, vector<128x512xf32>, vector<8x512xf32> -> vector<8x512xf32>
    %602 = arith.addf %600, %601 : vector<8x512xf32>
    %603 = vector.extract_strided_slice %602 {offsets = [0, 0], sizes = [8, 128], strides = [1, 1]} : vector<8x512xf32> to vector<8x128xf32>
    %cst_208 = arith.constant 0.000000e+00 : f32
    %604 = vector.broadcast %cst_208 : f32 to vector<8x128xf32>
    %605 = arith.subf %604, %603 : vector<8x128xf32>
    %606 = math.exp %605 : vector<8x128xf32>
    %cst_209 = arith.constant 1.000000e+00 : f32
    %607 = vector.broadcast %cst_209 : f32 to vector<8x128xf32>
    %608 = arith.addf %607, %606 : vector<8x128xf32>
    %cst_210 = arith.constant 1.000000e+00 : f32
    %609 = vector.broadcast %cst_210 : f32 to vector<8x128xf32>
    %610 = arith.divf %609, %608 : vector<8x128xf32>
    %611 = vector.extract_strided_slice %602 {offsets = [0, 128], sizes = [8, 128], strides = [1, 1]} : vector<8x512xf32> to vector<8x128xf32>
    %cst_211 = arith.constant 0.000000e+00 : f32
    %612 = vector.broadcast %cst_211 : f32 to vector<8x128xf32>
    %613 = arith.subf %612, %611 : vector<8x128xf32>
    %614 = math.exp %613 : vector<8x128xf32>
    %cst_212 = arith.constant 1.000000e+00 : f32
    %615 = vector.broadcast %cst_212 : f32 to vector<8x128xf32>
    %616 = arith.addf %615, %614 : vector<8x128xf32>
    %cst_213 = arith.constant 1.000000e+00 : f32
    %617 = vector.broadcast %cst_213 : f32 to vector<8x128xf32>
    %618 = arith.divf %617, %616 : vector<8x128xf32>
    %619 = vector.extract_strided_slice %602 {offsets = [0, 256], sizes = [8, 128], strides = [1, 1]} : vector<8x512xf32> to vector<8x128xf32>
    %620 = math.tanh %619 : vector<8x128xf32>
    %621 = vector.extract_strided_slice %602 {offsets = [0, 384], sizes = [8, 128], strides = [1, 1]} : vector<8x512xf32> to vector<8x128xf32>
    %cst_214 = arith.constant 0.000000e+00 : f32
    %622 = vector.broadcast %cst_214 : f32 to vector<8x128xf32>
    %623 = arith.subf %622, %621 : vector<8x128xf32>
    %624 = math.exp %623 : vector<8x128xf32>
    %cst_215 = arith.constant 1.000000e+00 : f32
    %625 = vector.broadcast %cst_215 : f32 to vector<8x128xf32>
    %626 = arith.addf %625, %624 : vector<8x128xf32>
    %cst_216 = arith.constant 1.000000e+00 : f32
    %627 = vector.broadcast %cst_216 : f32 to vector<8x128xf32>
    %628 = arith.divf %627, %626 : vector<8x128xf32>
    %629 = arith.mulf %618, %521 : vector<8x128xf32>
    %630 = arith.mulf %610, %620 : vector<8x128xf32>
    %631 = arith.addf %629, %630 : vector<8x128xf32>
    %632 = math.tanh %631 : vector<8x128xf32>
    %633 = arith.mulf %628, %632 : vector<8x128xf32>
    %cst_217 = arith.constant dense<0.000000e+00> : vector<8x512xf32>
    %634 = tpu.matmul %633, %6, %cst_217 {dimension_numbers = #tpu.dot_dimension_numbers<[1], [0], [0], [1], [0, 0, 1, 1], [], []>} : vector<8x128xf32>, vector<128x512xf32>, vector<8x512xf32> -> vector<8x512xf32>
    %635 = vector.broadcast %8 : vector<1x512xf32> to vector<8x512xf32>
    %636 = arith.addf %634, %635 : vector<8x512xf32>
    %cst_218 = arith.constant dense<0.000000e+00> : vector<8x512xf32>
    %637 = tpu.matmul %559, %7, %cst_218 {dimension_numbers = #tpu.dot_dimension_numbers<[1], [0], [0], [1], [0, 0, 1, 1], [], []>} : vector<8x128xf32>, vector<128x512xf32>, vector<8x512xf32> -> vector<8x512xf32>
    %638 = arith.addf %636, %637 : vector<8x512xf32>
    %639 = vector.extract_strided_slice %638 {offsets = [0, 0], sizes = [8, 128], strides = [1, 1]} : vector<8x512xf32> to vector<8x128xf32>
    %cst_219 = arith.constant 0.000000e+00 : f32
    %640 = vector.broadcast %cst_219 : f32 to vector<8x128xf32>
    %641 = arith.subf %640, %639 : vector<8x128xf32>
    %642 = math.exp %641 : vector<8x128xf32>
    %cst_220 = arith.constant 1.000000e+00 : f32
    %643 = vector.broadcast %cst_220 : f32 to vector<8x128xf32>
    %644 = arith.addf %643, %642 : vector<8x128xf32>
    %cst_221 = arith.constant 1.000000e+00 : f32
    %645 = vector.broadcast %cst_221 : f32 to vector<8x128xf32>
    %646 = arith.divf %645, %644 : vector<8x128xf32>
    %647 = vector.extract_strided_slice %638 {offsets = [0, 128], sizes = [8, 128], strides = [1, 1]} : vector<8x512xf32> to vector<8x128xf32>
    %cst_222 = arith.constant 0.000000e+00 : f32
    %648 = vector.broadcast %cst_222 : f32 to vector<8x128xf32>
    %649 = arith.subf %648, %647 : vector<8x128xf32>
    %650 = math.exp %649 : vector<8x128xf32>
    %cst_223 = arith.constant 1.000000e+00 : f32
    %651 = vector.broadcast %cst_223 : f32 to vector<8x128xf32>
    %652 = arith.addf %651, %650 : vector<8x128xf32>
    %cst_224 = arith.constant 1.000000e+00 : f32
    %653 = vector.broadcast %cst_224 : f32 to vector<8x128xf32>
    %654 = arith.divf %653, %652 : vector<8x128xf32>
    %655 = vector.extract_strided_slice %638 {offsets = [0, 256], sizes = [8, 128], strides = [1, 1]} : vector<8x512xf32> to vector<8x128xf32>
    %656 = math.tanh %655 : vector<8x128xf32>
    %657 = vector.extract_strided_slice %638 {offsets = [0, 384], sizes = [8, 128], strides = [1, 1]} : vector<8x512xf32> to vector<8x128xf32>
    %cst_225 = arith.constant 0.000000e+00 : f32
    %658 = vector.broadcast %cst_225 : f32 to vector<8x128xf32>
    %659 = arith.subf %658, %657 : vector<8x128xf32>
    %660 = math.exp %659 : vector<8x128xf32>
    %cst_226 = arith.constant 1.000000e+00 : f32
    %661 = vector.broadcast %cst_226 : f32 to vector<8x128xf32>
    %662 = arith.addf %661, %660 : vector<8x128xf32>
    %cst_227 = arith.constant 1.000000e+00 : f32
    %663 = vector.broadcast %cst_227 : f32 to vector<8x128xf32>
    %664 = arith.divf %663, %662 : vector<8x128xf32>
    %665 = arith.mulf %654, %557 : vector<8x128xf32>
    %666 = arith.mulf %646, %656 : vector<8x128xf32>
    %667 = arith.addf %665, %666 : vector<8x128xf32>
    %668 = math.tanh %667 : vector<8x128xf32>
    %669 = arith.mulf %664, %668 : vector<8x128xf32>
    %c6 = arith.constant 6 : index
    %c0_228 = arith.constant 0 : index
    %c0_229 = arith.constant 0 : index
    %670 = vector.load %arg1[%c6, %c0_228, %c0_229] : memref<8x8x32xf32, #tpu.memory_space<vmem>>, vector<1x8x32xf32>
    %671 = vector.shape_cast %670 : vector<1x8x32xf32> to vector<8x32xf32>
    %cst_230 = arith.constant dense<0.000000e+00> : vector<8x512xf32>
    %672 = tpu.matmul %671, %0, %cst_230 {dimension_numbers = #tpu.dot_dimension_numbers<[1], [0], [0], [1], [0, 0, 1, 1], [], []>} : vector<8x32xf32>, vector<32x512xf32>, vector<8x512xf32> -> vector<8x512xf32>
    %673 = vector.broadcast %2 : vector<1x512xf32> to vector<8x512xf32>
    %674 = arith.addf %672, %673 : vector<8x512xf32>
    %cst_231 = arith.constant dense<0.000000e+00> : vector<8x512xf32>
    %675 = tpu.matmul %597, %1, %cst_231 {dimension_numbers = #tpu.dot_dimension_numbers<[1], [0], [0], [1], [0, 0, 1, 1], [], []>} : vector<8x128xf32>, vector<128x512xf32>, vector<8x512xf32> -> vector<8x512xf32>
    %676 = arith.addf %674, %675 : vector<8x512xf32>
    %677 = vector.extract_strided_slice %676 {offsets = [0, 0], sizes = [8, 128], strides = [1, 1]} : vector<8x512xf32> to vector<8x128xf32>
    %cst_232 = arith.constant 0.000000e+00 : f32
    %678 = vector.broadcast %cst_232 : f32 to vector<8x128xf32>
    %679 = arith.subf %678, %677 : vector<8x128xf32>
    %680 = math.exp %679 : vector<8x128xf32>
    %cst_233 = arith.constant 1.000000e+00 : f32
    %681 = vector.broadcast %cst_233 : f32 to vector<8x128xf32>
    %682 = arith.addf %681, %680 : vector<8x128xf32>
    %cst_234 = arith.constant 1.000000e+00 : f32
    %683 = vector.broadcast %cst_234 : f32 to vector<8x128xf32>
    %684 = arith.divf %683, %682 : vector<8x128xf32>
    %685 = vector.extract_strided_slice %676 {offsets = [0, 128], sizes = [8, 128], strides = [1, 1]} : vector<8x512xf32> to vector<8x128xf32>
    %cst_235 = arith.constant 0.000000e+00 : f32
    %686 = vector.broadcast %cst_235 : f32 to vector<8x128xf32>
    %687 = arith.subf %686, %685 : vector<8x128xf32>
    %688 = math.exp %687 : vector<8x128xf32>
    %cst_236 = arith.constant 1.000000e+00 : f32
    %689 = vector.broadcast %cst_236 : f32 to vector<8x128xf32>
    %690 = arith.addf %689, %688 : vector<8x128xf32>
    %cst_237 = arith.constant 1.000000e+00 : f32
    %691 = vector.broadcast %cst_237 : f32 to vector<8x128xf32>
    %692 = arith.divf %691, %690 : vector<8x128xf32>
    %693 = vector.extract_strided_slice %676 {offsets = [0, 256], sizes = [8, 128], strides = [1, 1]} : vector<8x512xf32> to vector<8x128xf32>
    %694 = math.tanh %693 : vector<8x128xf32>
    %695 = vector.extract_strided_slice %676 {offsets = [0, 384], sizes = [8, 128], strides = [1, 1]} : vector<8x512xf32> to vector<8x128xf32>
    %cst_238 = arith.constant 0.000000e+00 : f32
    %696 = vector.broadcast %cst_238 : f32 to vector<8x128xf32>
    %697 = arith.subf %696, %695 : vector<8x128xf32>
    %698 = math.exp %697 : vector<8x128xf32>
    %cst_239 = arith.constant 1.000000e+00 : f32
    %699 = vector.broadcast %cst_239 : f32 to vector<8x128xf32>
    %700 = arith.addf %699, %698 : vector<8x128xf32>
    %cst_240 = arith.constant 1.000000e+00 : f32
    %701 = vector.broadcast %cst_240 : f32 to vector<8x128xf32>
    %702 = arith.divf %701, %700 : vector<8x128xf32>
    %703 = arith.mulf %692, %595 : vector<8x128xf32>
    %704 = arith.mulf %684, %694 : vector<8x128xf32>
    %705 = arith.addf %703, %704 : vector<8x128xf32>
    %706 = math.tanh %705 : vector<8x128xf32>
    %707 = arith.mulf %702, %706 : vector<8x128xf32>
    %cst_241 = arith.constant dense<0.000000e+00> : vector<8x512xf32>
    %708 = tpu.matmul %707, %3, %cst_241 {dimension_numbers = #tpu.dot_dimension_numbers<[1], [0], [0], [1], [0, 0, 1, 1], [], []>} : vector<8x128xf32>, vector<128x512xf32>, vector<8x512xf32> -> vector<8x512xf32>
    %709 = vector.broadcast %5 : vector<1x512xf32> to vector<8x512xf32>
    %710 = arith.addf %708, %709 : vector<8x512xf32>
    %cst_242 = arith.constant dense<0.000000e+00> : vector<8x512xf32>
    %711 = tpu.matmul %633, %4, %cst_242 {dimension_numbers = #tpu.dot_dimension_numbers<[1], [0], [0], [1], [0, 0, 1, 1], [], []>} : vector<8x128xf32>, vector<128x512xf32>, vector<8x512xf32> -> vector<8x512xf32>
    %712 = arith.addf %710, %711 : vector<8x512xf32>
    %713 = vector.extract_strided_slice %712 {offsets = [0, 0], sizes = [8, 128], strides = [1, 1]} : vector<8x512xf32> to vector<8x128xf32>
    %cst_243 = arith.constant 0.000000e+00 : f32
    %714 = vector.broadcast %cst_243 : f32 to vector<8x128xf32>
    %715 = arith.subf %714, %713 : vector<8x128xf32>
    %716 = math.exp %715 : vector<8x128xf32>
    %cst_244 = arith.constant 1.000000e+00 : f32
    %717 = vector.broadcast %cst_244 : f32 to vector<8x128xf32>
    %718 = arith.addf %717, %716 : vector<8x128xf32>
    %cst_245 = arith.constant 1.000000e+00 : f32
    %719 = vector.broadcast %cst_245 : f32 to vector<8x128xf32>
    %720 = arith.divf %719, %718 : vector<8x128xf32>
    %721 = vector.extract_strided_slice %712 {offsets = [0, 128], sizes = [8, 128], strides = [1, 1]} : vector<8x512xf32> to vector<8x128xf32>
    %cst_246 = arith.constant 0.000000e+00 : f32
    %722 = vector.broadcast %cst_246 : f32 to vector<8x128xf32>
    %723 = arith.subf %722, %721 : vector<8x128xf32>
    %724 = math.exp %723 : vector<8x128xf32>
    %cst_247 = arith.constant 1.000000e+00 : f32
    %725 = vector.broadcast %cst_247 : f32 to vector<8x128xf32>
    %726 = arith.addf %725, %724 : vector<8x128xf32>
    %cst_248 = arith.constant 1.000000e+00 : f32
    %727 = vector.broadcast %cst_248 : f32 to vector<8x128xf32>
    %728 = arith.divf %727, %726 : vector<8x128xf32>
    %729 = vector.extract_strided_slice %712 {offsets = [0, 256], sizes = [8, 128], strides = [1, 1]} : vector<8x512xf32> to vector<8x128xf32>
    %730 = math.tanh %729 : vector<8x128xf32>
    %731 = vector.extract_strided_slice %712 {offsets = [0, 384], sizes = [8, 128], strides = [1, 1]} : vector<8x512xf32> to vector<8x128xf32>
    %cst_249 = arith.constant 0.000000e+00 : f32
    %732 = vector.broadcast %cst_249 : f32 to vector<8x128xf32>
    %733 = arith.subf %732, %731 : vector<8x128xf32>
    %734 = math.exp %733 : vector<8x128xf32>
    %cst_250 = arith.constant 1.000000e+00 : f32
    %735 = vector.broadcast %cst_250 : f32 to vector<8x128xf32>
    %736 = arith.addf %735, %734 : vector<8x128xf32>
    %cst_251 = arith.constant 1.000000e+00 : f32
    %737 = vector.broadcast %cst_251 : f32 to vector<8x128xf32>
    %738 = arith.divf %737, %736 : vector<8x128xf32>
    %739 = arith.mulf %728, %631 : vector<8x128xf32>
    %740 = arith.mulf %720, %730 : vector<8x128xf32>
    %741 = arith.addf %739, %740 : vector<8x128xf32>
    %742 = math.tanh %741 : vector<8x128xf32>
    %743 = arith.mulf %738, %742 : vector<8x128xf32>
    %cst_252 = arith.constant dense<0.000000e+00> : vector<8x512xf32>
    %744 = tpu.matmul %743, %6, %cst_252 {dimension_numbers = #tpu.dot_dimension_numbers<[1], [0], [0], [1], [0, 0, 1, 1], [], []>} : vector<8x128xf32>, vector<128x512xf32>, vector<8x512xf32> -> vector<8x512xf32>
    %745 = vector.broadcast %8 : vector<1x512xf32> to vector<8x512xf32>
    %746 = arith.addf %744, %745 : vector<8x512xf32>
    %cst_253 = arith.constant dense<0.000000e+00> : vector<8x512xf32>
    %747 = tpu.matmul %669, %7, %cst_253 {dimension_numbers = #tpu.dot_dimension_numbers<[1], [0], [0], [1], [0, 0, 1, 1], [], []>} : vector<8x128xf32>, vector<128x512xf32>, vector<8x512xf32> -> vector<8x512xf32>
    %748 = arith.addf %746, %747 : vector<8x512xf32>
    %749 = vector.extract_strided_slice %748 {offsets = [0, 0], sizes = [8, 128], strides = [1, 1]} : vector<8x512xf32> to vector<8x128xf32>
    %cst_254 = arith.constant 0.000000e+00 : f32
    %750 = vector.broadcast %cst_254 : f32 to vector<8x128xf32>
    %751 = arith.subf %750, %749 : vector<8x128xf32>
    %752 = math.exp %751 : vector<8x128xf32>
    %cst_255 = arith.constant 1.000000e+00 : f32
    %753 = vector.broadcast %cst_255 : f32 to vector<8x128xf32>
    %754 = arith.addf %753, %752 : vector<8x128xf32>
    %cst_256 = arith.constant 1.000000e+00 : f32
    %755 = vector.broadcast %cst_256 : f32 to vector<8x128xf32>
    %756 = arith.divf %755, %754 : vector<8x128xf32>
    %757 = vector.extract_strided_slice %748 {offsets = [0, 128], sizes = [8, 128], strides = [1, 1]} : vector<8x512xf32> to vector<8x128xf32>
    %cst_257 = arith.constant 0.000000e+00 : f32
    %758 = vector.broadcast %cst_257 : f32 to vector<8x128xf32>
    %759 = arith.subf %758, %757 : vector<8x128xf32>
    %760 = math.exp %759 : vector<8x128xf32>
    %cst_258 = arith.constant 1.000000e+00 : f32
    %761 = vector.broadcast %cst_258 : f32 to vector<8x128xf32>
    %762 = arith.addf %761, %760 : vector<8x128xf32>
    %cst_259 = arith.constant 1.000000e+00 : f32
    %763 = vector.broadcast %cst_259 : f32 to vector<8x128xf32>
    %764 = arith.divf %763, %762 : vector<8x128xf32>
    %765 = vector.extract_strided_slice %748 {offsets = [0, 256], sizes = [8, 128], strides = [1, 1]} : vector<8x512xf32> to vector<8x128xf32>
    %766 = math.tanh %765 : vector<8x128xf32>
    %767 = vector.extract_strided_slice %748 {offsets = [0, 384], sizes = [8, 128], strides = [1, 1]} : vector<8x512xf32> to vector<8x128xf32>
    %cst_260 = arith.constant 0.000000e+00 : f32
    %768 = vector.broadcast %cst_260 : f32 to vector<8x128xf32>
    %769 = arith.subf %768, %767 : vector<8x128xf32>
    %770 = math.exp %769 : vector<8x128xf32>
    %cst_261 = arith.constant 1.000000e+00 : f32
    %771 = vector.broadcast %cst_261 : f32 to vector<8x128xf32>
    %772 = arith.addf %771, %770 : vector<8x128xf32>
    %cst_262 = arith.constant 1.000000e+00 : f32
    %773 = vector.broadcast %cst_262 : f32 to vector<8x128xf32>
    %774 = arith.divf %773, %772 : vector<8x128xf32>
    %775 = arith.mulf %764, %667 : vector<8x128xf32>
    %776 = arith.mulf %756, %766 : vector<8x128xf32>
    %777 = arith.addf %775, %776 : vector<8x128xf32>
    %778 = math.tanh %777 : vector<8x128xf32>
    %779 = arith.mulf %774, %778 : vector<8x128xf32>
    %c7 = arith.constant 7 : index
    %c0_263 = arith.constant 0 : index
    %c0_264 = arith.constant 0 : index
    %780 = vector.load %arg1[%c7, %c0_263, %c0_264] : memref<8x8x32xf32, #tpu.memory_space<vmem>>, vector<1x8x32xf32>
    %781 = vector.shape_cast %780 : vector<1x8x32xf32> to vector<8x32xf32>
    %cst_265 = arith.constant dense<0.000000e+00> : vector<8x512xf32>
    %782 = tpu.matmul %781, %0, %cst_265 {dimension_numbers = #tpu.dot_dimension_numbers<[1], [0], [0], [1], [0, 0, 1, 1], [], []>} : vector<8x32xf32>, vector<32x512xf32>, vector<8x512xf32> -> vector<8x512xf32>
    %783 = vector.broadcast %2 : vector<1x512xf32> to vector<8x512xf32>
    %784 = arith.addf %782, %783 : vector<8x512xf32>
    %cst_266 = arith.constant dense<0.000000e+00> : vector<8x512xf32>
    %785 = tpu.matmul %707, %1, %cst_266 {dimension_numbers = #tpu.dot_dimension_numbers<[1], [0], [0], [1], [0, 0, 1, 1], [], []>} : vector<8x128xf32>, vector<128x512xf32>, vector<8x512xf32> -> vector<8x512xf32>
    %786 = arith.addf %784, %785 : vector<8x512xf32>
    %787 = vector.extract_strided_slice %786 {offsets = [0, 0], sizes = [8, 128], strides = [1, 1]} : vector<8x512xf32> to vector<8x128xf32>
    %cst_267 = arith.constant 0.000000e+00 : f32
    %788 = vector.broadcast %cst_267 : f32 to vector<8x128xf32>
    %789 = arith.subf %788, %787 : vector<8x128xf32>
    %790 = math.exp %789 : vector<8x128xf32>
    %cst_268 = arith.constant 1.000000e+00 : f32
    %791 = vector.broadcast %cst_268 : f32 to vector<8x128xf32>
    %792 = arith.addf %791, %790 : vector<8x128xf32>
    %cst_269 = arith.constant 1.000000e+00 : f32
    %793 = vector.broadcast %cst_269 : f32 to vector<8x128xf32>
    %794 = arith.divf %793, %792 : vector<8x128xf32>
    %795 = vector.extract_strided_slice %786 {offsets = [0, 128], sizes = [8, 128], strides = [1, 1]} : vector<8x512xf32> to vector<8x128xf32>
    %cst_270 = arith.constant 0.000000e+00 : f32
    %796 = vector.broadcast %cst_270 : f32 to vector<8x128xf32>
    %797 = arith.subf %796, %795 : vector<8x128xf32>
    %798 = math.exp %797 : vector<8x128xf32>
    %cst_271 = arith.constant 1.000000e+00 : f32
    %799 = vector.broadcast %cst_271 : f32 to vector<8x128xf32>
    %800 = arith.addf %799, %798 : vector<8x128xf32>
    %cst_272 = arith.constant 1.000000e+00 : f32
    %801 = vector.broadcast %cst_272 : f32 to vector<8x128xf32>
    %802 = arith.divf %801, %800 : vector<8x128xf32>
    %803 = vector.extract_strided_slice %786 {offsets = [0, 256], sizes = [8, 128], strides = [1, 1]} : vector<8x512xf32> to vector<8x128xf32>
    %804 = math.tanh %803 : vector<8x128xf32>
    %805 = vector.extract_strided_slice %786 {offsets = [0, 384], sizes = [8, 128], strides = [1, 1]} : vector<8x512xf32> to vector<8x128xf32>
    %cst_273 = arith.constant 0.000000e+00 : f32
    %806 = vector.broadcast %cst_273 : f32 to vector<8x128xf32>
    %807 = arith.subf %806, %805 : vector<8x128xf32>
    %808 = math.exp %807 : vector<8x128xf32>
    %cst_274 = arith.constant 1.000000e+00 : f32
    %809 = vector.broadcast %cst_274 : f32 to vector<8x128xf32>
    %810 = arith.addf %809, %808 : vector<8x128xf32>
    %cst_275 = arith.constant 1.000000e+00 : f32
    %811 = vector.broadcast %cst_275 : f32 to vector<8x128xf32>
    %812 = arith.divf %811, %810 : vector<8x128xf32>
    %813 = arith.mulf %802, %705 : vector<8x128xf32>
    %814 = arith.mulf %794, %804 : vector<8x128xf32>
    %815 = arith.addf %813, %814 : vector<8x128xf32>
    %816 = math.tanh %815 : vector<8x128xf32>
    %817 = arith.mulf %812, %816 : vector<8x128xf32>
    %cst_276 = arith.constant dense<0.000000e+00> : vector<8x512xf32>
    %818 = tpu.matmul %817, %3, %cst_276 {dimension_numbers = #tpu.dot_dimension_numbers<[1], [0], [0], [1], [0, 0, 1, 1], [], []>} : vector<8x128xf32>, vector<128x512xf32>, vector<8x512xf32> -> vector<8x512xf32>
    %819 = vector.broadcast %5 : vector<1x512xf32> to vector<8x512xf32>
    %820 = arith.addf %818, %819 : vector<8x512xf32>
    %cst_277 = arith.constant dense<0.000000e+00> : vector<8x512xf32>
    %821 = tpu.matmul %743, %4, %cst_277 {dimension_numbers = #tpu.dot_dimension_numbers<[1], [0], [0], [1], [0, 0, 1, 1], [], []>} : vector<8x128xf32>, vector<128x512xf32>, vector<8x512xf32> -> vector<8x512xf32>
    %822 = arith.addf %820, %821 : vector<8x512xf32>
    %823 = vector.extract_strided_slice %822 {offsets = [0, 0], sizes = [8, 128], strides = [1, 1]} : vector<8x512xf32> to vector<8x128xf32>
    %cst_278 = arith.constant 0.000000e+00 : f32
    %824 = vector.broadcast %cst_278 : f32 to vector<8x128xf32>
    %825 = arith.subf %824, %823 : vector<8x128xf32>
    %826 = math.exp %825 : vector<8x128xf32>
    %cst_279 = arith.constant 1.000000e+00 : f32
    %827 = vector.broadcast %cst_279 : f32 to vector<8x128xf32>
    %828 = arith.addf %827, %826 : vector<8x128xf32>
    %cst_280 = arith.constant 1.000000e+00 : f32
    %829 = vector.broadcast %cst_280 : f32 to vector<8x128xf32>
    %830 = arith.divf %829, %828 : vector<8x128xf32>
    %831 = vector.extract_strided_slice %822 {offsets = [0, 128], sizes = [8, 128], strides = [1, 1]} : vector<8x512xf32> to vector<8x128xf32>
    %cst_281 = arith.constant 0.000000e+00 : f32
    %832 = vector.broadcast %cst_281 : f32 to vector<8x128xf32>
    %833 = arith.subf %832, %831 : vector<8x128xf32>
    %834 = math.exp %833 : vector<8x128xf32>
    %cst_282 = arith.constant 1.000000e+00 : f32
    %835 = vector.broadcast %cst_282 : f32 to vector<8x128xf32>
    %836 = arith.addf %835, %834 : vector<8x128xf32>
    %cst_283 = arith.constant 1.000000e+00 : f32
    %837 = vector.broadcast %cst_283 : f32 to vector<8x128xf32>
    %838 = arith.divf %837, %836 : vector<8x128xf32>
    %839 = vector.extract_strided_slice %822 {offsets = [0, 256], sizes = [8, 128], strides = [1, 1]} : vector<8x512xf32> to vector<8x128xf32>
    %840 = math.tanh %839 : vector<8x128xf32>
    %841 = vector.extract_strided_slice %822 {offsets = [0, 384], sizes = [8, 128], strides = [1, 1]} : vector<8x512xf32> to vector<8x128xf32>
    %cst_284 = arith.constant 0.000000e+00 : f32
    %842 = vector.broadcast %cst_284 : f32 to vector<8x128xf32>
    %843 = arith.subf %842, %841 : vector<8x128xf32>
    %844 = math.exp %843 : vector<8x128xf32>
    %cst_285 = arith.constant 1.000000e+00 : f32
    %845 = vector.broadcast %cst_285 : f32 to vector<8x128xf32>
    %846 = arith.addf %845, %844 : vector<8x128xf32>
    %cst_286 = arith.constant 1.000000e+00 : f32
    %847 = vector.broadcast %cst_286 : f32 to vector<8x128xf32>
    %848 = arith.divf %847, %846 : vector<8x128xf32>
    %849 = arith.mulf %838, %741 : vector<8x128xf32>
    %850 = arith.mulf %830, %840 : vector<8x128xf32>
    %851 = arith.addf %849, %850 : vector<8x128xf32>
    %852 = math.tanh %851 : vector<8x128xf32>
    %853 = arith.mulf %848, %852 : vector<8x128xf32>
    %cst_287 = arith.constant dense<0.000000e+00> : vector<8x512xf32>
    %854 = tpu.matmul %853, %6, %cst_287 {dimension_numbers = #tpu.dot_dimension_numbers<[1], [0], [0], [1], [0, 0, 1, 1], [], []>} : vector<8x128xf32>, vector<128x512xf32>, vector<8x512xf32> -> vector<8x512xf32>
    %855 = vector.broadcast %8 : vector<1x512xf32> to vector<8x512xf32>
    %856 = arith.addf %854, %855 : vector<8x512xf32>
    %cst_288 = arith.constant dense<0.000000e+00> : vector<8x512xf32>
    %857 = tpu.matmul %779, %7, %cst_288 {dimension_numbers = #tpu.dot_dimension_numbers<[1], [0], [0], [1], [0, 0, 1, 1], [], []>} : vector<8x128xf32>, vector<128x512xf32>, vector<8x512xf32> -> vector<8x512xf32>
    %858 = arith.addf %856, %857 : vector<8x512xf32>
    %859 = vector.extract_strided_slice %858 {offsets = [0, 0], sizes = [8, 128], strides = [1, 1]} : vector<8x512xf32> to vector<8x128xf32>
    %cst_289 = arith.constant 0.000000e+00 : f32
    %860 = vector.broadcast %cst_289 : f32 to vector<8x128xf32>
    %861 = arith.subf %860, %859 : vector<8x128xf32>
    %862 = math.exp %861 : vector<8x128xf32>
    %cst_290 = arith.constant 1.000000e+00 : f32
    %863 = vector.broadcast %cst_290 : f32 to vector<8x128xf32>
    %864 = arith.addf %863, %862 : vector<8x128xf32>
    %cst_291 = arith.constant 1.000000e+00 : f32
    %865 = vector.broadcast %cst_291 : f32 to vector<8x128xf32>
    %866 = arith.divf %865, %864 : vector<8x128xf32>
    %867 = vector.extract_strided_slice %858 {offsets = [0, 128], sizes = [8, 128], strides = [1, 1]} : vector<8x512xf32> to vector<8x128xf32>
    %cst_292 = arith.constant 0.000000e+00 : f32
    %868 = vector.broadcast %cst_292 : f32 to vector<8x128xf32>
    %869 = arith.subf %868, %867 : vector<8x128xf32>
    %870 = math.exp %869 : vector<8x128xf32>
    %cst_293 = arith.constant 1.000000e+00 : f32
    %871 = vector.broadcast %cst_293 : f32 to vector<8x128xf32>
    %872 = arith.addf %871, %870 : vector<8x128xf32>
    %cst_294 = arith.constant 1.000000e+00 : f32
    %873 = vector.broadcast %cst_294 : f32 to vector<8x128xf32>
    %874 = arith.divf %873, %872 : vector<8x128xf32>
    %875 = vector.extract_strided_slice %858 {offsets = [0, 256], sizes = [8, 128], strides = [1, 1]} : vector<8x512xf32> to vector<8x128xf32>
    %876 = math.tanh %875 : vector<8x128xf32>
    %877 = vector.extract_strided_slice %858 {offsets = [0, 384], sizes = [8, 128], strides = [1, 1]} : vector<8x512xf32> to vector<8x128xf32>
    %cst_295 = arith.constant 0.000000e+00 : f32
    %878 = vector.broadcast %cst_295 : f32 to vector<8x128xf32>
    %879 = arith.subf %878, %877 : vector<8x128xf32>
    %880 = math.exp %879 : vector<8x128xf32>
    %cst_296 = arith.constant 1.000000e+00 : f32
    %881 = vector.broadcast %cst_296 : f32 to vector<8x128xf32>
    %882 = arith.addf %881, %880 : vector<8x128xf32>
    %cst_297 = arith.constant 1.000000e+00 : f32
    %883 = vector.broadcast %cst_297 : f32 to vector<8x128xf32>
    %884 = arith.divf %883, %882 : vector<8x128xf32>
    %885 = arith.mulf %874, %777 : vector<8x128xf32>
    %886 = arith.mulf %866, %876 : vector<8x128xf32>
    %887 = arith.addf %885, %886 : vector<8x128xf32>
    %888 = math.tanh %887 : vector<8x128xf32>
    %889 = arith.mulf %884, %888 : vector<8x128xf32>
    %c0_298 = arith.constant 0 : index
    %c0_299 = arith.constant 0 : index
    %890 = vector.load %arg11[%c0_298, %c0_299] : memref<128x16xf32, #tpu.memory_space<vmem>>, vector<128x16xf32>
    %cst_300 = arith.constant dense<0.000000e+00> : vector<8x16xf32>
    %891 = tpu.matmul %889, %890, %cst_300 {dimension_numbers = #tpu.dot_dimension_numbers<[1], [0], [0], [1], [0, 0, 1, 1], [], []>} : vector<8x128xf32>, vector<128x16xf32>, vector<8x16xf32> -> vector<8x16xf32>
    %c0_301 = arith.constant 0 : index
    %c0_302 = arith.constant 0 : index
    %892 = vector.load %arg12[%c0_301, %c0_302] : memref<1x16xf32, #tpu.memory_space<vmem>>, vector<1x16xf32>
    %893 = vector.broadcast %892 : vector<1x16xf32> to vector<8x16xf32>
    %894 = arith.addf %891, %893 : vector<8x16xf32>
    %cst_303 = arith.constant 0.000000e+00 : f32
    %895 = vector.broadcast %cst_303 : f32 to vector<8x16xf32>
    %896 = arith.cmpf oge, %894, %895 : vector<8x16xf32>
    %cst_304 = arith.constant 0.00999999977 : f32
    %897 = vector.broadcast %cst_304 : f32 to vector<8x16xf32>
    %898 = arith.mulf %897, %894 : vector<8x16xf32>
    %899 = arith.select %896, %894, %898 : vector<8x16xi1>, vector<8x16xf32>
    %c0_305 = arith.constant 0 : index
    %c0_306 = arith.constant 0 : index
    %900 = vector.load %arg13[%c0_305, %c0_306] : memref<16x4xf32, #tpu.memory_space<vmem>>, vector<16x4xf32>
    %cst_307 = arith.constant dense<0.000000e+00> : vector<8x4xf32>
    %901 = tpu.matmul %899, %900, %cst_307 {dimension_numbers = #tpu.dot_dimension_numbers<[1], [0], [0], [1], [0, 0, 1, 1], [], []>} : vector<8x16xf32>, vector<16x4xf32>, vector<8x4xf32> -> vector<8x4xf32>
    %c0_308 = arith.constant 0 : index
    %c0_309 = arith.constant 0 : index
    %902 = vector.load %arg14[%c0_308, %c0_309] : memref<1x4xf32, #tpu.memory_space<vmem>>, vector<1x4xf32>
    %903 = vector.broadcast %902 : vector<1x4xf32> to vector<8x4xf32>
    %904 = arith.addf %901, %903 : vector<8x4xf32>
    %c0_310 = arith.constant 0 : index
    %c0_311 = arith.constant 0 : index
    %905 = vector.load %arg15[%c0_310, %c0_311] : memref<8x4xf32, #tpu.memory_space<vmem>>, vector<8x4xf32>
    tpu.vector_store %arg15[%c0_310, %c0_311], %904 {strides = array<i32>} : memref<8x4xf32, #tpu.memory_space<vmem>>, vector<8x4xf32>,
    return
  }
  func.func @transform_0(%arg0: i32) -> (i32, i32, i32) {
    %c0_i32 = arith.constant 0 : i32
    %c0_i32_0 = arith.constant 0 : i32
    %c0_i32_1 = arith.constant 0 : i32
    return %c0_i32, %arg0, %c0_i32_0 : i32, i32, i32
  }
  func.func @transform_1(%arg0: i32) -> (i32, i32) {
    %c0_i32 = arith.constant 0 : i32
    %c0_i32_0 = arith.constant 0 : i32
    %c0_i32_1 = arith.constant 0 : i32
    return %c0_i32, %c0_i32_0 : i32, i32
  }
  func.func @transform_2(%arg0: i32) -> (i32, i32) {
    %c0_i32 = arith.constant 0 : i32
    %c0_i32_0 = arith.constant 0 : i32
    %c0_i32_1 = arith.constant 0 : i32
    return %c0_i32, %c0_i32_0 : i32, i32
  }
  func.func @transform_3(%arg0: i32) -> (i32, i32) {
    %c0_i32 = arith.constant 0 : i32
    %c0_i32_0 = arith.constant 0 : i32
    %c0_i32_1 = arith.constant 0 : i32
    return %c0_i32, %c0_i32_0 : i32, i32
  }
  func.func @transform_4(%arg0: i32) -> (i32, i32) {
    %c0_i32 = arith.constant 0 : i32
    %c0_i32_0 = arith.constant 0 : i32
    %c0_i32_1 = arith.constant 0 : i32
    return %c0_i32, %c0_i32_0 : i32, i32
  }
  func.func @transform_5(%arg0: i32) -> (i32, i32) {
    %c0_i32 = arith.constant 0 : i32
    %c0_i32_0 = arith.constant 0 : i32
    %c0_i32_1 = arith.constant 0 : i32
    return %c0_i32, %c0_i32_0 : i32, i32
  }
  func.func @transform_6(%arg0: i32) -> (i32, i32) {
    %c0_i32 = arith.constant 0 : i32
    %c0_i32_0 = arith.constant 0 : i32
    %c0_i32_1 = arith.constant 0 : i32
    return %c0_i32, %c0_i32_0 : i32, i32
  }
  func.func @transform_7(%arg0: i32) -> (i32, i32) {
    %c0_i32 = arith.constant 0 : i32
    %c0_i32_0 = arith.constant 0 : i32
    %c0_i32_1 = arith.constant 0 : i32
    return %c0_i32, %c0_i32_0 : i32, i32
  }
  func.func @transform_8(%arg0: i32) -> (i32, i32) {
    %c0_i32 = arith.constant 0 : i32
    %c0_i32_0 = arith.constant 0 : i32
    %c0_i32_1 = arith.constant 0 : i32
    return %c0_i32, %c0_i32_0 : i32, i32
  }
  func.func @transform_9(%arg0: i32) -> (i32, i32) {
    %c0_i32 = arith.constant 0 : i32
    %c0_i32_0 = arith.constant 0 : i32
    %c0_i32_1 = arith.constant 0 : i32
    return %c0_i32, %c0_i32_0 : i32, i32
  }
  func.func @transform_10(%arg0: i32) -> (i32, i32) {
    %c0_i32 = arith.constant 0 : i32
    %c0_i32_0 = arith.constant 0 : i32
    %c0_i32_1 = arith.constant 0 : i32
    return %c0_i32, %c0_i32_0 : i32, i32
  }
  func.func @transform_11(%arg0: i32) -> (i32, i32) {
    %c0_i32 = arith.constant 0 : i32
    %c0_i32_0 = arith.constant 0 : i32
    %c0_i32_1 = arith.constant 0 : i32
    return %c0_i32, %c0_i32_0 : i32, i32
  }
  func.func @transform_12(%arg0: i32) -> (i32, i32) {
    %c0_i32 = arith.constant 0 : i32
    %c0_i32_0 = arith.constant 0 : i32
    %c0_i32_1 = arith.constant 0 : i32
    return %c0_i32, %c0_i32_0 : i32, i32
  }
  func.func @transform_13(%arg0: i32) -> (i32, i32) {
    %c0_i32 = arith.constant 0 : i32
    %c0_i32_0 = arith.constant 0 : i32
    %c0_i32_1 = arith.constant 0 : i32
    return %c0_i32, %c0_i32_0 : i32, i32
  }
  func.func @transform_14(%arg0: i32) -> (i32, i32) {
    %c0_i32 = arith.constant 0 : i32
    %c0_i32_0 = arith.constant 0 : i32
    return %arg0, %c0_i32 : i32, i32
  }
}

</mosaic_0001>

<bundles_post_ra>
// kernel: tpu_custom_call.1
= control target key start
LH: loop header
LB: loop body
LE: loop exit
PB: predicated region body
PF: predicated region fallthrough
CT: control target
= control target key end

     0   :  { %19 = vsyncpa [#allocation3], 0  ;;  %s14207_s0 = inlined_call_operand.hbm [shape: f32[8,8,32], index: 0, kind: input, shape index: {}]   ;;  %s14208_s1 = inlined_call_operand.vmem [shape: f32[32,512], index: 1, kind: input, shape index: {}]   ;;  %s14209_s2 = inlined_call_operand.hbm [shape: f32[128,512], index: 2, kind: input, shape index: {}]   ;;  %s14210_s3 = inlined_call_operand.vmem [shape: f32[1,512], index: 3, kind: input, shape index: {}]   ;;  %s14211_s4 = inlined_call_operand.hbm [shape: f32[128,512], index: 4, kind: input, shape index: {}]   ;;  %s14212_s5 = inlined_call_operand.hbm [shape: f32[128,512], index: 5, kind: input, shape index: {}]   ;;  %s14213_s6 = inlined_call_operand.vmem [shape: f32[1,512], index: 6, kind: input, shape index: {}]   ;;  %s14214_s7 = inlined_call_operand.hbm [shape: f32[128,512], index: 7, kind: input, shape index: {}]   ;;  %s14215_s8 = inlined_call_operand.hbm [shape: f32[128,512], index: 8, kind: input, shape index: {}]   ;;  %s14216_s9 = inlined_call_operand.vmem [shape: f32[1,512], index: 9, kind: input, shape index: {}]   ;;  %s14217_s10 = inlined_call_operand.vmem [shape: f32[128,16], index: 10, kind: input, shape index: {}]   ;;  %s14218_s11 = inlined_call_operand.vmem [shape: f32[1,16], index: 11, kind: input, shape index: {}]   ;;  %s14219_s12 = inlined_call_operand.vmem [shape: f32[16,4], index: 12, kind: input, shape index: {}]   ;;  %s14220_s13 = inlined_call_operand.vmem [shape: f32[1,4], index: 13, kind: input, shape index: {}]   ;;  %s14221_s14 = inlined_call_operand.vmem [shape: f32[8,4], index: 14, kind: output, shape index: {}]  }
   0x1   :  { %20 = vsyncpa [#allocation5], 0 }
   0x2   :  { %21 = vsyncpa [#allocation8], 0 }
   0x3   :  { %22 = vsyncpa [#allocation11], 0  ;;  %s11773_s29 = smov [#allocation4]   ;;  %s11633_s17 = scalar_lea.hbm %s14209_s2, 8192 }
   0x4   :  { %s42_s30 = sshll.u32 %s11773_s29, 4  ;;  %p11634_p0 = scmp.ne.s32.totalorder %s14209_s2, %s11633_s17  ;;  %s43_s30 = int_to_ptr.vmem [resolvable:$true] %s42_s30 }
   0x5   :  { %p11637_p1 = scmp.lt.u32.totalorder %s11633_s17, %s14209_s2 }
   0x7   :  { %p11639_p2 = pnand %p11637_p1, %p11634_p0 }
   0x9   :  { %11642 = shalt.err (!%p11639_p2)
}
   0xa   :  { %s11643_s22 = scalar_lea.vmem %s43_s30, 8192  ;;  %p11648_p4 = scmp.lt.s32.totalorder %s43_s30, %s43_s30 }
   0xb   :  { %p11644_p3 = scmp.ne.s32.totalorder %s43_s30, %s11643_s22  ;;  %p11649_p5 = scmp.lt.s32.totalorder %s11643_s22, %s11643_s22 }
   0xd   :  { %p11650_p6 = por %p11649_p5, %p11648_p4 }
   0xf   :  { %p11651_p7 = pnand %p11650_p6, %p11644_p3 }
  0x11   :  { %11654 = shalt.err (!%p11651_p7)
}
  0x12   :  { %s11774_s23 = smov 512   ;;  %s11775_s24 = smov 32  }
  0x13   :  { %48 = dma.hbm_to_vmem [thread:$0]  %s14209_s2, 8192, %s43_s30, [#allocation5], %s11774_s23, %s11774_s23, %s11775_s24  }
  0x14   :  { %s11776_s27 = smov [#allocation7]   ;;  %s11777_s29 = smov [#allocation2]  }
  0x15   :  { %s68_s28 = sshll.u32 %s11776_s27, 4  ;;  %s28_s15 = sshll.u32 %s11777_s29, 4  ;;  %s69_s28 = int_to_ptr.vmem [resolvable:$true] %s68_s28  ;;  %s29_s15 = int_to_ptr.vmem [resolvable:$true] %s28_s15 }
  0x16   :  { %s11655_s18 = scalar_lea.hbm %s14212_s5, 8192 }
  0x17   :  { %p11656_p8 = scmp.ne.s32.totalorder %s14212_s5, %s11655_s18  ;;  %p11659_p9 = scmp.lt.u32.totalorder %s11655_s18, %s14212_s5 }
  0x19   :  { %p11661_p10 = pnand %p11659_p9, %p11656_p8 }
  0x1b   :  { %11664 = shalt.err (!%p11661_p10)
}
  0x1c   :  { %s11665_s2 = scalar_lea.vmem %s69_s28, 8192  ;;  %p11670_p12 = scmp.lt.s32.totalorder %s69_s28, %s69_s28 }
  0x1d   :  { %p11666_p11 = scmp.ne.s32.totalorder %s69_s28, %s11665_s2  ;;  %p11671_p13 = scmp.lt.s32.totalorder %s11665_s2, %s11665_s2 }
  0x1f   :  { %p11672_p0 = por %p11671_p13, %p11670_p12 }
  0x21   :  { %p11673_p1 = pnand %p11672_p0, %p11666_p11 }
  0x23   :  { %11676 = shalt.err (!%p11673_p1)
}
  0x24   :  { %74 = dma.hbm_to_vmem [thread:$0]  %s14212_s5, 8192, %s69_s28, [#allocation8], %s11774_s23, %s11774_s23, %s11775_s24  }
  0x25   :  { %s11677_s29 = scalar_lea.hbm %s14207_s0, 1024 }
  0x26   :  { %p11678_p2 = scmp.ne.s32.totalorder %s14207_s0, %s11677_s29  ;;  %p11681_p3 = scmp.lt.u32.totalorder %s11677_s29, %s14207_s0 }
  0x28   :  { %p11683_p4 = pnand %p11681_p3, %p11678_p2 }
  0x2a   :  { %11686 = shalt.err (!%p11683_p4)
}
  0x2b   :  { %s11687_s20 = scalar_lea.vmem %s29_s15, 1024  ;;  %p11692_p6 = scmp.lt.s32.totalorder %s29_s15, %s29_s15 }
  0x2c   :  { %p11688_p5 = scmp.ne.s32.totalorder %s29_s15, %s11687_s20  ;;  %p11693_p7 = scmp.lt.s32.totalorder %s11687_s20, %s11687_s20 }
  0x2e   :  { %p11694_p8 = por %p11693_p7, %p11692_p6 }
  0x30   :  { %p11695_p9 = pnand %p11694_p8, %p11688_p5 }
  0x32   :  { %11698 = shalt.err (!%p11695_p9)
}
  0x33   :  { %s11778_s5 = smov 128   ;;  %s11779_s28 = smov 8  }
  0x34   :  { %34 = dma.hbm_to_vmem [thread:$0]  %s14207_s0, 1024, %s29_s15, [#allocation3], %s11778_s5, %s11778_s5, %s11779_s28  }
  0x35   :  { %s11780_s2 = smov [#allocation6]   ;;  %s11781_s25 = smov [#allocation9]  }
  0x36   :  { %s56_s30 = sshll.u32 %s11780_s2, 4  ;;  %s82_s26 = sshll.u32 %s11781_s25, 4  ;;  %s57_s30 = int_to_ptr.vmem [resolvable:$true] %s56_s30  ;;  %s83_s26 = int_to_ptr.vmem [resolvable:$true] %s82_s26 }
  0x37   :  { %s11699_s16 = scalar_lea.hbm %s14211_s4, 8192 }
  0x38   :  { %p11700_p10 = scmp.ne.s32.totalorder %s14211_s4, %s11699_s16  ;;  %p11703_p11 = scmp.lt.u32.totalorder %s11699_s16, %s14211_s4 }
  0x3a   :  { %p11705_p12 = pnand %p11703_p11, %p11700_p10 }
  0x3c   :  { %11708 = shalt.err (!%p11705_p12)
}
  0x3d   :  { %s11709_s0 = scalar_lea.vmem %s57_s30, 8192  ;;  %p11714_p0 = scmp.lt.s32.totalorder %s57_s30, %s57_s30 }
  0x3e   :  { %p11710_p13 = scmp.ne.s32.totalorder %s57_s30, %s11709_s0  ;;  %p11715_p1 = scmp.lt.s32.totalorder %s11709_s0, %s11709_s0 }
  0x40   :  { %p11716_p2 = por %p11715_p1, %p11714_p0 }
  0x42   :  { %p11717_p3 = pnand %p11716_p2, %p11710_p13 }
  0x44   :  { %11720 = shalt.err (!%p11717_p3)
}
  0x45   :  { %62 = dma.hbm_to_vmem [thread:$0]  %s14211_s4, 8192, %s57_s30, [#allocation5], %s11774_s23, %s11774_s23, %s11775_s24  }
  0x46   :  { %s11721_s22 = scalar_lea.hbm %s14214_s7, 8192 }
  0x47   :  { %p11722_p4 = scmp.ne.s32.totalorder %s14214_s7, %s11721_s22  ;;  %p11725_p5 = scmp.lt.u32.totalorder %s11721_s22, %s14214_s7 }
  0x49   :  { %p11727_p6 = pnand %p11725_p5, %p11722_p4 }
  0x4b   :  { %11730 = shalt.err (!%p11727_p6)
}
  0x4c   :  { %s11731_s16 = scalar_lea.vmem %s83_s26, 8192  ;;  %p11736_p8 = scmp.lt.s32.totalorder %s83_s26, %s83_s26 }
  0x4d   :  { %p11732_p7 = scmp.ne.s32.totalorder %s83_s26, %s11731_s16  ;;  %p11737_p9 = scmp.lt.s32.totalorder %s11731_s16, %s11731_s16 }
  0x4f   :  { %p11738_p10 = por %p11737_p9, %p11736_p8 }
  0x51   :  { %p11739_p11 = pnand %p11738_p10, %p11732_p7 }
  0x53   :  { %11742 = shalt.err (!%p11739_p11)
}
  0x54   :  { %88 = dma.hbm_to_vmem [thread:$0]  %s14214_s7, 8192, %s83_s26, [#allocation8], %s11774_s23, %s11774_s23, %s11775_s24  }
  0x55   :  { %s11782_s17 = smov [#allocation10]   ;;  %s11743_s0 = scalar_lea.hbm %s14215_s8, 8192 }
  0x56   :  { %s94_s18 = sshll.u32 %s11782_s17, 4  ;;  %p11744_p12 = scmp.ne.s32.totalorder %s14215_s8, %s11743_s0  ;;  %s95_s18 = int_to_ptr.vmem [resolvable:$true] %s94_s18 }
  0x57   :  { %p11747_p13 = scmp.lt.u32.totalorder %s11743_s0, %s14215_s8 }
  0x59   :  { %p11749_p0 = pnand %p11747_p13, %p11744_p12 }
  0x5b   :  { %11752 = shalt.err (!%p11749_p0)
}
  0x5c   :  { %s11753_s22 = scalar_lea.vmem %s95_s18, 8192  ;;  %p11758_p2 = scmp.lt.s32.totalorder %s95_s18, %s95_s18 }
  0x5d   :  { %p11754_p1 = scmp.ne.s32.totalorder %s95_s18, %s11753_s22  ;;  %p11759_p3 = scmp.lt.s32.totalorder %s11753_s22, %s11753_s22 }
  0x5f   :  { %p11760_p4 = por %p11759_p3, %p11758_p2 }
  0x61   :  { %p11761_p5 = pnand %p11760_p4, %p11754_p1 }
  0x63   :  { %11764 = shalt.err (!%p11761_p5)
}
  0x64   :  { %100 = dma.hbm_to_vmem [thread:$0]  %s14215_s8, 8192, %s95_s18, [#allocation11], %s11774_s23, %s11774_s23, %s11775_s24  }
  0x65   :  { %11765 = dma.done.wait [#allocation3], 1024  }
  0x66   :  { %11766 = vsyncadd [#allocation3], 4294966272 }
  0x67   :  { %11767 = dma.done.wait [#allocation5], 16384  }
  0x68   :  { %11768 = vsyncadd [#allocation5], 4294950912 }
  0x69   :  { %11769 = dma.done.wait [#allocation8], 16384  }
  0x6a   :  { %11770 = vsyncadd [#allocation8], 4294950912 }
  0x6b   :  { %11771 = dma.done.wait [#allocation11], 8192  }
  0x6c   :  { %11772 = vsyncadd [#allocation11], 4294959104  ;;  %v14222_v0 = vmov 0.0   ;;  %v130_v1 = vld [vmem:[%s14208_s1 + $0x8] sm:$0xff]  ;;  %v129_v6 = vld [vmem:[%s14208_s1] sm:$0xff]  ;;  %vm490_vm0 = vcmask 261120  }
  0x6d   :  { %558 = vmatprep.mubr.f32.mxu1 %v14222_v0  ;;  %700 = vmatprep.mubr.f32.mxu0 %v14222_v0  ;;  %v134_v2 = vld [vmem:[%s14208_s1 + $0x28] sm:$0xff]  ;;  %v133_v7 = vld [vmem:[%s14208_s1 + $0x20] sm:$0xff]  ;;  %v132_v24 = vld [vmem:[%s14208_s1 + $0x18] sm:$0xff]  ;;  %vm11785_vm1 = vmmov 0   ;;  %vm8164_vm3 = vcmask 130048   ;;  %vm8238_vm4 = vcmask 31744  }
  0x6e   :  { %v146_v3 = vld [vmem:[#allocation4 + $0x8] sm:$0xff]  ;;  %v11956_v4 = vpack.c.bf16 %v134_v2, %v130_v1  ;;  %v11966_v9 = vpack.c.bf16 %v133_v7, %v129_v6  ;;  %v145_v10 = vld [vmem:[#allocation4] sm:$0xff]  ;;  %v136_v27 = vld [vmem:[%s14208_s1 + $0x38] sm:$0xff] }
  0x6f   :  { %v150_v5 = vld [vmem:[#allocation4 + $0x28] sm:$0xff]  ;;  %v149_v11 = vld [vmem:[#allocation4 + $0x20] sm:$0xff]  ;;  %v12004_v30 = vpack.c.bf16 %v136_v27, %v132_v24  ;;  %v131_v32 = vld [vmem:[%s14208_s1 + $0x10] sm:$0xff] }
  0x70   :  { %v11964_v8 = vpack.c.bf16 %v150_v5, %v146_v3  ;;  %14568 = vst [vmem:[#allocation17_spill] sm:$0xff] %v11966_v9  ;;  %v138_v12 = vld [vmem:[%s14208_s1 + $0x48] sm:$0xff]  ;;  %8330 = vmatprep.subr.bf16.mxu1 %v11956_v4  ;;  %v11972_v13 = vpack.c.bf16 %v149_v11, %v145_v10  ;;  %v137_v19 = vld [vmem:[%s14208_s1 + $0x40] sm:$0xff]  ;;  %v135_v33 = vld [vmem:[%s14208_s1 + $0x30] sm:$0xff] }
  0x71   :  { %v142_v14 = vld [vmem:[%s14208_s1 + $0x68] sm:$0xff]  ;;  %8332 = vmatpush1.bf16.msra.mxu1 %v11966_v9  ;;  %v141_v20 = vld [vmem:[%s14208_s1 + $0x60] sm:$0xff]  ;;  %14574 = vst [vmem:[#allocation23_spill] sm:$0xff] %v12004_v30  ;;  %v12015_v35 = vpack.c.bf16 %v135_v33, %v131_v32  ;;  %v140_v37 = vld [vmem:[%s14208_s1 + $0x58] sm:$0xff] }
  0x72   :  { %14567 = vst [vmem:[#allocation16_spill] sm:$0xff] %v11964_v8  ;;  %14569 = vst [vmem:[#allocation18_spill] sm:$0xff] %v11972_v13  ;;  %v154_v15 = vld [vmem:[#allocation4 + $0x48] sm:$0xff]  ;;  %8346 = vmatprep.subr.bf16.mxu0 %v11964_v8  ;;  %v11979_v17 = vpack.c.bf16 %v142_v14, %v138_v12  ;;  %v153_v21 = vld [vmem:[#allocation4 + $0x40] sm:$0xff]  ;;  %v11990_v22 = vpack.c.bf16 %v141_v20, %v137_v19 }
  0x73   :  { %v158_v16 = vld [vmem:[#allocation4 + $0x68] sm:$0xff]  ;;  %8348 = vmatpush1.bf16.msra.mxu0 %v11972_v13  ;;  %v157_v23 = vld [vmem:[#allocation4 + $0x60] sm:$0xff]  ;;  %14576 = vst [vmem:[#allocation25_spill] sm:$0xff] %v12015_v35  ;;  %v144_v38 = vld [vmem:[%s14208_s1 + $0x78] sm:$0xff] }
  0x74   :  { %14570 = vst [vmem:[#allocation19_spill] sm:$0xff] %v11979_v17  ;;  %v11981_v18 = vpack.c.bf16 %v158_v16, %v154_v15  ;;  %14572 = vst [vmem:[#allocation21_spill] sm:$0xff] %v11990_v22  ;;  %8334 = vmatprep.subr.bf16.mxu1 %v11979_v17  ;;  %v11997_v25 = vpack.c.bf16 %v157_v23, %v153_v21  ;;  %v11999_v26 = vld [vmem:[#allocation2] sm:$0xff]  ;;  %v162_v28 = vld [vmem:[#allocation4 + $0x88] sm:$0xff]  ;;  %v12027_v40 = vpack.c.bf16 %v144_v38, %v140_v37 }
  0x75   :  { %v166_v29 = vld [vmem:[#allocation4 + $0xa8] sm:$0xff]  ;;  %v161_v34 = vld [vmem:[#allocation4 + $0x80] sm:$0xff]  ;;  %8336 = vmatpush1.bf16.msra.mxu1 %v11990_v22  ;;  %v139_v43 = vld [vmem:[%s14208_s1 + $0x50] sm:$0xff] }
  0x76   :  { %14571 = vst [vmem:[#allocation20_spill] sm:$0xff] %v11981_v18  ;;  %8350 = vmatprep.subr.bf16.mxu0 %v11981_v18  ;;  %14573 = vst [vmem:[#allocation22_spill] sm:$0xff] %v11997_v25  ;;  %v12006_v31 = vpack.c.bf16 %v166_v29, %v162_v28  ;;  %v165_v36 = vld [vmem:[#allocation4 + $0xa0] sm:$0xff]  ;;  %8338 = vmatprep.subr.bf16.mxu1 %v12004_v30  ;;  %v170_v41 = vld [vmem:[#allocation4 + $0xc8] sm:$0xff] }
  0x77   :  { %8352 = vmatpush1.bf16.msra.mxu0 %v11997_v25  ;;  %v12025_v39 = vpack.c.bf16 %v165_v36, %v161_v34  ;;  %14578 = vst [vmem:[#allocation27_spill] sm:$0xff] %v12027_v40  ;;  %v174_v42 = vld [vmem:[#allocation4 + $0xe8] sm:$0xff]  ;;  %v143_v45 = vld [vmem:[%s14208_s1 + $0x70] sm:$0xff]  ;;  %v169_v46 = vld [vmem:[#allocation4 + $0xc0] sm:$0xff] }
  0x78   :  { %14575 = vst [vmem:[#allocation24_spill] sm:$0xff] %v12006_v31  ;;  %8354 = vmatprep.subr.bf16.mxu0 %v12006_v31  ;;  %v12033_v44 = vpack.c.bf16 %v174_v42, %v170_v41  ;;  %v173_v47 = vld [vmem:[#allocation4 + $0xe0] sm:$0xff]  ;;  %8248 = vmatmul.mubr.msk.f32.vlgmr.msra.gmra.mrb[0].mxu1 %vm490_vm0, %v11999_v26  ;;  %v178_v48 = vld [vmem:[#allocation4 + $0x108] sm:$0xff]  ;;  %v148_v50 = vld [vmem:[#allocation4 + $0x18] sm:$0xff]  ;;  %v12041_v51 = vpack.c.bf16 %v143_v45, %v139_v43 }
  0x79   :  { %14577 = vst [vmem:[#allocation26_spill] sm:$0xff] %v12025_v39  ;;  %v182_v49 = vld [vmem:[#allocation4 + $0x128] sm:$0xff]  ;;  %8340 = vmatpush1.bf16.msra.mxu1 %v12015_v35  ;;  %629 = vmatprep.mubr.f32.mxu1 %v14222_v0  ;;  %v152_v52 = vld [vmem:[#allocation4 + $0x38] sm:$0xff]  ;;  %v12046_v53 = vpack.c.bf16 %v173_v47, %v169_v46  ;;  %v177_v55 = vld [vmem:[#allocation4 + $0x100] sm:$0xff] }
  0x7a   :  { %14579 = vst [vmem:[#allocation28_spill] sm:$0xff] %v12033_v44  ;;  %14580 = vst [vmem:[#allocation29_spill] sm:$0xff] %v12041_v51  ;;  %8342 = vmatprep.subr.bf16.mxu1 %v12027_v40  ;;  %v12048_v54 = vpack.c.bf16 %v152_v52, %v148_v50  ;;  %v147_v56 = vld [vmem:[#allocation4 + $0x10] sm:$0xff]  ;;  %v12051_v58 = vpack.c.bf16 %v182_v49, %v178_v48  ;;  %v181_v59 = vld [vmem:[#allocation4 + $0x120] sm:$0xff] }
  0x7b   :  { %8356 = vmatpush1.bf16.msra.mxu0 %v12025_v39  ;;  %14581 = vst [vmem:[#allocation30_spill] sm:$0xff] %v12046_v53  ;;  %v151_v57 = vld [vmem:[#allocation4 + $0x30] sm:$0xff]  ;;  %v156_v60 = vld [vmem:[#allocation4 + $0x58] sm:$0xff]  ;;  %v186_v62 = vld [vmem:[#allocation4 + $0x148] sm:$0xff]  ;;  %v12058_v2 = vpack.c.bf16 %v181_v59, %v177_v55 }
  0x7c   :  { %14582 = vst [vmem:[#allocation31_spill] sm:$0xff] %v12048_v54  ;;  %8358 = vmatprep.subr.bf16.mxu0 %v12033_v44  ;;  %14583 = vst [vmem:[#allocation32_spill] sm:$0xff] %v12051_v58  ;;  %v160_v61 = vld [vmem:[#allocation4 + $0x78] sm:$0xff]  ;;  %v190_v63 = vld [vmem:[#allocation4 + $0x168] sm:$0xff]  ;;  %v12054_v1 = vpack.c.bf16 %v151_v57, %v147_v56 }
  0x7d   :  { %8344 = vmatpush1.bf16.msra.mxu1 %v12041_v51  ;;  %14585 = vst [vmem:[#allocation34_spill] sm:$0xff] %v12058_v2  ;;  %v12060_v3 = vpack.c.bf16 %v160_v61, %v156_v60  ;;  %v185_v5 = vld [vmem:[#allocation4 + $0x140] sm:$0xff]  ;;  %v155_v6 = vld [vmem:[#allocation4 + $0x50] sm:$0xff]  ;;  %v12063_v10 = vpack.c.bf16 %v190_v63, %v186_v62  ;;  %v164_v12 = vld [vmem:[#allocation4 + $0x98] sm:$0xff] }
  0x7e   :  { %14584 = vst [vmem:[#allocation33_spill] sm:$0xff] %v12054_v1  ;;  %8378 = vmatprep.subr.bf16.mxu1 %v12048_v54  ;;  %v159_v7 = vld [vmem:[#allocation4 + $0x70] sm:$0xff]  ;;  %v189_v11 = vld [vmem:[#allocation4 + $0x160] sm:$0xff]  ;;  %v168_v14 = vld [vmem:[#allocation4 + $0xb8] sm:$0xff] }
  0x7f   :  { %8360 = vmatpush1.bf16.msra.mxu0 %v12046_v53  ;;  %14586 = vst [vmem:[#allocation35_spill] sm:$0xff] %v12060_v3  ;;  %14587 = vst [vmem:[#allocation36_spill] sm:$0xff] %v12063_v10  ;;  %v194_v15 = vld [vmem:[#allocation4 + $0x188] sm:$0xff]  ;;  %v12068_v19 = vpack.c.bf16 %v159_v7, %v155_v6  ;;  %v12073_v20 = vpack.c.bf16 %v189_v11, %v185_v5  ;;  %v12075_v21 = vpack.c.bf16 %v168_v14, %v164_v12  ;;  %v193_v23 = vld [vmem:[#allocation4 + $0x180] sm:$0xff] }
  0x80   :  { %8362 = vmatprep.subr.bf16.mxu0 %v12051_v58  ;;  %8249 = vmatmul.mubr.msk.f32.vlgmr.msra.gmra.mrb[2].mxu1 %vm490_vm0, %v11999_v26  ;;  %v198_v16 = vld [vmem:[#allocation4 + $0x1a8] sm:$0xff]  ;;  %v163_v24 = vld [vmem:[#allocation4 + $0x90] sm:$0xff]  ;;  %v197_v28 = vld [vmem:[#allocation4 + $0x1a0] sm:$0xff] }
  0x81   :  { %8380 = vmatpush1.bf16.msra.mxu1 %v12054_v1  ;;  %14588 = vst [vmem:[#allocation37_spill] sm:$0xff] %v12068_v19  ;;  %771 = vmatprep.mubr.f32.mxu1 %v14222_v0  ;;  %14589 = vst [vmem:[#allocation38_spill] sm:$0xff] %v12073_v20  ;;  %v167_v27 = vld [vmem:[#allocation4 + $0xb0] sm:$0xff]  ;;  %v12078_v26 = vpack.c.bf16 %v198_v16, %v194_v15  ;;  %v172_v29 = vld [vmem:[#allocation4 + $0xd8] sm:$0xff]  ;;  %v12085_v37 = vpack.c.bf16 %v197_v28, %v193_v23 }
  0x82   :  { %8382 = vmatprep.subr.bf16.mxu1 %v12060_v3  ;;  %14590 = vst [vmem:[#allocation39_spill] sm:$0xff] %v12075_v21  ;;  %v176_v32 = vld [vmem:[#allocation4 + $0xf8] sm:$0xff]  ;;  %v202_v33 = vld [vmem:[#allocation4 + $0x1c8] sm:$0xff]  ;;  %v12081_v36 = vpack.c.bf16 %v167_v27, %v163_v24  ;;  %v201_v41 = vld [vmem:[#allocation4 + $0x1c0] sm:$0xff] }
  0x83   :  { %8364 = vmatpush1.bf16.msra.mxu0 %v12058_v2  ;;  %14591 = vst [vmem:[#allocation40_spill] sm:$0xff] %v12078_v26  ;;  %v206_v34 = vld [vmem:[#allocation4 + $0x1e8] sm:$0xff]  ;;  %14593 = vst [vmem:[#allocation42_spill] sm:$0xff] %v12085_v37  ;;  %v12087_v38 = vpack.c.bf16 %v176_v32, %v172_v29  ;;  %v171_v42 = vld [vmem:[#allocation4 + $0xd0] sm:$0xff] }
  0x84   :  { %8366 = vmatprep.subr.bf16.mxu0 %v12063_v10  ;;  %14592 = vst [vmem:[#allocation41_spill] sm:$0xff] %v12081_v36  ;;  %v175_v43 = vld [vmem:[#allocation4 + $0xf0] sm:$0xff]  ;;  %v12090_v45 = vpack.c.bf16 %v206_v34, %v202_v33  ;;  %v205_v46 = vld [vmem:[#allocation4 + $0x1e0] sm:$0xff]  ;;  %v180_v47 = vld [vmem:[#allocation4 + $0x118] sm:$0xff] }
  0x85   :  { %8384 = vmatpush1.bf16.msra.mxu1 %v12068_v19  ;;  %14594 = vst [vmem:[#allocation43_spill] sm:$0xff] %v12087_v38  ;;  %v184_v48 = vld [vmem:[#allocation4 + $0x138] sm:$0xff]  ;;  %v12093_v49 = vpack.c.bf16 %v175_v43, %v171_v42  ;;  %v12097_v50 = vpack.c.bf16 %v205_v46, %v201_v41  ;;  %v179_v55 = vld [vmem:[#allocation4 + $0x110] sm:$0xff]  ;;  %v211_v32 = vld [vmem:[#allocation6 + $0x8] sm:$0xff] }
  0x86   :  { %8386 = vmatprep.subr.bf16.mxu1 %v12075_v21  ;;  %14595 = vst [vmem:[#allocation44_spill] sm:$0xff] %v12090_v45  ;;  %v12099_v52 = vpack.c.bf16 %v184_v48, %v180_v47  ;;  %v183_v56 = vld [vmem:[#allocation4 + $0x130] sm:$0xff]  ;;  %v188_v57 = vld [vmem:[#allocation4 + $0x158] sm:$0xff]  ;;  %v215_v33 = vld [vmem:[#allocation6 + $0x28] sm:$0xff] }
  0x87   :  { %8368 = vmatpush1.bf16.msra.mxu0 %v12073_v20  ;;  %14596 = vst [vmem:[#allocation45_spill] sm:$0xff] %v12093_v49  ;;  %14597 = vst [vmem:[#allocation46_spill] sm:$0xff] %v12097_v50  ;;  %v192_v59 = vld [vmem:[#allocation4 + $0x178] sm:$0xff]  ;;  %v12103_v60 = vpack.c.bf16 %v183_v56, %v179_v55  ;;  %v187_v62 = vld [vmem:[#allocation4 + $0x150] sm:$0xff]  ;;  %v12130_v41 = vpack.c.bf16 %v215_v33, %v211_v32 }
  0x88   :  { %8370 = vmatprep.subr.bf16.mxu0 %v12078_v26  ;;  %14598 = vst [vmem:[#allocation47_spill] sm:$0xff] %v12099_v52  ;;  %v12107_v61 = vpack.c.bf16 %v192_v59, %v188_v57  ;;  %v191_v63 = vld [vmem:[#allocation4 + $0x170] sm:$0xff]  ;;  %v196_v5 = vld [vmem:[#allocation4 + $0x198] sm:$0xff]  ;;  %v210_v43 = vld [vmem:[#allocation6] sm:$0xff] }
  0x89   :  { %8388 = vmatpush1.bf16.msra.mxu1 %v12081_v36  ;;  %14599 = vst [vmem:[#allocation48_spill] sm:$0xff] %v12103_v60  ;;  %v200_v6 = vld [vmem:[#allocation4 + $0x1b8] sm:$0xff]  ;;  %v12111_v7 = vpack.c.bf16 %v191_v63, %v187_v62  ;;  %v195_v12 = vld [vmem:[#allocation4 + $0x190] sm:$0xff]  ;;  %14606 = vst [vmem:[#allocation55_spill] sm:$0xff] %v12130_v41 }
  0x8a   :  { %8390 = vmatprep.subr.bf16.mxu1 %v12087_v38  ;;  %14600 = vst [vmem:[#allocation49_spill] sm:$0xff] %v12107_v61  ;;  %v12114_v11 = vpack.c.bf16 %v200_v6, %v196_v5  ;;  %v199_v14 = vld [vmem:[#allocation4 + $0x1b0] sm:$0xff]  ;;  %v204_v15 = vld [vmem:[#allocation4 + $0x1d8] sm:$0xff]  ;;  %v214_v46 = vld [vmem:[#allocation6 + $0x20] sm:$0xff] }
  0x8b   :  { %8372 = vmatpush1.bf16.msra.mxu0 %v12085_v37  ;;  %14601 = vst [vmem:[#allocation50_spill] sm:$0xff] %v12111_v7  ;;  %v208_v16 = vld [vmem:[#allocation4 + $0x1f8] sm:$0xff]  ;;  %v12118_v23 = vpack.c.bf16 %v199_v14, %v195_v12  ;;  %v203_v27 = vld [vmem:[#allocation4 + $0x1d0] sm:$0xff]  ;;  %v12134_v48 = vpack.c.bf16 %v214_v46, %v210_v43  ;;  %v219_v59 = vld [vmem:[#allocation6 + $0x48] sm:$0xff] }
  0x8c   :  { %8374 = vmatprep.subr.bf16.mxu0 %v12090_v45  ;;  %14602 = vst [vmem:[#allocation51_spill] sm:$0xff] %v12114_v11  ;;  %v12121_v24 = vpack.c.bf16 %v208_v16, %v204_v15  ;;  %v207_v28 = vld [vmem:[#allocation4 + $0x1f0] sm:$0xff]  ;;  %v213_v34 = vld [vmem:[#allocation6 + $0x18] sm:$0xff]  ;;  %v223_v62 = vld [vmem:[#allocation6 + $0x68] sm:$0xff] }
  0x8d   :  { %8392 = vmatpush1.bf16.msra.mxu1 %v12093_v49  ;;  %14603 = vst [vmem:[#allocation52_spill] sm:$0xff] %v12118_v23  ;;  %v12124_v29 = vpack.c.bf16 %v207_v28, %v203_v27  ;;  %v217_v42 = vld [vmem:[#allocation6 + $0x38] sm:$0xff]  ;;  %14608 = vst [vmem:[#allocation57_spill] sm:$0xff] %v12134_v48  ;;  %v212_v55 = vld [vmem:[#allocation6 + $0x10] sm:$0xff]  ;;  %v12142_v5 = vpack.c.bf16 %v223_v62, %v219_v59 }
  0x8e   :  { %8394 = vmatprep.subr.bf16.mxu1 %v12099_v52  ;;  %14604 = vst [vmem:[#allocation53_spill] sm:$0xff] %v12121_v24  ;;  %v12132_v47 = vpack.c.bf16 %v217_v42, %v213_v34  ;;  %v216_v56 = vld [vmem:[#allocation6 + $0x30] sm:$0xff]  ;;  %v221_v63 = vld [vmem:[#allocation6 + $0x58] sm:$0xff]  ;;  %v218_v12 = vld [vmem:[#allocation6 + $0x40] sm:$0xff] }
  0x8f   :  { %8376 = vmatpush1.bf16.msra.mxu0 %v12097_v50  ;;  %14605 = vst [vmem:[#allocation54_spill] sm:$0xff] %v12124_v29  ;;  %v12137_v57 = vpack.c.bf16 %v216_v56, %v212_v55  ;;  %14610 = vst [vmem:[#allocation59_spill] sm:$0xff] %v12142_v5  ;;  %v225_v6 = vld [vmem:[#allocation6 + $0x78] sm:$0xff]  ;;  %v222_v14 = vld [vmem:[#allocation6 + $0x60] sm:$0xff] }
  0x90   :  { %14607 = vst [vmem:[#allocation56_spill] sm:$0xff] %v12132_v47  ;;  %8410 = vmatprep.subr.bf16.mxu0 %v12130_v41  ;;  %v12144_v15 = vpack.c.bf16 %v225_v6, %v221_v63  ;;  %v12146_v16 = vpack.c.bf16 %v222_v14, %v218_v12  ;;  %v220_v27 = vld [vmem:[#allocation6 + $0x50] sm:$0xff]  ;;  %v227_v33 = vld [vmem:[#allocation6 + $0x88] sm:$0xff]  ;;  %v229_v42 = vld [vmem:[#allocation6 + $0x98] sm:$0xff] }
  0x91   :  { %8396 = vmatpush1.bf16.msra.mxu1 %v12103_v60  ;;  %14609 = vst [vmem:[#allocation58_spill] sm:$0xff] %v12137_v57  ;;  %v224_v28 = vld [vmem:[#allocation6 + $0x70] sm:$0xff]  ;;  %v231_v34 = vld [vmem:[#allocation6 + $0xa8] sm:$0xff]  ;;  %v233_v46 = vld [vmem:[#allocation6 + $0xb8] sm:$0xff] }
  0x92   :  { %701 = vmatmul.mubr.f32.vlgmr.msra.gmra.mrb[0].mxu0 %v14222_v0  ;;  %8398 = vmatprep.subr.bf16.mxu1 %v12107_v61  ;;  %14611 = vst [vmem:[#allocation60_spill] sm:$0xff] %v12144_v15  ;;  %14612 = vst [vmem:[#allocation61_spill] sm:$0xff] %v12146_v16  ;;  %v12149_v32 = vpack.c.bf16 %v224_v28, %v220_v27  ;;  %v12154_v43 = vpack.c.bf16 %v231_v34, %v227_v33  ;;  %v226_v55 = vld [vmem:[#allocation6 + $0x80] sm:$0xff]  ;;  %v228_v63 = vld [vmem:[#allocation6 + $0x90] sm:$0xff] }
  0x93   :  { %891 = vmatprep.mubr.f32.mxu0 %v14222_v0  ;;  %8412 = vmatpush1.bf16.msra.mxu0 %v12134_v48  ;;  %v230_v56 = vld [vmem:[#allocation6 + $0xa0] sm:$0xff]  ;;  %v12156_v59 = vpack.c.bf16 %v233_v46, %v229_v42  ;;  %v232_v6 = vld [vmem:[#allocation6 + $0xb0] sm:$0xff]  ;;  %v235_v14 = vld [vmem:[#allocation6 + $0xc8] sm:$0xff] }
  0x94   :  { %8414 = vmatprep.subr.bf16.mxu0 %v12142_v5  ;;  %14613 = vst [vmem:[#allocation62_spill] sm:$0xff] %v12149_v32  ;;  %14614 = vst [vmem:[#allocation63_spill] sm:$0xff] %v12154_v43  ;;  %v12158_v62 = vpack.c.bf16 %v230_v56, %v226_v55  ;;  %v12161_v12 = vpack.c.bf16 %v232_v6, %v228_v63  ;;  %v239_v27 = vld [vmem:[#allocation6 + $0xe8] sm:$0xff]  ;;  %v237_v28 = vld [vmem:[#allocation6 + $0xd8] sm:$0xff] }
  0x95   :  { %8400 = vmatpush1.bf16.msra.mxu1 %v12111_v7  ;;  %14615 = vst [vmem:[#allocation64_spill] sm:$0xff] %v12156_v59  ;;  %v12166_v33 = vpack.c.bf16 %v239_v27, %v235_v14  ;;  %v241_v34 = vld [vmem:[#allocation6 + $0xf8] sm:$0xff]  ;;  %v234_v42 = vld [vmem:[#allocation6 + $0xc0] sm:$0xff]  ;;  %v236_v63 = vld [vmem:[#allocation6 + $0xd0] sm:$0xff] }
  0x96   :  { %8402 = vmatprep.subr.bf16.mxu1 %v12114_v11  ;;  %14616 = vst [vmem:[#allocation65_spill] sm:$0xff] %v12158_v62  ;;  %14617 = vst [vmem:[#allocation66_spill] sm:$0xff] %v12161_v12  ;;  %v238_v46 = vld [vmem:[#allocation6 + $0xe0] sm:$0xff]  ;;  %v12168_v55 = vpack.c.bf16 %v241_v34, %v237_v28  ;;  %v240_v6 = vld [vmem:[#allocation6 + $0xf0] sm:$0xff] }
  0x97   :  { %8416 = vmatpush1.bf16.msra.mxu0 %v12146_v16  ;;  %14618 = vst [vmem:[#allocation67_spill] sm:$0xff] %v12166_v33  ;;  %v12170_v56 = vpack.c.bf16 %v238_v46, %v234_v42  ;;  %v247_v14 = vld [vmem:[#allocation6 + $0x128] sm:$0xff]  ;;  %v245_v27 = vld [vmem:[#allocation6 + $0x118] sm:$0xff]  ;;  %v242_v34 = vld [vmem:[#allocation6 + $0x100] sm:$0xff] }
  0x98   :  { %8418 = vmatprep.subr.bf16.mxu0 %v12154_v43  ;;  %14619 = vst [vmem:[#allocation68_spill] sm:$0xff] %v12168_v55  ;;  %v249_v28 = vld [vmem:[#allocation6 + $0x138] sm:$0xff]  ;;  %v246_v42 = vld [vmem:[#allocation6 + $0x120] sm:$0xff]  ;;  %v291_v11 = vld [vmem:[#allocation7 + $0x88] sm:$0xff] }
  0x99   :  { %8404 = vmatpush1.bf16.msra.mxu1 %v12118_v23  ;;  %14620 = vst [vmem:[#allocation69_spill] sm:$0xff] %v12170_v56  ;;  %v12180_v46 = vpack.c.bf16 %v249_v28, %v245_v27  ;;  %v257_v27 = vld [vmem:[#allocation6 + $0x178] sm:$0xff]  ;;  %v250_v28 = vld [vmem:[#allocation6 + $0x140] sm:$0xff]  ;;  %v295_v16 = vld [vmem:[#allocation7 + $0xa8] sm:$0xff] }
  0x9a   :  { %8406 = vmatprep.subr.bf16.mxu1 %v12121_v24  ;;  %v293_v7 = vld [vmem:[#allocation7 + $0x98] sm:$0xff] }
  0x9b   :  { %8420 = vmatpush1.bf16.msra.mxu0 %v12158_v62  ;;  %14623 = vst [vmem:[#allocation72_spill] sm:$0xff] %v12180_v46  ;;  %v297_v5 = vld [vmem:[#allocation7 + $0xb8] sm:$0xff] }
  0x9c   :  { %8422 = vmatprep.subr.bf16.mxu0 %v12166_v33  ;;  %v309_v61 = vld [vmem:[#allocation7 + $0x118] sm:$0xff] }
  0x9d   :  { %8408 = vmatpush1.bf16.msra.mxu1 %v12124_v29 }
  0x9e   :  { %8442 = vmatprep.subr.bf16.mxu1 %v12132_v47  ;;  %v261_v47 = vld [vmem:[#allocation6 + $0x198] sm:$0xff] }
  0x9f   :  { %8424 = vmatpush1.bf16.msra.mxu0 %v12170_v56 }
  0xa0   :  { %772 = vmatmul.mubr.f32.vlgmr.msra.gmra.mrb[2].mxu1 %v14222_v0 }
  0xa1   :  { %962 = vmatprep.mubr.f32.mxu1 %v14222_v0  ;;  %8444 = vmatpush1.bf16.msra.mxu1 %v12137_v57  ;;  %v12173_v0 = vpack.c.bf16 %v240_v6, %v236_v63  ;;  %v244_v63 = vld [vmem:[#allocation6 + $0x110] sm:$0xff] }
  0xa2   :  { %8446 = vmatprep.subr.bf16.mxu1 %v12144_v15  ;;  %v248_v6 = vld [vmem:[#allocation6 + $0x130] sm:$0xff] }
  0xa3   :  { %14621 = vst [vmem:[#allocation70_spill] sm:$0xff] %v12173_v0 }
  0xa5   :  { %8448 = vmatpush1.bf16.msra.mxu1 %v12149_v32  ;;  %v12182_v32 = vpack.c.bf16 %v246_v42, %v242_v34  ;;  %v254_v34 = vld [vmem:[#allocation6 + $0x160] sm:$0xff] }
  0xa6   :  { %8450 = vmatprep.subr.bf16.mxu1 %v12156_v59  ;;  %v12194_v57 = vpack.c.bf16 %v254_v34, %v250_v28 }
  0xa7   :  { %14624 = vst [vmem:[#allocation73_spill] sm:$0xff] %v12182_v32 }
  0xa8   :  { %14628 = vst [vmem:[#allocation77_spill] sm:$0xff] %v12194_v57 }
  0xa9   :  { %8452 = vmatpush1.bf16.msra.mxu1 %v12161_v12  ;;  %v243_v12 = vld [vmem:[#allocation6 + $0x108] sm:$0xff] }
  0xaa   :  { %8454 = vmatprep.subr.bf16.mxu1 %v12168_v55  ;;  %v12178_v59 = vpack.c.bf16 %v247_v14, %v243_v12  ;;  %v12185_v55 = vpack.c.bf16 %v248_v6, %v244_v63  ;;  %v255_v12 = vld [vmem:[#allocation6 + $0x168] sm:$0xff]  ;;  %v253_v14 = vld [vmem:[#allocation6 + $0x158] sm:$0xff]  ;;  %v252_v63 = vld [vmem:[#allocation6 + $0x150] sm:$0xff] }
  0xab   :  { %v12192_v42 = vpack.c.bf16 %v257_v27, %v253_v14  ;;  %v256_v6 = vld [vmem:[#allocation6 + $0x170] sm:$0xff]  ;;  %v258_v14 = vld [vmem:[#allocation6 + $0x180] sm:$0xff] }
  0xac   :  { %14622 = vst [vmem:[#allocation71_spill] sm:$0xff] %v12178_v59  ;;  %8426 = vmatprep.subr.bf16.mxu0 %v12178_v59  ;;  %14625 = vst [vmem:[#allocation74_spill] sm:$0xff] %v12185_v55  ;;  %v263_v59 = vld [vmem:[#allocation6 + $0x1a8] sm:$0xff]  ;;  %v262_v27 = vld [vmem:[#allocation6 + $0x1a0] sm:$0xff] }
  0xad   :  { %8456 = vmatpush1.bf16.msra.mxu1 %v12173_v0  ;;  %8428 = vmatpush1.bf16.msra.mxu0 %v12182_v32  ;;  %v251_v0 = vld [vmem:[#allocation6 + $0x148] sm:$0xff]  ;;  %14627 = vst [vmem:[#allocation76_spill] sm:$0xff] %v12192_v42  ;;  %v12206_v34 = vpack.c.bf16 %v262_v27, %v258_v14  ;;  %v268_v14 = vld [vmem:[#allocation6 + $0x1d0] sm:$0xff] }
  0xae   :  { %8458 = vmatprep.subr.bf16.mxu1 %v12180_v46  ;;  %v12190_v15 = vpack.c.bf16 %v255_v12, %v251_v0  ;;  %v12197_v46 = vpack.c.bf16 %v256_v6, %v252_v63  ;;  %v259_v32 = vld [vmem:[#allocation6 + $0x188] sm:$0xff]  ;;  %v265_v12 = vld [vmem:[#allocation6 + $0x1b8] sm:$0xff]  ;;  %v260_v63 = vld [vmem:[#allocation6 + $0x190] sm:$0xff] }
  0xaf   :  { %v12201_v0 = vpack.c.bf16 %v263_v59, %v259_v32  ;;  %v12204_v28 = vpack.c.bf16 %v265_v12, %v261_v47  ;;  %14632 = vst [vmem:[#allocation81_spill] sm:$0xff] %v12206_v34  ;;  %v264_v6 = vld [vmem:[#allocation6 + $0x1b0] sm:$0xff]  ;;  %v273_v32 = vld [vmem:[#allocation6 + $0x1f8] sm:$0xff]  ;;  %v266_v47 = vld [vmem:[#allocation6 + $0x1c0] sm:$0xff] }
  0xb0   :  { %14626 = vst [vmem:[#allocation75_spill] sm:$0xff] %v12190_v15  ;;  %8430 = vmatprep.subr.bf16.mxu0 %v12190_v15  ;;  %14629 = vst [vmem:[#allocation78_spill] sm:$0xff] %v12197_v46  ;;  %v12209_v15 = vpack.c.bf16 %v264_v6, %v260_v63  ;;  %v270_v12 = vld [vmem:[#allocation6 + $0x1e0] sm:$0xff]  ;;  %v279_v63 = vld [vmem:[#allocation7 + $0x28] sm:$0xff] }
  0xb1   :  { %8460 = vmatpush1.bf16.msra.mxu1 %v12185_v55  ;;  %8432 = vmatpush1.bf16.msra.mxu0 %v12194_v57  ;;  %14630 = vst [vmem:[#allocation79_spill] sm:$0xff] %v12201_v0  ;;  %14631 = vst [vmem:[#allocation80_spill] sm:$0xff] %v12204_v28  ;;  %v267_v55 = vld [vmem:[#allocation6 + $0x1c8] sm:$0xff]  ;;  %v269_v57 = vld [vmem:[#allocation6 + $0x1d8] sm:$0xff]  ;;  %v12217_v27 = vpack.c.bf16 %v270_v12, %v266_v47 }
  0xb2   :  { %8462 = vmatprep.subr.bf16.mxu1 %v12192_v42  ;;  %8434 = vmatprep.subr.bf16.mxu0 %v12201_v0  ;;  %14633 = vst [vmem:[#allocation82_spill] sm:$0xff] %v12209_v15  ;;  %v271_v42 = vld [vmem:[#allocation6 + $0x1e8] sm:$0xff]  ;;  %v12214_v56 = vpack.c.bf16 %v273_v32, %v269_v57  ;;  %v277_v57 = vld [vmem:[#allocation7 + $0x18] sm:$0xff] }
  0xb3   :  { %v12212_v59 = vpack.c.bf16 %v271_v42, %v267_v55  ;;  %14636 = vst [vmem:[#allocation85_spill] sm:$0xff] %v12217_v27  ;;  %v275_v0 = vld [vmem:[#allocation7 + $0x8] sm:$0xff]  ;;  %v281_v42 = vld [vmem:[#allocation7 + $0x38] sm:$0xff] }
  0xb4   :  { %14635 = vst [vmem:[#allocation84_spill] sm:$0xff] %v12214_v56  ;;  %v12223_v55 = vpack.c.bf16 %v279_v63, %v275_v0  ;;  %v12226_v32 = vpack.c.bf16 %v281_v42, %v277_v57  ;;  %v209_v63 = vld [vmem:[%s14210_s3] sm:$0xf] }
  0xb5   :  { %8464 = vmatpush1.bf16.msra.mxu1 %v12197_v46  ;;  %14634 = vst [vmem:[#allocation83_spill] sm:$0xff] %v12212_v59  ;;  %8436 = vmatpush1.bf16.msra.mxu0 %v12206_v34  ;;  %v272_v46 = vld [vmem:[#allocation6 + $0x1f0] sm:$0xff] }
  0xb6   :  { %8466 = vmatprep.subr.bf16.mxu1 %v12204_v28  ;;  %8438 = vmatprep.subr.bf16.mxu0 %v12212_v59  ;;  %v12221_v6 = vpack.c.bf16 %v272_v46, %v268_v14  ;;  %14638 = vst [vmem:[#allocation87_spill] sm:$0xff] %v12223_v55  ;;  %14639 = vst [vmem:[#allocation88_spill] sm:$0xff] %v12226_v32  ;;  %v470_v46 = vlaneseq }
  0xb8   :  { %14637 = vst [vmem:[#allocation86_spill] sm:$0xff] %v12221_v6  ;;  %v471_v14 = vshrl.u32 %v470_v46, 7 }
  0xb9   :  { %8468 = vmatpush1.bf16.msra.mxu1 %v12209_v15  ;;  %8440 = vmatpush1.bf16.msra.mxu0 %v12217_v27 }
  0xba   :  { %8470 = vmatprep.subr.bf16.mxu1 %v12214_v56  ;;  %8474 = vmatprep.subr.bf16.mxu0 %v12223_v55  ;;  %v12232_v0 = vsub.s32 0, %v471_v14  ;;  %v12237_v57 = vsub.s32 1, %v471_v14  ;;  %v12247_v33 = vsub.s32 2, %v471_v14  ;;  %v12249_v24 = vsub.s32 3, %v471_v14 }
  0xbc   :  { %v12240_v42 = vrot.slane %v209_v63, %v12232_v0  ;;  %14642 = vst [vmem:[#allocation91_spill] sm:$0xff] %v12249_v24  ;;  %v12252_v62 = vrot.slane %v209_v63, %v12247_v33 }
  0xbd   :  { %8472 = vmatpush1.bf16.msra.mxu1 %v12221_v6  ;;  %v12243_v6 = vrot.slane %v209_v63, %v12237_v57 }
  0xbe   :  { %8506 = vmatprep.subr.bf16.mxu1 %v12226_v32  ;;  %14640 = vst [vmem:[#allocation89_spill] sm:$0xff] %v12240_v42  ;;  %14643 = vst [vmem:[#allocation92_spill] sm:$0xff] %v12252_v62 }
  0xbf   :  { %14641 = vst [vmem:[#allocation90_spill] sm:$0xff] %v12243_v6 }
 0x14b   :  { %v560_v47 = vpop.f32.mrb[0].mxu1 }
 0x14c   :  { %v562_v12 = vpop.f32.mrb[1].mxu1  ;;  %v561_v32 = vadd.f32 %v560_v47, %v12240_v42  ;;  %v12255_v47 = vrot.slane %v209_v63, %v12249_v24 }
 0x14d   :  { %v563_v56 = vadd.f32 %v562_v12, %v12243_v6 }
 0x14e   :  { %14644 = vst [vmem:[#allocation93_spill] sm:$0xff] %v12255_v47 }
 0x165   :  { %v702_v15 = vpop.f32.mrb[0].mxu0 }
 0x166   :  { %v778_v46 = vadd.f32 %v702_v15, %v561_v32  ;;  %v704_v28 = vpop.f32.mrb[1].mxu0 }
 0x167   :  { %v779_v55 = vadd.f32 %v704_v28, %v563_v56 }
 0x168   :  { %v782_v27 = vsub.f32 0.0, %v778_v46 }
 0x169   :  { %v788_v59 = vsub.f32 0.0, %v779_v55 }
 0x16a   :  { %v783_v34 = vmul.f32 1.442695, %v782_v27 }
 0x16b   :  { %v789_v29 = vmul.f32 1.442695, %v788_v59 }
 0x16c   :  { %11249 = vpow2.f32 %v783_v34 }
 0x16d   :  { %11251 = vpow2.f32 %v789_v29 }
 0x173   :  { %v773_v12 = vpop.f32.mrb[2].mxu1 }
 0x174   :  { %v11048_v15 = vadd.f32 %v773_v12, %v12252_v62  ;;  %v775_v56 = vpop.f32.mrb[3].mxu1 }
 0x175   :  { %v11049_v27 = vadd.f32 %v775_v56, %v12255_v47  ;;  %v274_v56 = vld [vmem:[#allocation7] sm:$0xff] }
 0x176   :  { %v11250_v28 = vpop.eup %11249  ;;  %11253 = vtanh.f32 %v11048_v15  ;;  %v278_v15 = vld [vmem:[#allocation7 + $0x20] sm:$0xff] }
 0x177   :  { %v11252_v59 = vpop.eup %11251  ;;  %v785_v34 = vadd.f32 1.0, %v11250_v28  ;;  %v795_v55 = vsub.f32 0.0, %v11049_v27  ;;  %v276_v28 = vld [vmem:[#allocation7 + $0x10] sm:$0xff]  ;;  %v12262_v43 = vpack.c.bf16 %v278_v15, %v274_v56  ;;  %v290_v15 = vld [vmem:[#allocation7 + $0x80] sm:$0xff] }
 0x178   :  { %v791_v29 = vadd.f32 1.0, %v11252_v59  ;;  %v280_v27 = vld [vmem:[#allocation7 + $0x30] sm:$0xff]  ;;  %v283_v59 = vld [vmem:[#allocation7 + $0x48] sm:$0xff] }
 0x179   :  { %11255 = vrcp.f32 %v785_v34  ;;  %v796_v32 = vmul.f32 1.442695, %v795_v55  ;;  %v287_v34 = vld [vmem:[#allocation7 + $0x68] sm:$0xff]  ;;  %v289_v55 = vld [vmem:[#allocation7 + $0x78] sm:$0xff]  ;;  %14646 = vst [vmem:[#allocation95_spill] sm:$0xff] %v12262_v43 }
 0x17a   :  { %11257 = vrcp.f32 %v791_v29  ;;  %v285_v29 = vld [vmem:[#allocation7 + $0x58] sm:$0xff] }
 0x17b   :  { %11259 = vpow2.f32 %v796_v32 }
 0x180   :  { %v11254_v14 = vpop.eup %11253 }
 0x183   :  { %v11256_v46 = vpop.eup %11255 }
 0x184   :  { %v11258_v63 = vpop.eup %11257  ;;  %v802_v6 = vmul.f32 %v11256_v46, %v11254_v14  ;;  %v12264_v14 = vpack.c.bf16 %v280_v27, %v276_v28  ;;  %v12268_v46 = vpack.c.bf16 %v287_v34, %v283_v59  ;;  %v294_v28 = vld [vmem:[#allocation7 + $0xa0] sm:$0xff]  ;;  %v12282_v27 = vpack.c.bf16 %v295_v16, %v291_v11  ;;  %v292_v34 = vld [vmem:[#allocation7 + $0x90] sm:$0xff] }
 0x185   :  { %v801_v42 = vmul.f32 0.0, %v11258_v63  ;;  %v11260_v23 = vpop.eup %11259  ;;  %v284_v63 = vld [vmem:[#allocation7 + $0x50] sm:$0xff]  ;;  %v12284_v59 = vpack.c.bf16 %v297_v5, %v293_v7  ;;  %v298_v7 = vld [vmem:[#allocation7 + $0xc0] sm:$0xff] }
 0x186   :  { %v798_v62 = vadd.f32 1.0, %v11260_v23  ;;  %14647 = vst [vmem:[#allocation96_spill] sm:$0xff] %v12264_v14  ;;  %14648 = vst [vmem:[#allocation97_spill] sm:$0xff] %v12268_v46  ;;  %v302_v5 = vld [vmem:[#allocation7 + $0xe0] sm:$0xff] }
 0x187   :  { %v12259_v12 = vadd.f32 %v802_v6, %v801_v42  ;;  %v282_v6 = vld [vmem:[#allocation7 + $0x40] sm:$0xff]  ;;  %14652 = vst [vmem:[#allocation101_spill] sm:$0xff] %v12282_v27  ;;  %14653 = vst [vmem:[#allocation102_spill] sm:$0xff] %v12284_v59 }
 0x188   :  { %v286_v42 = vld [vmem:[#allocation7 + $0x60] sm:$0xff] }
 0x189   :  { %14645 = vst [vmem:[#allocation94_spill] sm:$0xff] %v12259_v12  ;;  %11261 = vtanh.f32 %v12259_v12  ;;  %v288_v12 = vld [vmem:[#allocation7 + $0x70] sm:$0xff] }
 0x18a   :  { %11263 = vrcp.f32 %v798_v62  ;;  %v12270_v62 = vpack.c.bf16 %v289_v55, %v285_v29  ;;  %v12278_v56 = vpack.c.bf16 %v288_v12, %v284_v63  ;;  %v296_v29 = vld [vmem:[#allocation7 + $0xb0] sm:$0xff]  ;;  %v299_v55 = vld [vmem:[#allocation7 + $0xc8] sm:$0xff]  ;;  %v12290_v12 = vpack.c.bf16 %v294_v28, %v290_v15 }
 0x18b   :  { %v12292_v11 = vpack.c.bf16 %v296_v29, %v292_v34  ;;  %v300_v63 = vld [vmem:[#allocation7 + $0xd0] sm:$0xff]  ;;  %v12302_v15 = vpack.c.bf16 %v302_v5, %v298_v7  ;;  %v306_v34 = vld [vmem:[#allocation7 + $0x100] sm:$0xff] }
 0x18c   :  { %14649 = vst [vmem:[#allocation98_spill] sm:$0xff] %v12270_v62  ;;  %14651 = vst [vmem:[#allocation100_spill] sm:$0xff] %v12278_v56  ;;  %v310_v29 = vld [vmem:[#allocation7 + $0x120] sm:$0xff] }
 0x18d   :  { %14655 = vst [vmem:[#allocation103_spill] sm:$0xff] %v12290_v12  ;;  %14656 = vst [vmem:[#allocation104_spill] sm:$0xff] %v12292_v11  ;;  %v314_v5 = vld [vmem:[#allocation7 + $0x140] sm:$0xff] }
 0x18e   :  { %14659 = vst [vmem:[#allocation107_spill] sm:$0xff] %v12302_v15 }
 0x193   :  { %v11262_v32 = vpop.eup %11261 }
 0x194   :  { %v11264_v47 = vpop.eup %11263 }
 0x195   :  { %v12266_v23 = vmul.f32 %v11264_v47, %v11262_v32  ;;  %v12276_v47 = vpack.c.bf16 %v286_v42, %v282_v6  ;;  %v303_v32 = vld [vmem:[#allocation7 + $0xe8] sm:$0xff]  ;;  %v14654_v6 = vmov 0.0  }
 0x196   :  { %v12296_v16 = vpack.c.bf16 %v303_v32, %v299_v55  ;;  %v308_v55 = vld [vmem:[#allocation7 + $0x110] sm:$0xff] }
 0x197   :  { %892 = vmatmul.mubr.f32.vlgmr.msra.gmra.mrb[2].mxu0 %v12266_v23  ;;  %963 = vmatmul.mubr.f32.vlgmr.msra.gmra.mrb[4].mxu1 %v12266_v23  ;;  %14650 = vst [vmem:[#allocation99_spill] sm:$0xff] %v12276_v47  ;;  %v312_v32 = vld [vmem:[#allocation7 + $0x130] sm:$0xff] }
 0x198   :  { %8476 = vmatpush1.bf16.msra.mxu0 %v12262_v43  ;;  %8508 = vmatpush1.bf16.msra.mxu1 %v12264_v14  ;;  %v301_v43 = vld [vmem:[#allocation7 + $0xd8] sm:$0xff]  ;;  %14657 = vst [vmem:[#allocation105_spill] sm:$0xff] %v12296_v16  ;;  %v12316_v7 = vpack.c.bf16 %v312_v32, %v308_v55  ;;  %v322_v55 = vld [vmem:[#allocation7 + $0x180] sm:$0xff] }
 0x199   :  { %8478 = vmatprep.subr.bf16.mxu0 %v12268_v46  ;;  %8510 = vmatprep.subr.bf16.mxu1 %v12270_v62  ;;  %v305_v14 = vld [vmem:[#allocation7 + $0xf8] sm:$0xff]  ;;  %v304_v62 = vld [vmem:[#allocation7 + $0xf0] sm:$0xff]  ;;  %v307_v46 = vld [vmem:[#allocation7 + $0x108] sm:$0xff] }
 0x19a   :  { %1033 = vmatprep.mubr.f32.mxu0 %v14654_v6  ;;  %1104 = vmatprep.mubr.f32.mxu1 %v14654_v6  ;;  %v12298_v42 = vpack.c.bf16 %v305_v14, %v301_v43  ;;  %v12304_v28 = vpack.c.bf16 %v304_v62, %v300_v63  ;;  %v12314_v62 = vpack.c.bf16 %v310_v29, %v306_v34  ;;  %v318_v63 = vld [vmem:[#allocation7 + $0x160] sm:$0xff] }
 0x19b   :  { %14664 = vst [vmem:[#allocation112_spill] sm:$0xff] %v12316_v7  ;;  %v12326_v34 = vpack.c.bf16 %v318_v63, %v314_v5  ;;  %v326_v32 = vld [vmem:[#allocation7 + $0x1a0] sm:$0xff] }
 0x19c   :  { %8480 = vmatpush1.bf16.msra.mxu0 %v12276_v47  ;;  %8512 = vmatpush1.bf16.msra.mxu1 %v12278_v56  ;;  %14658 = vst [vmem:[#allocation106_spill] sm:$0xff] %v12298_v42  ;;  %v311_v47 = vld [vmem:[#allocation7 + $0x128] sm:$0xff]  ;;  %v313_v56 = vld [vmem:[#allocation7 + $0x138] sm:$0xff]  ;;  %14660 = vst [vmem:[#allocation108_spill] sm:$0xff] %v12304_v28  ;;  %v12338_v5 = vpack.c.bf16 %v326_v32, %v322_v55 }
 0x19d   :  { %8482 = vmatprep.subr.bf16.mxu0 %v12282_v27  ;;  %8514 = vmatprep.subr.bf16.mxu1 %v12284_v59  ;;  %v12308_v43 = vpack.c.bf16 %v311_v47, %v307_v46  ;;  %v12310_v14 = vpack.c.bf16 %v313_v56, %v309_v61  ;;  %v315_v59 = vld [vmem:[#allocation7 + $0x148] sm:$0xff]  ;;  %v317_v27 = vld [vmem:[#allocation7 + $0x158] sm:$0xff]  ;;  %14663 = vst [vmem:[#allocation111_spill] sm:$0xff] %v12314_v62  ;;  %v316_v47 = vld [vmem:[#allocation7 + $0x150] sm:$0xff] }
 0x19e   :  { %v320_v56 = vld [vmem:[#allocation7 + $0x170] sm:$0xff]  ;;  %14667 = vst [vmem:[#allocation115_spill] sm:$0xff] %v12326_v34  ;;  %14671 = vst [vmem:[#allocation119_spill] sm:$0xff] %v12338_v5 }
 0x19f   :  { %14661 = vst [vmem:[#allocation109_spill] sm:$0xff] %v12308_v43  ;;  %14662 = vst [vmem:[#allocation110_spill] sm:$0xff] %v12310_v14  ;;  %v12328_v29 = vpack.c.bf16 %v320_v56, %v316_v47  ;;  %v330_v47 = vld [vmem:[#allocation7 + $0x1c0] sm:$0xff]  ;;  %v336_v56 = vld [vmem:[#allocation7 + $0x1f0] sm:$0xff] }
 0x1a0   :  { %8484 = vmatpush1.bf16.msra.mxu0 %v12290_v12  ;;  %8516 = vmatpush1.bf16.msra.mxu1 %v12292_v11  ;;  %v319_v12 = vld [vmem:[#allocation7 + $0x168] sm:$0xff]  ;;  %v321_v11 = vld [vmem:[#allocation7 + $0x178] sm:$0xff] }
 0x1a1   :  { %8486 = vmatprep.subr.bf16.mxu0 %v12296_v16  ;;  %8518 = vmatprep.subr.bf16.mxu1 %v12298_v42  ;;  %v12320_v61 = vpack.c.bf16 %v319_v12, %v315_v59  ;;  %v12322_v46 = vpack.c.bf16 %v321_v11, %v317_v27  ;;  %v323_v42 = vld [vmem:[#allocation7 + $0x188] sm:$0xff]  ;;  %v325_v16 = vld [vmem:[#allocation7 + $0x198] sm:$0xff]  ;;  %14668 = vst [vmem:[#allocation116_spill] sm:$0xff] %v12328_v29  ;;  %v324_v12 = vld [vmem:[#allocation7 + $0x190] sm:$0xff] }
 0x1a2   :  { %v328_v11 = vld [vmem:[#allocation7 + $0x1b0] sm:$0xff] }
 0x1a3   :  { %14665 = vst [vmem:[#allocation113_spill] sm:$0xff] %v12320_v61  ;;  %14666 = vst [vmem:[#allocation114_spill] sm:$0xff] %v12322_v46  ;;  %v12340_v63 = vpack.c.bf16 %v328_v11, %v324_v12  ;;  %v346_v12 = vld [vmem:[#allocation9 + $0x38] sm:$0xff]  ;;  %v339_v11 = vld [vmem:[#allocation9] sm:$0xff] }
 0x1a4   :  { %8488 = vmatpush1.bf16.msra.mxu0 %v12302_v15  ;;  %8520 = vmatpush1.bf16.msra.mxu1 %v12304_v28  ;;  %v327_v15 = vld [vmem:[#allocation7 + $0x1a8] sm:$0xff]  ;;  %v329_v28 = vld [vmem:[#allocation7 + $0x1b8] sm:$0xff] }
 0x1a5   :  { %8490 = vmatprep.subr.bf16.mxu0 %v12308_v43  ;;  %8522 = vmatprep.subr.bf16.mxu1 %v12310_v14  ;;  %v12332_v27 = vpack.c.bf16 %v327_v15, %v323_v42  ;;  %v12334_v59 = vpack.c.bf16 %v329_v28, %v325_v16  ;;  %v331_v14 = vld [vmem:[#allocation7 + $0x1c8] sm:$0xff]  ;;  %v333_v43 = vld [vmem:[#allocation7 + $0x1d8] sm:$0xff]  ;;  %14672 = vst [vmem:[#allocation120_spill] sm:$0xff] %v12340_v63  ;;  %v334_v15 = vld [vmem:[#allocation7 + $0x1e0] sm:$0xff] }
 0x1a6   :  { %v332_v28 = vld [vmem:[#allocation7 + $0x1d0] sm:$0xff]  ;;  %v12350_v55 = vpack.c.bf16 %v334_v15, %v330_v47  ;;  %v343_v47 = vld [vmem:[#allocation9 + $0x20] sm:$0xff] }
 0x1a7   :  { %14669 = vst [vmem:[#allocation117_spill] sm:$0xff] %v12332_v27  ;;  %14670 = vst [vmem:[#allocation118_spill] sm:$0xff] %v12334_v59  ;;  %v12352_v32 = vpack.c.bf16 %v336_v56, %v332_v28  ;;  %v12366_v28 = vpack.c.bf16 %v343_v47, %v339_v11  ;;  %v341_v56 = vld [vmem:[#allocation9 + $0x10] sm:$0xff]  ;;  %v351_v11 = vld [vmem:[#allocation9 + $0x60] sm:$0xff] }
 0x1a8   :  { %8492 = vmatpush1.bf16.msra.mxu0 %v12314_v62  ;;  %8524 = vmatpush1.bf16.msra.mxu1 %v12316_v7  ;;  %v335_v62 = vld [vmem:[#allocation7 + $0x1e8] sm:$0xff]  ;;  %v337_v7 = vld [vmem:[#allocation7 + $0x1f8] sm:$0xff]  ;;  %14675 = vst [vmem:[#allocation123_spill] sm:$0xff] %v12350_v55 }
 0x1a9   :  { %8494 = vmatprep.subr.bf16.mxu0 %v12320_v61  ;;  %8526 = vmatprep.subr.bf16.mxu1 %v12322_v46  ;;  %v12344_v16 = vpack.c.bf16 %v335_v62, %v331_v14  ;;  %v12346_v42 = vpack.c.bf16 %v337_v7, %v333_v43  ;;  %14676 = vst [vmem:[#allocation124_spill] sm:$0xff] %v12352_v32  ;;  %v340_v43 = vld [vmem:[#allocation9 + $0x8] sm:$0xff]  ;;  %v342_v62 = vld [vmem:[#allocation9 + $0x18] sm:$0xff]  ;;  %14679 = vst [vmem:[#allocation127_spill] sm:$0xff] %v12366_v28 }
 0x1aa   :  { %v344_v14 = vld [vmem:[#allocation9 + $0x28] sm:$0xff]  ;;  %v12364_v15 = vpack.c.bf16 %v346_v12, %v342_v62  ;;  %v354_v62 = vld [vmem:[#allocation9 + $0x78] sm:$0xff]  ;;  %v347_v12 = vld [vmem:[#allocation9 + $0x40] sm:$0xff] }
 0x1ab   :  { %14673 = vst [vmem:[#allocation121_spill] sm:$0xff] %v12344_v16  ;;  %14674 = vst [vmem:[#allocation122_spill] sm:$0xff] %v12346_v42  ;;  %v12362_v7 = vpack.c.bf16 %v344_v14, %v340_v43  ;;  %v352_v43 = vld [vmem:[#allocation9 + $0x68] sm:$0xff]  ;;  %v350_v14 = vld [vmem:[#allocation9 + $0x58] sm:$0xff] }
 0x1ac   :  { %8496 = vmatpush1.bf16.msra.mxu0 %v12326_v34  ;;  %8528 = vmatpush1.bf16.msra.mxu1 %v12328_v29  ;;  %14678 = vst [vmem:[#allocation126_spill] sm:$0xff] %v12364_v15  ;;  %v12376_v47 = vpack.c.bf16 %v354_v62, %v350_v14  ;;  %v362_v14 = vld [vmem:[#allocation9 + $0xb8] sm:$0xff]  ;;  %v355_v62 = vld [vmem:[#allocation9 + $0x80] sm:$0xff]  ;;  %v424_v34 = vld [vmem:[#allocation10 + $0xa8] sm:$0xff] }
 0x1ad   :  { %8498 = vmatprep.subr.bf16.mxu0 %v12332_v27  ;;  %8530 = vmatprep.subr.bf16.mxu1 %v12334_v59  ;;  %14677 = vst [vmem:[#allocation125_spill] sm:$0xff] %v12362_v7  ;;  %v394_v59 = vld [vmem:[#allocation9 + $0x1b8] sm:$0xff]  ;;  %v404_v27 = vld [vmem:[#allocation10 + $0x8] sm:$0xff] }
 0x1ae   :  { %14682 = vst [vmem:[#allocation130_spill] sm:$0xff] %v12376_v47  ;;  %v406_v29 = vld [vmem:[#allocation10 + $0x18] sm:$0xff] }
 0x1af   :  { %v422_v46 = vld [vmem:[#allocation10 + $0x98] sm:$0xff] }
 0x1b0   :  { %8500 = vmatpush1.bf16.msra.mxu0 %v12338_v5  ;;  %8532 = vmatpush1.bf16.msra.mxu1 %v12340_v63  ;;  %v12378_v63 = vpack.c.bf16 %v351_v11, %v347_v12  ;;  %v359_v12 = vld [vmem:[#allocation9 + $0xa0] sm:$0xff]  ;;  %v390_v5 = vld [vmem:[#allocation9 + $0x198] sm:$0xff] }
 0x1b1   :  { %8502 = vmatprep.subr.bf16.mxu0 %v12344_v16  ;;  %8534 = vmatprep.subr.bf16.mxu1 %v12346_v42  ;;  %v348_v42 = vld [vmem:[#allocation9 + $0x48] sm:$0xff]  ;;  %v426_v61 = vld [vmem:[#allocation10 + $0xb8] sm:$0xff] }
 0x1b2   :  { %v12374_v16 = vpack.c.bf16 %v352_v43, %v348_v42  ;;  %14683 = vst [vmem:[#allocation131_spill] sm:$0xff] %v12378_v63  ;;  %v360_v42 = vld [vmem:[#allocation9 + $0xa8] sm:$0xff]  ;;  %v358_v43 = vld [vmem:[#allocation9 + $0x98] sm:$0xff] }
 0x1b3   :  { %v12388_v11 = vpack.c.bf16 %v362_v14, %v358_v43  ;;  %v370_v43 = vld [vmem:[#allocation9 + $0xf8] sm:$0xff]  ;;  %v363_v14 = vld [vmem:[#allocation9 + $0xc0] sm:$0xff] }
 0x1b4   :  { %8504 = vmatpush1.bf16.msra.mxu0 %v12350_v55  ;;  %8536 = vmatpush1.bf16.msra.mxu1 %v12352_v32  ;;  %v345_v32 = vld [vmem:[#allocation9 + $0x30] sm:$0xff]  ;;  %14681 = vst [vmem:[#allocation129_spill] sm:$0xff] %v12374_v16 }
 0x1b5   :  { %8538 = vmatprep.subr.bf16.mxu0 %v12362_v7  ;;  %v12369_v55 = vpack.c.bf16 %v345_v32, %v341_v56  ;;  %8570 = vmatprep.subr.bf16.mxu1 %v12364_v15  ;;  %v349_v32 = vld [vmem:[#allocation9 + $0x50] sm:$0xff]  ;;  %14686 = vst [vmem:[#allocation134_spill] sm:$0xff] %v12388_v11  ;;  %v12390_v7 = vpack.c.bf16 %v359_v12, %v355_v62  ;;  %v367_v62 = vld [vmem:[#allocation9 + $0xe0] sm:$0xff] }
 0x1b6   :  { %v353_v56 = vld [vmem:[#allocation9 + $0x70] sm:$0xff] }
 0x1b7   :  { %1034 = vmatmul.mubr.f32.vlgmr.msra.gmra.mrb[2].mxu0 %v14654_v6  ;;  %1105 = vmatmul.mubr.f32.vlgmr.msra.gmra.mrb[4].mxu1 %v14654_v6  ;;  %14680 = vst [vmem:[#allocation128_spill] sm:$0xff] %v12369_v55  ;;  %v12381_v15 = vpack.c.bf16 %v353_v56, %v349_v32  ;;  %14687 = vst [vmem:[#allocation135_spill] sm:$0xff] %v12390_v7  ;;  %v357_v32 = vld [vmem:[#allocation9 + $0x90] sm:$0xff] }
 0x1b8   :  { %1224 = vmatprep.mubr.f32.mxu0 %v14654_v6  ;;  %1295 = vmatprep.mubr.f32.mxu1 %v14654_v6  ;;  %v361_v56 = vld [vmem:[#allocation9 + $0xb0] sm:$0xff] }
 0x1b9   :  { %8540 = vmatpush1.bf16.msra.mxu0 %v12366_v28  ;;  %8572 = vmatpush1.bf16.msra.mxu1 %v12369_v55  ;;  %14684 = vst [vmem:[#allocation132_spill] sm:$0xff] %v12381_v15  ;;  %v356_v55 = vld [vmem:[#allocation9 + $0x88] sm:$0xff] }
 0x1ba   :  { %8542 = vmatprep.subr.bf16.mxu0 %v12374_v16  ;;  %8574 = vmatprep.subr.bf16.mxu1 %v12376_v47  ;;  %v12386_v28 = vpack.c.bf16 %v360_v42, %v356_v55  ;;  %v12393_v47 = vpack.c.bf16 %v361_v56, %v357_v32  ;;  %v368_v55 = vld [vmem:[#allocation9 + $0xe8] sm:$0xff]  ;;  %v366_v42 = vld [vmem:[#allocation9 + $0xd8] sm:$0xff]  ;;  %v12402_v16 = vpack.c.bf16 %v367_v62, %v363_v14  ;;  %v365_v32 = vld [vmem:[#allocation9 + $0xd0] sm:$0xff] }
 0x1bb   :  { %v12400_v12 = vpack.c.bf16 %v370_v43, %v366_v42  ;;  %v369_v56 = vld [vmem:[#allocation9 + $0xf0] sm:$0xff]  ;;  %v378_v42 = vld [vmem:[#allocation9 + $0x138] sm:$0xff]  ;;  %v371_v43 = vld [vmem:[#allocation9 + $0x100] sm:$0xff] }
 0x1bc   :  { %14685 = vst [vmem:[#allocation133_spill] sm:$0xff] %v12386_v28  ;;  %14688 = vst [vmem:[#allocation136_spill] sm:$0xff] %v12393_v47  ;;  %v375_v14 = vld [vmem:[#allocation9 + $0x120] sm:$0xff] }
 0x1bd   :  { %8544 = vmatpush1.bf16.msra.mxu0 %v12378_v63  ;;  %8576 = vmatpush1.bf16.msra.mxu1 %v12381_v15  ;;  %v364_v15 = vld [vmem:[#allocation9 + $0xc8] sm:$0xff]  ;;  %14690 = vst [vmem:[#allocation138_spill] sm:$0xff] %v12400_v12  ;;  %14691 = vst [vmem:[#allocation139_spill] sm:$0xff] %v12402_v16 }
 0x1be   :  { %8546 = vmatprep.subr.bf16.mxu0 %v12386_v28  ;;  %8578 = vmatprep.subr.bf16.mxu1 %v12388_v11  ;;  %v12398_v63 = vpack.c.bf16 %v368_v55, %v364_v15  ;;  %v12405_v11 = vpack.c.bf16 %v369_v56, %v365_v32  ;;  %v376_v15 = vld [vmem:[#allocation9 + $0x128] sm:$0xff]  ;;  %v374_v55 = vld [vmem:[#allocation9 + $0x118] sm:$0xff]  ;;  %v12414_v28 = vpack.c.bf16 %v375_v14, %v371_v43  ;;  %v373_v32 = vld [vmem:[#allocation9 + $0x110] sm:$0xff] }
 0x1bf   :  { %v12412_v62 = vpack.c.bf16 %v378_v42, %v374_v55  ;;  %v377_v56 = vld [vmem:[#allocation9 + $0x130] sm:$0xff]  ;;  %v386_v55 = vld [vmem:[#allocation9 + $0x178] sm:$0xff]  ;;  %v379_v42 = vld [vmem:[#allocation9 + $0x140] sm:$0xff] }
 0x1c0   :  { %14689 = vst [vmem:[#allocation137_spill] sm:$0xff] %v12398_v63  ;;  %14692 = vst [vmem:[#allocation140_spill] sm:$0xff] %v12405_v11  ;;  %v383_v43 = vld [vmem:[#allocation9 + $0x160] sm:$0xff] }
 0x1c1   :  { %8548 = vmatpush1.bf16.msra.mxu0 %v12390_v7  ;;  %8580 = vmatpush1.bf16.msra.mxu1 %v12393_v47  ;;  %v372_v47 = vld [vmem:[#allocation9 + $0x108] sm:$0xff]  ;;  %14694 = vst [vmem:[#allocation142_spill] sm:$0xff] %v12412_v62  ;;  %14695 = vst [vmem:[#allocation143_spill] sm:$0xff] %v12414_v28 }
 0x1c2   :  { %8550 = vmatprep.subr.bf16.mxu0 %v12398_v63  ;;  %8582 = vmatprep.subr.bf16.mxu1 %v12400_v12  ;;  %v12410_v7 = vpack.c.bf16 %v376_v15, %v372_v47  ;;  %v12417_v12 = vpack.c.bf16 %v377_v56, %v373_v32  ;;  %v384_v47 = vld [vmem:[#allocation9 + $0x168] sm:$0xff]  ;;  %v382_v15 = vld [vmem:[#allocation9 + $0x158] sm:$0xff]  ;;  %v12426_v63 = vpack.c.bf16 %v383_v43, %v379_v42  ;;  %v381_v32 = vld [vmem:[#allocation9 + $0x150] sm:$0xff] }
 0x1c3   :  { %v12424_v14 = vpack.c.bf16 %v386_v55, %v382_v15  ;;  %v385_v56 = vld [vmem:[#allocation9 + $0x170] sm:$0xff]  ;;  %v387_v15 = vld [vmem:[#allocation9 + $0x180] sm:$0xff] }
 0x1c4   :  { %14693 = vst [vmem:[#allocation141_spill] sm:$0xff] %v12410_v7  ;;  %14696 = vst [vmem:[#allocation144_spill] sm:$0xff] %v12417_v12  ;;  %v391_v55 = vld [vmem:[#allocation9 + $0x1a0] sm:$0xff]  ;;  %v389_v42 = vld [vmem:[#allocation9 + $0x190] sm:$0xff] }
 0x1c5   :  { %8552 = vmatpush1.bf16.msra.mxu0 %v12402_v16  ;;  %8584 = vmatpush1.bf16.msra.mxu1 %v12405_v11  ;;  %v380_v11 = vld [vmem:[#allocation9 + $0x148] sm:$0xff]  ;;  %14698 = vst [vmem:[#allocation146_spill] sm:$0xff] %v12424_v14  ;;  %14699 = vst [vmem:[#allocation147_spill] sm:$0xff] %v12426_v63  ;;  %v12438_v43 = vpack.c.bf16 %v391_v55, %v387_v15  ;;  %v401_v15 = vld [vmem:[#allocation9 + $0x1f0] sm:$0xff] }
 0x1c6   :  { %8554 = vmatprep.subr.bf16.mxu0 %v12410_v7  ;;  %8586 = vmatprep.subr.bf16.mxu1 %v12412_v62  ;;  %v12422_v16 = vpack.c.bf16 %v384_v47, %v380_v11  ;;  %v388_v7 = vld [vmem:[#allocation9 + $0x188] sm:$0xff]  ;;  %v12435_v47 = vpack.c.bf16 %v394_v59, %v390_v5  ;;  %v398_v59 = vld [vmem:[#allocation9 + $0x1d8] sm:$0xff] }
 0x1c7   :  { %v392_v62 = vld [vmem:[#allocation9 + $0x1a8] sm:$0xff]  ;;  %14703 = vst [vmem:[#allocation151_spill] sm:$0xff] %v12438_v43  ;;  %v402_v5 = vld [vmem:[#allocation9 + $0x1f8] sm:$0xff] }
 0x1c8   :  { %14697 = vst [vmem:[#allocation145_spill] sm:$0xff] %v12422_v16  ;;  %v12433_v11 = vpack.c.bf16 %v392_v62, %v388_v7  ;;  %14702 = vst [vmem:[#allocation150_spill] sm:$0xff] %v12435_v47  ;;  %v395_v62 = vld [vmem:[#allocation9 + $0x1c0] sm:$0xff] }
 0x1c9   :  { %8556 = vmatpush1.bf16.msra.mxu0 %v12414_v28  ;;  %8588 = vmatpush1.bf16.msra.mxu1 %v12417_v12  ;;  %v12429_v28 = vpack.c.bf16 %v385_v56, %v381_v32  ;;  %v393_v32 = vld [vmem:[#allocation9 + $0x1b0] sm:$0xff]  ;;  %v396_v56 = vld [vmem:[#allocation9 + $0x1c8] sm:$0xff]  ;;  %v399_v12 = vld [vmem:[#allocation9 + $0x1e0] sm:$0xff] }
 0x1ca   :  { %8558 = vmatprep.subr.bf16.mxu0 %v12422_v16  ;;  %8590 = vmatprep.subr.bf16.mxu1 %v12424_v14  ;;  %14701 = vst [vmem:[#allocation149_spill] sm:$0xff] %v12433_v11  ;;  %v400_v16 = vld [vmem:[#allocation9 + $0x1e8] sm:$0xff]  ;;  %v12442_v14 = vpack.c.bf16 %v393_v32, %v389_v42  ;;  %v12449_v55 = vpack.c.bf16 %v399_v12, %v395_v62  ;;  %v410_v32 = vld [vmem:[#allocation10 + $0x38] sm:$0xff] }
 0x1cb   :  { %14700 = vst [vmem:[#allocation148_spill] sm:$0xff] %v12429_v28  ;;  %v12444_v7 = vpack.c.bf16 %v400_v16, %v396_v56  ;;  %v12458_v56 = vpack.c.bf16 %v410_v32, %v406_v29 }
 0x1cc   :  { %14704 = vst [vmem:[#allocation152_spill] sm:$0xff] %v12442_v14  ;;  %14707 = vst [vmem:[#allocation155_spill] sm:$0xff] %v12449_v55 }
 0x1cd   :  { %8560 = vmatpush1.bf16.msra.mxu0 %v12426_v63  ;;  %8592 = vmatpush1.bf16.msra.mxu1 %v12429_v28  ;;  %14705 = vst [vmem:[#allocation153_spill] sm:$0xff] %v12444_v7  ;;  %v12446_v63 = vpack.c.bf16 %v402_v5, %v398_v59  ;;  %v397_v28 = vld [vmem:[#allocation9 + $0x1d0] sm:$0xff]  ;;  %14710 = vst [vmem:[#allocation158_spill] sm:$0xff] %v12458_v56 }
 0x1ce   :  { %8562 = vmatprep.subr.bf16.mxu0 %v12433_v11  ;;  %8594 = vmatprep.subr.bf16.mxu1 %v12435_v47  ;;  %v408_v11 = vld [vmem:[#allocation10 + $0x28] sm:$0xff]  ;;  %v12453_v16 = vpack.c.bf16 %v401_v15, %v397_v28  ;;  %v338_v28 = vld [vmem:[%s14213_s6] sm:$0xf] }
 0x1cf   :  { %14706 = vst [vmem:[#allocation154_spill] sm:$0xff] %v12446_v63  ;;  %v12455_v42 = vpack.c.bf16 %v408_v11, %v404_v27  ;;  %v12468_v27 = vrot.slane %v338_v28, %v12232_v0  ;;  %v12471_v12 = vrot.slane %v338_v28, %v12237_v57  ;;  %v12476_v32 = vrot.slane %v338_v28, %v12249_v24  ;;  %v420_v47 = vld [vmem:[#allocation10 + $0x88] sm:$0xff] }
 0x1d0   :  { %14708 = vst [vmem:[#allocation156_spill] sm:$0xff] %v12453_v16 }
 0x1d1   :  { %8564 = vmatpush1.bf16.msra.mxu0 %v12438_v43  ;;  %8596 = vmatpush1.bf16.msra.mxu1 %v12442_v14  ;;  %14709 = vst [vmem:[#allocation157_spill] sm:$0xff] %v12455_v42  ;;  %14711 = vst [vmem:[#allocation159_spill] sm:$0xff] %v12468_v27  ;;  %v12480_v14 = vrot.slane %v338_v28, %v12247_v33 }
 0x1d2   :  { %8566 = vmatprep.subr.bf16.mxu0 %v12444_v7  ;;  %8598 = vmatprep.subr.bf16.mxu1 %v12446_v63  ;;  %14712 = vst [vmem:[#allocation160_spill] sm:$0xff] %v12471_v12  ;;  %14713 = vst [vmem:[#allocation161_spill] sm:$0xff] %v12476_v32 }
 0x1d3   :  { %14714 = vst [vmem:[#allocation162_spill] sm:$0xff] %v12480_v14 }
 0x1d5   :  { %8568 = vmatpush1.bf16.msra.mxu0 %v12449_v55  ;;  %8600 = vmatpush1.bf16.msra.mxu1 %v12453_v16 }
 0x1d6   :  { %8602 = vmatprep.subr.bf16.mxu0 %v12455_v42  ;;  %8634 = vmatprep.subr.bf16.mxu1 %v12458_v56 }
 0x28a   :  { %v1035_v29 = vpop.f32.mrb[2].mxu0  ;;  %v1106_v11 = vpop.f32.mrb[4].mxu1 }
 0x28b   :  { %v11050_v59 = vadd.f32 %v1035_v29, %v12468_v27  ;;  %v1037_v5 = vpop.f32.mrb[3].mxu0  ;;  %v1108_v62 = vpop.f32.mrb[5].mxu1  ;;  %v11052_v27 = vadd.f32 %v1106_v11, %v12480_v14  ;;  %v407_v11 = vld [vmem:[#allocation10 + $0x20] sm:$0xff] }
 0x28c   :  { %v11051_v15 = vadd.f32 %v1037_v5, %v12471_v12  ;;  %v11053_v63 = vadd.f32 %v1108_v62, %v12476_v32 }
 0x28d   :  { %v1115_v56 = vsub.f32 0.0, %v11050_v59 }
 0x28e   :  { %v1121_v42 = vsub.f32 0.0, %v11051_v15  ;;  %v1128_v7 = vsub.f32 0.0, %v11053_v63 }
 0x28f   :  { %v1116_v16 = vmul.f32 1.442695, %v1115_v56 }
 0x290   :  { %v1122_v55 = vmul.f32 1.442695, %v1121_v42  ;;  %v1129_v29 = vmul.f32 1.442695, %v1128_v7  ;;  %v403_v7 = vld [vmem:[#allocation10] sm:$0xff] }
 0x291   :  { %11265 = vpow2.f32 %v1116_v16  ;;  %v12486_v32 = vpack.c.bf16 %v407_v11, %v403_v7  ;;  %v419_v7 = vld [vmem:[#allocation10 + $0x80] sm:$0xff] }
 0x292   :  { %11267 = vpow2.f32 %v1122_v55  ;;  %v423_v11 = vld [vmem:[#allocation10 + $0xa0] sm:$0xff] }
 0x293   :  { %11269 = vpow2.f32 %v1129_v29  ;;  %v409_v29 = vld [vmem:[#allocation10 + $0x30] sm:$0xff]  ;;  %14716 = vst [vmem:[#allocation164_spill] sm:$0xff] %v12486_v32 }
 0x294   :  { %11271 = vtanh.f32 %v11052_v27  ;;  %v412_v27 = vld [vmem:[#allocation10 + $0x48] sm:$0xff] }
 0x29b   :  { %v11266_v43 = vpop.eup %11265 }
 0x29c   :  { %v11268_v5 = vpop.eup %11267  ;;  %v1118_v12 = vadd.f32 1.0, %v11266_v43  ;;  %v405_v43 = vld [vmem:[#allocation10 + $0x10] sm:$0xff] }
 0x29d   :  { %v1124_v59 = vadd.f32 1.0, %v11268_v5  ;;  %v11270_v42 = vpop.eup %11269  ;;  %v416_v5 = vld [vmem:[#allocation10 + $0x68] sm:$0xff] }
 0x29e   :  { %11273 = vrcp.f32 %v1118_v12  ;;  %v11272_v56 = vpop.eup %11271  ;;  %v1131_v63 = vadd.f32 1.0, %v11270_v42  ;;  %v414_v12 = vld [vmem:[#allocation10 + $0x58] sm:$0xff]  ;;  %v411_v42 = vld [vmem:[#allocation10 + $0x40] sm:$0xff] }
 0x29f   :  { %11275 = vrcp.f32 %v1124_v59  ;;  %v418_v59 = vld [vmem:[#allocation10 + $0x78] sm:$0xff] }
 0x2a0   :  { %11277 = vrcp.f32 %v1131_v63  ;;  %v12494_v63 = vpack.c.bf16 %v418_v59, %v414_v12  ;;  %v428_v12 = vld [vmem:[#allocation10 + $0xc8] sm:$0xff] }
 0x2a1   :  { %v432_v59 = vld [vmem:[#allocation10 + $0xe8] sm:$0xff] }
 0x2a2   :  { %14719 = vst [vmem:[#allocation167_spill] sm:$0xff] %v12494_v63 }
 0x2a8   :  { %v11274_v62 = vpop.eup %11273 }
 0x2a9   :  { %v11276_v16 = vpop.eup %11275  ;;  %v1135_v55 = vmul.f32 %v11274_v62, %v11272_v56  ;;  %v12488_v56 = vpack.c.bf16 %v409_v29, %v405_v43  ;;  %v415_v62 = vld [vmem:[#allocation10 + $0x60] sm:$0xff]  ;;  %v12506_v43 = vpack.c.bf16 %v424_v34, %v420_v47  ;;  %v12508_v29 = vpack.c.bf16 %v426_v61, %v422_v46 }
 0x2aa   :  { %v1134_v15 = vmul.f32 0.0, %v11276_v16  ;;  %v11278_v24 = vpop.eup %11277  ;;  %v427_v61 = vld [vmem:[#allocation10 + $0xc0] sm:$0xff]  ;;  %v12520_v47 = vpack.c.bf16 %v432_v59, %v428_v12  ;;  %v437_v12 = vld [vmem:[#allocation10 + $0x110] sm:$0xff] }
 0x2ab   :  { %14717 = vst [vmem:[#allocation165_spill] sm:$0xff] %v12488_v56  ;;  %14722 = vst [vmem:[#allocation170_spill] sm:$0xff] %v12506_v43  ;;  %v431_v46 = vld [vmem:[#allocation10 + $0xe0] sm:$0xff]  ;;  %v441_v59 = vld [vmem:[#allocation10 + $0x130] sm:$0xff] }
 0x2ac   :  { %v12483_v28 = vadd.f32 %v1135_v55, %v1134_v15  ;;  %v12492_v55 = vpack.c.bf16 %v416_v5, %v412_v27  ;;  %v413_v15 = vld [vmem:[#allocation10 + $0x50] sm:$0xff]  ;;  %14723 = vst [vmem:[#allocation171_spill] sm:$0xff] %v12508_v29  ;;  %14726 = vst [vmem:[#allocation174_spill] sm:$0xff] %v12520_v47 }
 0x2ad   :  { %v421_v27 = vld [vmem:[#allocation10 + $0x90] sm:$0xff] }
 0x2ae   :  { %14715 = vst [vmem:[#allocation163_spill] sm:$0xff] %v12483_v28  ;;  %11279 = vtanh.f32 %v12483_v28  ;;  %14718 = vst [vmem:[#allocation166_spill] sm:$0xff] %v12492_v55  ;;  %v417_v28 = vld [vmem:[#allocation10 + $0x70] sm:$0xff] }
 0x2af   :  { %v425_v5 = vld [vmem:[#allocation10 + $0xb0] sm:$0xff] }
 0x2b0   :  { %v12516_v34 = vpack.c.bf16 %v425_v5, %v421_v27  ;;  %v435_v27 = vld [vmem:[#allocation10 + $0x100] sm:$0xff] }
 0x2b1   :  { %v439_v5 = vld [vmem:[#allocation10 + $0x120] sm:$0xff] }
 0x2b2   :  { %14725 = vst [vmem:[#allocation173_spill] sm:$0xff] %v12516_v34 }
 0x2b8   :  { %v11280_v14 = vpop.eup %11279 }
 0x2b9   :  { %v12490_v16 = vmul.f32 %v11280_v14, %v11278_v24  ;;  %v12500_v24 = vpack.c.bf16 %v415_v62, %v411_v42  ;;  %v12502_v14 = vpack.c.bf16 %v417_v28, %v413_v15  ;;  %v12514_v28 = vpack.c.bf16 %v423_v11, %v419_v7  ;;  %v429_v62 = vld [vmem:[#allocation10 + $0xd0] sm:$0xff] }
 0x2ba   :  { %v433_v15 = vld [vmem:[#allocation10 + $0xf0] sm:$0xff]  ;;  %v12526_v7 = vpack.c.bf16 %v431_v46, %v427_v61  ;;  %v12538_v61 = vpack.c.bf16 %v439_v5, %v435_v27  ;;  %v12540_v46 = vpack.c.bf16 %v441_v59, %v437_v12  ;;  %v451_v12 = vld [vmem:[#allocation10 + $0x180] sm:$0xff] }
 0x2bb   :  { %1225 = vmatmul.mubr.f32.vlgmr.msra.gmra.mrb[4].mxu0 %v12490_v16  ;;  %1296 = vmatmul.mubr.f32.vlgmr.msra.gmra.mrb[6].mxu1 %v12490_v16  ;;  %14720 = vst [vmem:[#allocation168_spill] sm:$0xff] %v12500_v24  ;;  %14721 = vst [vmem:[#allocation169_spill] sm:$0xff] %v12502_v14  ;;  %v12528_v11 = vpack.c.bf16 %v433_v15, %v429_v62  ;;  %v443_v62 = vld [vmem:[#allocation10 + $0x140] sm:$0xff] }
 0x2bc   :  { %8604 = vmatpush1.bf16.msra.mxu0 %v12486_v32  ;;  %8636 = vmatpush1.bf16.msra.mxu1 %v12488_v56  ;;  %v430_v32 = vld [vmem:[#allocation10 + $0xd8] sm:$0xff]  ;;  %14724 = vst [vmem:[#allocation172_spill] sm:$0xff] %v12514_v28  ;;  %14728 = vst [vmem:[#allocation176_spill] sm:$0xff] %v12526_v7  ;;  %v447_v15 = vld [vmem:[#allocation10 + $0x160] sm:$0xff] }
 0x2bd   :  { %8606 = vmatprep.subr.bf16.mxu0 %v12492_v55  ;;  %8638 = vmatprep.subr.bf16.mxu1 %v12494_v63  ;;  %v434_v56 = vld [vmem:[#allocation10 + $0xf8] sm:$0xff]  ;;  %v436_v63 = vld [vmem:[#allocation10 + $0x108] sm:$0xff]  ;;  %14729 = vst [vmem:[#allocation177_spill] sm:$0xff] %v12528_v11  ;;  %14732 = vst [vmem:[#allocation180_spill] sm:$0xff] %v12538_v61  ;;  %v12550_v27 = vpack.c.bf16 %v447_v15, %v443_v62 }
 0x2be   :  { %1366 = vmatprep.mubr.f32.mxu0 %v14654_v6  ;;  %1437 = vmatprep.mubr.f32.mxu1 %v14654_v6  ;;  %v12522_v42 = vpack.c.bf16 %v434_v56, %v430_v32  ;;  %v438_v55 = vld [vmem:[#allocation10 + $0x118] sm:$0xff]  ;;  %14733 = vst [vmem:[#allocation181_spill] sm:$0xff] %v12540_v46  ;;  %v455_v59 = vld [vmem:[#allocation10 + $0x1a0] sm:$0xff] }
 0x2bf   :  { %v12562_v62 = vpack.c.bf16 %v455_v59, %v451_v12 }
 0x2c0   :  { %8608 = vmatpush1.bf16.msra.mxu0 %v12500_v24  ;;  %8640 = vmatpush1.bf16.msra.mxu1 %v12502_v14  ;;  %14727 = vst [vmem:[#allocation175_spill] sm:$0xff] %v12522_v42  ;;  %v440_v24 = vld [vmem:[#allocation10 + $0x128] sm:$0xff]  ;;  %v442_v14 = vld [vmem:[#allocation10 + $0x138] sm:$0xff] }
 0x2c1   :  { %8610 = vmatprep.subr.bf16.mxu0 %v12506_v43  ;;  %8642 = vmatprep.subr.bf16.mxu1 %v12508_v29  ;;  %v12532_v32 = vpack.c.bf16 %v440_v24, %v436_v63  ;;  %v12534_v56 = vpack.c.bf16 %v442_v14, %v438_v55  ;;  %v444_v29 = vld [vmem:[#allocation10 + $0x148] sm:$0xff]  ;;  %v446_v43 = vld [vmem:[#allocation10 + $0x158] sm:$0xff]  ;;  %v445_v24 = vld [vmem:[#allocation10 + $0x150] sm:$0xff] }
 0x2c2   :  { %v449_v14 = vld [vmem:[#allocation10 + $0x170] sm:$0xff] }
 0x2c3   :  { %14730 = vst [vmem:[#allocation178_spill] sm:$0xff] %v12532_v32  ;;  %14731 = vst [vmem:[#allocation179_spill] sm:$0xff] %v12534_v56  ;;  %v12552_v5 = vpack.c.bf16 %v449_v14, %v445_v24  ;;  %v459_v24 = vld [vmem:[#allocation10 + $0x1c0] sm:$0xff]  ;;  %v465_v14 = vld [vmem:[#allocation10 + $0x1f0] sm:$0xff] }
 0x2c4   :  { %8612 = vmatpush1.bf16.msra.mxu0 %v12514_v28  ;;  %8644 = vmatpush1.bf16.msra.mxu1 %v12516_v34  ;;  %v448_v28 = vld [vmem:[#allocation10 + $0x168] sm:$0xff]  ;;  %v450_v34 = vld [vmem:[#allocation10 + $0x178] sm:$0xff] }
 0x2c5   :  { %8614 = vmatprep.subr.bf16.mxu0 %v12520_v47  ;;  %8646 = vmatprep.subr.bf16.mxu1 %v12522_v42  ;;  %v12544_v55 = vpack.c.bf16 %v448_v28, %v444_v29  ;;  %v12546_v63 = vpack.c.bf16 %v450_v34, %v446_v43  ;;  %v452_v42 = vld [vmem:[#allocation10 + $0x188] sm:$0xff]  ;;  %v454_v47 = vld [vmem:[#allocation10 + $0x198] sm:$0xff]  ;;  %v453_v28 = vld [vmem:[#allocation10 + $0x190] sm:$0xff] }
 0x2c6   :  { %v457_v34 = vld [vmem:[#allocation10 + $0x1b0] sm:$0xff] }
 0x2c7   :  { %14734 = vst [vmem:[#allocation182_spill] sm:$0xff] %v12544_v55  ;;  %v12564_v15 = vpack.c.bf16 %v457_v34, %v453_v28  ;;  %v14738_v28 = vld [vmem:[#allocation61_spill] sm:$0xff]  ;;  %v14739_v34 = vld [vmem:[#allocation51_spill] sm:$0xff] }
 0x2c8   :  { %8616 = vmatpush1.bf16.msra.mxu0 %v12526_v7  ;;  %8648 = vmatpush1.bf16.msra.mxu1 %v12528_v11  ;;  %v456_v7 = vld [vmem:[#allocation10 + $0x1a8] sm:$0xff]  ;;  %v458_v11 = vld [vmem:[#allocation10 + $0x1b8] sm:$0xff] }
 0x2c9   :  { %8618 = vmatprep.subr.bf16.mxu0 %v12532_v32  ;;  %8650 = vmatprep.subr.bf16.mxu1 %v12534_v56  ;;  %v12556_v43 = vpack.c.bf16 %v456_v7, %v452_v42  ;;  %v12558_v29 = vpack.c.bf16 %v458_v11, %v454_v47  ;;  %v460_v56 = vld [vmem:[#allocation10 + $0x1c8] sm:$0xff]  ;;  %v462_v32 = vld [vmem:[#allocation10 + $0x1d8] sm:$0xff]  ;;  %v463_v7 = vld [vmem:[#allocation10 + $0x1e0] sm:$0xff] }
 0x2ca   :  { %v461_v11 = vld [vmem:[#allocation10 + $0x1d0] sm:$0xff]  ;;  %v12574_v12 = vpack.c.bf16 %v463_v7, %v459_v24  ;;  %v14740_v24 = vld [vmem:[#allocation63_spill] sm:$0xff]  ;;  %v14741_v7 = vld [vmem:[#allocation52_spill] sm:$0xff] }
 0x2cb   :  { %v12576_v59 = vpack.c.bf16 %v465_v14, %v461_v11  ;;  %v14742_v11 = vld [vmem:[#allocation65_spill] sm:$0xff] }
 0x2cc   :  { %8620 = vmatpush1.bf16.msra.mxu0 %v12538_v61  ;;  %8652 = vmatpush1.bf16.msra.mxu1 %v12540_v46  ;;  %v464_v61 = vld [vmem:[#allocation10 + $0x1e8] sm:$0xff]  ;;  %v466_v46 = vld [vmem:[#allocation10 + $0x1f8] sm:$0xff] }
 0x2cd   :  { %8622 = vmatprep.subr.bf16.mxu0 %v12544_v55  ;;  %8654 = vmatprep.subr.bf16.mxu1 %v12546_v63  ;;  %v12568_v47 = vpack.c.bf16 %v464_v61, %v460_v56  ;;  %v12570_v42 = vpack.c.bf16 %v466_v46, %v462_v32  ;;  %v1473_v32 = vld [vmem:[#allocation2 + $0x8] sm:$0xff]  ;;  %v14736_v61 = vld [vmem:[#allocation59_spill] sm:$0xff]  ;;  %v14737_v46 = vld [vmem:[#allocation50_spill] sm:$0xff] }
 0x2ce   :  { %v14735_v56 = vld [vmem:[#allocation49_spill] sm:$0xff] }
 0x2cf   :  { %v14743_v14 = vld [vmem:[#allocation53_spill] sm:$0xff] }
 0x2d0   :  { %8624 = vmatpush1.bf16.msra.mxu0 %v12550_v27  ;;  %8656 = vmatpush1.bf16.msra.mxu1 %v12552_v5 }
 0x2d1   :  { %8626 = vmatprep.subr.bf16.mxu0 %v12556_v43  ;;  %8658 = vmatprep.subr.bf16.mxu1 %v12558_v29 }
 0x2d4   :  { %8628 = vmatpush1.bf16.msra.mxu0 %v12562_v62  ;;  %8660 = vmatpush1.bf16.msra.mxu1 %v12564_v15 }
 0x2d5   :  { %8630 = vmatprep.subr.bf16.mxu0 %v12568_v47  ;;  %8662 = vmatprep.subr.bf16.mxu1 %v12570_v42 }
 0x2d8   :  { %8632 = vmatpush1.bf16.msra.mxu0 %v12574_v12  ;;  %8664 = vmatpush1.bf16.msra.mxu1 %v12576_v59 }
 0x2d9   :  { %8666 = vmatprep.subr.bf16.mxu1 %v11956_v4  ;;  %8682 = vmatprep.subr.bf16.mxu0 %v11964_v8 }
 0x2db   :  { %1367 = vmatmul.mubr.f32.vlgmr.msra.gmra.mrb[4].mxu0 %v14654_v6  ;;  %1438 = vmatmul.mubr.f32.vlgmr.msra.gmra.mrb[6].mxu1 %v14654_v6 }
 0x2dc   :  { %8668 = vmatpush1.bf16.msra.mxu1 %v11966_v9  ;;  %8684 = vmatpush1.bf16.msra.mxu0 %v11972_v13 }
 0x2dd   :  { %8670 = vmatprep.subr.bf16.mxu1 %v11979_v17  ;;  %8686 = vmatprep.subr.bf16.mxu0 %v11981_v18 }
 0x2de   :  { %1541 = vmatprep.mubr.f32.mxu1 %v14654_v6  ;;  %1683 = vmatprep.mubr.f32.mxu0 %v14654_v6 }
 0x2e0   :  { %8672 = vmatpush1.bf16.msra.mxu1 %v11990_v22  ;;  %8688 = vmatpush1.bf16.msra.mxu0 %v11997_v25 }
 0x2e1   :  { %8674 = vmatprep.subr.bf16.mxu1 %v12004_v30  ;;  %8690 = vmatprep.subr.bf16.mxu0 %v12006_v31 }
 0x2e3   :  { %8250 = vmatmul.mubr.msk.f32.vlgmr.msra.gmra.mrb[8].mxu1 %vm490_vm0, %v1473_v32 }
 0x2e4   :  { %8676 = vmatpush1.bf16.msra.mxu1 %v12015_v35  ;;  %8692 = vmatpush1.bf16.msra.mxu0 %v12025_v39 }
 0x2e5   :  { %8678 = vmatprep.subr.bf16.mxu1 %v12027_v40  ;;  %8694 = vmatprep.subr.bf16.mxu0 %v12033_v44 }
 0x2e6   :  { %1612 = vmatprep.mubr.f32.mxu1 %v14654_v6 }
 0x2e8   :  { %8680 = vmatpush1.bf16.msra.mxu1 %v12041_v51  ;;  %8696 = vmatpush1.bf16.msra.mxu0 %v12046_v53 }
 0x2e9   :  { %8698 = vmatprep.subr.bf16.mxu0 %v12051_v58  ;;  %8714 = vmatprep.subr.bf16.mxu1 %v12048_v54 }
 0x2eb   :  { %8251 = vmatmul.mubr.msk.f32.vlgmr.msra.gmra.mrb[10].mxu1 %vm490_vm0, %v1473_v32  ;;  %v14744_v32 = vld [vmem:[#allocation67_spill] sm:$0xff] }
 0x2ec   :  { %8700 = vmatpush1.bf16.msra.mxu0 %v12058_v2  ;;  %8716 = vmatpush1.bf16.msra.mxu1 %v12054_v1 }
 0x2ed   :  { %8702 = vmatprep.subr.bf16.mxu0 %v12063_v10  ;;  %8718 = vmatprep.subr.bf16.mxu1 %v12060_v3 }
 0x2ee   :  { %1754 = vmatprep.mubr.f32.mxu1 %v14654_v6 }
 0x2f0   :  { %8704 = vmatpush1.bf16.msra.mxu0 %v12073_v20  ;;  %8720 = vmatpush1.bf16.msra.mxu1 %v12068_v19 }
 0x2f1   :  { %8706 = vmatprep.subr.bf16.mxu0 %v12078_v26  ;;  %8722 = vmatprep.subr.bf16.mxu1 %v12075_v21 }
 0x2f4   :  { %8708 = vmatpush1.bf16.msra.mxu0 %v12085_v37  ;;  %8724 = vmatpush1.bf16.msra.mxu1 %v12081_v36 }
 0x2f5   :  { %8710 = vmatprep.subr.bf16.mxu0 %v12090_v45  ;;  %8726 = vmatprep.subr.bf16.mxu1 %v12087_v38  ;;  %v14751_v45 = vld [vmem:[#allocation60_spill] sm:$0xff] }
 0x2f8   :  { %8712 = vmatpush1.bf16.msra.mxu0 %v12097_v50  ;;  %8728 = vmatpush1.bf16.msra.mxu1 %v12093_v49  ;;  %v14748_v50 = vld [vmem:[#allocation71_spill] sm:$0xff] }
 0x2f9   :  { %8730 = vmatprep.subr.bf16.mxu1 %v12099_v52  ;;  %8746 = vmatprep.subr.bf16.mxu0 %v12130_v41  ;;  %v14747_v41 = vld [vmem:[#allocation56_spill] sm:$0xff] }
 0x2fb   :  { %1684 = vmatmul.mubr.f32.vlgmr.msra.gmra.mrb[6].mxu0 %v12266_v23 }
 0x2fc   :  { %8732 = vmatpush1.bf16.msra.mxu1 %v12103_v60  ;;  %8748 = vmatpush1.bf16.msra.mxu0 %v12134_v48  ;;  %v14745_v48 = vld [vmem:[#allocation54_spill] sm:$0xff] }
 0x2fd   :  { %8734 = vmatprep.subr.bf16.mxu1 %v14735_v56  ;;  %8750 = vmatprep.subr.bf16.mxu0 %v14736_v61  ;;  %v14746_v61 = vld [vmem:[#allocation69_spill] sm:$0xff] }
 0x2fe   :  { %1853 = vmatprep.mubr.f32.mxu0 %v14654_v6 }
 0x300   :  { %8736 = vmatpush1.bf16.msra.mxu1 %v14737_v46  ;;  %8752 = vmatpush1.bf16.msra.mxu0 %v14738_v28  ;;  %v14749_v28 = vld [vmem:[#allocation58_spill] sm:$0xff] }
 0x301   :  { %8738 = vmatprep.subr.bf16.mxu1 %v14739_v34  ;;  %8754 = vmatprep.subr.bf16.mxu0 %v14740_v24  ;;  %v14750_v24 = vld [vmem:[#allocation73_spill] sm:$0xff] }
 0x304   :  { %8740 = vmatpush1.bf16.msra.mxu1 %v14741_v7  ;;  %8756 = vmatpush1.bf16.msra.mxu0 %v14742_v11  ;;  %v14752_v11 = vld [vmem:[#allocation75_spill] sm:$0xff] }
 0x305   :  { %8742 = vmatprep.subr.bf16.mxu1 %v14743_v14  ;;  %8758 = vmatprep.subr.bf16.mxu0 %v14744_v32  ;;  %v14753_v32 = vld [vmem:[#allocation62_spill] sm:$0xff]  ;;  %v14763_v14 = vld [vmem:[#allocation72_spill] sm:$0xff] }
 0x308   :  { %8744 = vmatpush1.bf16.msra.mxu1 %v14745_v48  ;;  %8760 = vmatpush1.bf16.msra.mxu0 %v14746_v61  ;;  %v14754_v48 = vld [vmem:[#allocation77_spill] sm:$0xff]  ;;  %v14755_v61 = vld [vmem:[#allocation64_spill] sm:$0xff] }
 0x309   :  { %8778 = vmatprep.subr.bf16.mxu1 %v14747_v41  ;;  %8762 = vmatprep.subr.bf16.mxu0 %v14748_v50  ;;  %v14756_v41 = vld [vmem:[#allocation79_spill] sm:$0xff]  ;;  %v14757_v50 = vld [vmem:[#allocation66_spill] sm:$0xff] }
 0x30b   :  { %1755 = vmatmul.mubr.f32.vlgmr.msra.gmra.mrb[10].mxu1 %v12266_v23  ;;  %v14758_v23 = vld [vmem:[#allocation81_spill] sm:$0xff] }
 0x30c   :  { %8780 = vmatpush1.bf16.msra.mxu1 %v14749_v28  ;;  %8764 = vmatpush1.bf16.msra.mxu0 %v14750_v24  ;;  %v14759_v28 = vld [vmem:[#allocation68_spill] sm:$0xff]  ;;  %v14760_v24 = vld [vmem:[#allocation83_spill] sm:$0xff] }
 0x30d   :  { %8782 = vmatprep.subr.bf16.mxu1 %v14751_v45  ;;  %8766 = vmatprep.subr.bf16.mxu0 %v14752_v11  ;;  %v14761_v45 = vld [vmem:[#allocation70_spill] sm:$0xff]  ;;  %v14762_v11 = vld [vmem:[#allocation85_spill] sm:$0xff] }
 0x30e   :  { %1924 = vmatprep.mubr.f32.mxu1 %v14654_v6 }
 0x310   :  { %8784 = vmatpush1.bf16.msra.mxu1 %v14753_v32  ;;  %8768 = vmatpush1.bf16.msra.mxu0 %v14754_v48  ;;  %v14764_v32 = vld [vmem:[#allocation87_spill] sm:$0xff]  ;;  %v14765_v48 = vld [vmem:[#allocation74_spill] sm:$0xff] }
 0x311   :  { %8786 = vmatprep.subr.bf16.mxu1 %v14755_v61  ;;  %8770 = vmatprep.subr.bf16.mxu0 %v14756_v41  ;;  %v14766_v61 = vld [vmem:[#allocation76_spill] sm:$0xff]  ;;  %v14767_v41 = vld [vmem:[#allocation78_spill] sm:$0xff] }
 0x314   :  { %8788 = vmatpush1.bf16.msra.mxu1 %v14757_v50  ;;  %8772 = vmatpush1.bf16.msra.mxu0 %v14758_v23  ;;  %v14768_v50 = vld [vmem:[#allocation80_spill] sm:$0xff]  ;;  %v14769_v23 = vld [vmem:[#allocation82_spill] sm:$0xff] }
 0x315   :  { %8790 = vmatprep.subr.bf16.mxu1 %v14759_v28  ;;  %8774 = vmatprep.subr.bf16.mxu0 %v14760_v24  ;;  %v14770_v28 = vld [vmem:[#allocation84_spill] sm:$0xff]  ;;  %v14771_v24 = vld [vmem:[#allocation86_spill] sm:$0xff] }
 0x318   :  { %8792 = vmatpush1.bf16.msra.mxu1 %v14761_v45  ;;  %8776 = vmatpush1.bf16.msra.mxu0 %v14762_v11  ;;  %v14772_v45 = vld [vmem:[#allocation88_spill] sm:$0xff] }
 0x319   :  { %8794 = vmatprep.subr.bf16.mxu1 %v14763_v14  ;;  %8810 = vmatprep.subr.bf16.mxu0 %v14764_v32  ;;  %v12671_v32 = vld [vmem:[%s14216_s9] sm:$0xf] }
 0x31a   :  { %v12675_v11 = vrot.slane %v12671_v32, %v12232_v0 }
 0x31c   :  { %8796 = vmatpush1.bf16.msra.mxu1 %v14765_v48  ;;  %14773 = vst [vmem:[#allocation183_spill] sm:$0xff] %v12675_v11 }
 0x31d   :  { %8798 = vmatprep.subr.bf16.mxu1 %v14766_v61 }
 0x320   :  { %8800 = vmatpush1.bf16.msra.mxu1 %v14767_v41 }
 0x321   :  { %8802 = vmatprep.subr.bf16.mxu1 %v14768_v50  ;;  %v12679_v50 = vrot.slane %v12671_v32, %v12237_v57  ;;  %v12687_v57 = vrot.slane %v12671_v32, %v12247_v33 }
 0x323   :  { %14774 = vst [vmem:[#allocation184_spill] sm:$0xff] %v12679_v50  ;;  %14775 = vst [vmem:[#allocation185_spill] sm:$0xff] %v12687_v57 }
 0x324   :  { %8804 = vmatpush1.bf16.msra.mxu1 %v14769_v23 }
 0x325   :  { %8806 = vmatprep.subr.bf16.mxu1 %v14770_v28 }
 0x328   :  { %8808 = vmatpush1.bf16.msra.mxu1 %v14771_v24 }
 0x329   :  { %8842 = vmatprep.subr.bf16.mxu1 %v14772_v45 }
 0x3ae   :  { %v1368_v23 = vpop.f32.mrb[4].mxu0  ;;  %v1439_v41 = vpop.f32.mrb[6].mxu1 }
 0x3af   :  { %v11054_v28 = vadd.f32 %v1368_v23, %v12675_v11  ;;  %v1370_v24 = vpop.f32.mrb[5].mxu0  ;;  %v12682_v61 = vpop.f32.mrb[7].mxu1  ;;  %v11056_v26 = vadd.f32 %v1439_v41, %v12687_v57 }
 0x3b0   :  { %v11055_v45 = vadd.f32 %v1370_v24, %v12679_v50  ;;  %v14777_v50 = vld [vmem:[#allocation90_spill] sm:$0xff] }
 0x3b1   :  { %v1448_v48 = vsub.f32 0.0, %v11054_v28 }
 0x3b2   :  { %v1454_v14 = vsub.f32 0.0, %v11055_v45 }
 0x3b3   :  { %v1449_v7 = vmul.f32 1.442695, %v1448_v48 }
 0x3b4   :  { %v1455_v37 = vmul.f32 1.442695, %v1454_v14 }
 0x3b5   :  { %11281 = vpow2.f32 %v1449_v7 }
 0x3b6   :  { %11283 = vpow2.f32 %v1455_v37  ;;  %v1543_v0 = vpop.f32.mrb[8].mxu1  ;;  %v14776_v37 = vld [vmem:[#allocation89_spill] sm:$0xff] }
 0x3b7   :  { %v1545_v34 = vpop.f32.mrb[9].mxu1  ;;  %11285 = vtanh.f32 %v11056_v26  ;;  %v1544_v7 = vadd.f32 %v1543_v0, %v14776_v37 }
 0x3b8   :  { %v1546_v56 = vadd.f32 %v1545_v34, %v14777_v50  ;;  %v14779_v34 = vld [vmem:[#allocation93_spill] sm:$0xff] }
 0x3bf   :  { %v11282_v23 = vpop.eup %11281 }
 0x3c0   :  { %v11284_v11 = vpop.eup %11283  ;;  %v1451_v46 = vadd.f32 1.0, %v11282_v23 }
 0x3c1   :  { %v1457_v20 = vadd.f32 1.0, %v11284_v11  ;;  %v11286_v45 = vpop.eup %11285 }
 0x3c2   :  { %11287 = vrcp.f32 %v1451_v46 }
 0x3c3   :  { %11289 = vrcp.f32 %v1457_v20 }
 0x3cc   :  { %v11288_v48 = vpop.eup %11287 }
 0x3cd   :  { %v11290_v28 = vpop.eup %11289  ;;  %v1468_v24 = vmul.f32 %v11288_v48, %v11286_v45  ;;  %v14778_v45 = vld [vmem:[#allocation92_spill] sm:$0xff] }
 0x3ce   :  { %v1467_v14 = vmul.f32 0.0, %v11290_v28  ;;  %v1685_v33 = vpop.f32.mrb[6].mxu0 }
 0x3cf   :  { %v1761_v10 = vadd.f32 %v1685_v33, %v1544_v7  ;;  %v1687_v60 = vpop.f32.mrb[7].mxu0  ;;  %v14780_v33 = vld [vmem:[#allocation94_spill] sm:$0xff] }
 0x3d0   :  { %v12692_v41 = vadd.f32 %v1468_v24, %v1467_v14  ;;  %v1762_v57 = vadd.f32 %v1687_v60, %v1546_v56 }
 0x3d1   :  { %v1765_v23 = vsub.f32 0.0, %v1761_v10 }
 0x3d2   :  { %v1771_v26 = vsub.f32 0.0, %v1762_v57 }
 0x3d3   :  { %v1766_v11 = vmul.f32 1.442695, %v1765_v23 }
 0x3d4   :  { %v1772_v46 = vmul.f32 1.442695, %v1771_v26 }
 0x3d5   :  { %11291 = vpow2.f32 %v1766_v11 }
 0x3d6   :  { %11293 = vpow2.f32 %v1772_v46 }
 0x3de   :  { %v1756_v20 = vpop.f32.mrb[10].mxu1 }
 0x3df   :  { %v11292_v2 = vpop.eup %11291  ;;  %v11062_v48 = vadd.f32 %v1756_v20, %v14778_v45  ;;  %v1758_v0 = vpop.f32.mrb[11].mxu1 }
 0x3e0   :  { %v11294_v28 = vpop.eup %11293  ;;  %v1768_v37 = vadd.f32 1.0, %v11292_v2  ;;  %v11063_v50 = vadd.f32 %v1758_v0, %v14779_v34  ;;  %v14784_v0 = vld [vmem:[#allocation97_spill] sm:$0xff] }
 0x3e1   :  { %v1774_v7 = vadd.f32 1.0, %v11294_v28  ;;  %11295 = vtanh.f32 %v11062_v48  ;;  %v14783_v48 = vld [vmem:[#allocation96_spill] sm:$0xff]  ;;  %v14785_v28 = vld [vmem:[#allocation98_spill] sm:$0xff] }
 0x3e2   :  { %11297 = vrcp.f32 %v1768_v37  ;;  %v1778_v24 = vsub.f32 0.0, %v11063_v50  ;;  %v14782_v50 = vld [vmem:[#allocation95_spill] sm:$0xff] }
 0x3e3   :  { %11299 = vrcp.f32 %v1774_v7  ;;  %v14786_v7 = vld [vmem:[#allocation99_spill] sm:$0xff] }
 0x3e4   :  { %v1779_v10 = vmul.f32 1.442695, %v1778_v24  ;;  %v14787_v24 = vld [vmem:[#allocation100_spill] sm:$0xff] }
 0x3e6   :  { %11301 = vpow2.f32 %v1779_v10  ;;  %v14788_v10 = vld [vmem:[#allocation101_spill] sm:$0xff] }
 0x3eb   :  { %v11296_v60 = vpop.eup %11295 }
 0x3ec   :  { %v11298_v56 = vpop.eup %11297 }
 0x3ed   :  { %v11300_v57 = vpop.eup %11299  ;;  %v1785_v14 = vmul.f32 %v11298_v56, %v11296_v60  ;;  %v14789_v60 = vld [vmem:[#allocation102_spill] sm:$0xff]  ;;  %v14790_v56 = vld [vmem:[#allocation103_spill] sm:$0xff] }
 0x3ee   :  { %v1784_v23 = vmul.f32 %v11300_v57, %v14780_v33  ;;  %v14791_v57 = vld [vmem:[#allocation104_spill] sm:$0xff]  ;;  %v14793_v33 = vld [vmem:[#allocation106_spill] sm:$0xff] }
 0x3f0   :  { %v11302_v26 = vpop.eup %11301  ;;  %v12697_v11 = vadd.f32 %v1785_v14, %v1784_v23  ;;  %v14792_v14 = vld [vmem:[#allocation105_spill] sm:$0xff]  ;;  %v14794_v23 = vld [vmem:[#allocation107_spill] sm:$0xff] }
 0x3f1   :  { %v1781_v46 = vadd.f32 1.0, %v11302_v26  ;;  %v14795_v26 = vld [vmem:[#allocation108_spill] sm:$0xff] }
 0x3f2   :  { %14781 = vst [vmem:[#allocation94_spill] sm:$0xff] %v12697_v11  ;;  %11303 = vtanh.f32 %v12697_v11 }
 0x3f3   :  { %11305 = vrcp.f32 %v1781_v46  ;;  %v14796_v46 = vld [vmem:[#allocation109_spill] sm:$0xff] }
 0x3fc   :  { %v11304_v2 = vpop.eup %11303 }
 0x3fd   :  { %v11306_v20 = vpop.eup %11305 }
 0x3fe   :  { %v12700_v37 = vmul.f32 %v11306_v20, %v11304_v2  ;;  %v14797_v2 = vld [vmem:[#allocation110_spill] sm:$0xff]  ;;  %v14798_v20 = vld [vmem:[#allocation111_spill] sm:$0xff] }
 0x400   :  { %1854 = vmatmul.mubr.f32.vlgmr.msra.gmra.mrb[8].mxu0 %v12700_v37  ;;  %1925 = vmatmul.mubr.f32.vlgmr.msra.gmra.mrb[12].mxu1 %v12700_v37 }
 0x401   :  { %8812 = vmatpush1.bf16.msra.mxu0 %v14782_v50  ;;  %8844 = vmatpush1.bf16.msra.mxu1 %v14783_v48  ;;  %v14848_v48 = vld [vmem:[#allocation161_spill] sm:$0xff]  ;;  %v14849_v50 = vld [vmem:[#allocation162_spill] sm:$0xff] }
 0x402   :  { %8814 = vmatprep.subr.bf16.mxu0 %v14784_v0  ;;  %8846 = vmatprep.subr.bf16.mxu1 %v14785_v28 }
 0x403   :  { %1995 = vmatprep.mubr.f32.mxu0 %v14654_v6  ;;  %2066 = vmatprep.mubr.f32.mxu1 %v14654_v6 }
 0x405   :  { %8816 = vmatpush1.bf16.msra.mxu0 %v14786_v7  ;;  %8848 = vmatpush1.bf16.msra.mxu1 %v14787_v24  ;;  %v14847_v7 = vld [vmem:[#allocation160_spill] sm:$0xff] }
 0x406   :  { %8818 = vmatprep.subr.bf16.mxu0 %v14788_v10  ;;  %8850 = vmatprep.subr.bf16.mxu1 %v14789_v60  ;;  %v14799_v10 = vld [vmem:[#allocation112_spill] sm:$0xff]  ;;  %v14800_v60 = vld [vmem:[#allocation113_spill] sm:$0xff] }
 0x409   :  { %8820 = vmatpush1.bf16.msra.mxu0 %v14790_v56  ;;  %8852 = vmatpush1.bf16.msra.mxu1 %v14791_v57  ;;  %v14801_v56 = vld [vmem:[#allocation114_spill] sm:$0xff]  ;;  %v14802_v57 = vld [vmem:[#allocation115_spill] sm:$0xff] }
 0x40a   :  { %8822 = vmatprep.subr.bf16.mxu0 %v14792_v14  ;;  %8854 = vmatprep.subr.bf16.mxu1 %v14793_v33  ;;  %v14803_v14 = vld [vmem:[#allocation116_spill] sm:$0xff]  ;;  %v14804_v33 = vld [vmem:[#allocation117_spill] sm:$0xff] }
 0x40d   :  { %8824 = vmatpush1.bf16.msra.mxu0 %v14794_v23  ;;  %8856 = vmatpush1.bf16.msra.mxu1 %v14795_v26  ;;  %v14805_v23 = vld [vmem:[#allocation118_spill] sm:$0xff]  ;;  %v14806_v26 = vld [vmem:[#allocation119_spill] sm:$0xff] }
 0x40e   :  { %8826 = vmatprep.subr.bf16.mxu0 %v14796_v46  ;;  %8858 = vmatprep.subr.bf16.mxu1 %v14797_v2  ;;  %v14807_v46 = vld [vmem:[#allocation120_spill] sm:$0xff]  ;;  %v14808_v2 = vld [vmem:[#allocation121_spill] sm:$0xff] }
 0x411   :  { %8828 = vmatpush1.bf16.msra.mxu0 %v14798_v20  ;;  %8860 = vmatpush1.bf16.msra.mxu1 %v14799_v10  ;;  %v14809_v20 = vld [vmem:[#allocation122_spill] sm:$0xff]  ;;  %v14810_v10 = vld [vmem:[#allocation123_spill] sm:$0xff] }
 0x412   :  { %8830 = vmatprep.subr.bf16.mxu0 %v14800_v60  ;;  %8862 = vmatprep.subr.bf16.mxu1 %v14801_v56  ;;  %v14811_v60 = vld [vmem:[#allocation124_spill] sm:$0xff]  ;;  %v14812_v56 = vld [vmem:[#allocation125_spill] sm:$0xff] }
 0x415   :  { %8832 = vmatpush1.bf16.msra.mxu0 %v14802_v57  ;;  %8864 = vmatpush1.bf16.msra.mxu1 %v14803_v14  ;;  %v14813_v57 = vld [vmem:[#allocation126_spill] sm:$0xff]  ;;  %v14846_v14 = vld [vmem:[#allocation159_spill] sm:$0xff] }
 0x416   :  { %8834 = vmatprep.subr.bf16.mxu0 %v14804_v33  ;;  %8866 = vmatprep.subr.bf16.mxu1 %v14805_v23  ;;  %v14814_v23 = vld [vmem:[#allocation127_spill] sm:$0xff]  ;;  %v14828_v33 = vld [vmem:[#allocation141_spill] sm:$0xff] }
 0x419   :  { %8836 = vmatpush1.bf16.msra.mxu0 %v14806_v26  ;;  %8868 = vmatpush1.bf16.msra.mxu1 %v14807_v46  ;;  %v14815_v26 = vld [vmem:[#allocation128_spill] sm:$0xff]  ;;  %v14816_v46 = vld [vmem:[#allocation129_spill] sm:$0xff] }
 0x41a   :  { %8838 = vmatprep.subr.bf16.mxu0 %v14808_v2  ;;  %8870 = vmatprep.subr.bf16.mxu1 %v14809_v20  ;;  %v14817_v2 = vld [vmem:[#allocation130_spill] sm:$0xff]  ;;  %v14827_v20 = vld [vmem:[#allocation140_spill] sm:$0xff] }
 0x41d   :  { %8840 = vmatpush1.bf16.msra.mxu0 %v14810_v10  ;;  %8872 = vmatpush1.bf16.msra.mxu1 %v14811_v60  ;;  %v14818_v60 = vld [vmem:[#allocation131_spill] sm:$0xff]  ;;  %v14821_v10 = vld [vmem:[#allocation134_spill] sm:$0xff] }
 0x41e   :  { %8874 = vmatprep.subr.bf16.mxu0 %v14812_v56  ;;  %8906 = vmatprep.subr.bf16.mxu1 %v14813_v57  ;;  %v14819_v56 = vld [vmem:[#allocation132_spill] sm:$0xff]  ;;  %v14820_v57 = vld [vmem:[#allocation133_spill] sm:$0xff] }
 0x420   :  { %1996 = vmatmul.mubr.f32.vlgmr.msra.gmra.mrb[8].mxu0 %v12490_v16  ;;  %2067 = vmatmul.mubr.f32.vlgmr.msra.gmra.mrb[12].mxu1 %v12490_v16  ;;  %v14822_v16 = vld [vmem:[#allocation135_spill] sm:$0xff] }
 0x421   :  { %8876 = vmatpush1.bf16.msra.mxu0 %v14814_v23  ;;  %8908 = vmatpush1.bf16.msra.mxu1 %v14815_v26  ;;  %v14823_v23 = vld [vmem:[#allocation136_spill] sm:$0xff]  ;;  %v14824_v26 = vld [vmem:[#allocation137_spill] sm:$0xff] }
 0x422   :  { %8878 = vmatprep.subr.bf16.mxu0 %v14816_v46  ;;  %8910 = vmatprep.subr.bf16.mxu1 %v14817_v2  ;;  %v14825_v46 = vld [vmem:[#allocation138_spill] sm:$0xff]  ;;  %v14826_v2 = vld [vmem:[#allocation139_spill] sm:$0xff] }
 0x423   :  { %2165 = vmatprep.mubr.f32.mxu0 %v14654_v6  ;;  %2236 = vmatprep.mubr.f32.mxu1 %v14654_v6 }
 0x425   :  { %8880 = vmatpush1.bf16.msra.mxu0 %v14818_v60  ;;  %8912 = vmatpush1.bf16.msra.mxu1 %v14819_v56  ;;  %v14829_v60 = vld [vmem:[#allocation142_spill] sm:$0xff]  ;;  %v14830_v56 = vld [vmem:[#allocation143_spill] sm:$0xff] }
 0x426   :  { %8882 = vmatprep.subr.bf16.mxu0 %v14820_v57  ;;  %8914 = vmatprep.subr.bf16.mxu1 %v14821_v10  ;;  %v14831_v57 = vld [vmem:[#allocation144_spill] sm:$0xff]  ;;  %v14832_v10 = vld [vmem:[#allocation145_spill] sm:$0xff] }
 0x429   :  { %8884 = vmatpush1.bf16.msra.mxu0 %v14822_v16  ;;  %8916 = vmatpush1.bf16.msra.mxu1 %v14823_v23  ;;  %v14833_v16 = vld [vmem:[#allocation146_spill] sm:$0xff]  ;;  %v14834_v23 = vld [vmem:[#allocation147_spill] sm:$0xff] }
 0x42a   :  { %8886 = vmatprep.subr.bf16.mxu0 %v14824_v26  ;;  %8918 = vmatprep.subr.bf16.mxu1 %v14825_v46  ;;  %v14835_v26 = vld [vmem:[#allocation148_spill] sm:$0xff]  ;;  %v14836_v46 = vld [vmem:[#allocation149_spill] sm:$0xff] }
 0x42d   :  { %8888 = vmatpush1.bf16.msra.mxu0 %v14826_v2  ;;  %8920 = vmatpush1.bf16.msra.mxu1 %v14827_v20  ;;  %v14837_v2 = vld [vmem:[#allocation150_spill] sm:$0xff]  ;;  %v14838_v20 = vld [vmem:[#allocation151_spill] sm:$0xff] }
 0x42e   :  { %8890 = vmatprep.subr.bf16.mxu0 %v14828_v33  ;;  %8922 = vmatprep.subr.bf16.mxu1 %v14829_v60  ;;  %v14839_v33 = vld [vmem:[#allocation152_spill] sm:$0xff]  ;;  %v14840_v60 = vld [vmem:[#allocation153_spill] sm:$0xff] }
 0x431   :  { %8892 = vmatpush1.bf16.msra.mxu0 %v14830_v56  ;;  %8924 = vmatpush1.bf16.msra.mxu1 %v14831_v57  ;;  %v14841_v56 = vld [vmem:[#allocation154_spill] sm:$0xff]  ;;  %v14842_v57 = vld [vmem:[#allocation155_spill] sm:$0xff] }
 0x432   :  { %8894 = vmatprep.subr.bf16.mxu0 %v14832_v10  ;;  %8926 = vmatprep.subr.bf16.mxu1 %v14833_v16  ;;  %v14843_v10 = vld [vmem:[#allocation156_spill] sm:$0xff]  ;;  %v14844_v16 = vld [vmem:[#allocation157_spill] sm:$0xff] }
 0x435   :  { %8896 = vmatpush1.bf16.msra.mxu0 %v14834_v23  ;;  %8928 = vmatpush1.bf16.msra.mxu1 %v14835_v26  ;;  %v14845_v23 = vld [vmem:[#allocation158_spill] sm:$0xff] }
 0x436   :  { %8898 = vmatprep.subr.bf16.mxu0 %v14836_v46  ;;  %8930 = vmatprep.subr.bf16.mxu1 %v14837_v2 }
 0x439   :  { %8900 = vmatpush1.bf16.msra.mxu0 %v14838_v20  ;;  %8932 = vmatpush1.bf16.msra.mxu1 %v14839_v33 }
 0x43a   :  { %8902 = vmatprep.subr.bf16.mxu0 %v14840_v60  ;;  %8934 = vmatprep.subr.bf16.mxu1 %v14841_v56 }
 0x43d   :  { %8904 = vmatpush1.bf16.msra.mxu0 %v14842_v57  ;;  %8936 = vmatpush1.bf16.msra.mxu1 %v14843_v10 }
 0x43e   :  { %8938 = vmatprep.subr.bf16.mxu0 %v14844_v16  ;;  %8970 = vmatprep.subr.bf16.mxu1 %v14845_v23 }
 0x4f3   :  { %v1997_v26 = vpop.f32.mrb[8].mxu0  ;;  %v2068_v46 = vpop.f32.mrb[12].mxu1 }
 0x4f4   :  { %v11064_v2 = vadd.f32 %v1997_v26, %v14846_v14  ;;  %v1999_v24 = vpop.f32.mrb[9].mxu0  ;;  %v2070_v20 = vpop.f32.mrb[13].mxu1  ;;  %v11066_v23 = vadd.f32 %v2068_v46, %v14849_v50 }
 0x4f5   :  { %v11065_v33 = vadd.f32 %v1999_v24, %v14847_v7  ;;  %v11067_v57 = vadd.f32 %v2070_v20, %v14848_v48 }
 0x4f6   :  { %v2077_v28 = vsub.f32 0.0, %v11064_v2 }
 0x4f7   :  { %v2083_v60 = vsub.f32 0.0, %v11065_v33  ;;  %v2090_v10 = vsub.f32 0.0, %v11067_v57 }
 0x4f8   :  { %v2078_v0 = vmul.f32 1.442695, %v2077_v28 }
 0x4f9   :  { %v2084_v56 = vmul.f32 1.442695, %v2083_v60  ;;  %v2091_v16 = vmul.f32 1.442695, %v2090_v10  ;;  %v14851_v10 = vld [vmem:[#allocation91_spill] sm:$0xff] }
 0x4fa   :  { %11307 = vpow2.f32 %v2078_v0  ;;  %v14850_v0 = vld [vmem:[#allocation163_spill] sm:$0xff]  ;;  %v12783_v46 = vrot.slane %v12671_v32, %v14851_v10  ;;  %v14853_v32 = vld [vmem:[#allocation165_spill] sm:$0xff]  ;;  %v14862_v10 = vld [vmem:[#allocation174_spill] sm:$0xff] }
 0x4fb   :  { %11309 = vpow2.f32 %v2084_v56 }
 0x4fc   :  { %11311 = vpow2.f32 %v2091_v16 }
 0x4fd   :  { %11313 = vtanh.f32 %v11066_v23 }
 0x504   :  { %v11308_v11 = vpop.eup %11307 }
 0x505   :  { %v11310_v45 = vpop.eup %11309  ;;  %v2080_v34 = vadd.f32 1.0, %v11308_v11 }
 0x506   :  { %v2086_v26 = vadd.f32 1.0, %v11310_v45  ;;  %v11312_v24 = vpop.eup %11311  ;;  %v11057_v45 = vadd.f32 %v12682_v61, %v12783_v46  ;;  %v14856_v61 = vld [vmem:[#allocation168_spill] sm:$0xff] }
 0x507   :  { %11315 = vrcp.f32 %v2080_v34  ;;  %v11314_v33 = vpop.eup %11313  ;;  %v2093_v20 = vadd.f32 1.0, %v11312_v24  ;;  %v14852_v24 = vld [vmem:[#allocation164_spill] sm:$0xff] }
 0x508   :  { %11317 = vrcp.f32 %v2086_v26  ;;  %v1461_v34 = vsub.f32 0.0, %v11057_v45  ;;  %v14863_v45 = vld [vmem:[#allocation175_spill] sm:$0xff] }
 0x509   :  { %11319 = vrcp.f32 %v2093_v20  ;;  %v14859_v20 = vld [vmem:[#allocation171_spill] sm:$0xff] }
 0x50a   :  { %v1462_v16 = vmul.f32 1.442695, %v1461_v34 }
 0x511   :  { %v11316_v28 = vpop.eup %11315 }
 0x512   :  { %v11318_v60 = vpop.eup %11317  ;;  %v2097_v2 = vmul.f32 %v11316_v28, %v11314_v33  ;;  %v14854_v33 = vld [vmem:[#allocation166_spill] sm:$0xff]  ;;  %v14855_v28 = vld [vmem:[#allocation167_spill] sm:$0xff] }
 0x513   :  { %v2096_v56 = vmul.f32 %v11318_v60, %v14850_v0  ;;  %v11320_v11 = vpop.eup %11319  ;;  %v14857_v60 = vld [vmem:[#allocation169_spill] sm:$0xff]  ;;  %v14860_v0 = vld [vmem:[#allocation172_spill] sm:$0xff] }
 0x515   :  { %v12779_v57 = vadd.f32 %v2097_v2, %v2096_v56  ;;  %v14858_v2 = vld [vmem:[#allocation170_spill] sm:$0xff]  ;;  %v14861_v56 = vld [vmem:[#allocation173_spill] sm:$0xff] }
 0x517   :  { %11321 = vtanh.f32 %v12779_v57 }
 0x518   :  { %11323 = vpow2.f32 %v1462_v16  ;;  %v14866_v16 = vld [vmem:[#allocation178_spill] sm:$0xff] }
 0x519   :  { %11325 = vtanh.f32 %v12692_v41 }
 0x521   :  { %v11322_v23 = vpop.eup %11321 }
 0x522   :  { %v12788_v26 = vmul.f32 %v11322_v23, %v11320_v11  ;;  %v11324_v34 = vpop.eup %11323  ;;  %v14864_v11 = vld [vmem:[#allocation176_spill] sm:$0xff]  ;;  %v14865_v23 = vld [vmem:[#allocation177_spill] sm:$0xff] }
 0x524   :  { %2166 = vmatmul.mubr.f32.vlgmr.msra.gmra.mrb[10].mxu0 %v12788_v26  ;;  %2237 = vmatmul.mubr.f32.vlgmr.msra.gmra.mrb[14].mxu1 %v12788_v26 }
 0x525   :  { %8940 = vmatpush1.bf16.msra.mxu0 %v14852_v24  ;;  %8972 = vmatpush1.bf16.msra.mxu1 %v14853_v32 }
 0x526   :  { %8942 = vmatprep.subr.bf16.mxu0 %v14854_v33  ;;  %8974 = vmatprep.subr.bf16.mxu1 %v14855_v28 }
 0x527   :  { %2307 = vmatprep.mubr.f32.mxu0 %v14654_v6  ;;  %2378 = vmatprep.mubr.f32.mxu1 %v14654_v6 }
 0x529   :  { %8944 = vmatpush1.bf16.msra.mxu0 %v14856_v61  ;;  %8976 = vmatpush1.bf16.msra.mxu1 %v14857_v60  ;;  %v14867_v60 = vld [vmem:[#allocation179_spill] sm:$0xff] }
 0x52a   :  { %8946 = vmatprep.subr.bf16.mxu0 %v14858_v2  ;;  %8978 = vmatprep.subr.bf16.mxu1 %v14859_v20  ;;  %v1464_v2 = vadd.f32 1.0, %v11324_v34  ;;  %v14868_v20 = vld [vmem:[#allocation180_spill] sm:$0xff]  ;;  %v11326_v34 = vpop.eup %11325 }
 0x52c   :  { %11327 = vrcp.f32 %v1464_v2 }
 0x52d   :  { %8948 = vmatpush1.bf16.msra.mxu0 %v14860_v0  ;;  %8980 = vmatpush1.bf16.msra.mxu1 %v14861_v56  ;;  %v14869_v0 = vld [vmem:[#allocation181_spill] sm:$0xff] }
 0x52e   :  { %8950 = vmatprep.subr.bf16.mxu0 %v14862_v10  ;;  %8982 = vmatprep.subr.bf16.mxu1 %v14863_v45 }
 0x531   :  { %8952 = vmatpush1.bf16.msra.mxu0 %v14864_v11  ;;  %8984 = vmatpush1.bf16.msra.mxu1 %v14865_v23 }
 0x532   :  { %8954 = vmatprep.subr.bf16.mxu0 %v14866_v16  ;;  %8986 = vmatprep.subr.bf16.mxu1 %v14867_v60 }
 0x535   :  { %8956 = vmatpush1.bf16.msra.mxu0 %v14868_v20  ;;  %8988 = vmatpush1.bf16.msra.mxu1 %v14869_v0 }
 0x536   :  { %8958 = vmatprep.subr.bf16.mxu0 %v12544_v55  ;;  %8990 = vmatprep.subr.bf16.mxu1 %v12546_v63  ;;  %v11328_v55 = vpop.eup %11327 }
 0x537   :  { %v1471_v2 = vmul.f32 %v11328_v55, %v11326_v34  ;;  %v2414_v55 = vld [vmem:[#allocation2 + $0x10] sm:$0xff] }
 0x538   :  { %v14870_v34 = vld [vmem:[#allocation34_spill] sm:$0xff] }
 0x539   :  { %8960 = vmatpush1.bf16.msra.mxu0 %v12550_v27  ;;  %8992 = vmatpush1.bf16.msra.mxu1 %v12552_v5 }
 0x53a   :  { %8962 = vmatprep.subr.bf16.mxu0 %v12556_v43  ;;  %8994 = vmatprep.subr.bf16.mxu1 %v12558_v29 }
 0x53d   :  { %8964 = vmatpush1.bf16.msra.mxu0 %v12562_v62  ;;  %8996 = vmatpush1.bf16.msra.mxu1 %v12564_v15 }
 0x53e   :  { %8966 = vmatprep.subr.bf16.mxu0 %v12568_v47  ;;  %8998 = vmatprep.subr.bf16.mxu1 %v12570_v42 }
 0x541   :  { %8968 = vmatpush1.bf16.msra.mxu0 %v12574_v12  ;;  %9000 = vmatpush1.bf16.msra.mxu1 %v12576_v59 }
 0x542   :  { %9002 = vmatprep.subr.bf16.mxu0 %v11956_v4  ;;  %9010 = vmatprep.subr.bf16.mxu1 %v12004_v30 }
 0x544   :  { %2308 = vmatmul.mubr.f32.vlgmr.msra.gmra.mrb[10].mxu0 %v1471_v2  ;;  %2379 = vmatmul.mubr.f32.vlgmr.msra.gmra.mrb[14].mxu1 %v1471_v2  ;;  %v14871_v2 = vld [vmem:[#allocation48_spill] sm:$0xff] }
 0x545   :  { %9004 = vmatpush1.bf16.msra.mxu0 %v11966_v9  ;;  %9012 = vmatpush1.bf16.msra.mxu1 %v12015_v35 }
 0x546   :  { %9006 = vmatprep.subr.bf16.mxu0 %v11979_v17  ;;  %9014 = vmatprep.subr.bf16.mxu1 %v12027_v40 }
 0x547   :  { %2482 = vmatprep.mubr.f32.mxu0 %v14654_v6  ;;  %2553 = vmatprep.mubr.f32.mxu1 %v14654_v6 }
 0x549   :  { %9008 = vmatpush1.bf16.msra.mxu0 %v11990_v22  ;;  %9016 = vmatpush1.bf16.msra.mxu1 %v12041_v51 }
 0x54a   :  { %9018 = vmatprep.subr.bf16.mxu0 %v11964_v8  ;;  %9050 = vmatprep.subr.bf16.mxu1 %v12048_v54 }
 0x54c   :  { %8252 = vmatmul.mubr.msk.f32.vlgmr.msra.gmra.mrb[12].mxu0 %vm490_vm0, %v2414_v55  ;;  %8253 = vmatmul.mubr.msk.f32.vlgmr.msra.gmra.mrb[16].mxu1 %vm490_vm0, %v2414_v55  ;;  %v14872_v55 = vld [vmem:[#allocation36_spill] sm:$0xff] }
 0x54d   :  { %9020 = vmatpush1.bf16.msra.mxu0 %v11972_v13  ;;  %9052 = vmatpush1.bf16.msra.mxu1 %v12054_v1 }
 0x54e   :  { %9022 = vmatprep.subr.bf16.mxu0 %v11981_v18  ;;  %9054 = vmatprep.subr.bf16.mxu1 %v12060_v3 }
 0x54f   :  { %2624 = vmatprep.mubr.f32.mxu0 %v14654_v6  ;;  %2695 = vmatprep.mubr.f32.mxu1 %v14654_v6 }
 0x551   :  { %9024 = vmatpush1.bf16.msra.mxu0 %v11997_v25  ;;  %9056 = vmatpush1.bf16.msra.mxu1 %v12068_v19 }
 0x552   :  { %9026 = vmatprep.subr.bf16.mxu0 %v12006_v31  ;;  %9058 = vmatprep.subr.bf16.mxu1 %v12075_v21 }
 0x555   :  { %9028 = vmatpush1.bf16.msra.mxu0 %v12025_v39  ;;  %9060 = vmatpush1.bf16.msra.mxu1 %v12081_v36  ;;  %v14873_v39 = vld [vmem:[#allocation49_spill] sm:$0xff]  ;;  %v14874_v36 = vld [vmem:[#allocation38_spill] sm:$0xff] }
 0x556   :  { %9030 = vmatprep.subr.bf16.mxu0 %v12033_v44  ;;  %9062 = vmatprep.subr.bf16.mxu1 %v12087_v38  ;;  %v14875_v44 = vld [vmem:[#allocation50_spill] sm:$0xff]  ;;  %v14876_v38 = vld [vmem:[#allocation40_spill] sm:$0xff] }
 0x559   :  { %9032 = vmatpush1.bf16.msra.mxu0 %v12046_v53  ;;  %9064 = vmatpush1.bf16.msra.mxu1 %v12093_v49  ;;  %v14877_v53 = vld [vmem:[#allocation51_spill] sm:$0xff]  ;;  %v14878_v49 = vld [vmem:[#allocation42_spill] sm:$0xff] }
 0x55a   :  { %9034 = vmatprep.subr.bf16.mxu0 %v12051_v58  ;;  %9066 = vmatprep.subr.bf16.mxu1 %v12099_v52  ;;  %v14879_v58 = vld [vmem:[#allocation52_spill] sm:$0xff] }
 0x55b   :  { %v14880_v52 = vld [vmem:[#allocation44_spill] sm:$0xff] }
 0x55d   :  { %9036 = vmatpush1.bf16.msra.mxu0 %v14870_v34  ;;  %9068 = vmatpush1.bf16.msra.mxu1 %v14871_v2  ;;  %v14881_v34 = vld [vmem:[#allocation53_spill] sm:$0xff]  ;;  %v14882_v2 = vld [vmem:[#allocation46_spill] sm:$0xff] }
 0x55e   :  { %9038 = vmatprep.subr.bf16.mxu0 %v14872_v55  ;;  %9070 = vmatprep.subr.bf16.mxu1 %v14873_v39  ;;  %v14883_v55 = vld [vmem:[#allocation54_spill] sm:$0xff]  ;;  %v14884_v39 = vld [vmem:[#allocation55_spill] sm:$0xff] }
 0x561   :  { %9040 = vmatpush1.bf16.msra.mxu0 %v14874_v36  ;;  %9072 = vmatpush1.bf16.msra.mxu1 %v14875_v44  ;;  %v14885_v36 = vld [vmem:[#allocation56_spill] sm:$0xff]  ;;  %v14918_v44 = vld [vmem:[#allocation183_spill] sm:$0xff] }
 0x562   :  { %9042 = vmatprep.subr.bf16.mxu0 %v14876_v38  ;;  %9074 = vmatprep.subr.bf16.mxu1 %v14877_v53  ;;  %v14886_v53 = vld [vmem:[#allocation57_spill] sm:$0xff]  ;;  %v14900_v38 = vld [vmem:[#allocation71_spill] sm:$0xff] }
 0x565   :  { %9044 = vmatpush1.bf16.msra.mxu0 %v14878_v49  ;;  %9076 = vmatpush1.bf16.msra.mxu1 %v14879_v58  ;;  %v14887_v49 = vld [vmem:[#allocation58_spill] sm:$0xff]  ;;  %v14888_v58 = vld [vmem:[#allocation59_spill] sm:$0xff] }
 0x566   :  { %9046 = vmatprep.subr.bf16.mxu0 %v14880_v52  ;;  %9078 = vmatprep.subr.bf16.mxu1 %v14881_v34  ;;  %v14889_v52 = vld [vmem:[#allocation60_spill] sm:$0xff]  ;;  %v14899_v34 = vld [vmem:[#allocation70_spill] sm:$0xff] }
 0x569   :  { %9048 = vmatpush1.bf16.msra.mxu0 %v14882_v2  ;;  %9080 = vmatpush1.bf16.msra.mxu1 %v14883_v55  ;;  %v14890_v55 = vld [vmem:[#allocation61_spill] sm:$0xff]  ;;  %v14893_v2 = vld [vmem:[#allocation64_spill] sm:$0xff] }
 0x56a   :  { %9082 = vmatprep.subr.bf16.mxu0 %v14884_v39  ;;  %9114 = vmatprep.subr.bf16.mxu1 %v14885_v36  ;;  %v14891_v39 = vld [vmem:[#allocation62_spill] sm:$0xff]  ;;  %v14892_v36 = vld [vmem:[#allocation63_spill] sm:$0xff] }
 0x56c   :  { %2625 = vmatmul.mubr.f32.vlgmr.msra.gmra.mrb[12].mxu0 %v12700_v37  ;;  %2696 = vmatmul.mubr.f32.vlgmr.msra.gmra.mrb[16].mxu1 %v12700_v37  ;;  %v14894_v37 = vld [vmem:[#allocation65_spill] sm:$0xff] }
 0x56d   :  { %9084 = vmatpush1.bf16.msra.mxu0 %v14886_v53  ;;  %9116 = vmatpush1.bf16.msra.mxu1 %v14887_v49  ;;  %v14895_v53 = vld [vmem:[#allocation66_spill] sm:$0xff]  ;;  %v14896_v49 = vld [vmem:[#allocation67_spill] sm:$0xff] }
 0x56e   :  { %9086 = vmatprep.subr.bf16.mxu0 %v14888_v58  ;;  %9118 = vmatprep.subr.bf16.mxu1 %v14889_v52  ;;  %v14897_v58 = vld [vmem:[#allocation68_spill] sm:$0xff]  ;;  %v14898_v52 = vld [vmem:[#allocation69_spill] sm:$0xff] }
 0x56f   :  { %2794 = vmatprep.mubr.f32.mxu0 %v14654_v6  ;;  %2865 = vmatprep.mubr.f32.mxu1 %v14654_v6 }
 0x571   :  { %9088 = vmatpush1.bf16.msra.mxu0 %v14890_v55  ;;  %9120 = vmatpush1.bf16.msra.mxu1 %v14891_v39  ;;  %v14901_v55 = vld [vmem:[#allocation72_spill] sm:$0xff]  ;;  %v14902_v39 = vld [vmem:[#allocation73_spill] sm:$0xff] }
 0x572   :  { %9090 = vmatprep.subr.bf16.mxu0 %v14892_v36  ;;  %9122 = vmatprep.subr.bf16.mxu1 %v14893_v2  ;;  %v14903_v36 = vld [vmem:[#allocation74_spill] sm:$0xff]  ;;  %v14904_v2 = vld [vmem:[#allocation75_spill] sm:$0xff] }
 0x575   :  { %9092 = vmatpush1.bf16.msra.mxu0 %v14894_v37  ;;  %9124 = vmatpush1.bf16.msra.mxu1 %v14895_v53  ;;  %v14905_v37 = vld [vmem:[#allocation76_spill] sm:$0xff]  ;;  %v14906_v53 = vld [vmem:[#allocation77_spill] sm:$0xff] }
 0x576   :  { %9094 = vmatprep.subr.bf16.mxu0 %v14896_v49  ;;  %9126 = vmatprep.subr.bf16.mxu1 %v14897_v58  ;;  %v14907_v49 = vld [vmem:[#allocation78_spill] sm:$0xff]  ;;  %v14908_v58 = vld [vmem:[#allocation79_spill] sm:$0xff] }
 0x579   :  { %9096 = vmatpush1.bf16.msra.mxu0 %v14898_v52  ;;  %9128 = vmatpush1.bf16.msra.mxu1 %v14899_v34  ;;  %v14909_v52 = vld [vmem:[#allocation80_spill] sm:$0xff]  ;;  %v14910_v34 = vld [vmem:[#allocation81_spill] sm:$0xff] }
 0x57a   :  { %9098 = vmatprep.subr.bf16.mxu0 %v14900_v38  ;;  %9130 = vmatprep.subr.bf16.mxu1 %v14901_v55  ;;  %v14911_v38 = vld [vmem:[#allocation82_spill] sm:$0xff]  ;;  %v14912_v55 = vld [vmem:[#allocation83_spill] sm:$0xff] }
 0x57d   :  { %9100 = vmatpush1.bf16.msra.mxu0 %v14902_v39  ;;  %9132 = vmatpush1.bf16.msra.mxu1 %v14903_v36  ;;  %v14913_v39 = vld [vmem:[#allocation84_spill] sm:$0xff]  ;;  %v14914_v36 = vld [vmem:[#allocation85_spill] sm:$0xff] }
 0x57e   :  { %9102 = vmatprep.subr.bf16.mxu0 %v14904_v2  ;;  %9134 = vmatprep.subr.bf16.mxu1 %v14905_v37  ;;  %v14915_v2 = vld [vmem:[#allocation86_spill] sm:$0xff]  ;;  %v14916_v37 = vld [vmem:[#allocation87_spill] sm:$0xff] }
 0x581   :  { %9104 = vmatpush1.bf16.msra.mxu0 %v14906_v53  ;;  %9136 = vmatpush1.bf16.msra.mxu1 %v14907_v49  ;;  %v14917_v53 = vld [vmem:[#allocation88_spill] sm:$0xff] }
 0x582   :  { %9106 = vmatprep.subr.bf16.mxu0 %v14908_v58  ;;  %9138 = vmatprep.subr.bf16.mxu1 %v14909_v52 }
 0x585   :  { %9108 = vmatpush1.bf16.msra.mxu0 %v14910_v34  ;;  %9140 = vmatpush1.bf16.msra.mxu1 %v14911_v38  ;;  %v14919_v38 = vld [vmem:[#allocation184_spill] sm:$0xff] }
 0x586   :  { %9110 = vmatprep.subr.bf16.mxu0 %v14912_v55  ;;  %9142 = vmatprep.subr.bf16.mxu1 %v14913_v39 }
 0x589   :  { %9112 = vmatpush1.bf16.msra.mxu0 %v14914_v36  ;;  %9144 = vmatpush1.bf16.msra.mxu1 %v14915_v2  ;;  %v14920_v2 = vld [vmem:[#allocation185_spill] sm:$0xff] }
 0x58a   :  { %9146 = vmatprep.subr.bf16.mxu0 %v14916_v37  ;;  %9178 = vmatprep.subr.bf16.mxu1 %v14917_v53 }
 0x617   :  { %v2309_v49 = vpop.f32.mrb[10].mxu0  ;;  %v2380_v58 = vpop.f32.mrb[14].mxu1 }
 0x618   :  { %v11068_v52 = vadd.f32 %v2309_v49, %v14918_v44  ;;  %v2311_v21 = vpop.f32.mrb[11].mxu0  ;;  %v12910_v34 = vpop.f32.mrb[15].mxu1  ;;  %v11070_v36 = vadd.f32 %v2380_v58, %v14920_v2  ;;  %v14922_v2 = vld [vmem:[#allocation90_spill] sm:$0xff] }
 0x619   :  { %v11069_v31 = vadd.f32 %v2311_v21, %v14919_v38  ;;  %v14923_v38 = vld [vmem:[#allocation93_spill] sm:$0xff] }
 0x61a   :  { %v2389_v55 = vsub.f32 0.0, %v11068_v52 }
 0x61b   :  { %v2395_v19 = vsub.f32 0.0, %v11069_v31 }
 0x61c   :  { %v2390_v39 = vmul.f32 1.442695, %v2389_v55 }
 0x61d   :  { %v2396_v25 = vmul.f32 1.442695, %v2395_v19 }
 0x61e   :  { %11329 = vpow2.f32 %v2390_v39 }
 0x61f   :  { %11331 = vpow2.f32 %v2396_v25  ;;  %v14921_v25 = vld [vmem:[#allocation89_spill] sm:$0xff] }
 0x620   :  { %11333 = vtanh.f32 %v11070_v36 }
 0x628   :  { %v11330_v37 = vpop.eup %11329 }
 0x629   :  { %v11332_v3 = vpop.eup %11331  ;;  %v2392_v53 = vadd.f32 1.0, %v11330_v37 }
 0x62a   :  { %v2398_v18 = vadd.f32 1.0, %v11332_v3  ;;  %v11334_v49 = vpop.eup %11333 }
 0x62b   :  { %11335 = vrcp.f32 %v2392_v53 }
 0x62c   :  { %11337 = vrcp.f32 %v2398_v18 }
 0x635   :  { %v11336_v44 = vpop.eup %11335 }
 0x636   :  { %v11338_v1 = vpop.eup %11337  ;;  %v2409_v13 = vmul.f32 %v11336_v44, %v11334_v49 }
 0x637   :  { %v2408_v21 = vmul.f32 %v11338_v1, %v12692_v41 }
 0x639   :  { %v12915_v31 = vadd.f32 %v2409_v13, %v2408_v21  ;;  %v14924_v13 = vld [vmem:[#allocation92_spill] sm:$0xff] }
 0x63f   :  { %v2626_v19 = vpop.f32.mrb[12].mxu0  ;;  %v2697_v39 = vpop.f32.mrb[16].mxu1 }
 0x640   :  { %v11072_v52 = vadd.f32 %v2626_v19, %v14921_v25  ;;  %v2628_v58 = vpop.f32.mrb[13].mxu0  ;;  %v2699_v55 = vpop.f32.mrb[17].mxu1  ;;  %v11074_v41 = vadd.f32 %v2697_v39, %v14924_v13 }
 0x641   :  { %v11073_v37 = vadd.f32 %v2628_v58, %v14922_v2  ;;  %v11075_v54 = vadd.f32 %v2699_v55, %v14923_v38 }
 0x642   :  { %v2706_v36 = vsub.f32 0.0, %v11072_v52 }
 0x643   :  { %v2712_v3 = vsub.f32 0.0, %v11073_v37  ;;  %v2719_v44 = vsub.f32 0.0, %v11075_v54 }
 0x644   :  { %v2707_v53 = vmul.f32 1.442695, %v2706_v36 }
 0x645   :  { %v2713_v18 = vmul.f32 1.442695, %v2712_v3  ;;  %v2720_v1 = vmul.f32 1.442695, %v2719_v44 }
 0x646   :  { %11339 = vpow2.f32 %v2707_v53  ;;  %v14925_v53 = vld [vmem:[#allocation94_spill] sm:$0xff] }
 0x647   :  { %11341 = vpow2.f32 %v2713_v18 }
 0x648   :  { %11343 = vpow2.f32 %v2720_v1 }
 0x649   :  { %11345 = vtanh.f32 %v11074_v41  ;;  %v14928_v41 = vld [vmem:[#allocation96_spill] sm:$0xff] }
 0x650   :  { %v11340_v49 = vpop.eup %11339 }
 0x651   :  { %v11342_v21 = vpop.eup %11341  ;;  %v2709_v8 = vadd.f32 1.0, %v11340_v49  ;;  %v14929_v49 = vld [vmem:[#allocation97_spill] sm:$0xff] }
 0x652   :  { %v2715_v19 = vadd.f32 1.0, %v11342_v21  ;;  %v11344_v52 = vpop.eup %11343  ;;  %v14930_v21 = vld [vmem:[#allocation98_spill] sm:$0xff] }
 0x653   :  { %11347 = vrcp.f32 %v2709_v8  ;;  %v11346_v58 = vpop.eup %11345  ;;  %v2722_v55 = vadd.f32 1.0, %v11344_v52  ;;  %v14927_v8 = vld [vmem:[#allocation95_spill] sm:$0xff]  ;;  %v14932_v52 = vld [vmem:[#allocation100_spill] sm:$0xff] }
 0x654   :  { %11349 = vrcp.f32 %v2715_v19  ;;  %v14931_v19 = vld [vmem:[#allocation99_spill] sm:$0xff] }
 0x655   :  { %11351 = vrcp.f32 %v2722_v55  ;;  %v14937_v55 = vld [vmem:[#allocation105_spill] sm:$0xff] }
 0x65d   :  { %v11348_v37 = vpop.eup %11347 }
 0x65e   :  { %v11350_v36 = vpop.eup %11349  ;;  %v2726_v3 = vmul.f32 %v11348_v37, %v11346_v58  ;;  %v14933_v58 = vld [vmem:[#allocation101_spill] sm:$0xff]  ;;  %v14934_v37 = vld [vmem:[#allocation102_spill] sm:$0xff] }
 0x65f   :  { %v2725_v18 = vmul.f32 %v11350_v36, %v14925_v53  ;;  %v11352_v39 = vpop.eup %11351  ;;  %v14935_v36 = vld [vmem:[#allocation103_spill] sm:$0xff]  ;;  %v14938_v53 = vld [vmem:[#allocation106_spill] sm:$0xff] }
 0x661   :  { %v12922_v54 = vadd.f32 %v2726_v3, %v2725_v18  ;;  %v14936_v3 = vld [vmem:[#allocation104_spill] sm:$0xff]  ;;  %v14939_v18 = vld [vmem:[#allocation107_spill] sm:$0xff] }
 0x663   :  { %14926 = vst [vmem:[#allocation159_spill] sm:$0xff] %v12922_v54  ;;  %11353 = vtanh.f32 %v12922_v54 }
 0x66d   :  { %v11354_v44 = vpop.eup %11353 }
 0x66e   :  { %v12925_v1 = vmul.f32 %v11354_v44, %v11352_v39  ;;  %v14940_v39 = vld [vmem:[#allocation108_spill] sm:$0xff]  ;;  %v14941_v44 = vld [vmem:[#allocation109_spill] sm:$0xff] }
 0x670   :  { %2795 = vmatmul.mubr.f32.vlgmr.msra.gmra.mrb[14].mxu0 %v12925_v1  ;;  %2866 = vmatmul.mubr.f32.vlgmr.msra.gmra.mrb[18].mxu1 %v12925_v1 }
 0x671   :  { %9148 = vmatpush1.bf16.msra.mxu0 %v14927_v8  ;;  %9180 = vmatpush1.bf16.msra.mxu1 %v14928_v41 }
 0x672   :  { %9150 = vmatprep.subr.bf16.mxu0 %v14929_v49  ;;  %9182 = vmatprep.subr.bf16.mxu1 %v14930_v21 }
 0x673   :  { %2936 = vmatprep.mubr.f32.mxu0 %v14654_v6  ;;  %3007 = vmatprep.mubr.f32.mxu1 %v14654_v6 }
 0x675   :  { %9152 = vmatpush1.bf16.msra.mxu0 %v14931_v19  ;;  %9184 = vmatpush1.bf16.msra.mxu1 %v14932_v52  ;;  %v14942_v19 = vld [vmem:[#allocation110_spill] sm:$0xff]  ;;  %v14943_v52 = vld [vmem:[#allocation111_spill] sm:$0xff] }
 0x676   :  { %9154 = vmatprep.subr.bf16.mxu0 %v14933_v58  ;;  %9186 = vmatprep.subr.bf16.mxu1 %v14934_v37  ;;  %v14944_v58 = vld [vmem:[#allocation112_spill] sm:$0xff]  ;;  %v14945_v37 = vld [vmem:[#allocation113_spill] sm:$0xff] }
 0x679   :  { %9156 = vmatpush1.bf16.msra.mxu0 %v14935_v36  ;;  %9188 = vmatpush1.bf16.msra.mxu1 %v14936_v3  ;;  %v14946_v36 = vld [vmem:[#allocation114_spill] sm:$0xff]  ;;  %v14947_v3 = vld [vmem:[#allocation115_spill] sm:$0xff] }
 0x67a   :  { %9158 = vmatprep.subr.bf16.mxu0 %v14937_v55  ;;  %9190 = vmatprep.subr.bf16.mxu1 %v14938_v53  ;;  %v14948_v55 = vld [vmem:[#allocation116_spill] sm:$0xff]  ;;  %v14949_v53 = vld [vmem:[#allocation117_spill] sm:$0xff] }
 0x67d   :  { %9160 = vmatpush1.bf16.msra.mxu0 %v14939_v18  ;;  %9192 = vmatpush1.bf16.msra.mxu1 %v14940_v39  ;;  %v14950_v18 = vld [vmem:[#allocation118_spill] sm:$0xff]  ;;  %v14951_v39 = vld [vmem:[#allocation119_spill] sm:$0xff] }
 0x67e   :  { %9162 = vmatprep.subr.bf16.mxu0 %v14941_v44  ;;  %9194 = vmatprep.subr.bf16.mxu1 %v14942_v19  ;;  %v14952_v44 = vld [vmem:[#allocation120_spill] sm:$0xff]  ;;  %v14953_v19 = vld [vmem:[#allocation121_spill] sm:$0xff] }
 0x681   :  { %9164 = vmatpush1.bf16.msra.mxu0 %v14943_v52  ;;  %9196 = vmatpush1.bf16.msra.mxu1 %v14944_v58  ;;  %v14954_v52 = vld [vmem:[#allocation122_spill] sm:$0xff]  ;;  %v14955_v58 = vld [vmem:[#allocation123_spill] sm:$0xff] }
 0x682   :  { %9166 = vmatprep.subr.bf16.mxu0 %v14945_v37  ;;  %9198 = vmatprep.subr.bf16.mxu1 %v14946_v36  ;;  %v14956_v37 = vld [vmem:[#allocation124_spill] sm:$0xff]  ;;  %v14957_v36 = vld [vmem:[#allocation125_spill] sm:$0xff] }
 0x685   :  { %9168 = vmatpush1.bf16.msra.mxu0 %v14947_v3  ;;  %9200 = vmatpush1.bf16.msra.mxu1 %v14948_v55  ;;  %v14958_v3 = vld [vmem:[#allocation126_spill] sm:$0xff] }
 0x686   :  { %9170 = vmatprep.subr.bf16.mxu0 %v14949_v53  ;;  %9202 = vmatprep.subr.bf16.mxu1 %v14950_v18  ;;  %v14959_v18 = vld [vmem:[#allocation127_spill] sm:$0xff]  ;;  %v14973_v53 = vld [vmem:[#allocation141_spill] sm:$0xff] }
 0x689   :  { %9172 = vmatpush1.bf16.msra.mxu0 %v14951_v39  ;;  %9204 = vmatpush1.bf16.msra.mxu1 %v14952_v44  ;;  %v14960_v39 = vld [vmem:[#allocation128_spill] sm:$0xff]  ;;  %v14961_v44 = vld [vmem:[#allocation129_spill] sm:$0xff] }
 0x68a   :  { %9174 = vmatprep.subr.bf16.mxu0 %v14953_v19  ;;  %9206 = vmatprep.subr.bf16.mxu1 %v14954_v52  ;;  %v14962_v19 = vld [vmem:[#allocation130_spill] sm:$0xff]  ;;  %v14972_v52 = vld [vmem:[#allocation140_spill] sm:$0xff] }
 0x68d   :  { %9176 = vmatpush1.bf16.msra.mxu0 %v14955_v58  ;;  %9208 = vmatpush1.bf16.msra.mxu1 %v14956_v37  ;;  %v14963_v37 = vld [vmem:[#allocation131_spill] sm:$0xff]  ;;  %v14966_v58 = vld [vmem:[#allocation134_spill] sm:$0xff] }
 0x68e   :  { %9210 = vmatprep.subr.bf16.mxu0 %v14957_v36  ;;  %9242 = vmatprep.subr.bf16.mxu1 %v14958_v3  ;;  %v14964_v36 = vld [vmem:[#allocation132_spill] sm:$0xff]  ;;  %v14965_v3 = vld [vmem:[#allocation133_spill] sm:$0xff] }
 0x690   :  { %2937 = vmatmul.mubr.f32.vlgmr.msra.gmra.mrb[14].mxu0 %v12788_v26  ;;  %3008 = vmatmul.mubr.f32.vlgmr.msra.gmra.mrb[18].mxu1 %v12788_v26  ;;  %v14967_v26 = vld [vmem:[#allocation135_spill] sm:$0xff] }
 0x691   :  { %9212 = vmatpush1.bf16.msra.mxu0 %v14959_v18  ;;  %9244 = vmatpush1.bf16.msra.mxu1 %v14960_v39  ;;  %v14968_v18 = vld [vmem:[#allocation136_spill] sm:$0xff]  ;;  %v14969_v39 = vld [vmem:[#allocation137_spill] sm:$0xff] }
 0x692   :  { %9214 = vmatprep.subr.bf16.mxu0 %v14961_v44  ;;  %9246 = vmatprep.subr.bf16.mxu1 %v14962_v19  ;;  %v14970_v44 = vld [vmem:[#allocation138_spill] sm:$0xff]  ;;  %v14971_v19 = vld [vmem:[#allocation139_spill] sm:$0xff] }
 0x693   :  { %3106 = vmatprep.mubr.f32.mxu0 %v14654_v6  ;;  %3177 = vmatprep.mubr.f32.mxu1 %v14654_v6 }
 0x695   :  { %9216 = vmatpush1.bf16.msra.mxu0 %v14963_v37  ;;  %9248 = vmatpush1.bf16.msra.mxu1 %v14964_v36  ;;  %v14974_v37 = vld [vmem:[#allocation142_spill] sm:$0xff]  ;;  %v14975_v36 = vld [vmem:[#allocation143_spill] sm:$0xff] }
 0x696   :  { %9218 = vmatprep.subr.bf16.mxu0 %v14965_v3  ;;  %9250 = vmatprep.subr.bf16.mxu1 %v14966_v58  ;;  %v14976_v3 = vld [vmem:[#allocation144_spill] sm:$0xff]  ;;  %v14977_v58 = vld [vmem:[#allocation145_spill] sm:$0xff] }
 0x699   :  { %9220 = vmatpush1.bf16.msra.mxu0 %v14967_v26  ;;  %9252 = vmatpush1.bf16.msra.mxu1 %v14968_v18  ;;  %v14978_v26 = vld [vmem:[#allocation146_spill] sm:$0xff]  ;;  %v14979_v18 = vld [vmem:[#allocation147_spill] sm:$0xff] }
 0x69a   :  { %9222 = vmatprep.subr.bf16.mxu0 %v14969_v39  ;;  %9254 = vmatprep.subr.bf16.mxu1 %v14970_v44  ;;  %v14980_v39 = vld [vmem:[#allocation148_spill] sm:$0xff]  ;;  %v14981_v44 = vld [vmem:[#allocation149_spill] sm:$0xff] }
 0x69d   :  { %9224 = vmatpush1.bf16.msra.mxu0 %v14971_v19  ;;  %9256 = vmatpush1.bf16.msra.mxu1 %v14972_v52  ;;  %v14982_v19 = vld [vmem:[#allocation150_spill] sm:$0xff]  ;;  %v14983_v52 = vld [vmem:[#allocation151_spill] sm:$0xff] }
 0x69e   :  { %9226 = vmatprep.subr.bf16.mxu0 %v14973_v53  ;;  %9258 = vmatprep.subr.bf16.mxu1 %v14974_v37  ;;  %v14984_v53 = vld [vmem:[#allocation152_spill] sm:$0xff]  ;;  %v14985_v37 = vld [vmem:[#allocation153_spill] sm:$0xff] }
 0x6a1   :  { %9228 = vmatpush1.bf16.msra.mxu0 %v14975_v36  ;;  %9260 = vmatpush1.bf16.msra.mxu1 %v14976_v3  ;;  %v14986_v36 = vld [vmem:[#allocation154_spill] sm:$0xff]  ;;  %v14987_v3 = vld [vmem:[#allocation155_spill] sm:$0xff] }
 0x6a2   :  { %9230 = vmatprep.subr.bf16.mxu0 %v14977_v58  ;;  %9262 = vmatprep.subr.bf16.mxu1 %v14978_v26  ;;  %v14988_v58 = vld [vmem:[#allocation156_spill] sm:$0xff]  ;;  %v14989_v26 = vld [vmem:[#allocation157_spill] sm:$0xff] }
 0x6a5   :  { %9232 = vmatpush1.bf16.msra.mxu0 %v14979_v18  ;;  %9264 = vmatpush1.bf16.msra.mxu1 %v14980_v39  ;;  %v14990_v18 = vld [vmem:[#allocation158_spill] sm:$0xff] }
 0x6a6   :  { %9234 = vmatprep.subr.bf16.mxu0 %v14981_v44  ;;  %9266 = vmatprep.subr.bf16.mxu1 %v14982_v19 }
 0x6a9   :  { %9236 = vmatpush1.bf16.msra.mxu0 %v14983_v52  ;;  %9268 = vmatpush1.bf16.msra.mxu1 %v14984_v53 }
 0x6aa   :  { %9238 = vmatprep.subr.bf16.mxu0 %v14985_v37  ;;  %9270 = vmatprep.subr.bf16.mxu1 %v14986_v36 }
 0x6ad   :  { %9240 = vmatpush1.bf16.msra.mxu0 %v14987_v3  ;;  %9272 = vmatpush1.bf16.msra.mxu1 %v14988_v58 }
 0x6ae   :  { %9274 = vmatprep.subr.bf16.mxu0 %v14989_v26  ;;  %9306 = vmatprep.subr.bf16.mxu1 %v14990_v18 }
 0x763   :  { %v2938_v39 = vpop.f32.mrb[14].mxu0  ;;  %v3009_v44 = vpop.f32.mrb[18].mxu1 }
 0x764   :  { %v11076_v19 = vadd.f32 %v2938_v39, %v14846_v14  ;;  %v2940_v55 = vpop.f32.mrb[15].mxu0  ;;  %v3011_v52 = vpop.f32.mrb[19].mxu1  ;;  %v11078_v18 = vadd.f32 %v3009_v44, %v14849_v50  ;;  %v14993_v44 = vld [vmem:[#allocation171_spill] sm:$0xff] }
 0x765   :  { %v11077_v53 = vadd.f32 %v2940_v55, %v14847_v7  ;;  %v11079_v3 = vadd.f32 %v3011_v52, %v14848_v48 }
 0x766   :  { %v3018_v21 = vsub.f32 0.0, %v11076_v19 }
 0x767   :  { %v3024_v37 = vsub.f32 0.0, %v11077_v53  ;;  %v3031_v58 = vsub.f32 0.0, %v11079_v3 }
 0x768   :  { %v3019_v49 = vmul.f32 1.442695, %v3018_v21 }
 0x769   :  { %v3025_v36 = vmul.f32 1.442695, %v3024_v37  ;;  %v3032_v26 = vmul.f32 1.442695, %v3031_v58 }
 0x76a   :  { %11355 = vpow2.f32 %v3019_v49 }
 0x76b   :  { %11357 = vpow2.f32 %v3025_v36 }
 0x76c   :  { %11359 = vpow2.f32 %v3032_v26  ;;  %v14994_v26 = vld [vmem:[#allocation172_spill] sm:$0xff] }
 0x76d   :  { %11361 = vtanh.f32 %v11078_v18 }
 0x774   :  { %v11356_v41 = vpop.eup %11355 }
 0x775   :  { %v11358_v8 = vpop.eup %11357  ;;  %v3021_v54 = vadd.f32 1.0, %v11356_v41  ;;  %v11071_v41 = vadd.f32 %v12910_v34, %v12783_v46  ;;  %v14992_v34 = vld [vmem:[#allocation170_spill] sm:$0xff] }
 0x776   :  { %v3027_v39 = vadd.f32 1.0, %v11358_v8  ;;  %v11360_v19 = vpop.eup %11359 }
 0x777   :  { %11363 = vrcp.f32 %v3021_v54  ;;  %v11362_v55 = vpop.eup %11361  ;;  %v3034_v52 = vadd.f32 1.0, %v11360_v19  ;;  %v2402_v58 = vsub.f32 0.0, %v11071_v41  ;;  %v14997_v41 = vld [vmem:[#allocation31_spill] sm:$0xff] }
 0x778   :  { %11365 = vrcp.f32 %v3027_v39 }
 0x779   :  { %11367 = vrcp.f32 %v3034_v52  ;;  %v2403_v3 = vmul.f32 1.442695, %v2402_v58  ;;  %v3355_v52 = vld [vmem:[#allocation2 + $0x18] sm:$0xff]  ;;  %v14998_v58 = vld [vmem:[#allocation18_spill] sm:$0xff] }
 0x781   :  { %v11364_v21 = vpop.eup %11363 }
 0x782   :  { %v11366_v37 = vpop.eup %11365  ;;  %v3038_v53 = vmul.f32 %v11364_v21, %v11362_v55  ;;  %v14995_v55 = vld [vmem:[#allocation182_spill] sm:$0xff] }
 0x783   :  { %v3037_v49 = vmul.f32 %v11366_v37, %v12779_v57  ;;  %v11368_v8 = vpop.eup %11367  ;;  %v14991_v57 = vld [vmem:[#allocation169_spill] sm:$0xff] }
 0x785   :  { %v13004_v36 = vadd.f32 %v3038_v53, %v3037_v49  ;;  %v14996_v49 = vld [vmem:[#allocation16_spill] sm:$0xff] }
 0x787   :  { %11369 = vtanh.f32 %v13004_v36 }
 0x788   :  { %11371 = vpow2.f32 %v2403_v3  ;;  %v15001_v3 = vld [vmem:[#allocation35_spill] sm:$0xff] }
 0x789   :  { %11373 = vtanh.f32 %v12915_v31 }
 0x791   :  { %v11370_v54 = vpop.eup %11369 }
 0x792   :  { %v13009_v18 = vmul.f32 %v11370_v54, %v11368_v8  ;;  %v11372_v39 = vpop.eup %11371  ;;  %v14999_v8 = vld [vmem:[#allocation33_spill] sm:$0xff]  ;;  %v15000_v54 = vld [vmem:[#allocation20_spill] sm:$0xff] }
 0x793   :  { %v2405_v19 = vadd.f32 1.0, %v11372_v39  ;;  %v11374_v21 = vpop.eup %11373  ;;  %v15002_v39 = vld [vmem:[#allocation22_spill] sm:$0xff] }
 0x794   :  { %3107 = vmatmul.mubr.f32.vlgmr.msra.gmra.mrb[16].mxu0 %v13009_v18  ;;  %3178 = vmatmul.mubr.f32.vlgmr.msra.gmra.mrb[20].mxu1 %v13009_v18 }
 0x795   :  { %9276 = vmatpush1.bf16.msra.mxu0 %v14852_v24  ;;  %9308 = vmatpush1.bf16.msra.mxu1 %v14853_v32  ;;  %11375 = vrcp.f32 %v2405_v19  ;;  %v15003_v19 = vld [vmem:[#allocation37_spill] sm:$0xff] }
 0x796   :  { %9278 = vmatprep.subr.bf16.mxu0 %v14854_v33  ;;  %9310 = vmatprep.subr.bf16.mxu1 %v14855_v28 }
 0x797   :  { %3248 = vmatprep.mubr.f32.mxu0 %v14654_v6  ;;  %3319 = vmatprep.mubr.f32.mxu1 %v14654_v6 }
 0x799   :  { %9280 = vmatpush1.bf16.msra.mxu0 %v14856_v61  ;;  %9312 = vmatpush1.bf16.msra.mxu1 %v14991_v57 }
 0x79a   :  { %9282 = vmatprep.subr.bf16.mxu0 %v14992_v34  ;;  %9314 = vmatprep.subr.bf16.mxu1 %v14993_v44 }
 0x79d   :  { %9284 = vmatpush1.bf16.msra.mxu0 %v14994_v26  ;;  %9316 = vmatpush1.bf16.msra.mxu1 %v14861_v56 }
 0x79e   :  { %9286 = vmatprep.subr.bf16.mxu0 %v14862_v10  ;;  %9318 = vmatprep.subr.bf16.mxu1 %v14863_v45 }
 0x79f   :  { %v11376_v37 = vpop.eup %11375 }
 0x7a0   :  { %v2412_v53 = vmul.f32 %v11376_v37, %v11374_v21  ;;  %v15004_v21 = vld [vmem:[#allocation24_spill] sm:$0xff]  ;;  %v15005_v37 = vld [vmem:[#allocation39_spill] sm:$0xff] }
 0x7a1   :  { %9288 = vmatpush1.bf16.msra.mxu0 %v14864_v11  ;;  %9320 = vmatpush1.bf16.msra.mxu1 %v14865_v23 }
 0x7a2   :  { %9290 = vmatprep.subr.bf16.mxu0 %v14866_v16  ;;  %9322 = vmatprep.subr.bf16.mxu1 %v14867_v60 }
 0x7a5   :  { %9292 = vmatpush1.bf16.msra.mxu0 %v14868_v20  ;;  %9324 = vmatpush1.bf16.msra.mxu1 %v14869_v0 }
 0x7a6   :  { %9294 = vmatprep.subr.bf16.mxu0 %v14995_v55  ;;  %9326 = vmatprep.subr.bf16.mxu1 %v12546_v63 }
 0x7a9   :  { %9296 = vmatpush1.bf16.msra.mxu0 %v12550_v27  ;;  %9328 = vmatpush1.bf16.msra.mxu1 %v12552_v5 }
 0x7aa   :  { %9298 = vmatprep.subr.bf16.mxu0 %v12556_v43  ;;  %9330 = vmatprep.subr.bf16.mxu1 %v12558_v29 }
 0x7ad   :  { %9300 = vmatpush1.bf16.msra.mxu0 %v12562_v62  ;;  %9332 = vmatpush1.bf16.msra.mxu1 %v12564_v15 }
 0x7ae   :  { %9302 = vmatprep.subr.bf16.mxu0 %v12568_v47  ;;  %9334 = vmatprep.subr.bf16.mxu1 %v12570_v42 }
 0x7b1   :  { %9304 = vmatpush1.bf16.msra.mxu0 %v12574_v12  ;;  %9336 = vmatpush1.bf16.msra.mxu1 %v12576_v59 }
 0x7b2   :  { %9338 = vmatprep.subr.bf16.mxu0 %v11956_v4  ;;  %9346 = vmatprep.subr.bf16.mxu1 %v12004_v30 }
 0x7b4   :  { %3249 = vmatmul.mubr.f32.vlgmr.msra.gmra.mrb[16].mxu0 %v2412_v53  ;;  %3320 = vmatmul.mubr.f32.vlgmr.msra.gmra.mrb[20].mxu1 %v2412_v53  ;;  %v15006_v53 = vld [vmem:[#allocation26_spill] sm:$0xff] }
 0x7b5   :  { %9340 = vmatpush1.bf16.msra.mxu0 %v11966_v9  ;;  %9348 = vmatpush1.bf16.msra.mxu1 %v12015_v35 }
 0x7b6   :  { %9342 = vmatprep.subr.bf16.mxu0 %v11979_v17  ;;  %9350 = vmatprep.subr.bf16.mxu1 %v12027_v40 }
 0x7b7   :  { %3423 = vmatprep.mubr.f32.mxu0 %v14654_v6  ;;  %3494 = vmatprep.mubr.f32.mxu1 %v14654_v6 }
 0x7b9   :  { %9344 = vmatpush1.bf16.msra.mxu0 %v11990_v22  ;;  %9352 = vmatpush1.bf16.msra.mxu1 %v12041_v51 }
 0x7ba   :  { %9354 = vmatprep.subr.bf16.mxu0 %v14996_v49  ;;  %9386 = vmatprep.subr.bf16.mxu1 %v14997_v41  ;;  %v15012_v41 = vld [vmem:[#allocation32_spill] sm:$0xff] }
 0x7bc   :  { %8254 = vmatmul.mubr.msk.f32.vlgmr.msra.gmra.mrb[18].mxu0 %vm490_vm0, %v3355_v52  ;;  %8255 = vmatmul.mubr.msk.f32.vlgmr.msra.gmra.mrb[22].mxu1 %vm490_vm0, %v3355_v52  ;;  %v15007_v52 = vld [vmem:[#allocation41_spill] sm:$0xff] }
 0x7bd   :  { %9356 = vmatpush1.bf16.msra.mxu0 %v14998_v58  ;;  %9388 = vmatpush1.bf16.msra.mxu1 %v14999_v8  ;;  %v15008_v8 = vld [vmem:[#allocation28_spill] sm:$0xff]  ;;  %v15011_v58 = vld [vmem:[#allocation45_spill] sm:$0xff] }
 0x7be   :  { %9358 = vmatprep.subr.bf16.mxu0 %v15000_v54  ;;  %9390 = vmatprep.subr.bf16.mxu1 %v15001_v3  ;;  %v15009_v54 = vld [vmem:[#allocation43_spill] sm:$0xff]  ;;  %v15010_v3 = vld [vmem:[#allocation30_spill] sm:$0xff] }
 0x7bf   :  { %3565 = vmatprep.mubr.f32.mxu0 %v14654_v6  ;;  %3636 = vmatprep.mubr.f32.mxu1 %v14654_v6 }
 0x7c1   :  { %9360 = vmatpush1.bf16.msra.mxu0 %v15002_v39  ;;  %9392 = vmatpush1.bf16.msra.mxu1 %v15003_v19  ;;  %v15013_v39 = vld [vmem:[#allocation47_spill] sm:$0xff]  ;;  %v15014_v19 = vld [vmem:[#allocation34_spill] sm:$0xff] }
 0x7c2   :  { %9362 = vmatprep.subr.bf16.mxu0 %v15004_v21  ;;  %9394 = vmatprep.subr.bf16.mxu1 %v15005_v37  ;;  %v15015_v21 = vld [vmem:[#allocation48_spill] sm:$0xff] }
 0x7c3   :  { %v15016_v37 = vld [vmem:[#allocation36_spill] sm:$0xff] }
 0x7c5   :  { %9364 = vmatpush1.bf16.msra.mxu0 %v15006_v53  ;;  %9396 = vmatpush1.bf16.msra.mxu1 %v15007_v52  ;;  %v15017_v53 = vld [vmem:[#allocation49_spill] sm:$0xff]  ;;  %v15018_v52 = vld [vmem:[#allocation38_spill] sm:$0xff] }
 0x7c6   :  { %9366 = vmatprep.subr.bf16.mxu0 %v15008_v8  ;;  %9398 = vmatprep.subr.bf16.mxu1 %v15009_v54  ;;  %v15019_v8 = vld [vmem:[#allocation50_spill] sm:$0xff]  ;;  %v15020_v54 = vld [vmem:[#allocation40_spill] sm:$0xff] }
 0x7c9   :  { %9368 = vmatpush1.bf16.msra.mxu0 %v15010_v3  ;;  %9400 = vmatpush1.bf16.msra.mxu1 %v15011_v58  ;;  %v15021_v3 = vld [vmem:[#allocation51_spill] sm:$0xff]  ;;  %v15022_v58 = vld [vmem:[#allocation42_spill] sm:$0xff] }
 0x7ca   :  { %9370 = vmatprep.subr.bf16.mxu0 %v15012_v41  ;;  %9402 = vmatprep.subr.bf16.mxu1 %v15013_v39  ;;  %v15023_v41 = vld [vmem:[#allocation52_spill] sm:$0xff] }
 0x7cb   :  { %v15024_v39 = vld [vmem:[#allocation44_spill] sm:$0xff] }
 0x7cd   :  { %9372 = vmatpush1.bf16.msra.mxu0 %v15014_v19  ;;  %9404 = vmatpush1.bf16.msra.mxu1 %v15015_v21  ;;  %v15025_v19 = vld [vmem:[#allocation53_spill] sm:$0xff]  ;;  %v15026_v21 = vld [vmem:[#allocation46_spill] sm:$0xff] }
 0x7ce   :  { %9374 = vmatprep.subr.bf16.mxu0 %v15016_v37  ;;  %9406 = vmatprep.subr.bf16.mxu1 %v15017_v53  ;;  %v15027_v37 = vld [vmem:[#allocation54_spill] sm:$0xff]  ;;  %v15028_v53 = vld [vmem:[#allocation55_spill] sm:$0xff] }
 0x7d1   :  { %9376 = vmatpush1.bf16.msra.mxu0 %v15018_v52  ;;  %9408 = vmatpush1.bf16.msra.mxu1 %v15019_v8  ;;  %v15029_v52 = vld [vmem:[#allocation56_spill] sm:$0xff]  ;;  %v15062_v8 = vld [vmem:[#allocation183_spill] sm:$0xff] }
 0x7d2   :  { %9378 = vmatprep.subr.bf16.mxu0 %v15020_v54  ;;  %9410 = vmatprep.subr.bf16.mxu1 %v15021_v3  ;;  %v15030_v3 = vld [vmem:[#allocation57_spill] sm:$0xff]  ;;  %v15044_v54 = vld [vmem:[#allocation71_spill] sm:$0xff] }
 0x7d5   :  { %9380 = vmatpush1.bf16.msra.mxu0 %v15022_v58  ;;  %9412 = vmatpush1.bf16.msra.mxu1 %v15023_v41  ;;  %v15031_v58 = vld [vmem:[#allocation58_spill] sm:$0xff]  ;;  %v15032_v41 = vld [vmem:[#allocation59_spill] sm:$0xff] }
 0x7d6   :  { %9382 = vmatprep.subr.bf16.mxu0 %v15024_v39  ;;  %9414 = vmatprep.subr.bf16.mxu1 %v15025_v19  ;;  %v15033_v39 = vld [vmem:[#allocation60_spill] sm:$0xff]  ;;  %v15043_v19 = vld [vmem:[#allocation70_spill] sm:$0xff] }
 0x7d9   :  { %9384 = vmatpush1.bf16.msra.mxu0 %v15026_v21  ;;  %9416 = vmatpush1.bf16.msra.mxu1 %v15027_v37  ;;  %v15034_v37 = vld [vmem:[#allocation61_spill] sm:$0xff]  ;;  %v15037_v21 = vld [vmem:[#allocation64_spill] sm:$0xff] }
 0x7da   :  { %9418 = vmatprep.subr.bf16.mxu0 %v15028_v53  ;;  %9450 = vmatprep.subr.bf16.mxu1 %v15029_v52  ;;  %v15035_v53 = vld [vmem:[#allocation62_spill] sm:$0xff]  ;;  %v15036_v52 = vld [vmem:[#allocation63_spill] sm:$0xff] }
 0x7dc   :  { %3566 = vmatmul.mubr.f32.vlgmr.msra.gmra.mrb[18].mxu0 %v12925_v1  ;;  %3637 = vmatmul.mubr.f32.vlgmr.msra.gmra.mrb[22].mxu1 %v12925_v1  ;;  %v15038_v1 = vld [vmem:[#allocation65_spill] sm:$0xff] }
 0x7dd   :  { %9420 = vmatpush1.bf16.msra.mxu0 %v15030_v3  ;;  %9452 = vmatpush1.bf16.msra.mxu1 %v15031_v58  ;;  %v15039_v3 = vld [vmem:[#allocation66_spill] sm:$0xff]  ;;  %v15040_v58 = vld [vmem:[#allocation67_spill] sm:$0xff] }
 0x7de   :  { %9422 = vmatprep.subr.bf16.mxu0 %v15032_v41  ;;  %9454 = vmatprep.subr.bf16.mxu1 %v15033_v39  ;;  %v15041_v41 = vld [vmem:[#allocation68_spill] sm:$0xff]  ;;  %v15042_v39 = vld [vmem:[#allocation69_spill] sm:$0xff] }
 0x7df   :  { %3735 = vmatprep.mubr.f32.mxu0 %v14654_v6  ;;  %3806 = vmatprep.mubr.f32.mxu1 %v14654_v6 }
 0x7e1   :  { %9424 = vmatpush1.bf16.msra.mxu0 %v15034_v37  ;;  %9456 = vmatpush1.bf16.msra.mxu1 %v15035_v53  ;;  %v15045_v37 = vld [vmem:[#allocation72_spill] sm:$0xff]  ;;  %v15046_v53 = vld [vmem:[#allocation73_spill] sm:$0xff] }
 0x7e2   :  { %9426 = vmatprep.subr.bf16.mxu0 %v15036_v52  ;;  %9458 = vmatprep.subr.bf16.mxu1 %v15037_v21  ;;  %v15047_v52 = vld [vmem:[#allocation74_spill] sm:$0xff]  ;;  %v15048_v21 = vld [vmem:[#allocation75_spill] sm:$0xff] }
 0x7e5   :  { %9428 = vmatpush1.bf16.msra.mxu0 %v15038_v1  ;;  %9460 = vmatpush1.bf16.msra.mxu1 %v15039_v3  ;;  %v15049_v1 = vld [vmem:[#allocation76_spill] sm:$0xff]  ;;  %v15050_v3 = vld [vmem:[#allocation77_spill] sm:$0xff] }
 0x7e6   :  { %9430 = vmatprep.subr.bf16.mxu0 %v15040_v58  ;;  %9462 = vmatprep.subr.bf16.mxu1 %v15041_v41  ;;  %v15051_v58 = vld [vmem:[#allocation78_spill] sm:$0xff]  ;;  %v15052_v41 = vld [vmem:[#allocation79_spill] sm:$0xff] }
 0x7e9   :  { %9432 = vmatpush1.bf16.msra.mxu0 %v15042_v39  ;;  %9464 = vmatpush1.bf16.msra.mxu1 %v15043_v19  ;;  %v15053_v39 = vld [vmem:[#allocation80_spill] sm:$0xff]  ;;  %v15054_v19 = vld [vmem:[#allocation81_spill] sm:$0xff] }
 0x7ea   :  { %9434 = vmatprep.subr.bf16.mxu0 %v15044_v54  ;;  %9466 = vmatprep.subr.bf16.mxu1 %v15045_v37  ;;  %v15055_v54 = vld [vmem:[#allocation82_spill] sm:$0xff]  ;;  %v15056_v37 = vld [vmem:[#allocation83_spill] sm:$0xff] }
 0x7ed   :  { %9436 = vmatpush1.bf16.msra.mxu0 %v15046_v53  ;;  %9468 = vmatpush1.bf16.msra.mxu1 %v15047_v52  ;;  %v15057_v53 = vld [vmem:[#allocation84_spill] sm:$0xff]  ;;  %v15058_v52 = vld [vmem:[#allocation85_spill] sm:$0xff] }
 0x7ee   :  { %9438 = vmatprep.subr.bf16.mxu0 %v15048_v21  ;;  %9470 = vmatprep.subr.bf16.mxu1 %v15049_v1  ;;  %v15059_v21 = vld [vmem:[#allocation86_spill] sm:$0xff]  ;;  %v15060_v1 = vld [vmem:[#allocation87_spill] sm:$0xff] }
 0x7f1   :  { %9440 = vmatpush1.bf16.msra.mxu0 %v15050_v3  ;;  %9472 = vmatpush1.bf16.msra.mxu1 %v15051_v58  ;;  %v15061_v3 = vld [vmem:[#allocation88_spill] sm:$0xff] }
 0x7f2   :  { %9442 = vmatprep.subr.bf16.mxu0 %v15052_v41  ;;  %9474 = vmatprep.subr.bf16.mxu1 %v15053_v39 }
 0x7f5   :  { %9444 = vmatpush1.bf16.msra.mxu0 %v15054_v19  ;;  %9476 = vmatpush1.bf16.msra.mxu1 %v15055_v54  ;;  %v15063_v54 = vld [vmem:[#allocation184_spill] sm:$0xff] }
 0x7f6   :  { %9446 = vmatprep.subr.bf16.mxu0 %v15056_v37  ;;  %9478 = vmatprep.subr.bf16.mxu1 %v15057_v53 }
 0x7f9   :  { %9448 = vmatpush1.bf16.msra.mxu0 %v15058_v52  ;;  %9480 = vmatpush1.bf16.msra.mxu1 %v15059_v21  ;;  %v15064_v21 = vld [vmem:[#allocation185_spill] sm:$0xff] }
 0x7fa   :  { %9482 = vmatprep.subr.bf16.mxu0 %v15060_v1  ;;  %9514 = vmatprep.subr.bf16.mxu1 %v15061_v3 }
 0x887   :  { %v3250_v58 = vpop.f32.mrb[16].mxu0  ;;  %v3321_v41 = vpop.f32.mrb[20].mxu1 }
 0x888   :  { %v11080_v39 = vadd.f32 %v3250_v58, %v15062_v8  ;;  %v3252_v49 = vpop.f32.mrb[17].mxu0  ;;  %v13131_v19 = vpop.f32.mrb[21].mxu1  ;;  %v11082_v52 = vadd.f32 %v3321_v41, %v15064_v21 }
 0x889   :  { %v11081_v51 = vadd.f32 %v3252_v49, %v15063_v54 }
 0x88a   :  { %v3330_v37 = vsub.f32 0.0, %v11080_v39 }
 0x88b   :  { %v3336_v22 = vsub.f32 0.0, %v11081_v51 }
 0x88c   :  { %v3331_v53 = vmul.f32 1.442695, %v3330_v37 }
 0x88d   :  { %v3337_v40 = vmul.f32 1.442695, %v3336_v22 }
 0x88e   :  { %11377 = vpow2.f32 %v3331_v53 }
 0x88f   :  { %11379 = vpow2.f32 %v3337_v40 }
 0x890   :  { %11381 = vtanh.f32 %v11082_v52 }
 0x898   :  { %v11378_v1 = vpop.eup %11377 }
 0x899   :  { %v11380_v17 = vpop.eup %11379  ;;  %v3333_v3 = vadd.f32 1.0, %v11378_v1 }
 0x89a   :  { %v3339_v35 = vadd.f32 1.0, %v11380_v17  ;;  %v11382_v58 = vpop.eup %11381 }
 0x89b   :  { %11383 = vrcp.f32 %v3333_v3 }
 0x89c   :  { %11385 = vrcp.f32 %v3339_v35 }
 0x8a5   :  { %v11384_v8 = vpop.eup %11383 }
 0x8a6   :  { %v11386_v9 = vpop.eup %11385  ;;  %v3350_v30 = vmul.f32 %v11384_v8, %v11382_v58 }
 0x8a7   :  { %v3349_v49 = vmul.f32 %v11386_v9, %v12915_v31 }
 0x8a9   :  { %v13136_v51 = vadd.f32 %v3350_v30, %v3349_v49 }
 0x8af   :  { %v3567_v22 = vpop.f32.mrb[18].mxu0  ;;  %v3638_v39 = vpop.f32.mrb[22].mxu1 }
 0x8b0   :  { %v11084_v40 = vadd.f32 %v3567_v22, %v14921_v25  ;;  %v3569_v41 = vpop.f32.mrb[19].mxu0  ;;  %v3640_v37 = vpop.f32.mrb[23].mxu1  ;;  %v11086_v30 = vadd.f32 %v3638_v39, %v14924_v13 }
 0x8b1   :  { %v11085_v53 = vadd.f32 %v3569_v41, %v14922_v2  ;;  %v11087_v1 = vadd.f32 %v3640_v37, %v14923_v38 }
 0x8b2   :  { %v3647_v52 = vsub.f32 0.0, %v11084_v40 }
 0x8b3   :  { %v3653_v17 = vsub.f32 0.0, %v11085_v53  ;;  %v3660_v8 = vsub.f32 0.0, %v11087_v1 }
 0x8b4   :  { %v3648_v3 = vmul.f32 1.442695, %v3647_v52 }
 0x8b5   :  { %v3654_v35 = vmul.f32 1.442695, %v3653_v17  ;;  %v3661_v9 = vmul.f32 1.442695, %v3660_v8 }
 0x8b6   :  { %11387 = vpow2.f32 %v3648_v3  ;;  %v15065_v3 = vld [vmem:[#allocation159_spill] sm:$0xff] }
 0x8b7   :  { %11389 = vpow2.f32 %v3654_v35 }
 0x8b8   :  { %11391 = vpow2.f32 %v3661_v9 }
 0x8b9   :  { %11393 = vtanh.f32 %v11086_v30  ;;  %v15067_v30 = vld [vmem:[#allocation95_spill] sm:$0xff] }
 0x8c0   :  { %v11388_v31 = vpop.eup %11387 }
 0x8c1   :  { %v11390_v58 = vpop.eup %11389  ;;  %v3650_v49 = vadd.f32 1.0, %v11388_v31  ;;  %v15068_v31 = vld [vmem:[#allocation96_spill] sm:$0xff] }
 0x8c2   :  { %v3656_v22 = vadd.f32 1.0, %v11390_v58  ;;  %v11392_v40 = vpop.eup %11391  ;;  %v15069_v58 = vld [vmem:[#allocation97_spill] sm:$0xff] }
 0x8c3   :  { %11395 = vrcp.f32 %v3650_v49  ;;  %v11394_v41 = vpop.eup %11393  ;;  %v3663_v37 = vadd.f32 1.0, %v11392_v40  ;;  %v15070_v49 = vld [vmem:[#allocation98_spill] sm:$0xff]  ;;  %v15072_v40 = vld [vmem:[#allocation100_spill] sm:$0xff] }
 0x8c4   :  { %11397 = vrcp.f32 %v3656_v22  ;;  %v15071_v22 = vld [vmem:[#allocation99_spill] sm:$0xff] }
 0x8c5   :  { %11399 = vrcp.f32 %v3663_v37  ;;  %v15077_v37 = vld [vmem:[#allocation105_spill] sm:$0xff] }
 0x8cd   :  { %v11396_v53 = vpop.eup %11395 }
 0x8ce   :  { %v11398_v52 = vpop.eup %11397  ;;  %v3667_v17 = vmul.f32 %v11396_v53, %v11394_v41  ;;  %v15073_v41 = vld [vmem:[#allocation101_spill] sm:$0xff]  ;;  %v15074_v53 = vld [vmem:[#allocation102_spill] sm:$0xff] }
 0x8cf   :  { %v3666_v35 = vmul.f32 %v11398_v52, %v15065_v3  ;;  %v11400_v39 = vpop.eup %11399  ;;  %v15075_v52 = vld [vmem:[#allocation103_spill] sm:$0xff]  ;;  %v15078_v3 = vld [vmem:[#allocation106_spill] sm:$0xff] }
 0x8d1   :  { %v13143_v1 = vadd.f32 %v3667_v17, %v3666_v35  ;;  %v15076_v17 = vld [vmem:[#allocation104_spill] sm:$0xff]  ;;  %v15079_v35 = vld [vmem:[#allocation107_spill] sm:$0xff] }
 0x8d3   :  { %15066 = vst [vmem:[#allocation160_spill] sm:$0xff] %v13143_v1  ;;  %11401 = vtanh.f32 %v13143_v1 }
 0x8dd   :  { %v11402_v8 = vpop.eup %11401 }
 0x8de   :  { %v13146_v9 = vmul.f32 %v11402_v8, %v11400_v39  ;;  %v15080_v39 = vld [vmem:[#allocation108_spill] sm:$0xff]  ;;  %v15081_v8 = vld [vmem:[#allocation109_spill] sm:$0xff] }
 0x8e0   :  { %3736 = vmatmul.mubr.f32.vlgmr.msra.gmra.mrb[20].mxu0 %v13146_v9  ;;  %3807 = vmatmul.mubr.f32.vlgmr.msra.gmra.mrb[24].mxu1 %v13146_v9 }
 0x8e1   :  { %9484 = vmatpush1.bf16.msra.mxu0 %v15067_v30  ;;  %9516 = vmatpush1.bf16.msra.mxu1 %v15068_v31 }
 0x8e2   :  { %9486 = vmatprep.subr.bf16.mxu0 %v15069_v58  ;;  %9518 = vmatprep.subr.bf16.mxu1 %v15070_v49 }
 0x8e3   :  { %3877 = vmatprep.mubr.f32.mxu0 %v14654_v6  ;;  %3948 = vmatprep.mubr.f32.mxu1 %v14654_v6 }
 0x8e5   :  { %9488 = vmatpush1.bf16.msra.mxu0 %v15071_v22  ;;  %9520 = vmatpush1.bf16.msra.mxu1 %v15072_v40  ;;  %v15082_v22 = vld [vmem:[#allocation110_spill] sm:$0xff]  ;;  %v15083_v40 = vld [vmem:[#allocation111_spill] sm:$0xff] }
 0x8e6   :  { %9490 = vmatprep.subr.bf16.mxu0 %v15073_v41  ;;  %9522 = vmatprep.subr.bf16.mxu1 %v15074_v53  ;;  %v15084_v41 = vld [vmem:[#allocation112_spill] sm:$0xff]  ;;  %v15085_v53 = vld [vmem:[#allocation113_spill] sm:$0xff] }
 0x8e9   :  { %9492 = vmatpush1.bf16.msra.mxu0 %v15075_v52  ;;  %9524 = vmatpush1.bf16.msra.mxu1 %v15076_v17  ;;  %v15086_v52 = vld [vmem:[#allocation114_spill] sm:$0xff]  ;;  %v15087_v17 = vld [vmem:[#allocation115_spill] sm:$0xff] }
 0x8ea   :  { %9494 = vmatprep.subr.bf16.mxu0 %v15077_v37  ;;  %9526 = vmatprep.subr.bf16.mxu1 %v15078_v3  ;;  %v15088_v37 = vld [vmem:[#allocation116_spill] sm:$0xff]  ;;  %v15089_v3 = vld [vmem:[#allocation117_spill] sm:$0xff] }
 0x8ed   :  { %9496 = vmatpush1.bf16.msra.mxu0 %v15079_v35  ;;  %9528 = vmatpush1.bf16.msra.mxu1 %v15080_v39  ;;  %v15090_v35 = vld [vmem:[#allocation118_spill] sm:$0xff]  ;;  %v15091_v39 = vld [vmem:[#allocation119_spill] sm:$0xff] }
 0x8ee   :  { %9498 = vmatprep.subr.bf16.mxu0 %v15081_v8  ;;  %9530 = vmatprep.subr.bf16.mxu1 %v15082_v22  ;;  %v15092_v8 = vld [vmem:[#allocation120_spill] sm:$0xff]  ;;  %v15093_v22 = vld [vmem:[#allocation121_spill] sm:$0xff] }
 0x8f1   :  { %9500 = vmatpush1.bf16.msra.mxu0 %v15083_v40  ;;  %9532 = vmatpush1.bf16.msra.mxu1 %v15084_v41  ;;  %v15094_v40 = vld [vmem:[#allocation122_spill] sm:$0xff]  ;;  %v15095_v41 = vld [vmem:[#allocation123_spill] sm:$0xff] }
 0x8f2   :  { %9502 = vmatprep.subr.bf16.mxu0 %v15085_v53  ;;  %9534 = vmatprep.subr.bf16.mxu1 %v15086_v52  ;;  %v15096_v53 = vld [vmem:[#allocation124_spill] sm:$0xff]  ;;  %v15097_v52 = vld [vmem:[#allocation125_spill] sm:$0xff] }
 0x8f5   :  { %9504 = vmatpush1.bf16.msra.mxu0 %v15087_v17  ;;  %9536 = vmatpush1.bf16.msra.mxu1 %v15088_v37  ;;  %v15098_v17 = vld [vmem:[#allocation126_spill] sm:$0xff] }
 0x8f6   :  { %9506 = vmatprep.subr.bf16.mxu0 %v15089_v3  ;;  %9538 = vmatprep.subr.bf16.mxu1 %v15090_v35  ;;  %v15099_v35 = vld [vmem:[#allocation127_spill] sm:$0xff]  ;;  %v15113_v3 = vld [vmem:[#allocation141_spill] sm:$0xff] }
 0x8f9   :  { %9508 = vmatpush1.bf16.msra.mxu0 %v15091_v39  ;;  %9540 = vmatpush1.bf16.msra.mxu1 %v15092_v8  ;;  %v15100_v39 = vld [vmem:[#allocation128_spill] sm:$0xff]  ;;  %v15101_v8 = vld [vmem:[#allocation129_spill] sm:$0xff] }
 0x8fa   :  { %9510 = vmatprep.subr.bf16.mxu0 %v15093_v22  ;;  %9542 = vmatprep.subr.bf16.mxu1 %v15094_v40  ;;  %v15102_v22 = vld [vmem:[#allocation130_spill] sm:$0xff]  ;;  %v15112_v40 = vld [vmem:[#allocation140_spill] sm:$0xff] }
 0x8fd   :  { %9512 = vmatpush1.bf16.msra.mxu0 %v15095_v41  ;;  %9544 = vmatpush1.bf16.msra.mxu1 %v15096_v53  ;;  %v15103_v53 = vld [vmem:[#allocation131_spill] sm:$0xff]  ;;  %v15106_v41 = vld [vmem:[#allocation134_spill] sm:$0xff] }
 0x8fe   :  { %9546 = vmatprep.subr.bf16.mxu0 %v15097_v52  ;;  %9578 = vmatprep.subr.bf16.mxu1 %v15098_v17  ;;  %v15104_v52 = vld [vmem:[#allocation132_spill] sm:$0xff]  ;;  %v15105_v17 = vld [vmem:[#allocation133_spill] sm:$0xff] }
 0x900   :  { %3878 = vmatmul.mubr.f32.vlgmr.msra.gmra.mrb[20].mxu0 %v13009_v18  ;;  %3949 = vmatmul.mubr.f32.vlgmr.msra.gmra.mrb[24].mxu1 %v13009_v18  ;;  %v15107_v18 = vld [vmem:[#allocation135_spill] sm:$0xff] }
 0x901   :  { %9548 = vmatpush1.bf16.msra.mxu0 %v15099_v35  ;;  %9580 = vmatpush1.bf16.msra.mxu1 %v15100_v39  ;;  %v15108_v35 = vld [vmem:[#allocation136_spill] sm:$0xff]  ;;  %v15109_v39 = vld [vmem:[#allocation137_spill] sm:$0xff] }
 0x902   :  { %9550 = vmatprep.subr.bf16.mxu0 %v15101_v8  ;;  %9582 = vmatprep.subr.bf16.mxu1 %v15102_v22  ;;  %v15110_v8 = vld [vmem:[#allocation138_spill] sm:$0xff]  ;;  %v15111_v22 = vld [vmem:[#allocation139_spill] sm:$0xff] }
 0x903   :  { %4047 = vmatprep.mubr.f32.mxu0 %v14654_v6  ;;  %4118 = vmatprep.mubr.f32.mxu1 %v14654_v6 }
 0x905   :  { %9552 = vmatpush1.bf16.msra.mxu0 %v15103_v53  ;;  %9584 = vmatpush1.bf16.msra.mxu1 %v15104_v52  ;;  %v15114_v53 = vld [vmem:[#allocation142_spill] sm:$0xff]  ;;  %v15115_v52 = vld [vmem:[#allocation143_spill] sm:$0xff] }
 0x906   :  { %9554 = vmatprep.subr.bf16.mxu0 %v15105_v17  ;;  %9586 = vmatprep.subr.bf16.mxu1 %v15106_v41  ;;  %v15116_v17 = vld [vmem:[#allocation144_spill] sm:$0xff]  ;;  %v15117_v41 = vld [vmem:[#allocation145_spill] sm:$0xff] }
 0x909   :  { %9556 = vmatpush1.bf16.msra.mxu0 %v15107_v18  ;;  %9588 = vmatpush1.bf16.msra.mxu1 %v15108_v35  ;;  %v15118_v18 = vld [vmem:[#allocation146_spill] sm:$0xff]  ;;  %v15119_v35 = vld [vmem:[#allocation147_spill] sm:$0xff] }
 0x90a   :  { %9558 = vmatprep.subr.bf16.mxu0 %v15109_v39  ;;  %9590 = vmatprep.subr.bf16.mxu1 %v15110_v8  ;;  %v15120_v39 = vld [vmem:[#allocation148_spill] sm:$0xff]  ;;  %v15121_v8 = vld [vmem:[#allocation149_spill] sm:$0xff] }
 0x90d   :  { %9560 = vmatpush1.bf16.msra.mxu0 %v15111_v22  ;;  %9592 = vmatpush1.bf16.msra.mxu1 %v15112_v40  ;;  %v15122_v22 = vld [vmem:[#allocation150_spill] sm:$0xff]  ;;  %v15123_v40 = vld [vmem:[#allocation151_spill] sm:$0xff] }
 0x90e   :  { %9562 = vmatprep.subr.bf16.mxu0 %v15113_v3  ;;  %9594 = vmatprep.subr.bf16.mxu1 %v15114_v53  ;;  %v15124_v3 = vld [vmem:[#allocation152_spill] sm:$0xff]  ;;  %v15125_v53 = vld [vmem:[#allocation153_spill] sm:$0xff] }
 0x911   :  { %9564 = vmatpush1.bf16.msra.mxu0 %v15115_v52  ;;  %9596 = vmatpush1.bf16.msra.mxu1 %v15116_v17  ;;  %v15126_v52 = vld [vmem:[#allocation154_spill] sm:$0xff]  ;;  %v15127_v17 = vld [vmem:[#allocation155_spill] sm:$0xff] }
 0x912   :  { %9566 = vmatprep.subr.bf16.mxu0 %v15117_v41  ;;  %9598 = vmatprep.subr.bf16.mxu1 %v15118_v18  ;;  %v15128_v41 = vld [vmem:[#allocation156_spill] sm:$0xff]  ;;  %v15129_v18 = vld [vmem:[#allocation157_spill] sm:$0xff] }
 0x915   :  { %9568 = vmatpush1.bf16.msra.mxu0 %v15119_v35  ;;  %9600 = vmatpush1.bf16.msra.mxu1 %v15120_v39  ;;  %v15130_v35 = vld [vmem:[#allocation158_spill] sm:$0xff] }
 0x916   :  { %9570 = vmatprep.subr.bf16.mxu0 %v15121_v8  ;;  %9602 = vmatprep.subr.bf16.mxu1 %v15122_v22 }
 0x919   :  { %9572 = vmatpush1.bf16.msra.mxu0 %v15123_v40  ;;  %9604 = vmatpush1.bf16.msra.mxu1 %v15124_v3 }
 0x91a   :  { %9574 = vmatprep.subr.bf16.mxu0 %v15125_v53  ;;  %9606 = vmatprep.subr.bf16.mxu1 %v15126_v52 }
 0x91d   :  { %9576 = vmatpush1.bf16.msra.mxu0 %v15127_v17  ;;  %9608 = vmatpush1.bf16.msra.mxu1 %v15128_v41 }
 0x91e   :  { %9610 = vmatprep.subr.bf16.mxu0 %v15129_v18  ;;  %9642 = vmatprep.subr.bf16.mxu1 %v15130_v35 }
 0x9d3   :  { %v3879_v39 = vpop.f32.mrb[20].mxu0  ;;  %v3950_v8 = vpop.f32.mrb[24].mxu1 }
 0x9d4   :  { %v11088_v22 = vadd.f32 %v3879_v39, %v14846_v14  ;;  %v3881_v37 = vpop.f32.mrb[21].mxu0  ;;  %v3952_v40 = vpop.f32.mrb[25].mxu1  ;;  %v11090_v35 = vadd.f32 %v3950_v8, %v14849_v50 }
 0x9d5   :  { %v11089_v3 = vadd.f32 %v3881_v37, %v14847_v7  ;;  %v11091_v17 = vadd.f32 %v3952_v40, %v14848_v48 }
 0x9d6   :  { %v3959_v49 = vsub.f32 0.0, %v11088_v22 }
 0x9d7   :  { %v3965_v53 = vsub.f32 0.0, %v11089_v3  ;;  %v3972_v41 = vsub.f32 0.0, %v11091_v17 }
 0x9d8   :  { %v3960_v58 = vmul.f32 1.442695, %v3959_v49 }
 0x9d9   :  { %v3966_v52 = vmul.f32 1.442695, %v3965_v53  ;;  %v3973_v18 = vmul.f32 1.442695, %v3972_v41 }
 0x9da   :  { %11403 = vpow2.f32 %v3960_v58 }
 0x9db   :  { %11405 = vpow2.f32 %v3966_v52 }
 0x9dc   :  { %11407 = vpow2.f32 %v3973_v18 }
 0x9dd   :  { %11409 = vtanh.f32 %v11090_v35 }
 0x9e4   :  { %v11404_v31 = vpop.eup %11403 }
 0x9e5   :  { %v11406_v30 = vpop.eup %11405  ;;  %v3962_v1 = vadd.f32 1.0, %v11404_v31  ;;  %v11083_v31 = vadd.f32 %v13131_v19, %v12783_v46 }
 0x9e6   :  { %v3968_v39 = vadd.f32 1.0, %v11406_v30  ;;  %v11408_v22 = vpop.eup %11407 }
 0x9e7   :  { %11411 = vrcp.f32 %v3962_v1  ;;  %v11410_v37 = vpop.eup %11409  ;;  %v3975_v40 = vadd.f32 1.0, %v11408_v22  ;;  %v3343_v41 = vsub.f32 0.0, %v11083_v31  ;;  %v15131_v22 = vld [vmem:[#allocation23_spill] sm:$0xff]  ;;  %v4296_v31 = vld [vmem:[#allocation2 + $0x20] sm:$0xff] }
 0x9e8   :  { %11413 = vrcp.f32 %v3968_v39 }
 0x9e9   :  { %11415 = vrcp.f32 %v3975_v40  ;;  %v3344_v17 = vmul.f32 1.442695, %v3343_v41  ;;  %v15136_v40 = vld [vmem:[#allocation21_spill] sm:$0xff]  ;;  %v15138_v41 = vld [vmem:[#allocation16_spill] sm:$0xff] }
 0x9f1   :  { %v11412_v49 = vpop.eup %11411 }
 0x9f2   :  { %v11414_v53 = vpop.eup %11413  ;;  %v3979_v3 = vmul.f32 %v11412_v49, %v11410_v37  ;;  %v15132_v37 = vld [vmem:[#allocation17_spill] sm:$0xff] }
 0x9f3   :  { %v3978_v58 = vmul.f32 %v11414_v53, %v13004_v36  ;;  %v11416_v30 = vpop.eup %11415  ;;  %v15133_v49 = vld [vmem:[#allocation25_spill] sm:$0xff]  ;;  %v15134_v53 = vld [vmem:[#allocation19_spill] sm:$0xff] }
 0x9f5   :  { %v13225_v52 = vadd.f32 %v3979_v3, %v3978_v58  ;;  %v15135_v3 = vld [vmem:[#allocation27_spill] sm:$0xff]  ;;  %v15137_v58 = vld [vmem:[#allocation29_spill] sm:$0xff] }
 0x9f7   :  { %11417 = vtanh.f32 %v13225_v52 }
 0x9f8   :  { %11419 = vpow2.f32 %v3344_v17  ;;  %v15141_v17 = vld [vmem:[#allocation33_spill] sm:$0xff] }
 0x9f9   :  { %11421 = vtanh.f32 %v13136_v51 }
 0xa01   :  { %v11418_v1 = vpop.eup %11417 }
 0xa02   :  { %v13230_v35 = vmul.f32 %v11418_v1, %v11416_v30  ;;  %v11420_v36 = vpop.eup %11419  ;;  %v15139_v30 = vld [vmem:[#allocation31_spill] sm:$0xff]  ;;  %v15140_v1 = vld [vmem:[#allocation18_spill] sm:$0xff] }
 0xa03   :  { %v3346_v19 = vadd.f32 1.0, %v11420_v36  ;;  %v11422_v8 = vpop.eup %11421  ;;  %v15142_v36 = vld [vmem:[#allocation20_spill] sm:$0xff] }
 0xa04   :  { %4048 = vmatmul.mubr.f32.vlgmr.msra.gmra.mrb[22].mxu0 %v13230_v35  ;;  %4119 = vmatmul.mubr.f32.vlgmr.msra.gmra.mrb[26].mxu1 %v13230_v35 }
 0xa05   :  { %9612 = vmatpush1.bf16.msra.mxu0 %v14852_v24  ;;  %9644 = vmatpush1.bf16.msra.mxu1 %v14853_v32  ;;  %11423 = vrcp.f32 %v3346_v19  ;;  %v15143_v19 = vld [vmem:[#allocation35_spill] sm:$0xff] }
 0xa06   :  { %9614 = vmatprep.subr.bf16.mxu0 %v14854_v33  ;;  %9646 = vmatprep.subr.bf16.mxu1 %v14855_v28 }
 0xa07   :  { %4189 = vmatprep.mubr.f32.mxu0 %v14654_v6  ;;  %4260 = vmatprep.mubr.f32.mxu1 %v14654_v6 }
 0xa09   :  { %9616 = vmatpush1.bf16.msra.mxu0 %v14856_v61  ;;  %9648 = vmatpush1.bf16.msra.mxu1 %v14991_v57 }
 0xa0a   :  { %9618 = vmatprep.subr.bf16.mxu0 %v14992_v34  ;;  %9650 = vmatprep.subr.bf16.mxu1 %v14993_v44 }
 0xa0d   :  { %9620 = vmatpush1.bf16.msra.mxu0 %v14994_v26  ;;  %9652 = vmatpush1.bf16.msra.mxu1 %v14861_v56 }
 0xa0e   :  { %9622 = vmatprep.subr.bf16.mxu0 %v14862_v10  ;;  %9654 = vmatprep.subr.bf16.mxu1 %v14863_v45 }
 0xa0f   :  { %v11424_v18 = vpop.eup %11423 }
 0xa10   :  { %v3353_v39 = vmul.f32 %v11424_v18, %v11422_v8  ;;  %v15144_v8 = vld [vmem:[#allocation22_spill] sm:$0xff]  ;;  %v15145_v18 = vld [vmem:[#allocation37_spill] sm:$0xff] }
 0xa11   :  { %9624 = vmatpush1.bf16.msra.mxu0 %v14864_v11  ;;  %9656 = vmatpush1.bf16.msra.mxu1 %v14865_v23 }
 0xa12   :  { %9626 = vmatprep.subr.bf16.mxu0 %v14866_v16  ;;  %9658 = vmatprep.subr.bf16.mxu1 %v14867_v60 }
 0xa15   :  { %9628 = vmatpush1.bf16.msra.mxu0 %v14868_v20  ;;  %9660 = vmatpush1.bf16.msra.mxu1 %v14869_v0 }
 0xa16   :  { %9630 = vmatprep.subr.bf16.mxu0 %v14995_v55  ;;  %9662 = vmatprep.subr.bf16.mxu1 %v12546_v63 }
 0xa19   :  { %9632 = vmatpush1.bf16.msra.mxu0 %v12550_v27  ;;  %9664 = vmatpush1.bf16.msra.mxu1 %v12552_v5 }
 0xa1a   :  { %9634 = vmatprep.subr.bf16.mxu0 %v12556_v43  ;;  %9666 = vmatprep.subr.bf16.mxu1 %v12558_v29 }
 0xa1d   :  { %9636 = vmatpush1.bf16.msra.mxu0 %v12562_v62  ;;  %9668 = vmatpush1.bf16.msra.mxu1 %v12564_v15 }
 0xa1e   :  { %9638 = vmatprep.subr.bf16.mxu0 %v12568_v47  ;;  %9670 = vmatprep.subr.bf16.mxu1 %v12570_v42 }
 0xa21   :  { %9640 = vmatpush1.bf16.msra.mxu0 %v12574_v12  ;;  %9672 = vmatpush1.bf16.msra.mxu1 %v12576_v59 }
 0xa22   :  { %9674 = vmatprep.subr.bf16.mxu0 %v11956_v4  ;;  %9682 = vmatprep.subr.bf16.mxu1 %v15131_v22 }
 0xa24   :  { %4190 = vmatmul.mubr.f32.vlgmr.msra.gmra.mrb[22].mxu0 %v3353_v39  ;;  %4261 = vmatmul.mubr.f32.vlgmr.msra.gmra.mrb[26].mxu1 %v3353_v39  ;;  %v15146_v39 = vld [vmem:[#allocation24_spill] sm:$0xff] }
 0xa25   :  { %9676 = vmatpush1.bf16.msra.mxu0 %v15132_v37  ;;  %9684 = vmatpush1.bf16.msra.mxu1 %v15133_v49 }
 0xa26   :  { %9678 = vmatprep.subr.bf16.mxu0 %v15134_v53  ;;  %9686 = vmatprep.subr.bf16.mxu1 %v15135_v3 }
 0xa27   :  { %4364 = vmatprep.mubr.f32.mxu0 %v14654_v6  ;;  %4435 = vmatprep.mubr.f32.mxu1 %v14654_v6 }
 0xa29   :  { %9680 = vmatpush1.bf16.msra.mxu0 %v15136_v40  ;;  %9688 = vmatpush1.bf16.msra.mxu1 %v15137_v58  ;;  %v15154_v58 = vld [vmem:[#allocation32_spill] sm:$0xff] }
 0xa2a   :  { %9690 = vmatprep.subr.bf16.mxu0 %v15138_v41  ;;  %9722 = vmatprep.subr.bf16.mxu1 %v15139_v30  ;;  %v15147_v30 = vld [vmem:[#allocation39_spill] sm:$0xff]  ;;  %v15153_v41 = vld [vmem:[#allocation45_spill] sm:$0xff] }
 0xa2c   :  { %8256 = vmatmul.mubr.msk.f32.vlgmr.msra.gmra.mrb[24].mxu0 %vm490_vm0, %v4296_v31  ;;  %8257 = vmatmul.mubr.msk.f32.vlgmr.msra.gmra.mrb[28].mxu1 %vm490_vm0, %v4296_v31  ;;  %v15148_v31 = vld [vmem:[#allocation26_spill] sm:$0xff] }
 0xa2d   :  { %9692 = vmatpush1.bf16.msra.mxu0 %v15140_v1  ;;  %9724 = vmatpush1.bf16.msra.mxu1 %v15141_v17  ;;  %v15149_v1 = vld [vmem:[#allocation41_spill] sm:$0xff]  ;;  %v15150_v17 = vld [vmem:[#allocation28_spill] sm:$0xff] }
 0xa2e   :  { %9694 = vmatprep.subr.bf16.mxu0 %v15142_v36  ;;  %9726 = vmatprep.subr.bf16.mxu1 %v15143_v19  ;;  %v15151_v36 = vld [vmem:[#allocation43_spill] sm:$0xff]  ;;  %v15152_v19 = vld [vmem:[#allocation30_spill] sm:$0xff] }
 0xa2f   :  { %4506 = vmatprep.mubr.f32.mxu0 %v14654_v6  ;;  %4577 = vmatprep.mubr.f32.mxu1 %v14654_v6 }
 0xa31   :  { %9696 = vmatpush1.bf16.msra.mxu0 %v15144_v8  ;;  %9728 = vmatpush1.bf16.msra.mxu1 %v15145_v18  ;;  %v15155_v8 = vld [vmem:[#allocation47_spill] sm:$0xff]  ;;  %v15156_v18 = vld [vmem:[#allocation34_spill] sm:$0xff] }
 0xa32   :  { %9698 = vmatprep.subr.bf16.mxu0 %v15146_v39  ;;  %9730 = vmatprep.subr.bf16.mxu1 %v15147_v30  ;;  %v15157_v39 = vld [vmem:[#allocation48_spill] sm:$0xff] }
 0xa33   :  { %v15158_v30 = vld [vmem:[#allocation36_spill] sm:$0xff] }
 0xa35   :  { %9700 = vmatpush1.bf16.msra.mxu0 %v15148_v31  ;;  %9732 = vmatpush1.bf16.msra.mxu1 %v15149_v1  ;;  %v15159_v31 = vld [vmem:[#allocation49_spill] sm:$0xff]  ;;  %v15160_v1 = vld [vmem:[#allocation38_spill] sm:$0xff] }
 0xa36   :  { %9702 = vmatprep.subr.bf16.mxu0 %v15150_v17  ;;  %9734 = vmatprep.subr.bf16.mxu1 %v15151_v36  ;;  %v15161_v17 = vld [vmem:[#allocation50_spill] sm:$0xff]  ;;  %v15162_v36 = vld [vmem:[#allocation40_spill] sm:$0xff] }
 0xa39   :  { %9704 = vmatpush1.bf16.msra.mxu0 %v15152_v19  ;;  %9736 = vmatpush1.bf16.msra.mxu1 %v15153_v41  ;;  %v15163_v19 = vld [vmem:[#allocation51_spill] sm:$0xff]  ;;  %v15164_v41 = vld [vmem:[#allocation42_spill] sm:$0xff] }
 0xa3a   :  { %9706 = vmatprep.subr.bf16.mxu0 %v15154_v58  ;;  %9738 = vmatprep.subr.bf16.mxu1 %v15155_v8  ;;  %v15165_v58 = vld [vmem:[#allocation52_spill] sm:$0xff] }
 0xa3b   :  { %v15166_v8 = vld [vmem:[#allocation44_spill] sm:$0xff] }
 0xa3d   :  { %9708 = vmatpush1.bf16.msra.mxu0 %v15156_v18  ;;  %9740 = vmatpush1.bf16.msra.mxu1 %v15157_v39  ;;  %v15167_v18 = vld [vmem:[#allocation53_spill] sm:$0xff]  ;;  %v15168_v39 = vld [vmem:[#allocation46_spill] sm:$0xff] }
 0xa3e   :  { %9710 = vmatprep.subr.bf16.mxu0 %v15158_v30  ;;  %9742 = vmatprep.subr.bf16.mxu1 %v15159_v31  ;;  %v15169_v30 = vld [vmem:[#allocation54_spill] sm:$0xff]  ;;  %v15170_v31 = vld [vmem:[#allocation55_spill] sm:$0xff] }
 0xa41   :  { %9712 = vmatpush1.bf16.msra.mxu0 %v15160_v1  ;;  %9744 = vmatpush1.bf16.msra.mxu1 %v15161_v17  ;;  %v15171_v1 = vld [vmem:[#allocation56_spill] sm:$0xff]  ;;  %v15204_v17 = vld [vmem:[#allocation183_spill] sm:$0xff] }
 0xa42   :  { %9714 = vmatprep.subr.bf16.mxu0 %v15162_v36  ;;  %9746 = vmatprep.subr.bf16.mxu1 %v15163_v19  ;;  %v15172_v19 = vld [vmem:[#allocation57_spill] sm:$0xff]  ;;  %v15186_v36 = vld [vmem:[#allocation71_spill] sm:$0xff] }
 0xa45   :  { %9716 = vmatpush1.bf16.msra.mxu0 %v15164_v41  ;;  %9748 = vmatpush1.bf16.msra.mxu1 %v15165_v58  ;;  %v15173_v41 = vld [vmem:[#allocation58_spill] sm:$0xff]  ;;  %v15174_v58 = vld [vmem:[#allocation59_spill] sm:$0xff] }
 0xa46   :  { %9718 = vmatprep.subr.bf16.mxu0 %v15166_v8  ;;  %9750 = vmatprep.subr.bf16.mxu1 %v15167_v18  ;;  %v15175_v8 = vld [vmem:[#allocation60_spill] sm:$0xff]  ;;  %v15185_v18 = vld [vmem:[#allocation70_spill] sm:$0xff] }
 0xa49   :  { %9720 = vmatpush1.bf16.msra.mxu0 %v15168_v39  ;;  %9752 = vmatpush1.bf16.msra.mxu1 %v15169_v30  ;;  %v15176_v30 = vld [vmem:[#allocation61_spill] sm:$0xff]  ;;  %v15179_v39 = vld [vmem:[#allocation64_spill] sm:$0xff] }
 0xa4a   :  { %9754 = vmatprep.subr.bf16.mxu0 %v15170_v31  ;;  %9786 = vmatprep.subr.bf16.mxu1 %v15171_v1  ;;  %v15177_v31 = vld [vmem:[#allocation62_spill] sm:$0xff]  ;;  %v15178_v1 = vld [vmem:[#allocation63_spill] sm:$0xff] }
 0xa4c   :  { %4507 = vmatmul.mubr.f32.vlgmr.msra.gmra.mrb[24].mxu0 %v13146_v9  ;;  %4578 = vmatmul.mubr.f32.vlgmr.msra.gmra.mrb[28].mxu1 %v13146_v9  ;;  %v15180_v9 = vld [vmem:[#allocation65_spill] sm:$0xff] }
 0xa4d   :  { %9756 = vmatpush1.bf16.msra.mxu0 %v15172_v19  ;;  %9788 = vmatpush1.bf16.msra.mxu1 %v15173_v41  ;;  %v15181_v19 = vld [vmem:[#allocation66_spill] sm:$0xff]  ;;  %v15182_v41 = vld [vmem:[#allocation67_spill] sm:$0xff] }
 0xa4e   :  { %9758 = vmatprep.subr.bf16.mxu0 %v15174_v58  ;;  %9790 = vmatprep.subr.bf16.mxu1 %v15175_v8  ;;  %v15183_v58 = vld [vmem:[#allocation68_spill] sm:$0xff]  ;;  %v15184_v8 = vld [vmem:[#allocation69_spill] sm:$0xff] }
 0xa4f   :  { %4676 = vmatprep.mubr.f32.mxu0 %v14654_v6  ;;  %4747 = vmatprep.mubr.f32.mxu1 %v14654_v6 }
 0xa51   :  { %9760 = vmatpush1.bf16.msra.mxu0 %v15176_v30  ;;  %9792 = vmatpush1.bf16.msra.mxu1 %v15177_v31  ;;  %v15187_v30 = vld [vmem:[#allocation72_spill] sm:$0xff]  ;;  %v15188_v31 = vld [vmem:[#allocation73_spill] sm:$0xff] }
 0xa52   :  { %9762 = vmatprep.subr.bf16.mxu0 %v15178_v1  ;;  %9794 = vmatprep.subr.bf16.mxu1 %v15179_v39  ;;  %v15189_v1 = vld [vmem:[#allocation74_spill] sm:$0xff]  ;;  %v15190_v39 = vld [vmem:[#allocation75_spill] sm:$0xff] }
 0xa55   :  { %9764 = vmatpush1.bf16.msra.mxu0 %v15180_v9  ;;  %9796 = vmatpush1.bf16.msra.mxu1 %v15181_v19  ;;  %v15191_v9 = vld [vmem:[#allocation76_spill] sm:$0xff]  ;;  %v15192_v19 = vld [vmem:[#allocation77_spill] sm:$0xff] }
 0xa56   :  { %9766 = vmatprep.subr.bf16.mxu0 %v15182_v41  ;;  %9798 = vmatprep.subr.bf16.mxu1 %v15183_v58  ;;  %v15193_v41 = vld [vmem:[#allocation78_spill] sm:$0xff]  ;;  %v15194_v58 = vld [vmem:[#allocation79_spill] sm:$0xff] }
 0xa59   :  { %9768 = vmatpush1.bf16.msra.mxu0 %v15184_v8  ;;  %9800 = vmatpush1.bf16.msra.mxu1 %v15185_v18  ;;  %v15195_v8 = vld [vmem:[#allocation80_spill] sm:$0xff]  ;;  %v15196_v18 = vld [vmem:[#allocation81_spill] sm:$0xff] }
 0xa5a   :  { %9770 = vmatprep.subr.bf16.mxu0 %v15186_v36  ;;  %9802 = vmatprep.subr.bf16.mxu1 %v15187_v30  ;;  %v15197_v36 = vld [vmem:[#allocation82_spill] sm:$0xff]  ;;  %v15198_v30 = vld [vmem:[#allocation83_spill] sm:$0xff] }
 0xa5d   :  { %9772 = vmatpush1.bf16.msra.mxu0 %v15188_v31  ;;  %9804 = vmatpush1.bf16.msra.mxu1 %v15189_v1  ;;  %v15199_v31 = vld [vmem:[#allocation84_spill] sm:$0xff]  ;;  %v15200_v1 = vld [vmem:[#allocation85_spill] sm:$0xff] }
 0xa5e   :  { %9774 = vmatprep.subr.bf16.mxu0 %v15190_v39  ;;  %9806 = vmatprep.subr.bf16.mxu1 %v15191_v9  ;;  %v15201_v39 = vld [vmem:[#allocation86_spill] sm:$0xff]  ;;  %v15202_v9 = vld [vmem:[#allocation87_spill] sm:$0xff] }
 0xa61   :  { %9776 = vmatpush1.bf16.msra.mxu0 %v15192_v19  ;;  %9808 = vmatpush1.bf16.msra.mxu1 %v15193_v41  ;;  %v15203_v19 = vld [vmem:[#allocation88_spill] sm:$0xff] }
 0xa62   :  { %9778 = vmatprep.subr.bf16.mxu0 %v15194_v58  ;;  %9810 = vmatprep.subr.bf16.mxu1 %v15195_v8 }
 0xa65   :  { %9780 = vmatpush1.bf16.msra.mxu0 %v15196_v18  ;;  %9812 = vmatpush1.bf16.msra.mxu1 %v15197_v36 }
 0xa66   :  { %9782 = vmatprep.subr.bf16.mxu0 %v15198_v30  ;;  %9814 = vmatprep.subr.bf16.mxu1 %v15199_v31 }
 0xa69   :  { %9784 = vmatpush1.bf16.msra.mxu0 %v15200_v1  ;;  %9816 = vmatpush1.bf16.msra.mxu1 %v15201_v39 }
 0xa6a   :  { %9818 = vmatprep.subr.bf16.mxu0 %v15202_v9  ;;  %9850 = vmatprep.subr.bf16.mxu1 %v15203_v19 }
 0xaf7   :  { %v4191_v41 = vpop.f32.mrb[22].mxu0  ;;  %v4262_v58 = vpop.f32.mrb[26].mxu1 }
 0xaf8   :  { %v11092_v8 = vadd.f32 %v4191_v41, %v15204_v17  ;;  %v4193_v40 = vpop.f32.mrb[23].mxu0  ;;  %v13352_v18 = vpop.f32.mrb[27].mxu1  ;;  %v11094_v39 = vadd.f32 %v4262_v58, %v15064_v21 }
 0xaf9   :  { %v11093_v36 = vadd.f32 %v4193_v40, %v15063_v54 }
 0xafa   :  { %v4271_v30 = vsub.f32 0.0, %v11092_v8 }
 0xafb   :  { %v4277_v3 = vsub.f32 0.0, %v11093_v36 }
 0xafc   :  { %v4272_v31 = vmul.f32 1.442695, %v4271_v30 }
 0xafd   :  { %v4278_v53 = vmul.f32 1.442695, %v4277_v3 }
 0xafe   :  { %11425 = vpow2.f32 %v4272_v31 }
 0xaff   :  { %11427 = vpow2.f32 %v4278_v53 }
 0xb00   :  { %11429 = vtanh.f32 %v11094_v39 }
 0xb08   :  { %v11426_v9 = vpop.eup %11425 }
 0xb09   :  { %v11428_v1 = vpop.eup %11427  ;;  %v4274_v19 = vadd.f32 1.0, %v11426_v9 }
 0xb0a   :  { %v4280_v49 = vadd.f32 1.0, %v11428_v1  ;;  %v11430_v41 = vpop.eup %11429 }
 0xb0b   :  { %11431 = vrcp.f32 %v4274_v19 }
 0xb0c   :  { %11433 = vrcp.f32 %v4280_v49 }
 0xb15   :  { %v11432_v17 = vpop.eup %11431 }
 0xb16   :  { %v11434_v37 = vpop.eup %11433  ;;  %v4291_v22 = vmul.f32 %v11432_v17, %v11430_v41 }
 0xb17   :  { %v4290_v40 = vmul.f32 %v11434_v37, %v13136_v51 }
 0xb19   :  { %v13357_v36 = vadd.f32 %v4291_v22, %v4290_v40 }
 0xb1f   :  { %v4508_v3 = vpop.f32.mrb[24].mxu0  ;;  %v4579_v30 = vpop.f32.mrb[28].mxu1 }
 0xb20   :  { %v11096_v53 = vadd.f32 %v4508_v3, %v14921_v25  ;;  %v4510_v58 = vpop.f32.mrb[25].mxu0  ;;  %v4581_v8 = vpop.f32.mrb[29].mxu1  ;;  %v11098_v22 = vadd.f32 %v4579_v30, %v14924_v13 }
 0xb21   :  { %v11097_v31 = vadd.f32 %v4510_v58, %v14922_v2  ;;  %v11099_v9 = vadd.f32 %v4581_v8, %v14923_v38 }
 0xb22   :  { %v4588_v39 = vsub.f32 0.0, %v11096_v53 }
 0xb23   :  { %v4594_v1 = vsub.f32 0.0, %v11097_v31  ;;  %v4601_v17 = vsub.f32 0.0, %v11099_v9 }
 0xb24   :  { %v4589_v19 = vmul.f32 1.442695, %v4588_v39 }
 0xb25   :  { %v4595_v49 = vmul.f32 1.442695, %v4594_v1  ;;  %v4602_v51 = vmul.f32 1.442695, %v4601_v17 }
 0xb26   :  { %11435 = vpow2.f32 %v4589_v19  ;;  %v15205_v19 = vld [vmem:[#allocation160_spill] sm:$0xff] }
 0xb27   :  { %11437 = vpow2.f32 %v4595_v49 }
 0xb28   :  { %11439 = vpow2.f32 %v4602_v51 }
 0xb29   :  { %11441 = vtanh.f32 %v11098_v22  ;;  %v15207_v22 = vld [vmem:[#allocation95_spill] sm:$0xff] }
 0xb30   :  { %v11436_v37 = vpop.eup %11435 }
 0xb31   :  { %v11438_v41 = vpop.eup %11437  ;;  %v4591_v40 = vadd.f32 1.0, %v11436_v37  ;;  %v15208_v37 = vld [vmem:[#allocation96_spill] sm:$0xff] }
 0xb32   :  { %v4597_v3 = vadd.f32 1.0, %v11438_v41  ;;  %v11440_v53 = vpop.eup %11439  ;;  %v15209_v41 = vld [vmem:[#allocation97_spill] sm:$0xff] }
 0xb33   :  { %11443 = vrcp.f32 %v4591_v40  ;;  %v11442_v58 = vpop.eup %11441  ;;  %v4604_v8 = vadd.f32 1.0, %v11440_v53  ;;  %v15210_v40 = vld [vmem:[#allocation98_spill] sm:$0xff]  ;;  %v15212_v53 = vld [vmem:[#allocation100_spill] sm:$0xff] }
 0xb34   :  { %11445 = vrcp.f32 %v4597_v3  ;;  %v15211_v3 = vld [vmem:[#allocation99_spill] sm:$0xff] }
 0xb35   :  { %11447 = vrcp.f32 %v4604_v8  ;;  %v15217_v8 = vld [vmem:[#allocation105_spill] sm:$0xff] }
 0xb3d   :  { %v11444_v31 = vpop.eup %11443 }
 0xb3e   :  { %v11446_v39 = vpop.eup %11445  ;;  %v4608_v1 = vmul.f32 %v11444_v31, %v11442_v58  ;;  %v15213_v58 = vld [vmem:[#allocation101_spill] sm:$0xff]  ;;  %v15214_v31 = vld [vmem:[#allocation102_spill] sm:$0xff] }
 0xb3f   :  { %v4607_v49 = vmul.f32 %v11446_v39, %v15205_v19  ;;  %v11448_v30 = vpop.eup %11447  ;;  %v15215_v39 = vld [vmem:[#allocation103_spill] sm:$0xff]  ;;  %v15218_v19 = vld [vmem:[#allocation106_spill] sm:$0xff] }
 0xb41   :  { %v13364_v9 = vadd.f32 %v4608_v1, %v4607_v49  ;;  %v15216_v1 = vld [vmem:[#allocation104_spill] sm:$0xff]  ;;  %v15219_v49 = vld [vmem:[#allocation107_spill] sm:$0xff] }
 0xb43   :  { %15206 = vst [vmem:[#allocation161_spill] sm:$0xff] %v13364_v9  ;;  %11449 = vtanh.f32 %v13364_v9 }
 0xb4d   :  { %v11450_v17 = vpop.eup %11449 }
 0xb4e   :  { %v13367_v51 = vmul.f32 %v11450_v17, %v11448_v30  ;;  %v15220_v30 = vld [vmem:[#allocation108_spill] sm:$0xff]  ;;  %v15221_v17 = vld [vmem:[#allocation109_spill] sm:$0xff] }
 0xb50   :  { %4677 = vmatmul.mubr.f32.vlgmr.msra.gmra.mrb[26].mxu0 %v13367_v51  ;;  %4748 = vmatmul.mubr.f32.vlgmr.msra.gmra.mrb[30].mxu1 %v13367_v51 }
 0xb51   :  { %9820 = vmatpush1.bf16.msra.mxu0 %v15207_v22  ;;  %9852 = vmatpush1.bf16.msra.mxu1 %v15208_v37 }
 0xb52   :  { %9822 = vmatprep.subr.bf16.mxu0 %v15209_v41  ;;  %9854 = vmatprep.subr.bf16.mxu1 %v15210_v40 }
 0xb53   :  { %4818 = vmatprep.mubr.f32.mxu0 %v14654_v6  ;;  %4889 = vmatprep.mubr.f32.mxu1 %v14654_v6 }
 0xb55   :  { %9824 = vmatpush1.bf16.msra.mxu0 %v15211_v3  ;;  %9856 = vmatpush1.bf16.msra.mxu1 %v15212_v53  ;;  %v15222_v3 = vld [vmem:[#allocation110_spill] sm:$0xff]  ;;  %v15223_v53 = vld [vmem:[#allocation111_spill] sm:$0xff] }
 0xb56   :  { %9826 = vmatprep.subr.bf16.mxu0 %v15213_v58  ;;  %9858 = vmatprep.subr.bf16.mxu1 %v15214_v31  ;;  %v15224_v58 = vld [vmem:[#allocation112_spill] sm:$0xff]  ;;  %v15225_v31 = vld [vmem:[#allocation113_spill] sm:$0xff] }
 0xb59   :  { %9828 = vmatpush1.bf16.msra.mxu0 %v15215_v39  ;;  %9860 = vmatpush1.bf16.msra.mxu1 %v15216_v1  ;;  %v15226_v39 = vld [vmem:[#allocation114_spill] sm:$0xff]  ;;  %v15227_v1 = vld [vmem:[#allocation115_spill] sm:$0xff] }
 0xb5a   :  { %9830 = vmatprep.subr.bf16.mxu0 %v15217_v8  ;;  %9862 = vmatprep.subr.bf16.mxu1 %v15218_v19  ;;  %v15228_v8 = vld [vmem:[#allocation116_spill] sm:$0xff]  ;;  %v15229_v19 = vld [vmem:[#allocation117_spill] sm:$0xff] }
 0xb5d   :  { %9832 = vmatpush1.bf16.msra.mxu0 %v15219_v49  ;;  %9864 = vmatpush1.bf16.msra.mxu1 %v15220_v30  ;;  %v15230_v49 = vld [vmem:[#allocation118_spill] sm:$0xff]  ;;  %v15231_v30 = vld [vmem:[#allocation119_spill] sm:$0xff] }
 0xb5e   :  { %9834 = vmatprep.subr.bf16.mxu0 %v15221_v17  ;;  %9866 = vmatprep.subr.bf16.mxu1 %v15222_v3  ;;  %v15232_v17 = vld [vmem:[#allocation120_spill] sm:$0xff]  ;;  %v15233_v3 = vld [vmem:[#allocation121_spill] sm:$0xff] }
 0xb61   :  { %9836 = vmatpush1.bf16.msra.mxu0 %v15223_v53  ;;  %9868 = vmatpush1.bf16.msra.mxu1 %v15224_v58  ;;  %v15234_v53 = vld [vmem:[#allocation122_spill] sm:$0xff]  ;;  %v15235_v58 = vld [vmem:[#allocation123_spill] sm:$0xff] }
 0xb62   :  { %9838 = vmatprep.subr.bf16.mxu0 %v15225_v31  ;;  %9870 = vmatprep.subr.bf16.mxu1 %v15226_v39  ;;  %v15236_v31 = vld [vmem:[#allocation124_spill] sm:$0xff]  ;;  %v15237_v39 = vld [vmem:[#allocation125_spill] sm:$0xff] }
 0xb65   :  { %9840 = vmatpush1.bf16.msra.mxu0 %v15227_v1  ;;  %9872 = vmatpush1.bf16.msra.mxu1 %v15228_v8  ;;  %v15238_v1 = vld [vmem:[#allocation126_spill] sm:$0xff] }
 0xb66   :  { %9842 = vmatprep.subr.bf16.mxu0 %v15229_v19  ;;  %9874 = vmatprep.subr.bf16.mxu1 %v15230_v49  ;;  %v15239_v49 = vld [vmem:[#allocation127_spill] sm:$0xff]  ;;  %v15253_v19 = vld [vmem:[#allocation141_spill] sm:$0xff] }
 0xb69   :  { %9844 = vmatpush1.bf16.msra.mxu0 %v15231_v30  ;;  %9876 = vmatpush1.bf16.msra.mxu1 %v15232_v17  ;;  %v15240_v30 = vld [vmem:[#allocation128_spill] sm:$0xff]  ;;  %v15241_v17 = vld [vmem:[#allocation129_spill] sm:$0xff] }
 0xb6a   :  { %9846 = vmatprep.subr.bf16.mxu0 %v15233_v3  ;;  %9878 = vmatprep.subr.bf16.mxu1 %v15234_v53  ;;  %v15242_v3 = vld [vmem:[#allocation130_spill] sm:$0xff]  ;;  %v15252_v53 = vld [vmem:[#allocation140_spill] sm:$0xff] }
 0xb6d   :  { %9848 = vmatpush1.bf16.msra.mxu0 %v15235_v58  ;;  %9880 = vmatpush1.bf16.msra.mxu1 %v15236_v31  ;;  %v15243_v31 = vld [vmem:[#allocation131_spill] sm:$0xff]  ;;  %v15246_v58 = vld [vmem:[#allocation134_spill] sm:$0xff] }
 0xb6e   :  { %9882 = vmatprep.subr.bf16.mxu0 %v15237_v39  ;;  %9914 = vmatprep.subr.bf16.mxu1 %v15238_v1  ;;  %v15244_v39 = vld [vmem:[#allocation132_spill] sm:$0xff]  ;;  %v15245_v1 = vld [vmem:[#allocation133_spill] sm:$0xff] }
 0xb70   :  { %4819 = vmatmul.mubr.f32.vlgmr.msra.gmra.mrb[26].mxu0 %v13230_v35  ;;  %4890 = vmatmul.mubr.f32.vlgmr.msra.gmra.mrb[30].mxu1 %v13230_v35  ;;  %v15247_v35 = vld [vmem:[#allocation135_spill] sm:$0xff] }
 0xb71   :  { %9884 = vmatpush1.bf16.msra.mxu0 %v15239_v49  ;;  %9916 = vmatpush1.bf16.msra.mxu1 %v15240_v30  ;;  %v15248_v49 = vld [vmem:[#allocation136_spill] sm:$0xff]  ;;  %v15249_v30 = vld [vmem:[#allocation137_spill] sm:$0xff] }
 0xb72   :  { %9886 = vmatprep.subr.bf16.mxu0 %v15241_v17  ;;  %9918 = vmatprep.subr.bf16.mxu1 %v15242_v3  ;;  %v15250_v17 = vld [vmem:[#allocation138_spill] sm:$0xff]  ;;  %v15251_v3 = vld [vmem:[#allocation139_spill] sm:$0xff] }
 0xb73   :  { %4988 = vmatprep.mubr.f32.mxu0 %v14654_v6  ;;  %5059 = vmatprep.mubr.f32.mxu1 %v14654_v6 }
 0xb75   :  { %9888 = vmatpush1.bf16.msra.mxu0 %v15243_v31  ;;  %9920 = vmatpush1.bf16.msra.mxu1 %v15244_v39  ;;  %v15254_v31 = vld [vmem:[#allocation142_spill] sm:$0xff]  ;;  %v15255_v39 = vld [vmem:[#allocation143_spill] sm:$0xff] }
 0xb76   :  { %9890 = vmatprep.subr.bf16.mxu0 %v15245_v1  ;;  %9922 = vmatprep.subr.bf16.mxu1 %v15246_v58  ;;  %v15256_v1 = vld [vmem:[#allocation144_spill] sm:$0xff]  ;;  %v15257_v58 = vld [vmem:[#allocation145_spill] sm:$0xff] }
 0xb79   :  { %9892 = vmatpush1.bf16.msra.mxu0 %v15247_v35  ;;  %9924 = vmatpush1.bf16.msra.mxu1 %v15248_v49  ;;  %v15258_v35 = vld [vmem:[#allocation146_spill] sm:$0xff]  ;;  %v15259_v49 = vld [vmem:[#allocation147_spill] sm:$0xff] }
 0xb7a   :  { %9894 = vmatprep.subr.bf16.mxu0 %v15249_v30  ;;  %9926 = vmatprep.subr.bf16.mxu1 %v15250_v17  ;;  %v15260_v30 = vld [vmem:[#allocation148_spill] sm:$0xff]  ;;  %v15261_v17 = vld [vmem:[#allocation149_spill] sm:$0xff] }
 0xb7d   :  { %9896 = vmatpush1.bf16.msra.mxu0 %v15251_v3  ;;  %9928 = vmatpush1.bf16.msra.mxu1 %v15252_v53  ;;  %v15262_v3 = vld [vmem:[#allocation150_spill] sm:$0xff]  ;;  %v15263_v53 = vld [vmem:[#allocation151_spill] sm:$0xff] }
 0xb7e   :  { %9898 = vmatprep.subr.bf16.mxu0 %v15253_v19  ;;  %9930 = vmatprep.subr.bf16.mxu1 %v15254_v31  ;;  %v15264_v19 = vld [vmem:[#allocation152_spill] sm:$0xff]  ;;  %v15265_v31 = vld [vmem:[#allocation153_spill] sm:$0xff] }
 0xb81   :  { %9900 = vmatpush1.bf16.msra.mxu0 %v15255_v39  ;;  %9932 = vmatpush1.bf16.msra.mxu1 %v15256_v1  ;;  %v15266_v39 = vld [vmem:[#allocation154_spill] sm:$0xff]  ;;  %v15267_v1 = vld [vmem:[#allocation155_spill] sm:$0xff] }
 0xb82   :  { %9902 = vmatprep.subr.bf16.mxu0 %v15257_v58  ;;  %9934 = vmatprep.subr.bf16.mxu1 %v15258_v35  ;;  %v15268_v58 = vld [vmem:[#allocation156_spill] sm:$0xff]  ;;  %v15269_v35 = vld [vmem:[#allocation157_spill] sm:$0xff] }
 0xb85   :  { %9904 = vmatpush1.bf16.msra.mxu0 %v15259_v49  ;;  %9936 = vmatpush1.bf16.msra.mxu1 %v15260_v30  ;;  %v15270_v49 = vld [vmem:[#allocation158_spill] sm:$0xff] }
 0xb86   :  { %9906 = vmatprep.subr.bf16.mxu0 %v15261_v17  ;;  %9938 = vmatprep.subr.bf16.mxu1 %v15262_v3 }
 0xb89   :  { %9908 = vmatpush1.bf16.msra.mxu0 %v15263_v53  ;;  %9940 = vmatpush1.bf16.msra.mxu1 %v15264_v19 }
 0xb8a   :  { %9910 = vmatprep.subr.bf16.mxu0 %v15265_v31  ;;  %9942 = vmatprep.subr.bf16.mxu1 %v15266_v39 }
 0xb8d   :  { %9912 = vmatpush1.bf16.msra.mxu0 %v15267_v1  ;;  %9944 = vmatpush1.bf16.msra.mxu1 %v15268_v58 }
 0xb8e   :  { %9946 = vmatprep.subr.bf16.mxu0 %v15269_v35  ;;  %9978 = vmatprep.subr.bf16.mxu1 %v15270_v49 }
 0xc43   :  { %v4820_v30 = vpop.f32.mrb[26].mxu0  ;;  %v4891_v17 = vpop.f32.mrb[30].mxu1 }
 0xc44   :  { %v11100_v3 = vadd.f32 %v4820_v30, %v14846_v14  ;;  %v4822_v8 = vpop.f32.mrb[27].mxu0  ;;  %v4893_v53 = vpop.f32.mrb[31].mxu1  ;;  %v11102_v49 = vadd.f32 %v4891_v17, %v14849_v50 }
 0xc45   :  { %v11101_v19 = vadd.f32 %v4822_v8, %v14847_v7  ;;  %v11103_v1 = vadd.f32 %v4893_v53, %v14848_v48 }
 0xc46   :  { %v4900_v40 = vsub.f32 0.0, %v11100_v3 }
 0xc47   :  { %v4906_v31 = vsub.f32 0.0, %v11101_v19  ;;  %v4913_v58 = vsub.f32 0.0, %v11103_v1 }
 0xc48   :  { %v4901_v41 = vmul.f32 1.442695, %v4900_v40 }
 0xc49   :  { %v4907_v39 = vmul.f32 1.442695, %v4906_v31  ;;  %v4914_v35 = vmul.f32 1.442695, %v4913_v58 }
 0xc4a   :  { %11451 = vpow2.f32 %v4901_v41 }
 0xc4b   :  { %11453 = vpow2.f32 %v4907_v39 }
 0xc4c   :  { %11455 = vpow2.f32 %v4914_v35 }
 0xc4d   :  { %11457 = vtanh.f32 %v11102_v49 }
 0xc54   :  { %v11452_v37 = vpop.eup %11451 }
 0xc55   :  { %v11454_v22 = vpop.eup %11453  ;;  %v4903_v9 = vadd.f32 1.0, %v11452_v37  ;;  %v11095_v37 = vadd.f32 %v13352_v18, %v12783_v46 }
 0xc56   :  { %v4909_v30 = vadd.f32 1.0, %v11454_v22  ;;  %v11456_v3 = vpop.eup %11455 }
 0xc57   :  { %11459 = vrcp.f32 %v4903_v9  ;;  %v11458_v8 = vpop.eup %11457  ;;  %v4916_v53 = vadd.f32 1.0, %v11456_v3  ;;  %v4284_v58 = vsub.f32 0.0, %v11095_v37  ;;  %v15271_v3 = vld [vmem:[#allocation23_spill] sm:$0xff]  ;;  %v5237_v37 = vld [vmem:[#allocation2 + $0x28] sm:$0xff] }
 0xc58   :  { %11461 = vrcp.f32 %v4909_v30 }
 0xc59   :  { %11463 = vrcp.f32 %v4916_v53  ;;  %v4285_v1 = vmul.f32 1.442695, %v4284_v58  ;;  %v15276_v53 = vld [vmem:[#allocation21_spill] sm:$0xff]  ;;  %v15278_v58 = vld [vmem:[#allocation16_spill] sm:$0xff] }
 0xc61   :  { %v11460_v40 = vpop.eup %11459 }
 0xc62   :  { %v11462_v31 = vpop.eup %11461  ;;  %v4920_v19 = vmul.f32 %v11460_v40, %v11458_v8  ;;  %v15272_v8 = vld [vmem:[#allocation17_spill] sm:$0xff] }
 0xc63   :  { %v4919_v41 = vmul.f32 %v11462_v31, %v13225_v52  ;;  %v11464_v22 = vpop.eup %11463  ;;  %v15273_v40 = vld [vmem:[#allocation25_spill] sm:$0xff]  ;;  %v15274_v31 = vld [vmem:[#allocation19_spill] sm:$0xff] }
 0xc65   :  { %v13446_v39 = vadd.f32 %v4920_v19, %v4919_v41  ;;  %v15275_v19 = vld [vmem:[#allocation27_spill] sm:$0xff]  ;;  %v15277_v41 = vld [vmem:[#allocation29_spill] sm:$0xff] }
 0xc67   :  { %11465 = vtanh.f32 %v13446_v39 }
 0xc68   :  { %11467 = vpow2.f32 %v4285_v1  ;;  %v15281_v1 = vld [vmem:[#allocation33_spill] sm:$0xff] }
 0xc69   :  { %11469 = vtanh.f32 %v13357_v36 }
 0xc71   :  { %v11466_v9 = vpop.eup %11465 }
 0xc72   :  { %v13451_v49 = vmul.f32 %v11466_v9, %v11464_v22  ;;  %v11468_v52 = vpop.eup %11467  ;;  %v15279_v22 = vld [vmem:[#allocation31_spill] sm:$0xff]  ;;  %v15280_v9 = vld [vmem:[#allocation18_spill] sm:$0xff] }
 0xc73   :  { %v4287_v18 = vadd.f32 1.0, %v11468_v52  ;;  %v11470_v17 = vpop.eup %11469  ;;  %v15282_v52 = vld [vmem:[#allocation20_spill] sm:$0xff] }
 0xc74   :  { %4989 = vmatmul.mubr.f32.vlgmr.msra.gmra.mrb[28].mxu0 %v13451_v49  ;;  %5060 = vmatmul.mubr.f32.vlgmr.msra.gmra.mrb[32].mxu1 %v13451_v49 }
 0xc75   :  { %9948 = vmatpush1.bf16.msra.mxu0 %v14852_v24  ;;  %9980 = vmatpush1.bf16.msra.mxu1 %v14853_v32  ;;  %11471 = vrcp.f32 %v4287_v18  ;;  %v15283_v18 = vld [vmem:[#allocation35_spill] sm:$0xff] }
 0xc76   :  { %9950 = vmatprep.subr.bf16.mxu0 %v14854_v33  ;;  %9982 = vmatprep.subr.bf16.mxu1 %v14855_v28 }
 0xc77   :  { %5130 = vmatprep.mubr.f32.mxu0 %v14654_v6  ;;  %5201 = vmatprep.mubr.f32.mxu1 %v14654_v6 }
 0xc79   :  { %9952 = vmatpush1.bf16.msra.mxu0 %v14856_v61  ;;  %9984 = vmatpush1.bf16.msra.mxu1 %v14991_v57 }
 0xc7a   :  { %9954 = vmatprep.subr.bf16.mxu0 %v14992_v34  ;;  %9986 = vmatprep.subr.bf16.mxu1 %v14993_v44 }
 0xc7d   :  { %9956 = vmatpush1.bf16.msra.mxu0 %v14994_v26  ;;  %9988 = vmatpush1.bf16.msra.mxu1 %v14861_v56 }
 0xc7e   :  { %9958 = vmatprep.subr.bf16.mxu0 %v14862_v10  ;;  %9990 = vmatprep.subr.bf16.mxu1 %v14863_v45 }
 0xc7f   :  { %v11472_v35 = vpop.eup %11471 }
 0xc80   :  { %v4294_v30 = vmul.f32 %v11472_v35, %v11470_v17  ;;  %v15284_v17 = vld [vmem:[#allocation22_spill] sm:$0xff]  ;;  %v15285_v35 = vld [vmem:[#allocation37_spill] sm:$0xff] }
 0xc81   :  { %9960 = vmatpush1.bf16.msra.mxu0 %v14864_v11  ;;  %9992 = vmatpush1.bf16.msra.mxu1 %v14865_v23 }
 0xc82   :  { %9962 = vmatprep.subr.bf16.mxu0 %v14866_v16  ;;  %9994 = vmatprep.subr.bf16.mxu1 %v14867_v60 }
 0xc85   :  { %9964 = vmatpush1.bf16.msra.mxu0 %v14868_v20  ;;  %9996 = vmatpush1.bf16.msra.mxu1 %v14869_v0 }
 0xc86   :  { %9966 = vmatprep.subr.bf16.mxu0 %v14995_v55  ;;  %9998 = vmatprep.subr.bf16.mxu1 %v12546_v63 }
 0xc89   :  { %9968 = vmatpush1.bf16.msra.mxu0 %v12550_v27  ;;  %10000 = vmatpush1.bf16.msra.mxu1 %v12552_v5 }
 0xc8a   :  { %9970 = vmatprep.subr.bf16.mxu0 %v12556_v43  ;;  %10002 = vmatprep.subr.bf16.mxu1 %v12558_v29 }
 0xc8d   :  { %9972 = vmatpush1.bf16.msra.mxu0 %v12562_v62  ;;  %10004 = vmatpush1.bf16.msra.mxu1 %v12564_v15 }
 0xc8e   :  { %9974 = vmatprep.subr.bf16.mxu0 %v12568_v47  ;;  %10006 = vmatprep.subr.bf16.mxu1 %v12570_v42 }
 0xc91   :  { %9976 = vmatpush1.bf16.msra.mxu0 %v12574_v12  ;;  %10008 = vmatpush1.bf16.msra.mxu1 %v12576_v59 }
 0xc92   :  { %10010 = vmatprep.subr.bf16.mxu0 %v11956_v4  ;;  %10018 = vmatprep.subr.bf16.mxu1 %v15271_v3 }
 0xc94   :  { %5131 = vmatmul.mubr.f32.vlgmr.msra.gmra.mrb[28].mxu0 %v4294_v30  ;;  %5202 = vmatmul.mubr.f32.vlgmr.msra.gmra.mrb[32].mxu1 %v4294_v30  ;;  %v15286_v30 = vld [vmem:[#allocation24_spill] sm:$0xff] }
 0xc95   :  { %10012 = vmatpush1.bf16.msra.mxu0 %v15272_v8  ;;  %10020 = vmatpush1.bf16.msra.mxu1 %v15273_v40 }
 0xc96   :  { %10014 = vmatprep.subr.bf16.mxu0 %v15274_v31  ;;  %10022 = vmatprep.subr.bf16.mxu1 %v15275_v19 }
 0xc97   :  { %5305 = vmatprep.mubr.f32.mxu0 %v14654_v6  ;;  %5376 = vmatprep.mubr.f32.mxu1 %v14654_v6 }
 0xc99   :  { %10016 = vmatpush1.bf16.msra.mxu0 %v15276_v53  ;;  %10024 = vmatpush1.bf16.msra.mxu1 %v15277_v41  ;;  %v15294_v41 = vld [vmem:[#allocation32_spill] sm:$0xff] }
 0xc9a   :  { %10026 = vmatprep.subr.bf16.mxu0 %v15278_v58  ;;  %10058 = vmatprep.subr.bf16.mxu1 %v15279_v22  ;;  %v15287_v22 = vld [vmem:[#allocation39_spill] sm:$0xff]  ;;  %v15293_v58 = vld [vmem:[#allocation45_spill] sm:$0xff] }
 0xc9c   :  { %8258 = vmatmul.mubr.msk.f32.vlgmr.msra.gmra.mrb[30].mxu0 %vm490_vm0, %v5237_v37  ;;  %8259 = vmatmul.mubr.msk.f32.vlgmr.msra.gmra.mrb[34].mxu1 %vm490_vm0, %v5237_v37  ;;  %v15288_v37 = vld [vmem:[#allocation26_spill] sm:$0xff] }
 0xc9d   :  { %10028 = vmatpush1.bf16.msra.mxu0 %v15280_v9  ;;  %10060 = vmatpush1.bf16.msra.mxu1 %v15281_v1  ;;  %v15289_v9 = vld [vmem:[#allocation41_spill] sm:$0xff]  ;;  %v15290_v1 = vld [vmem:[#allocation28_spill] sm:$0xff] }
 0xc9e   :  { %10030 = vmatprep.subr.bf16.mxu0 %v15282_v52  ;;  %10062 = vmatprep.subr.bf16.mxu1 %v15283_v18  ;;  %v15291_v52 = vld [vmem:[#allocation43_spill] sm:$0xff]  ;;  %v15292_v18 = vld [vmem:[#allocation30_spill] sm:$0xff] }
 0xc9f   :  { %5447 = vmatprep.mubr.f32.mxu0 %v14654_v6  ;;  %5518 = vmatprep.mubr.f32.mxu1 %v14654_v6 }
 0xca1   :  { %10032 = vmatpush1.bf16.msra.mxu0 %v15284_v17  ;;  %10064 = vmatpush1.bf16.msra.mxu1 %v15285_v35  ;;  %v15295_v17 = vld [vmem:[#allocation47_spill] sm:$0xff]  ;;  %v15296_v35 = vld [vmem:[#allocation34_spill] sm:$0xff] }
 0xca2   :  { %10034 = vmatprep.subr.bf16.mxu0 %v15286_v30  ;;  %10066 = vmatprep.subr.bf16.mxu1 %v15287_v22  ;;  %v15297_v30 = vld [vmem:[#allocation48_spill] sm:$0xff] }
 0xca3   :  { %v15298_v22 = vld [vmem:[#allocation36_spill] sm:$0xff] }
 0xca5   :  { %10036 = vmatpush1.bf16.msra.mxu0 %v15288_v37  ;;  %10068 = vmatpush1.bf16.msra.mxu1 %v15289_v9  ;;  %v15299_v37 = vld [vmem:[#allocation49_spill] sm:$0xff]  ;;  %v15300_v9 = vld [vmem:[#allocation38_spill] sm:$0xff] }
 0xca6   :  { %10038 = vmatprep.subr.bf16.mxu0 %v15290_v1  ;;  %10070 = vmatprep.subr.bf16.mxu1 %v15291_v52  ;;  %v15301_v1 = vld [vmem:[#allocation50_spill] sm:$0xff]  ;;  %v15302_v52 = vld [vmem:[#allocation40_spill] sm:$0xff] }
 0xca9   :  { %10040 = vmatpush1.bf16.msra.mxu0 %v15292_v18  ;;  %10072 = vmatpush1.bf16.msra.mxu1 %v15293_v58  ;;  %v15303_v18 = vld [vmem:[#allocation51_spill] sm:$0xff]  ;;  %v15304_v58 = vld [vmem:[#allocation42_spill] sm:$0xff] }
 0xcaa   :  { %10042 = vmatprep.subr.bf16.mxu0 %v15294_v41  ;;  %10074 = vmatprep.subr.bf16.mxu1 %v15295_v17  ;;  %v15305_v41 = vld [vmem:[#allocation52_spill] sm:$0xff] }
 0xcab   :  { %v15306_v17 = vld [vmem:[#allocation44_spill] sm:$0xff] }
 0xcad   :  { %10044 = vmatpush1.bf16.msra.mxu0 %v15296_v35  ;;  %10076 = vmatpush1.bf16.msra.mxu1 %v15297_v30  ;;  %v15307_v35 = vld [vmem:[#allocation53_spill] sm:$0xff]  ;;  %v15308_v30 = vld [vmem:[#allocation46_spill] sm:$0xff] }
 0xcae   :  { %10046 = vmatprep.subr.bf16.mxu0 %v15298_v22  ;;  %10078 = vmatprep.subr.bf16.mxu1 %v15299_v37  ;;  %v15309_v22 = vld [vmem:[#allocation54_spill] sm:$0xff]  ;;  %v15310_v37 = vld [vmem:[#allocation55_spill] sm:$0xff] }
 0xcb1   :  { %10048 = vmatpush1.bf16.msra.mxu0 %v15300_v9  ;;  %10080 = vmatpush1.bf16.msra.mxu1 %v15301_v1  ;;  %v15311_v9 = vld [vmem:[#allocation56_spill] sm:$0xff]  ;;  %v15344_v1 = vld [vmem:[#allocation183_spill] sm:$0xff] }
 0xcb2   :  { %10050 = vmatprep.subr.bf16.mxu0 %v15302_v52  ;;  %10082 = vmatprep.subr.bf16.mxu1 %v15303_v18  ;;  %v15312_v18 = vld [vmem:[#allocation57_spill] sm:$0xff]  ;;  %v15326_v52 = vld [vmem:[#allocation71_spill] sm:$0xff] }
 0xcb5   :  { %10052 = vmatpush1.bf16.msra.mxu0 %v15304_v58  ;;  %10084 = vmatpush1.bf16.msra.mxu1 %v15305_v41  ;;  %v15313_v58 = vld [vmem:[#allocation58_spill] sm:$0xff]  ;;  %v15314_v41 = vld [vmem:[#allocation59_spill] sm:$0xff] }
 0xcb6   :  { %10054 = vmatprep.subr.bf16.mxu0 %v15306_v17  ;;  %10086 = vmatprep.subr.bf16.mxu1 %v15307_v35  ;;  %v15315_v17 = vld [vmem:[#allocation60_spill] sm:$0xff]  ;;  %v15325_v35 = vld [vmem:[#allocation70_spill] sm:$0xff] }
 0xcb9   :  { %10056 = vmatpush1.bf16.msra.mxu0 %v15308_v30  ;;  %10088 = vmatpush1.bf16.msra.mxu1 %v15309_v22  ;;  %v15316_v22 = vld [vmem:[#allocation61_spill] sm:$0xff]  ;;  %v15319_v30 = vld [vmem:[#allocation64_spill] sm:$0xff] }
 0xcba   :  { %10090 = vmatprep.subr.bf16.mxu0 %v15310_v37  ;;  %10122 = vmatprep.subr.bf16.mxu1 %v15311_v9  ;;  %v15317_v37 = vld [vmem:[#allocation62_spill] sm:$0xff]  ;;  %v15318_v9 = vld [vmem:[#allocation63_spill] sm:$0xff] }
 0xcbc   :  { %5448 = vmatmul.mubr.f32.vlgmr.msra.gmra.mrb[30].mxu0 %v13367_v51  ;;  %5519 = vmatmul.mubr.f32.vlgmr.msra.gmra.mrb[34].mxu1 %v13367_v51  ;;  %v15320_v51 = vld [vmem:[#allocation65_spill] sm:$0xff] }
 0xcbd   :  { %10092 = vmatpush1.bf16.msra.mxu0 %v15312_v18  ;;  %10124 = vmatpush1.bf16.msra.mxu1 %v15313_v58  ;;  %v15321_v18 = vld [vmem:[#allocation66_spill] sm:$0xff]  ;;  %v15322_v58 = vld [vmem:[#allocation67_spill] sm:$0xff] }
 0xcbe   :  { %10094 = vmatprep.subr.bf16.mxu0 %v15314_v41  ;;  %10126 = vmatprep.subr.bf16.mxu1 %v15315_v17  ;;  %v15323_v41 = vld [vmem:[#allocation68_spill] sm:$0xff]  ;;  %v15324_v17 = vld [vmem:[#allocation69_spill] sm:$0xff] }
 0xcbf   :  { %5617 = vmatprep.mubr.f32.mxu0 %v14654_v6  ;;  %5688 = vmatprep.mubr.f32.mxu1 %v14654_v6 }
 0xcc1   :  { %10096 = vmatpush1.bf16.msra.mxu0 %v15316_v22  ;;  %10128 = vmatpush1.bf16.msra.mxu1 %v15317_v37  ;;  %v15327_v22 = vld [vmem:[#allocation72_spill] sm:$0xff]  ;;  %v15328_v37 = vld [vmem:[#allocation73_spill] sm:$0xff] }
 0xcc2   :  { %10098 = vmatprep.subr.bf16.mxu0 %v15318_v9  ;;  %10130 = vmatprep.subr.bf16.mxu1 %v15319_v30  ;;  %v15329_v9 = vld [vmem:[#allocation74_spill] sm:$0xff]  ;;  %v15330_v30 = vld [vmem:[#allocation75_spill] sm:$0xff] }
 0xcc5   :  { %10100 = vmatpush1.bf16.msra.mxu0 %v15320_v51  ;;  %10132 = vmatpush1.bf16.msra.mxu1 %v15321_v18  ;;  %v15331_v51 = vld [vmem:[#allocation76_spill] sm:$0xff]  ;;  %v15332_v18 = vld [vmem:[#allocation77_spill] sm:$0xff] }
 0xcc6   :  { %10102 = vmatprep.subr.bf16.mxu0 %v15322_v58  ;;  %10134 = vmatprep.subr.bf16.mxu1 %v15323_v41  ;;  %v15333_v58 = vld [vmem:[#allocation78_spill] sm:$0xff]  ;;  %v15334_v41 = vld [vmem:[#allocation79_spill] sm:$0xff] }
 0xcc9   :  { %10104 = vmatpush1.bf16.msra.mxu0 %v15324_v17  ;;  %10136 = vmatpush1.bf16.msra.mxu1 %v15325_v35  ;;  %v15335_v17 = vld [vmem:[#allocation80_spill] sm:$0xff]  ;;  %v15336_v35 = vld [vmem:[#allocation81_spill] sm:$0xff] }
 0xcca   :  { %10106 = vmatprep.subr.bf16.mxu0 %v15326_v52  ;;  %10138 = vmatprep.subr.bf16.mxu1 %v15327_v22  ;;  %v15337_v52 = vld [vmem:[#allocation82_spill] sm:$0xff]  ;;  %v15338_v22 = vld [vmem:[#allocation83_spill] sm:$0xff] }
 0xccd   :  { %10108 = vmatpush1.bf16.msra.mxu0 %v15328_v37  ;;  %10140 = vmatpush1.bf16.msra.mxu1 %v15329_v9  ;;  %v15339_v37 = vld [vmem:[#allocation84_spill] sm:$0xff]  ;;  %v15340_v9 = vld [vmem:[#allocation85_spill] sm:$0xff] }
 0xcce   :  { %10110 = vmatprep.subr.bf16.mxu0 %v15330_v30  ;;  %10142 = vmatprep.subr.bf16.mxu1 %v15331_v51  ;;  %v15341_v30 = vld [vmem:[#allocation86_spill] sm:$0xff]  ;;  %v15342_v51 = vld [vmem:[#allocation87_spill] sm:$0xff] }
 0xcd1   :  { %10112 = vmatpush1.bf16.msra.mxu0 %v15332_v18  ;;  %10144 = vmatpush1.bf16.msra.mxu1 %v15333_v58  ;;  %v15343_v18 = vld [vmem:[#allocation88_spill] sm:$0xff] }
 0xcd2   :  { %10114 = vmatprep.subr.bf16.mxu0 %v15334_v41  ;;  %10146 = vmatprep.subr.bf16.mxu1 %v15335_v17 }
 0xcd5   :  { %10116 = vmatpush1.bf16.msra.mxu0 %v15336_v35  ;;  %10148 = vmatpush1.bf16.msra.mxu1 %v15337_v52 }
 0xcd6   :  { %10118 = vmatprep.subr.bf16.mxu0 %v15338_v22  ;;  %10150 = vmatprep.subr.bf16.mxu1 %v15339_v37 }
 0xcd9   :  { %10120 = vmatpush1.bf16.msra.mxu0 %v15340_v9  ;;  %10152 = vmatpush1.bf16.msra.mxu1 %v15341_v30 }
 0xcda   :  { %10154 = vmatprep.subr.bf16.mxu0 %v15342_v51  ;;  %10186 = vmatprep.subr.bf16.mxu1 %v15343_v18 }
 0xd67   :  { %v5132_v58 = vpop.f32.mrb[28].mxu0  ;;  %v5203_v41 = vpop.f32.mrb[32].mxu1 }
 0xd68   :  { %v11104_v17 = vadd.f32 %v5132_v58, %v15344_v1  ;;  %v5134_v53 = vpop.f32.mrb[29].mxu0  ;;  %v13573_v35 = vpop.f32.mrb[33].mxu1  ;;  %v11106_v30 = vadd.f32 %v5203_v41, %v15064_v21 }
 0xd69   :  { %v11105_v52 = vadd.f32 %v5134_v53, %v15063_v54 }
 0xd6a   :  { %v5212_v22 = vsub.f32 0.0, %v11104_v17 }
 0xd6b   :  { %v5218_v19 = vsub.f32 0.0, %v11105_v52 }
 0xd6c   :  { %v5213_v37 = vmul.f32 1.442695, %v5212_v22 }
 0xd6d   :  { %v5219_v31 = vmul.f32 1.442695, %v5218_v19 }
 0xd6e   :  { %11473 = vpow2.f32 %v5213_v37 }
 0xd6f   :  { %11475 = vpow2.f32 %v5219_v31 }
 0xd70   :  { %11477 = vtanh.f32 %v11106_v30 }
 0xd78   :  { %v11474_v51 = vpop.eup %11473 }
 0xd79   :  { %v11476_v9 = vpop.eup %11475  ;;  %v5215_v18 = vadd.f32 1.0, %v11474_v51 }
 0xd7a   :  { %v5221_v40 = vadd.f32 1.0, %v11476_v9  ;;  %v11478_v58 = vpop.eup %11477 }
 0xd7b   :  { %11479 = vrcp.f32 %v5215_v18 }
 0xd7c   :  { %11481 = vrcp.f32 %v5221_v40 }
 0xd85   :  { %v11480_v1 = vpop.eup %11479 }
 0xd86   :  { %v11482_v8 = vpop.eup %11481  ;;  %v5232_v3 = vmul.f32 %v11480_v1, %v11478_v58 }
 0xd87   :  { %v5231_v53 = vmul.f32 %v11482_v8, %v13357_v36 }
 0xd89   :  { %v13578_v52 = vadd.f32 %v5232_v3, %v5231_v53 }
 0xd8f   :  { %v5449_v19 = vpop.f32.mrb[30].mxu0  ;;  %v5520_v22 = vpop.f32.mrb[34].mxu1 }
 0xd90   :  { %v11108_v31 = vadd.f32 %v5449_v19, %v14921_v25  ;;  %v5451_v41 = vpop.f32.mrb[31].mxu0  ;;  %v5522_v17 = vpop.f32.mrb[35].mxu1  ;;  %v11110_v3 = vadd.f32 %v5520_v22, %v14924_v13 }
 0xd91   :  { %v11109_v37 = vadd.f32 %v5451_v41, %v14922_v2  ;;  %v11111_v51 = vadd.f32 %v5522_v17, %v14923_v38 }
 0xd92   :  { %v5529_v30 = vsub.f32 0.0, %v11108_v31 }
 0xd93   :  { %v5535_v9 = vsub.f32 0.0, %v11109_v37  ;;  %v5542_v1 = vsub.f32 0.0, %v11111_v51 }
 0xd94   :  { %v5530_v18 = vmul.f32 1.442695, %v5529_v30 }
 0xd95   :  { %v5536_v40 = vmul.f32 1.442695, %v5535_v9  ;;  %v5543_v36 = vmul.f32 1.442695, %v5542_v1 }
 0xd96   :  { %11483 = vpow2.f32 %v5530_v18  ;;  %v15345_v18 = vld [vmem:[#allocation161_spill] sm:$0xff] }
 0xd97   :  { %11485 = vpow2.f32 %v5536_v40 }
 0xd98   :  { %11487 = vpow2.f32 %v5543_v36 }
 0xd99   :  { %11489 = vtanh.f32 %v11110_v3  ;;  %v15347_v3 = vld [vmem:[#allocation95_spill] sm:$0xff] }
 0xda0   :  { %v11484_v8 = vpop.eup %11483 }
 0xda1   :  { %v11486_v58 = vpop.eup %11485  ;;  %v5532_v53 = vadd.f32 1.0, %v11484_v8  ;;  %v15348_v8 = vld [vmem:[#allocation96_spill] sm:$0xff] }
 0xda2   :  { %v5538_v19 = vadd.f32 1.0, %v11486_v58  ;;  %v11488_v31 = vpop.eup %11487  ;;  %v15349_v58 = vld [vmem:[#allocation97_spill] sm:$0xff] }
 0xda3   :  { %11491 = vrcp.f32 %v5532_v53  ;;  %v11490_v41 = vpop.eup %11489  ;;  %v5545_v17 = vadd.f32 1.0, %v11488_v31  ;;  %v15350_v53 = vld [vmem:[#allocation98_spill] sm:$0xff]  ;;  %v15352_v31 = vld [vmem:[#allocation100_spill] sm:$0xff] }
 0xda4   :  { %11493 = vrcp.f32 %v5538_v19  ;;  %v15351_v19 = vld [vmem:[#allocation99_spill] sm:$0xff] }
 0xda5   :  { %11495 = vrcp.f32 %v5545_v17  ;;  %v15357_v17 = vld [vmem:[#allocation105_spill] sm:$0xff] }
 0xdad   :  { %v11492_v37 = vpop.eup %11491 }
 0xdae   :  { %v11494_v30 = vpop.eup %11493  ;;  %v5549_v9 = vmul.f32 %v11492_v37, %v11490_v41  ;;  %v15353_v41 = vld [vmem:[#allocation101_spill] sm:$0xff]  ;;  %v15354_v37 = vld [vmem:[#allocation102_spill] sm:$0xff] }
 0xdaf   :  { %v5548_v40 = vmul.f32 %v11494_v30, %v15345_v18  ;;  %v11496_v22 = vpop.eup %11495  ;;  %v15355_v30 = vld [vmem:[#allocation103_spill] sm:$0xff]  ;;  %v15358_v18 = vld [vmem:[#allocation106_spill] sm:$0xff] }
 0xdb1   :  { %v13585_v51 = vadd.f32 %v5549_v9, %v5548_v40  ;;  %v15356_v9 = vld [vmem:[#allocation104_spill] sm:$0xff]  ;;  %v15359_v40 = vld [vmem:[#allocation107_spill] sm:$0xff] }
 0xdb3   :  { %15346 = vst [vmem:[#allocation162_spill] sm:$0xff] %v13585_v51  ;;  %11497 = vtanh.f32 %v13585_v51 }
 0xdbd   :  { %v11498_v1 = vpop.eup %11497 }
 0xdbe   :  { %v13588_v36 = vmul.f32 %v11498_v1, %v11496_v22  ;;  %v15360_v22 = vld [vmem:[#allocation108_spill] sm:$0xff]  ;;  %v15361_v1 = vld [vmem:[#allocation109_spill] sm:$0xff] }
 0xdc0   :  { %5618 = vmatmul.mubr.f32.vlgmr.msra.gmra.mrb[32].mxu0 %v13588_v36  ;;  %5689 = vmatmul.mubr.f32.vlgmr.msra.gmra.mrb[36].mxu1 %v13588_v36 }
 0xdc1   :  { %10156 = vmatpush1.bf16.msra.mxu0 %v15347_v3  ;;  %10188 = vmatpush1.bf16.msra.mxu1 %v15348_v8 }
 0xdc2   :  { %10158 = vmatprep.subr.bf16.mxu0 %v15349_v58  ;;  %10190 = vmatprep.subr.bf16.mxu1 %v15350_v53 }
 0xdc3   :  { %5759 = vmatprep.mubr.f32.mxu0 %v14654_v6  ;;  %5830 = vmatprep.mubr.f32.mxu1 %v14654_v6 }
 0xdc5   :  { %10160 = vmatpush1.bf16.msra.mxu0 %v15351_v19  ;;  %10192 = vmatpush1.bf16.msra.mxu1 %v15352_v31  ;;  %v15362_v19 = vld [vmem:[#allocation110_spill] sm:$0xff]  ;;  %v15363_v31 = vld [vmem:[#allocation111_spill] sm:$0xff] }
 0xdc6   :  { %10162 = vmatprep.subr.bf16.mxu0 %v15353_v41  ;;  %10194 = vmatprep.subr.bf16.mxu1 %v15354_v37  ;;  %v15364_v41 = vld [vmem:[#allocation112_spill] sm:$0xff]  ;;  %v15365_v37 = vld [vmem:[#allocation113_spill] sm:$0xff] }
 0xdc9   :  { %10164 = vmatpush1.bf16.msra.mxu0 %v15355_v30  ;;  %10196 = vmatpush1.bf16.msra.mxu1 %v15356_v9  ;;  %v15366_v30 = vld [vmem:[#allocation114_spill] sm:$0xff]  ;;  %v15367_v9 = vld [vmem:[#allocation115_spill] sm:$0xff] }
 0xdca   :  { %10166 = vmatprep.subr.bf16.mxu0 %v15357_v17  ;;  %10198 = vmatprep.subr.bf16.mxu1 %v15358_v18  ;;  %v15368_v17 = vld [vmem:[#allocation116_spill] sm:$0xff]  ;;  %v15369_v18 = vld [vmem:[#allocation117_spill] sm:$0xff] }
 0xdcd   :  { %10168 = vmatpush1.bf16.msra.mxu0 %v15359_v40  ;;  %10200 = vmatpush1.bf16.msra.mxu1 %v15360_v22  ;;  %v15370_v40 = vld [vmem:[#allocation118_spill] sm:$0xff]  ;;  %v15371_v22 = vld [vmem:[#allocation119_spill] sm:$0xff] }
 0xdce   :  { %10170 = vmatprep.subr.bf16.mxu0 %v15361_v1  ;;  %10202 = vmatprep.subr.bf16.mxu1 %v15362_v19  ;;  %v15372_v1 = vld [vmem:[#allocation120_spill] sm:$0xff]  ;;  %v15373_v19 = vld [vmem:[#allocation121_spill] sm:$0xff] }
 0xdd1   :  { %10172 = vmatpush1.bf16.msra.mxu0 %v15363_v31  ;;  %10204 = vmatpush1.bf16.msra.mxu1 %v15364_v41  ;;  %v15374_v31 = vld [vmem:[#allocation122_spill] sm:$0xff]  ;;  %v15375_v41 = vld [vmem:[#allocation123_spill] sm:$0xff] }
 0xdd2   :  { %10174 = vmatprep.subr.bf16.mxu0 %v15365_v37  ;;  %10206 = vmatprep.subr.bf16.mxu1 %v15366_v30  ;;  %v15376_v37 = vld [vmem:[#allocation124_spill] sm:$0xff]  ;;  %v15377_v30 = vld [vmem:[#allocation125_spill] sm:$0xff] }
 0xdd5   :  { %10176 = vmatpush1.bf16.msra.mxu0 %v15367_v9  ;;  %10208 = vmatpush1.bf16.msra.mxu1 %v15368_v17  ;;  %v15378_v9 = vld [vmem:[#allocation126_spill] sm:$0xff] }
 0xdd6   :  { %10178 = vmatprep.subr.bf16.mxu0 %v15369_v18  ;;  %10210 = vmatprep.subr.bf16.mxu1 %v15370_v40  ;;  %v15379_v40 = vld [vmem:[#allocation127_spill] sm:$0xff]  ;;  %v15393_v18 = vld [vmem:[#allocation141_spill] sm:$0xff] }
 0xdd9   :  { %10180 = vmatpush1.bf16.msra.mxu0 %v15371_v22  ;;  %10212 = vmatpush1.bf16.msra.mxu1 %v15372_v1  ;;  %v15380_v22 = vld [vmem:[#allocation128_spill] sm:$0xff]  ;;  %v15381_v1 = vld [vmem:[#allocation129_spill] sm:$0xff] }
 0xdda   :  { %10182 = vmatprep.subr.bf16.mxu0 %v15373_v19  ;;  %10214 = vmatprep.subr.bf16.mxu1 %v15374_v31  ;;  %v15382_v19 = vld [vmem:[#allocation130_spill] sm:$0xff]  ;;  %v15392_v31 = vld [vmem:[#allocation140_spill] sm:$0xff] }
 0xddd   :  { %10184 = vmatpush1.bf16.msra.mxu0 %v15375_v41  ;;  %10216 = vmatpush1.bf16.msra.mxu1 %v15376_v37  ;;  %v15383_v37 = vld [vmem:[#allocation131_spill] sm:$0xff]  ;;  %v15386_v41 = vld [vmem:[#allocation134_spill] sm:$0xff] }
 0xdde   :  { %10218 = vmatprep.subr.bf16.mxu0 %v15377_v30  ;;  %10250 = vmatprep.subr.bf16.mxu1 %v15378_v9  ;;  %v15384_v30 = vld [vmem:[#allocation132_spill] sm:$0xff]  ;;  %v15385_v9 = vld [vmem:[#allocation133_spill] sm:$0xff] }
 0xde0   :  { %5760 = vmatmul.mubr.f32.vlgmr.msra.gmra.mrb[32].mxu0 %v13451_v49  ;;  %5831 = vmatmul.mubr.f32.vlgmr.msra.gmra.mrb[36].mxu1 %v13451_v49  ;;  %v15387_v49 = vld [vmem:[#allocation135_spill] sm:$0xff] }
 0xde1   :  { %10220 = vmatpush1.bf16.msra.mxu0 %v15379_v40  ;;  %10252 = vmatpush1.bf16.msra.mxu1 %v15380_v22  ;;  %v15388_v40 = vld [vmem:[#allocation136_spill] sm:$0xff]  ;;  %v15389_v22 = vld [vmem:[#allocation137_spill] sm:$0xff] }
 0xde2   :  { %10222 = vmatprep.subr.bf16.mxu0 %v15381_v1  ;;  %10254 = vmatprep.subr.bf16.mxu1 %v15382_v19  ;;  %v15390_v1 = vld [vmem:[#allocation138_spill] sm:$0xff]  ;;  %v15391_v19 = vld [vmem:[#allocation139_spill] sm:$0xff] }
 0xde3   :  { %5929 = vmatprep.mubr.f32.mxu0 %v14654_v6  ;;  %6000 = vmatprep.mubr.f32.mxu1 %v14654_v6 }
 0xde5   :  { %10224 = vmatpush1.bf16.msra.mxu0 %v15383_v37  ;;  %10256 = vmatpush1.bf16.msra.mxu1 %v15384_v30  ;;  %v15394_v37 = vld [vmem:[#allocation142_spill] sm:$0xff]  ;;  %v15395_v30 = vld [vmem:[#allocation143_spill] sm:$0xff] }
 0xde6   :  { %10226 = vmatprep.subr.bf16.mxu0 %v15385_v9  ;;  %10258 = vmatprep.subr.bf16.mxu1 %v15386_v41  ;;  %v15396_v9 = vld [vmem:[#allocation144_spill] sm:$0xff]  ;;  %v15397_v41 = vld [vmem:[#allocation145_spill] sm:$0xff] }
 0xde9   :  { %10228 = vmatpush1.bf16.msra.mxu0 %v15387_v49  ;;  %10260 = vmatpush1.bf16.msra.mxu1 %v15388_v40  ;;  %v15398_v49 = vld [vmem:[#allocation146_spill] sm:$0xff]  ;;  %v15399_v40 = vld [vmem:[#allocation147_spill] sm:$0xff] }
 0xdea   :  { %10230 = vmatprep.subr.bf16.mxu0 %v15389_v22  ;;  %10262 = vmatprep.subr.bf16.mxu1 %v15390_v1  ;;  %v15400_v22 = vld [vmem:[#allocation148_spill] sm:$0xff]  ;;  %v15401_v1 = vld [vmem:[#allocation149_spill] sm:$0xff] }
 0xded   :  { %10232 = vmatpush1.bf16.msra.mxu0 %v15391_v19  ;;  %10264 = vmatpush1.bf16.msra.mxu1 %v15392_v31  ;;  %v15402_v19 = vld [vmem:[#allocation150_spill] sm:$0xff]  ;;  %v15403_v31 = vld [vmem:[#allocation151_spill] sm:$0xff] }
 0xdee   :  { %10234 = vmatprep.subr.bf16.mxu0 %v15393_v18  ;;  %10266 = vmatprep.subr.bf16.mxu1 %v15394_v37  ;;  %v15404_v18 = vld [vmem:[#allocation152_spill] sm:$0xff]  ;;  %v15405_v37 = vld [vmem:[#allocation153_spill] sm:$0xff] }
 0xdf1   :  { %10236 = vmatpush1.bf16.msra.mxu0 %v15395_v30  ;;  %10268 = vmatpush1.bf16.msra.mxu1 %v15396_v9  ;;  %v15406_v30 = vld [vmem:[#allocation154_spill] sm:$0xff]  ;;  %v15407_v9 = vld [vmem:[#allocation155_spill] sm:$0xff] }
 0xdf2   :  { %10238 = vmatprep.subr.bf16.mxu0 %v15397_v41  ;;  %10270 = vmatprep.subr.bf16.mxu1 %v15398_v49  ;;  %v15408_v41 = vld [vmem:[#allocation156_spill] sm:$0xff]  ;;  %v15409_v49 = vld [vmem:[#allocation157_spill] sm:$0xff] }
 0xdf5   :  { %10240 = vmatpush1.bf16.msra.mxu0 %v15399_v40  ;;  %10272 = vmatpush1.bf16.msra.mxu1 %v15400_v22  ;;  %v15410_v40 = vld [vmem:[#allocation158_spill] sm:$0xff] }
 0xdf6   :  { %10242 = vmatprep.subr.bf16.mxu0 %v15401_v1  ;;  %10274 = vmatprep.subr.bf16.mxu1 %v15402_v19 }
 0xdf9   :  { %10244 = vmatpush1.bf16.msra.mxu0 %v15403_v31  ;;  %10276 = vmatpush1.bf16.msra.mxu1 %v15404_v18 }
 0xdfa   :  { %10246 = vmatprep.subr.bf16.mxu0 %v15405_v37  ;;  %10278 = vmatprep.subr.bf16.mxu1 %v15406_v30 }
 0xdfd   :  { %10248 = vmatpush1.bf16.msra.mxu0 %v15407_v9  ;;  %10280 = vmatpush1.bf16.msra.mxu1 %v15408_v41 }
 0xdfe   :  { %10282 = vmatprep.subr.bf16.mxu0 %v15409_v49  ;;  %10314 = vmatprep.subr.bf16.mxu1 %v15410_v40 }
 0xeb3   :  { %v5761_v22 = vpop.f32.mrb[32].mxu0  ;;  %v5832_v1 = vpop.f32.mrb[36].mxu1 }
 0xeb4   :  { %v11112_v19 = vadd.f32 %v5761_v22, %v14846_v14  ;;  %v5763_v17 = vpop.f32.mrb[33].mxu0  ;;  %v5834_v31 = vpop.f32.mrb[37].mxu1  ;;  %v11114_v40 = vadd.f32 %v5832_v1, %v14849_v50 }
 0xeb5   :  { %v11113_v18 = vadd.f32 %v5763_v17, %v14847_v7  ;;  %v11115_v9 = vadd.f32 %v5834_v31, %v14848_v48 }
 0xeb6   :  { %v5841_v53 = vsub.f32 0.0, %v11112_v19 }
 0xeb7   :  { %v5847_v37 = vsub.f32 0.0, %v11113_v18  ;;  %v5854_v41 = vsub.f32 0.0, %v11115_v9 }
 0xeb8   :  { %v5842_v58 = vmul.f32 1.442695, %v5841_v53 }
 0xeb9   :  { %v5848_v30 = vmul.f32 1.442695, %v5847_v37  ;;  %v5855_v49 = vmul.f32 1.442695, %v5854_v41 }
 0xeba   :  { %11499 = vpow2.f32 %v5842_v58 }
 0xebb   :  { %11501 = vpow2.f32 %v5848_v30 }
 0xebc   :  { %11503 = vpow2.f32 %v5855_v49 }
 0xebd   :  { %11505 = vtanh.f32 %v11114_v40 }
 0xec4   :  { %v11500_v8 = vpop.eup %11499 }
 0xec5   :  { %v11502_v3 = vpop.eup %11501  ;;  %v5844_v51 = vadd.f32 1.0, %v11500_v8  ;;  %v11107_v8 = vadd.f32 %v13573_v35, %v12783_v46 }
 0xec6   :  { %v5850_v22 = vadd.f32 1.0, %v11502_v3  ;;  %v11504_v19 = vpop.eup %11503 }
 0xec7   :  { %11507 = vrcp.f32 %v5844_v51  ;;  %v11506_v17 = vpop.eup %11505  ;;  %v5857_v31 = vadd.f32 1.0, %v11504_v19  ;;  %v5225_v41 = vsub.f32 0.0, %v11107_v8  ;;  %v15411_v19 = vld [vmem:[#allocation23_spill] sm:$0xff]  ;;  %v6178_v8 = vld [vmem:[#allocation2 + $0x30] sm:$0xff] }
 0xec8   :  { %11509 = vrcp.f32 %v5850_v22 }
 0xec9   :  { %11511 = vrcp.f32 %v5857_v31  ;;  %v5226_v9 = vmul.f32 1.442695, %v5225_v41  ;;  %v15416_v31 = vld [vmem:[#allocation21_spill] sm:$0xff]  ;;  %v15418_v41 = vld [vmem:[#allocation16_spill] sm:$0xff] }
 0xed1   :  { %v11508_v53 = vpop.eup %11507 }
 0xed2   :  { %v11510_v37 = vpop.eup %11509  ;;  %v5861_v18 = vmul.f32 %v11508_v53, %v11506_v17  ;;  %v15412_v17 = vld [vmem:[#allocation17_spill] sm:$0xff] }
 0xed3   :  { %v5860_v58 = vmul.f32 %v11510_v37, %v13446_v39  ;;  %v11512_v3 = vpop.eup %11511  ;;  %v15413_v53 = vld [vmem:[#allocation25_spill] sm:$0xff]  ;;  %v15414_v37 = vld [vmem:[#allocation19_spill] sm:$0xff] }
 0xed5   :  { %v13667_v30 = vadd.f32 %v5861_v18, %v5860_v58  ;;  %v15415_v18 = vld [vmem:[#allocation27_spill] sm:$0xff]  ;;  %v15417_v58 = vld [vmem:[#allocation29_spill] sm:$0xff] }
 0xed7   :  { %11513 = vtanh.f32 %v13667_v30 }
 0xed8   :  { %11515 = vpow2.f32 %v5226_v9  ;;  %v15421_v9 = vld [vmem:[#allocation33_spill] sm:$0xff] }
 0xed9   :  { %11517 = vtanh.f32 %v13578_v52 }
 0xee1   :  { %v11514_v51 = vpop.eup %11513 }
 0xee2   :  { %v13672_v40 = vmul.f32 %v11514_v51, %v11512_v3  ;;  %v11516_v39 = vpop.eup %11515  ;;  %v15419_v3 = vld [vmem:[#allocation31_spill] sm:$0xff]  ;;  %v15420_v51 = vld [vmem:[#allocation18_spill] sm:$0xff] }
 0xee3   :  { %v5228_v35 = vadd.f32 1.0, %v11516_v39  ;;  %v11518_v1 = vpop.eup %11517  ;;  %v15422_v39 = vld [vmem:[#allocation20_spill] sm:$0xff] }
 0xee4   :  { %5930 = vmatmul.mubr.f32.vlgmr.msra.gmra.mrb[34].mxu0 %v13672_v40  ;;  %6001 = vmatmul.mubr.f32.vlgmr.msra.gmra.mrb[38].mxu1 %v13672_v40 }
 0xee5   :  { %10284 = vmatpush1.bf16.msra.mxu0 %v14852_v24  ;;  %10316 = vmatpush1.bf16.msra.mxu1 %v14853_v32  ;;  %11519 = vrcp.f32 %v5228_v35  ;;  %v15423_v35 = vld [vmem:[#allocation35_spill] sm:$0xff] }
 0xee6   :  { %10286 = vmatprep.subr.bf16.mxu0 %v14854_v33  ;;  %10318 = vmatprep.subr.bf16.mxu1 %v14855_v28 }
 0xee7   :  { %6071 = vmatprep.mubr.f32.mxu0 %v14654_v6  ;;  %6142 = vmatprep.mubr.f32.mxu1 %v14654_v6 }
 0xee9   :  { %10288 = vmatpush1.bf16.msra.mxu0 %v14856_v61  ;;  %10320 = vmatpush1.bf16.msra.mxu1 %v14991_v57 }
 0xeea   :  { %10290 = vmatprep.subr.bf16.mxu0 %v14992_v34  ;;  %10322 = vmatprep.subr.bf16.mxu1 %v14993_v44 }
 0xeed   :  { %10292 = vmatpush1.bf16.msra.mxu0 %v14994_v26  ;;  %10324 = vmatpush1.bf16.msra.mxu1 %v14861_v56 }
 0xeee   :  { %10294 = vmatprep.subr.bf16.mxu0 %v14862_v10  ;;  %10326 = vmatprep.subr.bf16.mxu1 %v14863_v45 }
 0xeef   :  { %v11520_v49 = vpop.eup %11519 }
 0xef0   :  { %v5235_v22 = vmul.f32 %v11520_v49, %v11518_v1  ;;  %v15424_v1 = vld [vmem:[#allocation22_spill] sm:$0xff]  ;;  %v15425_v49 = vld [vmem:[#allocation37_spill] sm:$0xff] }
 0xef1   :  { %10296 = vmatpush1.bf16.msra.mxu0 %v14864_v11  ;;  %10328 = vmatpush1.bf16.msra.mxu1 %v14865_v23 }
 0xef2   :  { %10298 = vmatprep.subr.bf16.mxu0 %v14866_v16  ;;  %10330 = vmatprep.subr.bf16.mxu1 %v14867_v60 }
 0xef5   :  { %10300 = vmatpush1.bf16.msra.mxu0 %v14868_v20  ;;  %10332 = vmatpush1.bf16.msra.mxu1 %v14869_v0 }
 0xef6   :  { %10302 = vmatprep.subr.bf16.mxu0 %v14995_v55  ;;  %10334 = vmatprep.subr.bf16.mxu1 %v12546_v63 }
 0xef9   :  { %10304 = vmatpush1.bf16.msra.mxu0 %v12550_v27  ;;  %10336 = vmatpush1.bf16.msra.mxu1 %v12552_v5 }
 0xefa   :  { %10306 = vmatprep.subr.bf16.mxu0 %v12556_v43  ;;  %10338 = vmatprep.subr.bf16.mxu1 %v12558_v29 }
 0xefd   :  { %10308 = vmatpush1.bf16.msra.mxu0 %v12562_v62  ;;  %10340 = vmatpush1.bf16.msra.mxu1 %v12564_v15 }
 0xefe   :  { %10310 = vmatprep.subr.bf16.mxu0 %v12568_v47  ;;  %10342 = vmatprep.subr.bf16.mxu1 %v12570_v42 }
 0xf01   :  { %10312 = vmatpush1.bf16.msra.mxu0 %v12574_v12  ;;  %10344 = vmatpush1.bf16.msra.mxu1 %v12576_v59 }
 0xf02   :  { %10346 = vmatprep.subr.bf16.mxu0 %v11956_v4  ;;  %10354 = vmatprep.subr.bf16.mxu1 %v15411_v19 }
 0xf04   :  { %6072 = vmatmul.mubr.f32.vlgmr.msra.gmra.mrb[34].mxu0 %v5235_v22  ;;  %6143 = vmatmul.mubr.f32.vlgmr.msra.gmra.mrb[38].mxu1 %v5235_v22  ;;  %v15426_v22 = vld [vmem:[#allocation24_spill] sm:$0xff] }
 0xf05   :  { %10348 = vmatpush1.bf16.msra.mxu0 %v15412_v17  ;;  %10356 = vmatpush1.bf16.msra.mxu1 %v15413_v53 }
 0xf06   :  { %10350 = vmatprep.subr.bf16.mxu0 %v15414_v37  ;;  %10358 = vmatprep.subr.bf16.mxu1 %v15415_v18 }
 0xf07   :  { %6246 = vmatprep.mubr.f32.mxu0 %v14654_v6  ;;  %6317 = vmatprep.mubr.f32.mxu1 %v14654_v6 }
 0xf09   :  { %10352 = vmatpush1.bf16.msra.mxu0 %v15416_v31  ;;  %10360 = vmatpush1.bf16.msra.mxu1 %v15417_v58  ;;  %v15434_v58 = vld [vmem:[#allocation32_spill] sm:$0xff] }
 0xf0a   :  { %10362 = vmatprep.subr.bf16.mxu0 %v15418_v41  ;;  %10394 = vmatprep.subr.bf16.mxu1 %v15419_v3  ;;  %v15427_v3 = vld [vmem:[#allocation39_spill] sm:$0xff]  ;;  %v15433_v41 = vld [vmem:[#allocation45_spill] sm:$0xff] }
 0xf0c   :  { %8260 = vmatmul.mubr.msk.f32.vlgmr.msra.gmra.mrb[36].mxu0 %vm490_vm0, %v6178_v8  ;;  %8261 = vmatmul.mubr.msk.f32.vlgmr.msra.gmra.mrb[40].mxu1 %vm490_vm0, %v6178_v8  ;;  %v15428_v8 = vld [vmem:[#allocation26_spill] sm:$0xff] }
 0xf0d   :  { %10364 = vmatpush1.bf16.msra.mxu0 %v15420_v51  ;;  %10396 = vmatpush1.bf16.msra.mxu1 %v15421_v9  ;;  %v15429_v51 = vld [vmem:[#allocation41_spill] sm:$0xff]  ;;  %v15430_v9 = vld [vmem:[#allocation28_spill] sm:$0xff] }
 0xf0e   :  { %10366 = vmatprep.subr.bf16.mxu0 %v15422_v39  ;;  %10398 = vmatprep.subr.bf16.mxu1 %v15423_v35  ;;  %v15431_v39 = vld [vmem:[#allocation43_spill] sm:$0xff]  ;;  %v15432_v35 = vld [vmem:[#allocation30_spill] sm:$0xff] }
 0xf0f   :  { %6388 = vmatprep.mubr.f32.mxu0 %v14654_v6  ;;  %6459 = vmatprep.mubr.f32.mxu1 %v14654_v6 }
 0xf11   :  { %10368 = vmatpush1.bf16.msra.mxu0 %v15424_v1  ;;  %10400 = vmatpush1.bf16.msra.mxu1 %v15425_v49  ;;  %v15435_v1 = vld [vmem:[#allocation47_spill] sm:$0xff]  ;;  %v15436_v49 = vld [vmem:[#allocation34_spill] sm:$0xff] }
 0xf12   :  { %10370 = vmatprep.subr.bf16.mxu0 %v15426_v22  ;;  %10402 = vmatprep.subr.bf16.mxu1 %v15427_v3  ;;  %v15437_v22 = vld [vmem:[#allocation48_spill] sm:$0xff] }
 0xf13   :  { %v15438_v3 = vld [vmem:[#allocation36_spill] sm:$0xff] }
 0xf15   :  { %10372 = vmatpush1.bf16.msra.mxu0 %v15428_v8  ;;  %10404 = vmatpush1.bf16.msra.mxu1 %v15429_v51  ;;  %v15439_v8 = vld [vmem:[#allocation49_spill] sm:$0xff]  ;;  %v15440_v51 = vld [vmem:[#allocation38_spill] sm:$0xff] }
 0xf16   :  { %10374 = vmatprep.subr.bf16.mxu0 %v15430_v9  ;;  %10406 = vmatprep.subr.bf16.mxu1 %v15431_v39  ;;  %v15441_v9 = vld [vmem:[#allocation50_spill] sm:$0xff]  ;;  %v15442_v39 = vld [vmem:[#allocation40_spill] sm:$0xff] }
 0xf19   :  { %10376 = vmatpush1.bf16.msra.mxu0 %v15432_v35  ;;  %10408 = vmatpush1.bf16.msra.mxu1 %v15433_v41  ;;  %v15443_v35 = vld [vmem:[#allocation51_spill] sm:$0xff]  ;;  %v15444_v41 = vld [vmem:[#allocation42_spill] sm:$0xff] }
 0xf1a   :  { %10378 = vmatprep.subr.bf16.mxu0 %v15434_v58  ;;  %10410 = vmatprep.subr.bf16.mxu1 %v15435_v1  ;;  %v15445_v58 = vld [vmem:[#allocation52_spill] sm:$0xff] }
 0xf1b   :  { %v15446_v1 = vld [vmem:[#allocation44_spill] sm:$0xff] }
 0xf1d   :  { %10380 = vmatpush1.bf16.msra.mxu0 %v15436_v49  ;;  %10412 = vmatpush1.bf16.msra.mxu1 %v15437_v22  ;;  %v15447_v49 = vld [vmem:[#allocation53_spill] sm:$0xff]  ;;  %v15448_v22 = vld [vmem:[#allocation46_spill] sm:$0xff] }
 0xf1e   :  { %10382 = vmatprep.subr.bf16.mxu0 %v15438_v3  ;;  %10414 = vmatprep.subr.bf16.mxu1 %v15439_v8  ;;  %v15449_v3 = vld [vmem:[#allocation54_spill] sm:$0xff]  ;;  %v15450_v8 = vld [vmem:[#allocation55_spill] sm:$0xff] }
 0xf21   :  { %10384 = vmatpush1.bf16.msra.mxu0 %v15440_v51  ;;  %10416 = vmatpush1.bf16.msra.mxu1 %v15441_v9  ;;  %v15451_v51 = vld [vmem:[#allocation56_spill] sm:$0xff]  ;;  %v15484_v9 = vld [vmem:[#allocation183_spill] sm:$0xff] }
 0xf22   :  { %10386 = vmatprep.subr.bf16.mxu0 %v15442_v39  ;;  %10418 = vmatprep.subr.bf16.mxu1 %v15443_v35  ;;  %v15452_v35 = vld [vmem:[#allocation57_spill] sm:$0xff]  ;;  %v15466_v39 = vld [vmem:[#allocation71_spill] sm:$0xff] }
 0xf25   :  { %10388 = vmatpush1.bf16.msra.mxu0 %v15444_v41  ;;  %10420 = vmatpush1.bf16.msra.mxu1 %v15445_v58  ;;  %v15453_v41 = vld [vmem:[#allocation58_spill] sm:$0xff]  ;;  %v15454_v58 = vld [vmem:[#allocation59_spill] sm:$0xff] }
 0xf26   :  { %10390 = vmatprep.subr.bf16.mxu0 %v15446_v1  ;;  %10422 = vmatprep.subr.bf16.mxu1 %v15447_v49  ;;  %v15455_v1 = vld [vmem:[#allocation60_spill] sm:$0xff]  ;;  %v15465_v49 = vld [vmem:[#allocation70_spill] sm:$0xff] }
 0xf29   :  { %10392 = vmatpush1.bf16.msra.mxu0 %v15448_v22  ;;  %10424 = vmatpush1.bf16.msra.mxu1 %v15449_v3  ;;  %v15456_v3 = vld [vmem:[#allocation61_spill] sm:$0xff]  ;;  %v15459_v22 = vld [vmem:[#allocation64_spill] sm:$0xff] }
 0xf2a   :  { %10426 = vmatprep.subr.bf16.mxu0 %v15450_v8  ;;  %10458 = vmatprep.subr.bf16.mxu1 %v15451_v51  ;;  %v15457_v8 = vld [vmem:[#allocation62_spill] sm:$0xff]  ;;  %v15458_v51 = vld [vmem:[#allocation63_spill] sm:$0xff] }
 0xf2c   :  { %6389 = vmatmul.mubr.f32.vlgmr.msra.gmra.mrb[36].mxu0 %v13588_v36  ;;  %6460 = vmatmul.mubr.f32.vlgmr.msra.gmra.mrb[40].mxu1 %v13588_v36  ;;  %v15460_v36 = vld [vmem:[#allocation65_spill] sm:$0xff] }
 0xf2d   :  { %10428 = vmatpush1.bf16.msra.mxu0 %v15452_v35  ;;  %10460 = vmatpush1.bf16.msra.mxu1 %v15453_v41  ;;  %v15461_v35 = vld [vmem:[#allocation66_spill] sm:$0xff]  ;;  %v15462_v41 = vld [vmem:[#allocation67_spill] sm:$0xff] }
 0xf2e   :  { %10430 = vmatprep.subr.bf16.mxu0 %v15454_v58  ;;  %10462 = vmatprep.subr.bf16.mxu1 %v15455_v1  ;;  %v15463_v58 = vld [vmem:[#allocation68_spill] sm:$0xff]  ;;  %v15464_v1 = vld [vmem:[#allocation69_spill] sm:$0xff] }
 0xf2f   :  { %6558 = vmatprep.mubr.f32.mxu0 %v14654_v6  ;;  %6629 = vmatprep.mubr.f32.mxu1 %v14654_v6 }
 0xf31   :  { %10432 = vmatpush1.bf16.msra.mxu0 %v15456_v3  ;;  %10464 = vmatpush1.bf16.msra.mxu1 %v15457_v8  ;;  %v15467_v3 = vld [vmem:[#allocation72_spill] sm:$0xff]  ;;  %v15468_v8 = vld [vmem:[#allocation73_spill] sm:$0xff] }
 0xf32   :  { %10434 = vmatprep.subr.bf16.mxu0 %v15458_v51  ;;  %10466 = vmatprep.subr.bf16.mxu1 %v15459_v22  ;;  %v15469_v51 = vld [vmem:[#allocation74_spill] sm:$0xff]  ;;  %v15470_v22 = vld [vmem:[#allocation75_spill] sm:$0xff] }
 0xf35   :  { %10436 = vmatpush1.bf16.msra.mxu0 %v15460_v36  ;;  %10468 = vmatpush1.bf16.msra.mxu1 %v15461_v35  ;;  %v15471_v36 = vld [vmem:[#allocation76_spill] sm:$0xff]  ;;  %v15472_v35 = vld [vmem:[#allocation77_spill] sm:$0xff] }
 0xf36   :  { %10438 = vmatprep.subr.bf16.mxu0 %v15462_v41  ;;  %10470 = vmatprep.subr.bf16.mxu1 %v15463_v58  ;;  %v15473_v41 = vld [vmem:[#allocation78_spill] sm:$0xff]  ;;  %v15474_v58 = vld [vmem:[#allocation79_spill] sm:$0xff] }
 0xf39   :  { %10440 = vmatpush1.bf16.msra.mxu0 %v15464_v1  ;;  %10472 = vmatpush1.bf16.msra.mxu1 %v15465_v49  ;;  %v15475_v1 = vld [vmem:[#allocation80_spill] sm:$0xff]  ;;  %v15476_v49 = vld [vmem:[#allocation81_spill] sm:$0xff] }
 0xf3a   :  { %10442 = vmatprep.subr.bf16.mxu0 %v15466_v39  ;;  %10474 = vmatprep.subr.bf16.mxu1 %v15467_v3  ;;  %v15477_v39 = vld [vmem:[#allocation82_spill] sm:$0xff]  ;;  %v15478_v3 = vld [vmem:[#allocation83_spill] sm:$0xff] }
 0xf3d   :  { %10444 = vmatpush1.bf16.msra.mxu0 %v15468_v8  ;;  %10476 = vmatpush1.bf16.msra.mxu1 %v15469_v51  ;;  %v15479_v8 = vld [vmem:[#allocation84_spill] sm:$0xff]  ;;  %v15480_v51 = vld [vmem:[#allocation85_spill] sm:$0xff] }
 0xf3e   :  { %10446 = vmatprep.subr.bf16.mxu0 %v15470_v22  ;;  %10478 = vmatprep.subr.bf16.mxu1 %v15471_v36  ;;  %v15481_v22 = vld [vmem:[#allocation86_spill] sm:$0xff]  ;;  %v15482_v36 = vld [vmem:[#allocation87_spill] sm:$0xff] }
 0xf41   :  { %10448 = vmatpush1.bf16.msra.mxu0 %v15472_v35  ;;  %10480 = vmatpush1.bf16.msra.mxu1 %v15473_v41  ;;  %v15483_v35 = vld [vmem:[#allocation88_spill] sm:$0xff] }
 0xf42   :  { %10450 = vmatprep.subr.bf16.mxu0 %v15474_v58  ;;  %10482 = vmatprep.subr.bf16.mxu1 %v15475_v1 }
 0xf45   :  { %10452 = vmatpush1.bf16.msra.mxu0 %v15476_v49  ;;  %10484 = vmatpush1.bf16.msra.mxu1 %v15477_v39 }
 0xf46   :  { %10454 = vmatprep.subr.bf16.mxu0 %v15478_v3  ;;  %10486 = vmatprep.subr.bf16.mxu1 %v15479_v8 }
 0xf49   :  { %10456 = vmatpush1.bf16.msra.mxu0 %v15480_v51  ;;  %10488 = vmatpush1.bf16.msra.mxu1 %v15481_v22 }
 0xf4a   :  { %10490 = vmatprep.subr.bf16.mxu0 %v15482_v36  ;;  %10522 = vmatprep.subr.bf16.mxu1 %v15483_v35 }
 0xfd7   :  { %v6073_v41 = vpop.f32.mrb[34].mxu0  ;;  %v6144_v58 = vpop.f32.mrb[38].mxu1 }
 0xfd8   :  { %v11116_v1 = vadd.f32 %v6073_v41, %v15484_v9  ;;  %v6075_v31 = vpop.f32.mrb[35].mxu0  ;;  %v13794_v49 = vpop.f32.mrb[39].mxu1  ;;  %v11118_v22 = vadd.f32 %v6144_v58, %v15064_v21 }
 0xfd9   :  { %v11117_v39 = vadd.f32 %v6075_v31, %v15063_v54 }
 0xfda   :  { %v6153_v3 = vsub.f32 0.0, %v11116_v1 }
 0xfdb   :  { %v6159_v18 = vsub.f32 0.0, %v11117_v39 }
 0xfdc   :  { %v6154_v8 = vmul.f32 1.442695, %v6153_v3 }
 0xfdd   :  { %v6160_v37 = vmul.f32 1.442695, %v6159_v18 }
 0xfde   :  { %11521 = vpow2.f32 %v6154_v8 }
 0xfdf   :  { %11523 = vpow2.f32 %v6160_v37 }
 0xfe0   :  { %11525 = vtanh.f32 %v11118_v22 }
 0xfe8   :  { %v11522_v36 = vpop.eup %11521 }
 0xfe9   :  { %v11524_v51 = vpop.eup %11523  ;;  %v6156_v35 = vadd.f32 1.0, %v11522_v36 }
 0xfea   :  { %v6162_v53 = vadd.f32 1.0, %v11524_v51  ;;  %v11526_v41 = vpop.eup %11525 }
 0xfeb   :  { %11527 = vrcp.f32 %v6156_v35 }
 0xfec   :  { %11529 = vrcp.f32 %v6162_v53 }
 0xff5   :  { %v11528_v9 = vpop.eup %11527 }
 0xff6   :  { %v11530_v17 = vpop.eup %11529  ;;  %v6173_v19 = vmul.f32 %v11528_v9, %v11526_v41 }
 0xff7   :  { %v6172_v31 = vmul.f32 %v11530_v17, %v13578_v52 }
 0xff9   :  { %v13799_v39 = vadd.f32 %v6173_v19, %v6172_v31 }
 0xfff   :  { %v6390_v18 = vpop.f32.mrb[36].mxu0  ;;  %v6461_v3 = vpop.f32.mrb[40].mxu1 }
0x1000   :  { %v11120_v37 = vadd.f32 %v6390_v18, %v14921_v25  ;;  %v6392_v58 = vpop.f32.mrb[37].mxu0  ;;  %v6463_v1 = vpop.f32.mrb[41].mxu1  ;;  %v11122_v19 = vadd.f32 %v6461_v3, %v14924_v13 }
0x1001   :  { %v11121_v8 = vadd.f32 %v6392_v58, %v14922_v2  ;;  %v11123_v36 = vadd.f32 %v6463_v1, %v14923_v38 }
0x1002   :  { %v6470_v22 = vsub.f32 0.0, %v11120_v37 }
0x1003   :  { %v6476_v51 = vsub.f32 0.0, %v11121_v8  ;;  %v6483_v9 = vsub.f32 0.0, %v11123_v36 }
0x1004   :  { %v6471_v35 = vmul.f32 1.442695, %v6470_v22 }
0x1005   :  { %v6477_v53 = vmul.f32 1.442695, %v6476_v51  ;;  %v6484_v52 = vmul.f32 1.442695, %v6483_v9 }
0x1006   :  { %11531 = vpow2.f32 %v6471_v35  ;;  %v15485_v35 = vld [vmem:[#allocation162_spill] sm:$0xff] }
0x1007   :  { %11533 = vpow2.f32 %v6477_v53 }
0x1008   :  { %11535 = vpow2.f32 %v6484_v52 }
0x1009   :  { %11537 = vtanh.f32 %v11122_v19  ;;  %v15487_v19 = vld [vmem:[#allocation95_spill] sm:$0xff] }
0x1010   :  { %v11532_v17 = vpop.eup %11531 }
0x1011   :  { %v11534_v41 = vpop.eup %11533  ;;  %v6473_v31 = vadd.f32 1.0, %v11532_v17  ;;  %v15488_v17 = vld [vmem:[#allocation96_spill] sm:$0xff] }
0x1012   :  { %v6479_v18 = vadd.f32 1.0, %v11534_v41  ;;  %v11536_v37 = vpop.eup %11535  ;;  %v15489_v41 = vld [vmem:[#allocation97_spill] sm:$0xff] }
0x1013   :  { %11539 = vrcp.f32 %v6473_v31  ;;  %v11538_v58 = vpop.eup %11537  ;;  %v6486_v1 = vadd.f32 1.0, %v11536_v37  ;;  %v15490_v31 = vld [vmem:[#allocation98_spill] sm:$0xff]  ;;  %v15492_v37 = vld [vmem:[#allocation100_spill] sm:$0xff] }
0x1014   :  { %11541 = vrcp.f32 %v6479_v18  ;;  %v15491_v18 = vld [vmem:[#allocation99_spill] sm:$0xff] }
0x1015   :  { %11543 = vrcp.f32 %v6486_v1  ;;  %v15497_v1 = vld [vmem:[#allocation105_spill] sm:$0xff] }
0x101d   :  { %v11540_v8 = vpop.eup %11539 }
0x101e   :  { %v11542_v22 = vpop.eup %11541  ;;  %v6490_v51 = vmul.f32 %v11540_v8, %v11538_v58  ;;  %v15493_v58 = vld [vmem:[#allocation101_spill] sm:$0xff]  ;;  %v15494_v8 = vld [vmem:[#allocation102_spill] sm:$0xff] }
0x101f   :  { %v6489_v53 = vmul.f32 %v11542_v22, %v15485_v35  ;;  %v11544_v3 = vpop.eup %11543  ;;  %v15495_v22 = vld [vmem:[#allocation103_spill] sm:$0xff]  ;;  %v15498_v35 = vld [vmem:[#allocation106_spill] sm:$0xff] }
0x1021   :  { %v13806_v36 = vadd.f32 %v6490_v51, %v6489_v53  ;;  %v15496_v51 = vld [vmem:[#allocation104_spill] sm:$0xff]  ;;  %v15499_v53 = vld [vmem:[#allocation107_spill] sm:$0xff] }
0x1023   :  { %15486 = vst [vmem:[#allocation163_spill] sm:$0xff] %v13806_v36  ;;  %11545 = vtanh.f32 %v13806_v36 }
0x102d   :  { %v11546_v9 = vpop.eup %11545 }
0x102e   :  { %v13809_v52 = vmul.f32 %v11546_v9, %v11544_v3  ;;  %v15500_v3 = vld [vmem:[#allocation108_spill] sm:$0xff]  ;;  %v15501_v9 = vld [vmem:[#allocation109_spill] sm:$0xff] }
0x1030   :  { %6559 = vmatmul.mubr.f32.vlgmr.msra.gmra.mrb[38].mxu0 %v13809_v52  ;;  %6630 = vmatmul.mubr.f32.vlgmr.msra.gmra.mrb[42].mxu1 %v13809_v52 }
0x1031   :  { %10492 = vmatpush1.bf16.msra.mxu0 %v15487_v19  ;;  %10524 = vmatpush1.bf16.msra.mxu1 %v15488_v17 }
0x1032   :  { %10494 = vmatprep.subr.bf16.mxu0 %v15489_v41  ;;  %10526 = vmatprep.subr.bf16.mxu1 %v15490_v31 }
0x1033   :  { %6700 = vmatprep.mubr.f32.mxu0 %v14654_v6  ;;  %6771 = vmatprep.mubr.f32.mxu1 %v14654_v6 }
0x1035   :  { %10496 = vmatpush1.bf16.msra.mxu0 %v15491_v18  ;;  %10528 = vmatpush1.bf16.msra.mxu1 %v15492_v37  ;;  %v15502_v18 = vld [vmem:[#allocation110_spill] sm:$0xff]  ;;  %v15503_v37 = vld [vmem:[#allocation111_spill] sm:$0xff] }
0x1036   :  { %10498 = vmatprep.subr.bf16.mxu0 %v15493_v58  ;;  %10530 = vmatprep.subr.bf16.mxu1 %v15494_v8  ;;  %v15504_v58 = vld [vmem:[#allocation112_spill] sm:$0xff]  ;;  %v15505_v8 = vld [vmem:[#allocation113_spill] sm:$0xff] }
0x1039   :  { %10500 = vmatpush1.bf16.msra.mxu0 %v15495_v22  ;;  %10532 = vmatpush1.bf16.msra.mxu1 %v15496_v51  ;;  %v15506_v22 = vld [vmem:[#allocation114_spill] sm:$0xff]  ;;  %v15507_v51 = vld [vmem:[#allocation115_spill] sm:$0xff] }
0x103a   :  { %10502 = vmatprep.subr.bf16.mxu0 %v15497_v1  ;;  %10534 = vmatprep.subr.bf16.mxu1 %v15498_v35  ;;  %v15508_v1 = vld [vmem:[#allocation116_spill] sm:$0xff]  ;;  %v15509_v35 = vld [vmem:[#allocation117_spill] sm:$0xff] }
0x103d   :  { %10504 = vmatpush1.bf16.msra.mxu0 %v15499_v53  ;;  %10536 = vmatpush1.bf16.msra.mxu1 %v15500_v3  ;;  %v15510_v53 = vld [vmem:[#allocation118_spill] sm:$0xff]  ;;  %v15511_v3 = vld [vmem:[#allocation119_spill] sm:$0xff] }
0x103e   :  { %10506 = vmatprep.subr.bf16.mxu0 %v15501_v9  ;;  %10538 = vmatprep.subr.bf16.mxu1 %v15502_v18  ;;  %v15512_v9 = vld [vmem:[#allocation120_spill] sm:$0xff]  ;;  %v15513_v18 = vld [vmem:[#allocation121_spill] sm:$0xff] }
0x1041   :  { %10508 = vmatpush1.bf16.msra.mxu0 %v15503_v37  ;;  %10540 = vmatpush1.bf16.msra.mxu1 %v15504_v58  ;;  %v15514_v37 = vld [vmem:[#allocation122_spill] sm:$0xff]  ;;  %v15515_v58 = vld [vmem:[#allocation123_spill] sm:$0xff] }
0x1042   :  { %10510 = vmatprep.subr.bf16.mxu0 %v15505_v8  ;;  %10542 = vmatprep.subr.bf16.mxu1 %v15506_v22  ;;  %v15516_v8 = vld [vmem:[#allocation124_spill] sm:$0xff]  ;;  %v15517_v22 = vld [vmem:[#allocation125_spill] sm:$0xff] }
0x1045   :  { %10512 = vmatpush1.bf16.msra.mxu0 %v15507_v51  ;;  %10544 = vmatpush1.bf16.msra.mxu1 %v15508_v1  ;;  %v15518_v51 = vld [vmem:[#allocation126_spill] sm:$0xff] }
0x1046   :  { %10514 = vmatprep.subr.bf16.mxu0 %v15509_v35  ;;  %10546 = vmatprep.subr.bf16.mxu1 %v15510_v53  ;;  %v15519_v53 = vld [vmem:[#allocation127_spill] sm:$0xff]  ;;  %v15533_v35 = vld [vmem:[#allocation141_spill] sm:$0xff] }
0x1049   :  { %10516 = vmatpush1.bf16.msra.mxu0 %v15511_v3  ;;  %10548 = vmatpush1.bf16.msra.mxu1 %v15512_v9  ;;  %v15520_v3 = vld [vmem:[#allocation128_spill] sm:$0xff]  ;;  %v15521_v9 = vld [vmem:[#allocation129_spill] sm:$0xff] }
0x104a   :  { %10518 = vmatprep.subr.bf16.mxu0 %v15513_v18  ;;  %10550 = vmatprep.subr.bf16.mxu1 %v15514_v37  ;;  %v15522_v18 = vld [vmem:[#allocation130_spill] sm:$0xff]  ;;  %v15532_v37 = vld [vmem:[#allocation140_spill] sm:$0xff] }
0x104d   :  { %10520 = vmatpush1.bf16.msra.mxu0 %v15515_v58  ;;  %10552 = vmatpush1.bf16.msra.mxu1 %v15516_v8  ;;  %v15523_v8 = vld [vmem:[#allocation131_spill] sm:$0xff]  ;;  %v15526_v58 = vld [vmem:[#allocation134_spill] sm:$0xff] }
0x104e   :  { %10554 = vmatprep.subr.bf16.mxu0 %v15517_v22  ;;  %10586 = vmatprep.subr.bf16.mxu1 %v15518_v51  ;;  %v15524_v22 = vld [vmem:[#allocation132_spill] sm:$0xff]  ;;  %v15525_v51 = vld [vmem:[#allocation133_spill] sm:$0xff] }
0x1050   :  { %6701 = vmatmul.mubr.f32.vlgmr.msra.gmra.mrb[38].mxu0 %v13672_v40  ;;  %6772 = vmatmul.mubr.f32.vlgmr.msra.gmra.mrb[42].mxu1 %v13672_v40  ;;  %v15527_v40 = vld [vmem:[#allocation135_spill] sm:$0xff] }
0x1051   :  { %10556 = vmatpush1.bf16.msra.mxu0 %v15519_v53  ;;  %10588 = vmatpush1.bf16.msra.mxu1 %v15520_v3  ;;  %v15528_v53 = vld [vmem:[#allocation136_spill] sm:$0xff]  ;;  %v15529_v3 = vld [vmem:[#allocation137_spill] sm:$0xff] }
0x1052   :  { %10558 = vmatprep.subr.bf16.mxu0 %v15521_v9  ;;  %10590 = vmatprep.subr.bf16.mxu1 %v15522_v18  ;;  %v15530_v9 = vld [vmem:[#allocation138_spill] sm:$0xff]  ;;  %v15531_v18 = vld [vmem:[#allocation139_spill] sm:$0xff] }
0x1053   :  { %6870 = vmatprep.mubr.f32.mxu0 %v14654_v6  ;;  %6941 = vmatprep.mubr.f32.mxu1 %v14654_v6 }
0x1055   :  { %10560 = vmatpush1.bf16.msra.mxu0 %v15523_v8  ;;  %10592 = vmatpush1.bf16.msra.mxu1 %v15524_v22  ;;  %v15534_v8 = vld [vmem:[#allocation142_spill] sm:$0xff]  ;;  %v15535_v22 = vld [vmem:[#allocation143_spill] sm:$0xff] }
0x1056   :  { %10562 = vmatprep.subr.bf16.mxu0 %v15525_v51  ;;  %10594 = vmatprep.subr.bf16.mxu1 %v15526_v58  ;;  %v15536_v51 = vld [vmem:[#allocation144_spill] sm:$0xff]  ;;  %v15537_v58 = vld [vmem:[#allocation145_spill] sm:$0xff] }
0x1059   :  { %10564 = vmatpush1.bf16.msra.mxu0 %v15527_v40  ;;  %10596 = vmatpush1.bf16.msra.mxu1 %v15528_v53  ;;  %v15538_v40 = vld [vmem:[#allocation146_spill] sm:$0xff]  ;;  %v15539_v53 = vld [vmem:[#allocation147_spill] sm:$0xff] }
0x105a   :  { %10566 = vmatprep.subr.bf16.mxu0 %v15529_v3  ;;  %10598 = vmatprep.subr.bf16.mxu1 %v15530_v9  ;;  %v15540_v3 = vld [vmem:[#allocation148_spill] sm:$0xff]  ;;  %v15541_v9 = vld [vmem:[#allocation149_spill] sm:$0xff] }
0x105d   :  { %10568 = vmatpush1.bf16.msra.mxu0 %v15531_v18  ;;  %10600 = vmatpush1.bf16.msra.mxu1 %v15532_v37  ;;  %v15542_v18 = vld [vmem:[#allocation150_spill] sm:$0xff]  ;;  %v15543_v37 = vld [vmem:[#allocation151_spill] sm:$0xff] }
0x105e   :  { %10570 = vmatprep.subr.bf16.mxu0 %v15533_v35  ;;  %10602 = vmatprep.subr.bf16.mxu1 %v15534_v8  ;;  %v15544_v35 = vld [vmem:[#allocation152_spill] sm:$0xff]  ;;  %v15545_v8 = vld [vmem:[#allocation153_spill] sm:$0xff] }
0x1061   :  { %10572 = vmatpush1.bf16.msra.mxu0 %v15535_v22  ;;  %10604 = vmatpush1.bf16.msra.mxu1 %v15536_v51  ;;  %v15546_v22 = vld [vmem:[#allocation154_spill] sm:$0xff]  ;;  %v15547_v51 = vld [vmem:[#allocation155_spill] sm:$0xff] }
0x1062   :  { %10574 = vmatprep.subr.bf16.mxu0 %v15537_v58  ;;  %10606 = vmatprep.subr.bf16.mxu1 %v15538_v40  ;;  %v15548_v58 = vld [vmem:[#allocation156_spill] sm:$0xff]  ;;  %v15549_v40 = vld [vmem:[#allocation157_spill] sm:$0xff] }
0x1065   :  { %10576 = vmatpush1.bf16.msra.mxu0 %v15539_v53  ;;  %10608 = vmatpush1.bf16.msra.mxu1 %v15540_v3  ;;  %v15550_v53 = vld [vmem:[#allocation158_spill] sm:$0xff] }
0x1066   :  { %10578 = vmatprep.subr.bf16.mxu0 %v15541_v9  ;;  %10610 = vmatprep.subr.bf16.mxu1 %v15542_v18 }
0x1069   :  { %10580 = vmatpush1.bf16.msra.mxu0 %v15543_v37  ;;  %10612 = vmatpush1.bf16.msra.mxu1 %v15544_v35 }
0x106a   :  { %10582 = vmatprep.subr.bf16.mxu0 %v15545_v8  ;;  %10614 = vmatprep.subr.bf16.mxu1 %v15546_v22 }
0x106d   :  { %10584 = vmatpush1.bf16.msra.mxu0 %v15547_v51  ;;  %10616 = vmatpush1.bf16.msra.mxu1 %v15548_v58 }
0x106e   :  { %10618 = vmatprep.subr.bf16.mxu0 %v15549_v40  ;;  %10650 = vmatprep.subr.bf16.mxu1 %v15550_v53 }
0x1123   :  { %v6702_v3 = vpop.f32.mrb[38].mxu0  ;;  %v6773_v9 = vpop.f32.mrb[42].mxu1 }
0x1124   :  { %v11124_v18 = vadd.f32 %v6702_v3, %v14846_v14  ;;  %v6704_v1 = vpop.f32.mrb[39].mxu0  ;;  %v6775_v37 = vpop.f32.mrb[43].mxu1  ;;  %v11126_v53 = vadd.f32 %v6773_v9, %v14849_v50 }
0x1125   :  { %v11125_v35 = vadd.f32 %v6704_v1, %v14847_v7  ;;  %v11127_v51 = vadd.f32 %v6775_v37, %v14848_v48 }
0x1126   :  { %v6782_v31 = vsub.f32 0.0, %v11124_v18 }
0x1127   :  { %v6788_v8 = vsub.f32 0.0, %v11125_v35  ;;  %v6795_v58 = vsub.f32 0.0, %v11127_v51 }
0x1128   :  { %v6783_v41 = vmul.f32 1.442695, %v6782_v31 }
0x1129   :  { %v6789_v22 = vmul.f32 1.442695, %v6788_v8  ;;  %v6796_v40 = vmul.f32 1.442695, %v6795_v58 }
0x112a   :  { %11547 = vpow2.f32 %v6783_v41 }
0x112b   :  { %11549 = vpow2.f32 %v6789_v22 }
0x112c   :  { %11551 = vpow2.f32 %v6796_v40 }
0x112d   :  { %11553 = vtanh.f32 %v11126_v53 }
0x1134   :  { %v11548_v17 = vpop.eup %11547 }
0x1135   :  { %v11550_v19 = vpop.eup %11549  ;;  %v6785_v36 = vadd.f32 1.0, %v11548_v17  ;;  %v11119_v17 = vadd.f32 %v13794_v49, %v12783_v46 }
0x1136   :  { %v6791_v3 = vadd.f32 1.0, %v11550_v19  ;;  %v11552_v18 = vpop.eup %11551 }
0x1137   :  { %11555 = vrcp.f32 %v6785_v36  ;;  %v11554_v1 = vpop.eup %11553  ;;  %v6798_v37 = vadd.f32 1.0, %v11552_v18  ;;  %v6166_v58 = vsub.f32 0.0, %v11119_v17  ;;  %v15551_v18 = vld [vmem:[#allocation23_spill] sm:$0xff]  ;;  %v15558_v17 = vld [vmem:[#allocation16_spill] sm:$0xff] }
0x1138   :  { %11557 = vrcp.f32 %v6791_v3 }
0x1139   :  { %11559 = vrcp.f32 %v6798_v37  ;;  %v6167_v51 = vmul.f32 1.442695, %v6166_v58  ;;  %v15556_v37 = vld [vmem:[#allocation21_spill] sm:$0xff]  ;;  %v15559_v58 = vld [vmem:[#allocation31_spill] sm:$0xff] }
0x1141   :  { %v11556_v31 = vpop.eup %11555 }
0x1142   :  { %v11558_v8 = vpop.eup %11557  ;;  %v6802_v35 = vmul.f32 %v11556_v31, %v11554_v1  ;;  %v15552_v1 = vld [vmem:[#allocation17_spill] sm:$0xff] }
0x1143   :  { %v6801_v41 = vmul.f32 %v11558_v8, %v13667_v30  ;;  %v11560_v19 = vpop.eup %11559  ;;  %v15553_v31 = vld [vmem:[#allocation25_spill] sm:$0xff]  ;;  %v15554_v8 = vld [vmem:[#allocation19_spill] sm:$0xff] }
0x1145   :  { %v13888_v22 = vadd.f32 %v6802_v35, %v6801_v41  ;;  %v15555_v35 = vld [vmem:[#allocation27_spill] sm:$0xff]  ;;  %v15557_v41 = vld [vmem:[#allocation29_spill] sm:$0xff] }
0x1147   :  { %11561 = vtanh.f32 %v13888_v22 }
0x1148   :  { %11563 = vpow2.f32 %v6167_v51  ;;  %v15562_v51 = vld [vmem:[#allocation20_spill] sm:$0xff] }
0x1149   :  { %11565 = vtanh.f32 %v13799_v39 }
0x1151   :  { %v11562_v36 = vpop.eup %11561 }
0x1152   :  { %v13893_v53 = vmul.f32 %v11562_v36, %v11560_v19  ;;  %v11564_v30 = vpop.eup %11563  ;;  %v15560_v19 = vld [vmem:[#allocation18_spill] sm:$0xff]  ;;  %v15561_v36 = vld [vmem:[#allocation33_spill] sm:$0xff] }
0x1153   :  { %v6169_v49 = vadd.f32 1.0, %v11564_v30  ;;  %v11566_v9 = vpop.eup %11565  ;;  %v15563_v30 = vld [vmem:[#allocation35_spill] sm:$0xff] }
0x1154   :  { %6871 = vmatmul.mubr.f32.vlgmr.msra.gmra.mrb[40].mxu0 %v13893_v53  ;;  %6942 = vmatmul.mubr.f32.vlgmr.msra.gmra.mrb[44].mxu1 %v13893_v53 }
0x1155   :  { %10620 = vmatpush1.bf16.msra.mxu0 %v14852_v24  ;;  %10652 = vmatpush1.bf16.msra.mxu1 %v14853_v32  ;;  %11567 = vrcp.f32 %v6169_v49  ;;  %v15564_v49 = vld [vmem:[#allocation22_spill] sm:$0xff] }
0x1156   :  { %10622 = vmatprep.subr.bf16.mxu0 %v14854_v33  ;;  %10654 = vmatprep.subr.bf16.mxu1 %v14855_v28 }
0x1157   :  { %7012 = vmatprep.mubr.f32.mxu0 %v14654_v6  ;;  %7083 = vmatprep.mubr.f32.mxu1 %v14654_v6 }
0x1159   :  { %10624 = vmatpush1.bf16.msra.mxu0 %v14856_v61  ;;  %10656 = vmatpush1.bf16.msra.mxu1 %v14991_v57 }
0x115a   :  { %10626 = vmatprep.subr.bf16.mxu0 %v14992_v34  ;;  %10658 = vmatprep.subr.bf16.mxu1 %v14993_v44 }
0x115d   :  { %10628 = vmatpush1.bf16.msra.mxu0 %v14994_v26  ;;  %10660 = vmatpush1.bf16.msra.mxu1 %v14861_v56 }
0x115e   :  { %10630 = vmatprep.subr.bf16.mxu0 %v14862_v10  ;;  %10662 = vmatprep.subr.bf16.mxu1 %v14863_v45 }
0x115f   :  { %v11568_v40 = vpop.eup %11567 }
0x1160   :  { %v6176_v3 = vmul.f32 %v11568_v40, %v11566_v9  ;;  %v15565_v9 = vld [vmem:[#allocation37_spill] sm:$0xff]  ;;  %v15566_v40 = vld [vmem:[#allocation24_spill] sm:$0xff] }
0x1161   :  { %10632 = vmatpush1.bf16.msra.mxu0 %v14864_v11  ;;  %10664 = vmatpush1.bf16.msra.mxu1 %v14865_v23 }
0x1162   :  { %10634 = vmatprep.subr.bf16.mxu0 %v14866_v16  ;;  %10666 = vmatprep.subr.bf16.mxu1 %v14867_v60 }
0x1165   :  { %10636 = vmatpush1.bf16.msra.mxu0 %v14868_v20  ;;  %10668 = vmatpush1.bf16.msra.mxu1 %v14869_v0 }
0x1166   :  { %10638 = vmatprep.subr.bf16.mxu0 %v14995_v55  ;;  %10670 = vmatprep.subr.bf16.mxu1 %v12546_v63 }
0x1169   :  { %10640 = vmatpush1.bf16.msra.mxu0 %v12550_v27  ;;  %10672 = vmatpush1.bf16.msra.mxu1 %v12552_v5 }
0x116a   :  { %10642 = vmatprep.subr.bf16.mxu0 %v12556_v43  ;;  %10674 = vmatprep.subr.bf16.mxu1 %v12558_v29 }
0x116d   :  { %10644 = vmatpush1.bf16.msra.mxu0 %v12562_v62  ;;  %10676 = vmatpush1.bf16.msra.mxu1 %v12564_v15 }
0x116e   :  { %10646 = vmatprep.subr.bf16.mxu0 %v12568_v47  ;;  %10678 = vmatprep.subr.bf16.mxu1 %v12570_v42 }
0x1171   :  { %10648 = vmatpush1.bf16.msra.mxu0 %v12574_v12  ;;  %10680 = vmatpush1.bf16.msra.mxu1 %v12576_v59 }
0x1172   :  { %10682 = vmatprep.subr.bf16.mxu0 %v11956_v4  ;;  %10690 = vmatprep.subr.bf16.mxu1 %v15551_v18  ;;  %v7119_v4 = vld [vmem:[#allocation2 + $0x38] sm:$0xff]  ;;  %v15568_v18 = vld [vmem:[#allocation26_spill] sm:$0xff] }
0x1174   :  { %7013 = vmatmul.mubr.f32.vlgmr.msra.gmra.mrb[40].mxu0 %v6176_v3  ;;  %7084 = vmatmul.mubr.f32.vlgmr.msra.gmra.mrb[44].mxu1 %v6176_v3  ;;  %v15567_v3 = vld [vmem:[#allocation39_spill] sm:$0xff] }
0x1175   :  { %10684 = vmatpush1.bf16.msra.mxu0 %v15552_v1  ;;  %10692 = vmatpush1.bf16.msra.mxu1 %v15553_v31  ;;  %v15569_v1 = vld [vmem:[#allocation41_spill] sm:$0xff]  ;;  %v15570_v31 = vld [vmem:[#allocation28_spill] sm:$0xff] }
0x1176   :  { %10686 = vmatprep.subr.bf16.mxu0 %v15554_v8  ;;  %10694 = vmatprep.subr.bf16.mxu1 %v15555_v35  ;;  %v15571_v8 = vld [vmem:[#allocation43_spill] sm:$0xff]  ;;  %v15572_v35 = vld [vmem:[#allocation30_spill] sm:$0xff] }
0x1177   :  { %7187 = vmatprep.mubr.f32.mxu0 %v14654_v6  ;;  %7258 = vmatprep.mubr.f32.mxu1 %v14654_v6 }
0x1179   :  { %10688 = vmatpush1.bf16.msra.mxu0 %v15556_v37  ;;  %10696 = vmatpush1.bf16.msra.mxu1 %v15557_v41  ;;  %v15573_v37 = vld [vmem:[#allocation45_spill] sm:$0xff]  ;;  %v15574_v41 = vld [vmem:[#allocation32_spill] sm:$0xff] }
0x117a   :  { %10698 = vmatprep.subr.bf16.mxu0 %v15558_v17  ;;  %10730 = vmatprep.subr.bf16.mxu1 %v15559_v58  ;;  %v15576_v17 = vld [vmem:[#allocation34_spill] sm:$0xff]  ;;  %v15577_v58 = vld [vmem:[#allocation48_spill] sm:$0xff] }
0x117c   :  { %8262 = vmatmul.mubr.msk.f32.vlgmr.msra.gmra.mrb[42].mxu0 %vm490_vm0, %v7119_v4  ;;  %8263 = vmatmul.mubr.msk.f32.vlgmr.msra.gmra.mrb[46].mxu1 %vm490_vm0, %v7119_v4  ;;  %v15575_v4 = vld [vmem:[#allocation47_spill] sm:$0xff] }
0x117d   :  { %10700 = vmatpush1.bf16.msra.mxu0 %v15560_v19  ;;  %10732 = vmatpush1.bf16.msra.mxu1 %v15561_v36  ;;  %v15578_v19 = vld [vmem:[#allocation36_spill] sm:$0xff]  ;;  %v15579_v36 = vld [vmem:[#allocation49_spill] sm:$0xff] }
0x117e   :  { %10702 = vmatprep.subr.bf16.mxu0 %v15562_v51  ;;  %10734 = vmatprep.subr.bf16.mxu1 %v15563_v30  ;;  %v15580_v51 = vld [vmem:[#allocation38_spill] sm:$0xff] }
0x117f   :  { %7329 = vmatprep.mubr.f32.mxu0 %v14654_v6  ;;  %7400 = vmatprep.mubr.f32.mxu1 %v14654_v6  ;;  %v15581_v30 = vld [vmem:[#allocation50_spill] sm:$0xff] }
0x1181   :  { %10704 = vmatpush1.bf16.msra.mxu0 %v15564_v49  ;;  %10736 = vmatpush1.bf16.msra.mxu1 %v15565_v9  ;;  %v15582_v49 = vld [vmem:[#allocation40_spill] sm:$0xff]  ;;  %v15583_v9 = vld [vmem:[#allocation51_spill] sm:$0xff] }
0x1182   :  { %10706 = vmatprep.subr.bf16.mxu0 %v15566_v40  ;;  %10738 = vmatprep.subr.bf16.mxu1 %v15567_v3  ;;  %v15584_v40 = vld [vmem:[#allocation42_spill] sm:$0xff]  ;;  %v15585_v3 = vld [vmem:[#allocation52_spill] sm:$0xff] }
0x1185   :  { %10708 = vmatpush1.bf16.msra.mxu0 %v15568_v18  ;;  %10740 = vmatpush1.bf16.msra.mxu1 %v15569_v1  ;;  %v15586_v18 = vld [vmem:[#allocation44_spill] sm:$0xff]  ;;  %v15587_v1 = vld [vmem:[#allocation53_spill] sm:$0xff] }
0x1186   :  { %10710 = vmatprep.subr.bf16.mxu0 %v15570_v31  ;;  %10742 = vmatprep.subr.bf16.mxu1 %v15571_v8  ;;  %v15588_v31 = vld [vmem:[#allocation46_spill] sm:$0xff] }
0x1187   :  { %v15589_v8 = vld [vmem:[#allocation54_spill] sm:$0xff] }
0x1189   :  { %10712 = vmatpush1.bf16.msra.mxu0 %v15572_v35  ;;  %10744 = vmatpush1.bf16.msra.mxu1 %v15573_v37  ;;  %v15590_v35 = vld [vmem:[#allocation55_spill] sm:$0xff]  ;;  %v15591_v37 = vld [vmem:[#allocation56_spill] sm:$0xff] }
0x118a   :  { %10714 = vmatprep.subr.bf16.mxu0 %v15574_v41  ;;  %10746 = vmatprep.subr.bf16.mxu1 %v15575_v4  ;;  %v15592_v41 = vld [vmem:[#allocation57_spill] sm:$0xff]  ;;  %v15593_v4 = vld [vmem:[#allocation58_spill] sm:$0xff] }
0x118d   :  { %10716 = vmatpush1.bf16.msra.mxu0 %v15576_v17  ;;  %10748 = vmatpush1.bf16.msra.mxu1 %v15577_v58  ;;  %v15594_v17 = vld [vmem:[#allocation59_spill] sm:$0xff]  ;;  %v15595_v58 = vld [vmem:[#allocation60_spill] sm:$0xff] }
0x118e   :  { %10718 = vmatprep.subr.bf16.mxu0 %v15578_v19  ;;  %10750 = vmatprep.subr.bf16.mxu1 %v15579_v36  ;;  %v15596_v19 = vld [vmem:[#allocation61_spill] sm:$0xff]  ;;  %v15597_v36 = vld [vmem:[#allocation62_spill] sm:$0xff] }
0x1191   :  { %10720 = vmatpush1.bf16.msra.mxu0 %v15580_v51  ;;  %10752 = vmatpush1.bf16.msra.mxu1 %v15581_v30  ;;  %v15598_v51 = vld [vmem:[#allocation63_spill] sm:$0xff]  ;;  %v15599_v30 = vld [vmem:[#allocation64_spill] sm:$0xff] }
0x1192   :  { %10722 = vmatprep.subr.bf16.mxu0 %v15582_v49  ;;  %10754 = vmatprep.subr.bf16.mxu1 %v15583_v9  ;;  %v15601_v49 = vld [vmem:[#allocation66_spill] sm:$0xff]  ;;  %v15602_v9 = vld [vmem:[#allocation67_spill] sm:$0xff] }
0x1195   :  { %10724 = vmatpush1.bf16.msra.mxu0 %v15584_v40  ;;  %10756 = vmatpush1.bf16.msra.mxu1 %v15585_v3  ;;  %v15603_v40 = vld [vmem:[#allocation68_spill] sm:$0xff]  ;;  %v15604_v3 = vld [vmem:[#allocation69_spill] sm:$0xff] }
0x1196   :  { %10726 = vmatprep.subr.bf16.mxu0 %v15586_v18  ;;  %10758 = vmatprep.subr.bf16.mxu1 %v15587_v1  ;;  %v15605_v18 = vld [vmem:[#allocation70_spill] sm:$0xff]  ;;  %v15606_v1 = vld [vmem:[#allocation71_spill] sm:$0xff] }
0x1199   :  { %10728 = vmatpush1.bf16.msra.mxu0 %v15588_v31  ;;  %10760 = vmatpush1.bf16.msra.mxu1 %v15589_v8  ;;  %v15607_v31 = vld [vmem:[#allocation72_spill] sm:$0xff]  ;;  %v15608_v8 = vld [vmem:[#allocation73_spill] sm:$0xff] }
0x119a   :  { %10762 = vmatprep.subr.bf16.mxu0 %v15590_v35  ;;  %10794 = vmatprep.subr.bf16.mxu1 %v15591_v37  ;;  %v15609_v35 = vld [vmem:[#allocation74_spill] sm:$0xff]  ;;  %v15610_v37 = vld [vmem:[#allocation75_spill] sm:$0xff] }
0x119c   :  { %7330 = vmatmul.mubr.f32.vlgmr.msra.gmra.mrb[42].mxu0 %v13809_v52  ;;  %7401 = vmatmul.mubr.f32.vlgmr.msra.gmra.mrb[46].mxu1 %v13809_v52  ;;  %v15600_v52 = vld [vmem:[#allocation65_spill] sm:$0xff] }
0x119d   :  { %10764 = vmatpush1.bf16.msra.mxu0 %v15592_v41  ;;  %10796 = vmatpush1.bf16.msra.mxu1 %v15593_v4  ;;  %v15611_v41 = vld [vmem:[#allocation76_spill] sm:$0xff]  ;;  %v15612_v4 = vld [vmem:[#allocation77_spill] sm:$0xff] }
0x119e   :  { %10766 = vmatprep.subr.bf16.mxu0 %v15594_v17  ;;  %10798 = vmatprep.subr.bf16.mxu1 %v15595_v58  ;;  %v15613_v17 = vld [vmem:[#allocation78_spill] sm:$0xff]  ;;  %v15614_v58 = vld [vmem:[#allocation79_spill] sm:$0xff] }
0x119f   :  { %7499 = vmatprep.mubr.f32.mxu0 %v14654_v6  ;;  %7570 = vmatprep.mubr.f32.mxu1 %v14654_v6 }
0x11a1   :  { %10768 = vmatpush1.bf16.msra.mxu0 %v15596_v19  ;;  %10800 = vmatpush1.bf16.msra.mxu1 %v15597_v36  ;;  %v15615_v19 = vld [vmem:[#allocation80_spill] sm:$0xff]  ;;  %v15616_v36 = vld [vmem:[#allocation81_spill] sm:$0xff] }
0x11a2   :  { %10770 = vmatprep.subr.bf16.mxu0 %v15598_v51  ;;  %10802 = vmatprep.subr.bf16.mxu1 %v15599_v30  ;;  %v15617_v51 = vld [vmem:[#allocation82_spill] sm:$0xff]  ;;  %v15618_v30 = vld [vmem:[#allocation83_spill] sm:$0xff] }
0x11a5   :  { %10772 = vmatpush1.bf16.msra.mxu0 %v15600_v52  ;;  %10804 = vmatpush1.bf16.msra.mxu1 %v15601_v49  ;;  %v15619_v52 = vld [vmem:[#allocation84_spill] sm:$0xff]  ;;  %v15620_v49 = vld [vmem:[#allocation85_spill] sm:$0xff] }
0x11a6   :  { %10774 = vmatprep.subr.bf16.mxu0 %v15602_v9  ;;  %10806 = vmatprep.subr.bf16.mxu1 %v15603_v40  ;;  %v15621_v9 = vld [vmem:[#allocation86_spill] sm:$0xff]  ;;  %v15622_v40 = vld [vmem:[#allocation87_spill] sm:$0xff] }
0x11a9   :  { %10776 = vmatpush1.bf16.msra.mxu0 %v15604_v3  ;;  %10808 = vmatpush1.bf16.msra.mxu1 %v15605_v18  ;;  %v15623_v3 = vld [vmem:[#allocation88_spill] sm:$0xff] }
0x11aa   :  { %10778 = vmatprep.subr.bf16.mxu0 %v15606_v1  ;;  %10810 = vmatprep.subr.bf16.mxu1 %v15607_v31  ;;  %v15624_v31 = vld [vmem:[#allocation183_spill] sm:$0xff] }
0x11ad   :  { %10780 = vmatpush1.bf16.msra.mxu0 %v15608_v8  ;;  %10812 = vmatpush1.bf16.msra.mxu1 %v15609_v35 }
0x11ae   :  { %10782 = vmatprep.subr.bf16.mxu0 %v15610_v37  ;;  %10814 = vmatprep.subr.bf16.mxu1 %v15611_v41 }
0x11b1   :  { %10784 = vmatpush1.bf16.msra.mxu0 %v15612_v4  ;;  %10816 = vmatpush1.bf16.msra.mxu1 %v15613_v17 }
0x11b2   :  { %10786 = vmatprep.subr.bf16.mxu0 %v15614_v58  ;;  %10818 = vmatprep.subr.bf16.mxu1 %v15615_v19 }
0x11b5   :  { %10788 = vmatpush1.bf16.msra.mxu0 %v15616_v36  ;;  %10820 = vmatpush1.bf16.msra.mxu1 %v15617_v51 }
0x11b6   :  { %10790 = vmatprep.subr.bf16.mxu0 %v15618_v30  ;;  %10822 = vmatprep.subr.bf16.mxu1 %v15619_v52 }
0x11b9   :  { %10792 = vmatpush1.bf16.msra.mxu0 %v15620_v49  ;;  %10824 = vmatpush1.bf16.msra.mxu1 %v15621_v9 }
0x11ba   :  { %10826 = vmatprep.subr.bf16.mxu0 %v15622_v40  ;;  %10858 = vmatprep.subr.bf16.mxu1 %v15623_v3 }
0x1247   :  { %v7014_v18 = vpop.f32.mrb[40].mxu0  ;;  %v7085_v1 = vpop.f32.mrb[44].mxu1 }
0x1248   :  { %v11128_v8 = vadd.f32 %v7014_v18, %v15624_v31  ;;  %v7016_v35 = vpop.f32.mrb[41].mxu0  ;;  %v14015_v37 = vpop.f32.mrb[45].mxu1  ;;  %v11130_v36 = vadd.f32 %v7085_v1, %v15064_v21 }
0x1249   :  { %v11129_v41 = vadd.f32 %v7016_v35, %v15063_v54 }
0x124a   :  { %v7094_v4 = vsub.f32 0.0, %v11128_v8 }
0x124b   :  { %v7100_v17 = vsub.f32 0.0, %v11129_v41 }
0x124c   :  { %v7095_v58 = vmul.f32 1.442695, %v7094_v4 }
0x124d   :  { %v7101_v19 = vmul.f32 1.442695, %v7100_v17 }
0x124e   :  { %11569 = vpow2.f32 %v7095_v58 }
0x124f   :  { %11571 = vpow2.f32 %v7101_v19 }
0x1250   :  { %11573 = vtanh.f32 %v11130_v36 }
0x1258   :  { %v11570_v51 = vpop.eup %11569 }
0x1259   :  { %v11572_v30 = vpop.eup %11571  ;;  %v7097_v52 = vadd.f32 1.0, %v11570_v51 }
0x125a   :  { %v7103_v49 = vadd.f32 1.0, %v11572_v30  ;;  %v11574_v9 = vpop.eup %11573 }
0x125b   :  { %11575 = vrcp.f32 %v7097_v52 }
0x125c   :  { %11577 = vrcp.f32 %v7103_v49 }
0x1265   :  { %v11576_v40 = vpop.eup %11575 }
0x1266   :  { %v11578_v3 = vpop.eup %11577  ;;  %v7114_v18 = vmul.f32 %v11576_v40, %v11574_v9 }
0x1267   :  { %v7113_v8 = vmul.f32 %v11578_v3, %v13799_v39 }
0x1269   :  { %v14020_v35 = vadd.f32 %v7114_v18, %v7113_v8 }
0x126f   :  { %v7331_v41 = vpop.f32.mrb[42].mxu0  ;;  %v7402_v4 = vpop.f32.mrb[46].mxu1 }
0x1270   :  { %v11132_v17 = vadd.f32 %v7331_v41, %v14921_v25  ;;  %v7333_v1 = vpop.f32.mrb[43].mxu0  ;;  %v7404_v58 = vpop.f32.mrb[47].mxu1  ;;  %v11134_v40 = vadd.f32 %v7402_v4, %v14924_v13 }
0x1271   :  { %v11133_v19 = vadd.f32 %v7333_v1, %v14922_v2  ;;  %v11135_v49 = vadd.f32 %v7404_v58, %v14923_v38  ;;  %v15625_v58 = vld [vmem:[#allocation163_spill] sm:$0xff] }
0x1272   :  { %v7411_v36 = vsub.f32 0.0, %v11132_v17 }
0x1273   :  { %v7417_v51 = vsub.f32 0.0, %v11133_v19  ;;  %v7424_v9 = vsub.f32 0.0, %v11135_v49  ;;  %v15627_v49 = vld [vmem:[#allocation96_spill] sm:$0xff] }
0x1274   :  { %v7412_v30 = vmul.f32 1.442695, %v7411_v36 }
0x1275   :  { %v7418_v52 = vmul.f32 1.442695, %v7417_v51  ;;  %v7425_v39 = vmul.f32 1.442695, %v7424_v9  ;;  %v15628_v9 = vld [vmem:[#allocation97_spill] sm:$0xff] }
0x1276   :  { %11579 = vpow2.f32 %v7412_v30 }
0x1277   :  { %11581 = vpow2.f32 %v7418_v52  ;;  %v15626_v52 = vld [vmem:[#allocation95_spill] sm:$0xff] }
0x1278   :  { %11583 = vpow2.f32 %v7425_v39  ;;  %v15629_v39 = vld [vmem:[#allocation98_spill] sm:$0xff] }
0x1279   :  { %11585 = vtanh.f32 %v11134_v40  ;;  %v15630_v40 = vld [vmem:[#allocation99_spill] sm:$0xff] }
0x1280   :  { %v11580_v3 = vpop.eup %11579 }
0x1281   :  { %v11582_v18 = vpop.eup %11581  ;;  %v7414_v8 = vadd.f32 1.0, %v11580_v3  ;;  %v15631_v3 = vld [vmem:[#allocation100_spill] sm:$0xff] }
0x1282   :  { %v7420_v25 = vadd.f32 1.0, %v11582_v18  ;;  %v11584_v2 = vpop.eup %11583  ;;  %v15632_v18 = vld [vmem:[#allocation101_spill] sm:$0xff] }
0x1283   :  { %11587 = vrcp.f32 %v7414_v8  ;;  %v11586_v41 = vpop.eup %11585  ;;  %v7427_v38 = vadd.f32 1.0, %v11584_v2  ;;  %v15633_v8 = vld [vmem:[#allocation102_spill] sm:$0xff]  ;;  %v15635_v2 = vld [vmem:[#allocation104_spill] sm:$0xff] }
0x1284   :  { %11589 = vrcp.f32 %v7420_v25  ;;  %v15634_v25 = vld [vmem:[#allocation103_spill] sm:$0xff] }
0x1285   :  { %11591 = vrcp.f32 %v7427_v38  ;;  %v15640_v38 = vld [vmem:[#allocation109_spill] sm:$0xff] }
0x128d   :  { %v11588_v17 = vpop.eup %11587 }
0x128e   :  { %v11590_v1 = vpop.eup %11589  ;;  %v7431_v19 = vmul.f32 %v11588_v17, %v11586_v41  ;;  %v15636_v41 = vld [vmem:[#allocation105_spill] sm:$0xff]  ;;  %v15637_v17 = vld [vmem:[#allocation106_spill] sm:$0xff] }
0x128f   :  { %v7430_v36 = vmul.f32 %v11590_v1, %v15625_v58  ;;  %v11592_v13 = vpop.eup %11591  ;;  %v15638_v1 = vld [vmem:[#allocation107_spill] sm:$0xff]  ;;  %v15641_v58 = vld [vmem:[#allocation110_spill] sm:$0xff] }
0x1291   :  { %v7432_v51 = vadd.f32 %v7431_v19, %v7430_v36  ;;  %v15639_v19 = vld [vmem:[#allocation108_spill] sm:$0xff]  ;;  %v15642_v36 = vld [vmem:[#allocation111_spill] sm:$0xff] }
0x1293   :  { %11593 = vtanh.f32 %v7432_v51  ;;  %v15643_v51 = vld [vmem:[#allocation112_spill] sm:$0xff] }
0x129d   :  { %v11594_v4 = vpop.eup %11593 }
0x129e   :  { %v7434_v30 = vmul.f32 %v11594_v4, %v11592_v13  ;;  %v15644_v13 = vld [vmem:[#allocation113_spill] sm:$0xff]  ;;  %v15645_v4 = vld [vmem:[#allocation114_spill] sm:$0xff] }
0x12a0   :  { %7500 = vmatmul.mubr.f32.vlgmr.msra.gmra.mrb[44].mxu0 %v7434_v30  ;;  %7571 = vmatmul.mubr.f32.vlgmr.msra.gmra.mrb[48].mxu1 %v7434_v30  ;;  %v15646_v30 = vld [vmem:[#allocation115_spill] sm:$0xff] }
0x12a1   :  { %10828 = vmatpush1.bf16.msra.mxu0 %v15626_v52  ;;  %10860 = vmatpush1.bf16.msra.mxu1 %v15627_v49  ;;  %v15647_v52 = vld [vmem:[#allocation116_spill] sm:$0xff]  ;;  %v15648_v49 = vld [vmem:[#allocation117_spill] sm:$0xff] }
0x12a2   :  { %10830 = vmatprep.subr.bf16.mxu0 %v15628_v9  ;;  %10862 = vmatprep.subr.bf16.mxu1 %v15629_v39  ;;  %v15649_v9 = vld [vmem:[#allocation118_spill] sm:$0xff]  ;;  %v15650_v39 = vld [vmem:[#allocation119_spill] sm:$0xff] }
0x12a3   :  { %7641 = vmatprep.mubr.f32.mxu0 %v14654_v6  ;;  %7712 = vmatprep.mubr.f32.mxu1 %v14654_v6 }
0x12a5   :  { %10832 = vmatpush1.bf16.msra.mxu0 %v15630_v40  ;;  %10864 = vmatpush1.bf16.msra.mxu1 %v15631_v3  ;;  %v15651_v40 = vld [vmem:[#allocation120_spill] sm:$0xff]  ;;  %v15652_v3 = vld [vmem:[#allocation121_spill] sm:$0xff] }
0x12a6   :  { %10834 = vmatprep.subr.bf16.mxu0 %v15632_v18  ;;  %10866 = vmatprep.subr.bf16.mxu1 %v15633_v8  ;;  %v15653_v18 = vld [vmem:[#allocation122_spill] sm:$0xff]  ;;  %v15654_v8 = vld [vmem:[#allocation123_spill] sm:$0xff] }
0x12a9   :  { %10836 = vmatpush1.bf16.msra.mxu0 %v15634_v25  ;;  %10868 = vmatpush1.bf16.msra.mxu1 %v15635_v2  ;;  %v15655_v25 = vld [vmem:[#allocation124_spill] sm:$0xff]  ;;  %v15656_v2 = vld [vmem:[#allocation125_spill] sm:$0xff] }
0x12aa   :  { %10838 = vmatprep.subr.bf16.mxu0 %v15636_v41  ;;  %10870 = vmatprep.subr.bf16.mxu1 %v15637_v17  ;;  %v15657_v41 = vld [vmem:[#allocation126_spill] sm:$0xff]  ;;  %v15658_v17 = vld [vmem:[#allocation127_spill] sm:$0xff] }
0x12ad   :  { %10840 = vmatpush1.bf16.msra.mxu0 %v15638_v1  ;;  %10872 = vmatpush1.bf16.msra.mxu1 %v15639_v19  ;;  %v15659_v1 = vld [vmem:[#allocation128_spill] sm:$0xff]  ;;  %v15660_v19 = vld [vmem:[#allocation129_spill] sm:$0xff] }
0x12ae   :  { %10842 = vmatprep.subr.bf16.mxu0 %v15640_v38  ;;  %10874 = vmatprep.subr.bf16.mxu1 %v15641_v58  ;;  %v15661_v38 = vld [vmem:[#allocation130_spill] sm:$0xff]  ;;  %v15662_v58 = vld [vmem:[#allocation131_spill] sm:$0xff] }
0x12b1   :  { %10844 = vmatpush1.bf16.msra.mxu0 %v15642_v36  ;;  %10876 = vmatpush1.bf16.msra.mxu1 %v15643_v51  ;;  %v15663_v36 = vld [vmem:[#allocation132_spill] sm:$0xff]  ;;  %v15664_v51 = vld [vmem:[#allocation133_spill] sm:$0xff] }
0x12b2   :  { %10846 = vmatprep.subr.bf16.mxu0 %v15644_v13  ;;  %10878 = vmatprep.subr.bf16.mxu1 %v15645_v4  ;;  %v15665_v13 = vld [vmem:[#allocation134_spill] sm:$0xff]  ;;  %v15667_v4 = vld [vmem:[#allocation136_spill] sm:$0xff] }
0x12b5   :  { %10848 = vmatpush1.bf16.msra.mxu0 %v15646_v30  ;;  %10880 = vmatpush1.bf16.msra.mxu1 %v15647_v52  ;;  %v15668_v30 = vld [vmem:[#allocation137_spill] sm:$0xff]  ;;  %v15669_v52 = vld [vmem:[#allocation138_spill] sm:$0xff] }
0x12b6   :  { %10850 = vmatprep.subr.bf16.mxu0 %v15648_v49  ;;  %10882 = vmatprep.subr.bf16.mxu1 %v15649_v9  ;;  %v15670_v49 = vld [vmem:[#allocation139_spill] sm:$0xff]  ;;  %v15671_v9 = vld [vmem:[#allocation140_spill] sm:$0xff] }
0x12b9   :  { %10852 = vmatpush1.bf16.msra.mxu0 %v15650_v39  ;;  %10884 = vmatpush1.bf16.msra.mxu1 %v15651_v40  ;;  %v15672_v39 = vld [vmem:[#allocation141_spill] sm:$0xff]  ;;  %v15673_v40 = vld [vmem:[#allocation142_spill] sm:$0xff] }
0x12ba   :  { %10854 = vmatprep.subr.bf16.mxu0 %v15652_v3  ;;  %10886 = vmatprep.subr.bf16.mxu1 %v15653_v18  ;;  %v15674_v3 = vld [vmem:[#allocation143_spill] sm:$0xff]  ;;  %v15675_v18 = vld [vmem:[#allocation144_spill] sm:$0xff] }
0x12bd   :  { %10856 = vmatpush1.bf16.msra.mxu0 %v15654_v8  ;;  %10888 = vmatpush1.bf16.msra.mxu1 %v15655_v25  ;;  %v15676_v8 = vld [vmem:[#allocation145_spill] sm:$0xff]  ;;  %v15677_v25 = vld [vmem:[#allocation146_spill] sm:$0xff] }
0x12be   :  { %10890 = vmatprep.subr.bf16.mxu0 %v15656_v2  ;;  %10922 = vmatprep.subr.bf16.mxu1 %v15657_v41  ;;  %v15678_v2 = vld [vmem:[#allocation147_spill] sm:$0xff]  ;;  %v15679_v41 = vld [vmem:[#allocation148_spill] sm:$0xff] }
0x12c0   :  { %7642 = vmatmul.mubr.f32.vlgmr.msra.gmra.mrb[44].mxu0 %v13893_v53  ;;  %7713 = vmatmul.mubr.f32.vlgmr.msra.gmra.mrb[48].mxu1 %v13893_v53  ;;  %v15666_v53 = vld [vmem:[#allocation135_spill] sm:$0xff] }
0x12c1   :  { %10892 = vmatpush1.bf16.msra.mxu0 %v15658_v17  ;;  %10924 = vmatpush1.bf16.msra.mxu1 %v15659_v1  ;;  %v15680_v17 = vld [vmem:[#allocation149_spill] sm:$0xff]  ;;  %v15681_v1 = vld [vmem:[#allocation150_spill] sm:$0xff] }
0x12c2   :  { %10894 = vmatprep.subr.bf16.mxu0 %v15660_v19  ;;  %10926 = vmatprep.subr.bf16.mxu1 %v15661_v38  ;;  %v15682_v19 = vld [vmem:[#allocation151_spill] sm:$0xff]  ;;  %v15683_v38 = vld [vmem:[#allocation152_spill] sm:$0xff] }
0x12c3   :  { %7811 = vmatprep.mubr.f32.mxu0 %v14654_v6  ;;  %7882 = vmatprep.mubr.f32.mxu1 %v14654_v6 }
0x12c5   :  { %10896 = vmatpush1.bf16.msra.mxu0 %v15662_v58  ;;  %10928 = vmatpush1.bf16.msra.mxu1 %v15663_v36  ;;  %v15684_v58 = vld [vmem:[#allocation153_spill] sm:$0xff]  ;;  %v15685_v36 = vld [vmem:[#allocation154_spill] sm:$0xff] }
0x12c6   :  { %10898 = vmatprep.subr.bf16.mxu0 %v15664_v51  ;;  %10930 = vmatprep.subr.bf16.mxu1 %v15665_v13  ;;  %v15686_v51 = vld [vmem:[#allocation155_spill] sm:$0xff]  ;;  %v15687_v13 = vld [vmem:[#allocation156_spill] sm:$0xff] }
0x12c9   :  { %10900 = vmatpush1.bf16.msra.mxu0 %v15666_v53  ;;  %10932 = vmatpush1.bf16.msra.mxu1 %v15667_v4  ;;  %v15688_v53 = vld [vmem:[#allocation157_spill] sm:$0xff]  ;;  %v15689_v4 = vld [vmem:[#allocation158_spill] sm:$0xff] }
0x12ca   :  { %10902 = vmatprep.subr.bf16.mxu0 %v15668_v30  ;;  %10934 = vmatprep.subr.bf16.mxu1 %v15669_v52 }
0x12cd   :  { %10904 = vmatpush1.bf16.msra.mxu0 %v15670_v49  ;;  %10936 = vmatpush1.bf16.msra.mxu1 %v15671_v9 }
0x12ce   :  { %10906 = vmatprep.subr.bf16.mxu0 %v15672_v39  ;;  %10938 = vmatprep.subr.bf16.mxu1 %v15673_v40 }
0x12d1   :  { %10908 = vmatpush1.bf16.msra.mxu0 %v15674_v3  ;;  %10940 = vmatpush1.bf16.msra.mxu1 %v15675_v18 }
0x12d2   :  { %10910 = vmatprep.subr.bf16.mxu0 %v15676_v8  ;;  %10942 = vmatprep.subr.bf16.mxu1 %v15677_v25 }
0x12d5   :  { %10912 = vmatpush1.bf16.msra.mxu0 %v15678_v2  ;;  %10944 = vmatpush1.bf16.msra.mxu1 %v15679_v41 }
0x12d6   :  { %10914 = vmatprep.subr.bf16.mxu0 %v15680_v17  ;;  %10946 = vmatprep.subr.bf16.mxu1 %v15681_v1 }
0x12d9   :  { %10916 = vmatpush1.bf16.msra.mxu0 %v15682_v19  ;;  %10948 = vmatpush1.bf16.msra.mxu1 %v15683_v38 }
0x12da   :  { %10918 = vmatprep.subr.bf16.mxu0 %v15684_v58  ;;  %10950 = vmatprep.subr.bf16.mxu1 %v15685_v36 }
0x12dd   :  { %10920 = vmatpush1.bf16.msra.mxu0 %v15686_v51  ;;  %10952 = vmatpush1.bf16.msra.mxu1 %v15687_v13 }
0x12de   :  { %10954 = vmatprep.subr.bf16.mxu0 %v15688_v53  ;;  %10986 = vmatprep.subr.bf16.mxu1 %v15689_v4 }
0x1393   :  { %v7643_v30 = vpop.f32.mrb[44].mxu0  ;;  %v7714_v52 = vpop.f32.mrb[48].mxu1 }
0x1394   :  { %v11136_v49 = vadd.f32 %v7643_v30, %v14846_v14  ;;  %v7645_v9 = vpop.f32.mrb[45].mxu0  ;;  %v7716_v39 = vpop.f32.mrb[49].mxu1  ;;  %v11138_v1 = vadd.f32 %v7714_v52, %v14849_v50  ;;  %v11131_v50 = vadd.f32 %v14015_v37, %v12783_v46 }
0x1395   :  { %v11137_v40 = vadd.f32 %v7645_v9, %v14847_v7  ;;  %v11139_v2 = vadd.f32 %v7716_v39, %v14848_v48 }
0x1396   :  { %v7723_v3 = vsub.f32 0.0, %v11136_v49  ;;  %v7107_v52 = vsub.f32 0.0, %v11131_v50 }
0x1397   :  { %v7729_v18 = vsub.f32 0.0, %v11137_v40  ;;  %v7736_v41 = vsub.f32 0.0, %v11139_v2 }
0x1398   :  { %v7724_v8 = vmul.f32 1.442695, %v7723_v3  ;;  %v7108_v39 = vmul.f32 1.442695, %v7107_v52 }
0x1399   :  { %v7730_v25 = vmul.f32 1.442695, %v7729_v18  ;;  %v7737_v17 = vmul.f32 1.442695, %v7736_v41 }
0x139a   :  { %11595 = vpow2.f32 %v7724_v8 }
0x139b   :  { %11597 = vpow2.f32 %v7730_v25 }
0x139c   :  { %11599 = vpow2.f32 %v7737_v17 }
0x139d   :  { %11601 = vtanh.f32 %v11138_v1 }
0x13a4   :  { %v11596_v19 = vpop.eup %11595 }
0x13a5   :  { %v11598_v38 = vpop.eup %11597  ;;  %v7726_v58 = vadd.f32 1.0, %v11596_v19 }
0x13a6   :  { %v7732_v14 = vadd.f32 1.0, %v11598_v38  ;;  %v11600_v7 = vpop.eup %11599 }
0x13a7   :  { %11603 = vrcp.f32 %v7726_v58  ;;  %v11602_v36 = vpop.eup %11601  ;;  %v7739_v48 = vadd.f32 1.0, %v11600_v7 }
0x13a8   :  { %11605 = vrcp.f32 %v7732_v14 }
0x13a9   :  { %11607 = vrcp.f32 %v7739_v48 }
0x13b1   :  { %v11604_v51 = vpop.eup %11603 }
0x13b2   :  { %v11606_v13 = vpop.eup %11605  ;;  %v7743_v53 = vmul.f32 %v11604_v51, %v11602_v36 }
0x13b3   :  { %v7742_v4 = vmul.f32 %v11606_v13, %v13888_v22  ;;  %v11608_v49 = vpop.eup %11607 }
0x13b5   :  { %v7744_v30 = vadd.f32 %v7743_v53, %v7742_v4 }
0x13b7   :  { %11609 = vtanh.f32 %v7744_v30 }
0x13b8   :  { %11611 = vpow2.f32 %v7108_v39 }
0x13b9   :  { %11613 = vtanh.f32 %v14020_v35 }
0x13c1   :  { %v11610_v9 = vpop.eup %11609 }
0x13c2   :  { %v7746_v40 = vmul.f32 %v11610_v9, %v11608_v49  ;;  %v8155_v49 = vld [vmem:[%s14219_s12] sm:$0xff]  ;;  %v8156_v9 = vld [vmem:[%s14219_s12 + $0x8] sm:$0xff] }
0x13c3   :  { %v11042_v39 = vpack.c.bf16 %v8156_v9, %v8155_v49 }
0x13c4   :  { %7812 = vmatmul.mubr.f32.vlgmr.msra.gmra.mrb[46].mxu0 %v7746_v40  ;;  %7883 = vmatmul.mubr.f32.vlgmr.msra.gmra.mrb[50].mxu1 %v7746_v40 }
0x13c5   :  { %10956 = vmatpush1.bf16.msra.mxu0 %v14852_v24  ;;  %10988 = vmatpush1.bf16.msra.mxu1 %v14853_v32  ;;  %v11612_v24 = vpop.eup %11611 }
0x13c6   :  { %10958 = vmatprep.subr.bf16.mxu0 %v14854_v33  ;;  %10990 = vmatprep.subr.bf16.mxu1 %v14855_v28  ;;  %v7110_v32 = vadd.f32 1.0, %v11612_v24  ;;  %v11614_v33 = vpop.eup %11613 }
0x13c7   :  { %7953 = vmatprep.mubr.f32.mxu0 %v14654_v6  ;;  %8024 = vmatprep.mubr.f32.mxu1 %v14654_v6 }
0x13c8   :  { %11615 = vrcp.f32 %v7110_v32 }
0x13c9   :  { %10960 = vmatpush1.bf16.msra.mxu0 %v14856_v61  ;;  %10992 = vmatpush1.bf16.msra.mxu1 %v14991_v57  ;;  %v8065_v61 = vld [vmem:[%s14217_s10 + $0x30] sm:$0xff]  ;;  %v8072_v57 = vld [vmem:[%s14217_s10 + $0x68] sm:$0xff] }
0x13ca   :  { %10962 = vmatprep.subr.bf16.mxu0 %v14992_v34  ;;  %10994 = vmatprep.subr.bf16.mxu1 %v14993_v44  ;;  %v8073_v44 = vld [vmem:[%s14217_s10 + $0x70] sm:$0xff] }
0x13cd   :  { %10964 = vmatpush1.bf16.msra.mxu0 %v14994_v26  ;;  %10996 = vmatpush1.bf16.msra.mxu1 %v14861_v56  ;;  %v8068_v56 = vld [vmem:[%s14217_s10 + $0x48] sm:$0xff]  ;;  %v8074_v26 = vld [vmem:[%s14217_s10 + $0x78] sm:$0xff] }
0x13ce   :  { %10966 = vmatprep.subr.bf16.mxu0 %v14862_v10  ;;  %10998 = vmatprep.subr.bf16.mxu1 %v14863_v45  ;;  %v8069_v45 = vld [vmem:[%s14217_s10 + $0x50] sm:$0xff] }
0x13d1   :  { %10968 = vmatpush1.bf16.msra.mxu0 %v14864_v11  ;;  %11000 = vmatpush1.bf16.msra.mxu1 %v14865_v23  ;;  %v8070_v11 = vld [vmem:[%s14217_s10 + $0x58] sm:$0xff] }
0x13d2   :  { %10970 = vmatprep.subr.bf16.mxu0 %v14866_v16  ;;  %11002 = vmatprep.subr.bf16.mxu1 %v14867_v60  ;;  %v11616_v28 = vpop.eup %11615  ;;  %v8066_v60 = vld [vmem:[%s14217_s10 + $0x38] sm:$0xff]  ;;  %v11033_v23 = vpack.c.bf16 %v8070_v11, %v8069_v45  ;;  %v8071_v16 = vld [vmem:[%s14217_s10 + $0x60] sm:$0xff] }
0x13d3   :  { %v11036_v34 = vpack.c.bf16 %v8072_v57, %v8071_v16 }
0x13d5   :  { %10972 = vmatpush1.bf16.msra.mxu0 %v14868_v20  ;;  %11004 = vmatpush1.bf16.msra.mxu1 %v14869_v0  ;;  %v11027_v20 = vpack.c.bf16 %v8066_v60, %v8065_v61  ;;  %v8067_v0 = vld [vmem:[%s14217_s10 + $0x40] sm:$0xff] }
0x13d6   :  { %10974 = vmatprep.subr.bf16.mxu0 %v14995_v55  ;;  %11006 = vmatprep.subr.bf16.mxu1 %v12546_v63  ;;  %v7117_v63 = vmul.f32 %v11616_v28, %v11614_v33  ;;  %v11030_v10 = vpack.c.bf16 %v8068_v56, %v8067_v0  ;;  %v11039_v55 = vpack.c.bf16 %v8074_v26, %v8073_v44 }
0x13d9   :  { %10976 = vmatpush1.bf16.msra.mxu0 %v12550_v27  ;;  %11008 = vmatpush1.bf16.msra.mxu1 %v12552_v5  ;;  %v8059_v27 = vld [vmem:[%s14217_s10] sm:$0xff]  ;;  %v8060_v5 = vld [vmem:[%s14217_s10 + $0x8] sm:$0xff] }
0x13da   :  { %10978 = vmatprep.subr.bf16.mxu0 %v12556_v43  ;;  %11010 = vmatprep.subr.bf16.mxu1 %v12558_v29  ;;  %v11018_v43 = vpack.c.bf16 %v8060_v5, %v8059_v27  ;;  %v11784_v29 = vmov 0.0|0.0  }
0x13dd   :  { %10980 = vmatpush1.bf16.msra.mxu0 %v12562_v62  ;;  %11012 = vmatpush1.bf16.msra.mxu1 %v12564_v15  ;;  %v8061_v62 = vld [vmem:[%s14217_s10 + $0x10] sm:$0xff]  ;;  %v8062_v15 = vld [vmem:[%s14217_s10 + $0x18] sm:$0xff] }
0x13de   :  { %10982 = vmatprep.subr.bf16.mxu0 %v12568_v47  ;;  %11014 = vmatprep.subr.bf16.mxu1 %v12570_v42  ;;  %v11021_v47 = vpack.c.bf16 %v8062_v15, %v8061_v62  ;;  %v8063_v42 = vld [vmem:[%s14217_s10 + $0x20] sm:$0xff] }
0x13e1   :  { %10984 = vmatpush1.bf16.msra.mxu0 %v12574_v12  ;;  %11016 = vmatpush1.bf16.msra.mxu1 %v12576_v59  ;;  %v8064_v12 = vld [vmem:[%s14217_s10 + $0x28] sm:$0xff] }
0x13e2   :  { %11017 = vmatprep.subr.bf16.mxu0 %v11784_v29  ;;  %11041 = vmatprep.subr.bf16.mxu1 %v11784_v29  ;;  %v11024_v59 = vpack.c.bf16 %v8064_v12, %v8063_v42 }
0x13e4   :  { %7954 = vmatmul.mubr.f32.vlgmr.msra.gmra.mrb[46].mxu0 %v7117_v63  ;;  %8025 = vmatmul.mubr.f32.vlgmr.msra.gmra.mrb[50].mxu1 %v7117_v63  ;;  %v8265_v63 = vld [vmem:[%s14220_s13] ss:$0 sm:$0xff] }
0x13e5   :  { %11019 = vmatpush3.bf16.msra.mxu0 %v11018_v43  ;;  %8319 = vmatprep.mubr.msk.f32.mxu0 %vm11785_vm1, %v14654_v6 }
0x13e6   :  { %11020 = vmatprep.subr.bf16.mxu0 %v11784_v29  ;;  %8326 = vmatprep.mubr.msk.f32.mxu1 %vm11785_vm1, %v14654_v6 }
0x13e7   :  { %11043 = vmatpush3.bf16.msra.mxu1 %v11042_v39 }
0x13e9   :  { %11022 = vmatpush3.bf16.msra.mxu0 %v11021_v47 }
0x13ea   :  { %11023 = vmatprep.subr.bf16.mxu0 %v11784_v29 }
0x13ed   :  { %11025 = vmatpush3.bf16.msra.mxu0 %v11024_v59 }
0x13ee   :  { %11026 = vmatprep.subr.bf16.mxu0 %v11784_v29 }
0x13f1   :  { %11028 = vmatpush3.bf16.msra.mxu0 %v11027_v20 }
0x13f2   :  { %11029 = vmatprep.subr.bf16.mxu0 %v11784_v29 }
0x13f5   :  { %11031 = vmatpush3.bf16.msra.mxu0 %v11030_v10 }
0x13f6   :  { %11032 = vmatprep.subr.bf16.mxu0 %v11784_v29 }
0x13f9   :  { %11034 = vmatpush3.bf16.msra.mxu0 %v11033_v23 }
0x13fa   :  { %11035 = vmatprep.subr.bf16.mxu0 %v11784_v29 }
0x13fd   :  { %11037 = vmatpush3.bf16.msra.mxu0 %v11036_v34 }
0x13fe   :  { %11038 = vmatprep.subr.bf16.mxu0 %v11784_v29 }
0x1401   :  { %11040 = vmatpush3.bf16.msra.mxu0 %v11039_v55 }
0x14b7   :  { %v7955_v22 = vpop.f32.mrb[46].mxu0  ;;  %v8026_v37 = vpop.f32.mrb[50].mxu1 }
0x14b8   :  { %v11140_v3 = vadd.f32 %v7955_v22, %v15624_v31  ;;  %v7957_v6 = vpop.f32.mrb[47].mxu0  ;;  %v8028_v18 = vpop.f32.mrb[51].mxu1  ;;  %v11142_v58 = vadd.f32 %v8026_v37, %v15064_v21 }
0x14b9   :  { %v11141_v8 = vadd.f32 %v7957_v6, %v15063_v54  ;;  %v11143_v1 = vadd.f32 %v8028_v18, %v12783_v46 }
0x14ba   :  { %v8035_v25 = vsub.f32 0.0, %v11140_v3 }
0x14bb   :  { %v8041_v2 = vsub.f32 0.0, %v11141_v8  ;;  %v8048_v19 = vsub.f32 0.0, %v11143_v1 }
0x14bc   :  { %v8036_v41 = vmul.f32 1.442695, %v8035_v25 }
0x14bd   :  { %v8042_v17 = vmul.f32 1.442695, %v8041_v2  ;;  %v8049_v38 = vmul.f32 1.442695, %v8048_v19 }
0x14be   :  { %11617 = vpow2.f32 %v8036_v41 }
0x14bf   :  { %11619 = vpow2.f32 %v8042_v17 }
0x14c0   :  { %11621 = vpow2.f32 %v8049_v38 }
0x14c1   :  { %11623 = vtanh.f32 %v11142_v58 }
0x14c8   :  { %v11618_v14 = vpop.eup %11617 }
0x14c9   :  { %v11620_v7 = vpop.eup %11619  ;;  %v8038_v36 = vadd.f32 1.0, %v11618_v14 }
0x14ca   :  { %v8044_v31 = vadd.f32 1.0, %v11620_v7  ;;  %v11622_v54 = vpop.eup %11621 }
0x14cb   :  { %11625 = vrcp.f32 %v8038_v36  ;;  %v11624_v51 = vpop.eup %11623  ;;  %v8051_v46 = vadd.f32 1.0, %v11622_v54 }
0x14cc   :  { %11627 = vrcp.f32 %v8044_v31 }
0x14cd   :  { %11629 = vrcp.f32 %v8051_v46 }
0x14d5   :  { %v11626_v13 = vpop.eup %11625 }
0x14d6   :  { %v11628_v53 = vpop.eup %11627  ;;  %v8055_v48 = vmul.f32 %v11626_v13, %v11624_v51 }
0x14d7   :  { %v8054_v4 = vmul.f32 %v11628_v53, %v14020_v35  ;;  %v11630_v21 = vpop.eup %11629  ;;  %v8264_v35 = vld [vmem:[%s14218_s11] ss:$0 sm:$0xff] }
0x14d9   :  { %v8056_v30 = vadd.f32 %v8055_v48, %v8054_v4 }
0x14db   :  { %11631 = vtanh.f32 %v8056_v30 }
0x14e5   :  { %v11632_v50 = vpop.eup %11631 }
0x14e6   :  { %v8058_v52 = vmul.f32 %v11632_v50, %v11630_v21 }
0x14e8   :  { %8320 = vmatmul.mubr.f32.vlgmr.msra.gmra.mrb[48].mxu0 %v8058_v52 }
0x15bb   :  { %v8148_v40 = vpop.f32.mrb[48].mxu0 }
0x15bc   :  { %v8149_v24 = vadd.f32 %v8264_v35, %v8148_v40  ;;  %v8321_v32 = vpop.f32.mrb[49].mxu0 }
0x15be   :  { %vm8152_vm2 = vcmp.ge.f32.partialorder %v8149_v24, 0.0  ;;  %v8153_v33 = vmul.f32 0.01, %v8149_v24 }
0x15c0   :  { %v8154_v28 = vsel %vm8152_vm2, %v8149_v24, %v8153_v33 }
0x15c1   :  { %8327 = vmatmul.mubr.msk.f32.vlgmr.msra.gmra.mrb[52].mxu1 %vm8164_vm3, %v8154_v28 }
0x1694   :  { %v8234_v27 = vpop.f32.mrb[52].mxu1 }
0x1695   :  { %v8235_v5 = vadd.f32 %v8265_v63, %v8234_v27  ;;  %v8328_v43 = vpop.f32.mrb[53].mxu1 }
0x1697   :  { %8239 = vst.msk [vmem:[%s14221_s14] sm:$0xff] %vm8238_vm4, %v8235_v5 }
0x1698   :  { %8244 = vsyncpa [#allocation3], 1 }
0x1699   :  { %8245 = vsyncpa [#allocation5], 1 }
0x169a   :  { %8246 = vsyncpa [#allocation8], 1 }
0x169b   :  { %8247 = vsyncpa [#allocation11], 1 }

</bundles_post_ra>
